<compile_context>
chip_gen: v7x
topology: tpu7x:2x2x1
jax: 0.10.0
libtpu: 0.0.40
codegen_flags: <defaults>
</compile_context>

<pallas_src>
import functools

import jax
import jax.numpy as jnp
from jax import lax
from jax.experimental import pallas as pl
from jax.experimental.pallas import tpu as pltpu


def _dyg_edgeconv_kernel(x_ref, xn_ref, wb_ref, wn_ref, b_ref, o_ref, *, k, n_valid):
    """Fused knn + EdgeConv for one (batch, query-row-tile) grid cell.

    x_ref : (C, Npad)    bf16  all node features of this batch element (channel-major)
    xn_ref: (C, Npad)    bf16  L2-normalized node features (for cosine/knn scores)
    wb_ref: (Cout, C)    bf16  (W_left - W_right)  -> acts on x_i
    wn_ref: (Cout, C)    bf16  W_right             -> acts on x_j
    b_ref : (Cout, 1)    f32   conv bias
    o_ref : (Cout, tm)   f32   output tile, channel-major (lane-dense)
    """
    C, Npad = x_ref.shape
    Cout, tm = o_ref.shape

    q0 = pl.multiple_of(pl.program_id(1) * tm, tm)

    xk = x_ref[...]                               # (C, Npad) bf16, resident per batch
    xn_k = xn_ref[...]                            # (C, Npad) bf16
    xq = x_ref[:, pl.ds(q0, tm)]                  # (C, tm)  query tile (sliced, no 2nd DMA)
    xn_q = xn_ref[:, pl.ds(q0, tm)]               # (C, tm)

    # --- knn scores: after L2 normalization the |x|^2 terms of the negative squared
    #     distance are constant per row, so top-k ordering == cosine ordering.
    scores = lax.dot_general(xn_q, xn_k, (((0,), (0,)), ((), ())),
                             preferred_element_type=jnp.float32)      # (tm, Npad) f32

    col = lax.broadcasted_iota(jnp.int32, (tm, Npad), 1)
    neg = jnp.float32(-3e38)
    if n_valid < Npad:                            # mask padded key columns (static branch)
        scores = jnp.where(col < n_valid, scores, neg)

    # --- EdgeConv base term: (Wl - Wr) @ x_i + b  ('-x_i' folded into wb) ---
    base = lax.dot_general(wb_ref[...], xq, (((1,), (0,)), ((), ())),
                           preferred_element_type=jnp.float32) + b_ref[...]   # (Cout, tm)

    # --- fused top-k + neighbor gather + K-max reduction ---
    # k passes: row-max -> exact one-hot (ties: lowest column, differs from torch.topk
    # only under exact ties) -> bf16 feature gather -> Wr projection -> running max.
    colf = col.astype(jnp.float32)
    wn = wn_ref[...]
    run = None
    for _ in range(k):                            # small static k, unrolled
        m = jnp.max(scores, axis=-1, keepdims=True)                   # (tm, 1)
        cand = jnp.where(scores >= m, colf, jnp.float32(Npad))
        sel = colf == jnp.min(cand, axis=-1, keepdims=True)           # (tm, Npad) one-hot
        # exact gather of neighbor features: 0/1 bf16 one-hot x bf16 features, f32 acc
        gx = lax.dot_general(xk, sel.astype(jnp.bfloat16), (((1,), (1,)), ((), ())),
                             preferred_element_type=jnp.float32)      # (C, tm)
        g = lax.dot_general(wn, gx.astype(jnp.bfloat16), (((1,), (0,)), ((), ())),
                            preferred_element_type=jnp.float32)       # (Cout, tm)
        run = g if run is None else jnp.maximum(run, g)
        scores = jnp.where(sel, neg, scores)

    # ReLU once at the end (monotone; base is k-independent).
    o_ref[...] = jnp.maximum(base + run, 0.0)


def dygraph_conv2d(x_nchw, w, b, *, k=9):
    """DyGraphConv2d forward. x_nchw: (B, C, H, W); w: (Cout, 2C, 1, 1); b: (Cout,)."""
    B, C, H, W = x_nchw.shape
    N = H * W
    Cout = w.shape[0]
    assert w.shape[1] == 2 * C, "conv expects 2*C input channels"
    assert N >= k, "need at least k nodes"

    # Pad the node axis to a multiple of 128 and cap the query tile at 256 (v7x VMEM).
    Npad = ((N + 127) // 128) * 128
    tm = 256 if Npad % 256 == 0 else 128
    tm = min(tm, Npad)

    # glue: NCHW -> channel-major (B, C, N).  NO transpose — kernel consumes channel-major.
    x = x_nchw.reshape(B, C, N).astype(jnp.float32)

    # Hoisted per-batch work: L2-normalize along C once, in plain XLA (rsqrt + mul).
    ss = jnp.sum(x * x, axis=1, keepdims=True)
    xn = (x * lax.rsqrt(jnp.maximum(ss, 1e-24))).astype(jnp.bfloat16)
    xb = x.astype(jnp.bfloat16)

    if Npad != N:
        pad = ((0, 0), (0, 0), (0, Npad - N))
        xb = jnp.pad(xb, pad)
        xn = jnp.pad(xn, pad)

    # 1x1 conv split on cat([x_i, x_j - x_i]):  W@cat = (Wl - Wr)@x_i + Wr@x_j + b
    w2d = w.reshape(Cout, 2 * C).astype(jnp.float32)
    w_base = (w2d[:, :C] - w2d[:, C:]).astype(jnp.bfloat16)          # (Cout, C)
    w_nbr = w2d[:, C:].astype(jnp.bfloat16)                          # (Cout, C)
    bias = b.reshape(Cout, 1).astype(jnp.float32)

    grid = (B, Npad // tm)

    out = pl.pallas_call(
        functools.partial(_dyg_edgeconv_kernel, k=k, n_valid=N),
        out_shape=jax.ShapeDtypeStruct((B, Cout, Npad), jnp.float32),
        grid=grid,
        in_specs=[
            # full key block per batch; index map is qq-independent -> DMA'd once per batch
            pl.BlockSpec((None, C, Npad), lambda bb, qq: (bb, 0, 0)),
            pl.BlockSpec((None, C, Npad), lambda bb, qq: (bb, 0, 0)),
            pl.BlockSpec((Cout, C), lambda bb, qq: (0, 0)),
            pl.BlockSpec((Cout, C), lambda bb, qq: (0, 0)),
            pl.BlockSpec((Cout, 1), lambda bb, qq: (0, 0)),
        ],
        out_specs=pl.BlockSpec((None, Cout, tm), lambda bb, qq: (bb, 0, qq)),
        compiler_params=pltpu.CompilerParams(
            dimension_semantics=("parallel", "parallel"),
            # above the 16/32 MiB scoped defaults (v5e/v6e) for large-N ViG tiles,
            # within v7x's 64 MiB physical VMEM
            vmem_limit_bytes=64 * 1024 * 1024),
    )(xb, xn, w_base, w_nbr, bias)

    # glue: output is already channel-major; drop padded query columns and unflatten.
    if Npad != N:
        out = out[:, :, :N]
    return out.reshape(B, Cout, H, W)


if __name__ == "__main__":
    key = jax.random.PRNGKey(0)
    B, C, H, W = 2, 16, 16, 16        # N = 256 nodes
    Cout, K = 32, 9                   # kernel_size=9 (module default)

    k1, k2, k3 = jax.random.split(key, 3)
    x = jax.random.normal(k1, (B, C, H, W), dtype=jnp.float32)
    # Conv2d(2C -> Cout, kernel 1x1, bias=True), deterministic synthetic init
    w = jax.random.normal(k2, (Cout, 2 * C, 1, 1), dtype=jnp.float32) * (1.0 / (2 * C) ** 0.5)
    b = jax.random.normal(k3, (Cout,), dtype=jnp.float32) * 0.01

    fn = jax.jit(functools.partial(dygraph_conv2d, k=K))
    out = fn(x, w, b)
    jax.block_until_ready(out)
    assert out.shape == (B, Cout, H, W), out.shape
    assert out.dtype == jnp.float32
    assert bool(jnp.all(jnp.isfinite(out)))
    print("KERNEL_OK")
</pallas_src>

<mosaic_0001>
module attributes {stable_mosaic.version = 11 : i64} {
  func.func @_dyg_edgeconv_kernel(%arg0: i32, %arg1: i32, %arg2: memref<1x16x256xbf16, #tpu.memory_space<vmem>>, %arg3: memref<1x16x256xbf16, #tpu.memory_space<vmem>>, %arg4: memref<32x16xbf16, #tpu.memory_space<vmem>>, %arg5: memref<32x16xbf16, #tpu.memory_space<vmem>>, %arg6: memref<32x1xf32, #tpu.memory_space<vmem>>, %arg7: memref<1x32x256xf32, #tpu.memory_space<vmem>>) attributes {dimension_semantics = [#tpu.dimension_semantics<parallel>, #tpu.dimension_semantics<parallel>], iteration_bounds = array<i64: 2, 1>, scalar_prefetch = 0 : i64, scratch_operands = 0 : i64, tpu.core_type = #tpu.core_type<tc>, window_params = [{transform_indices = @transform_0, window_bounds = array<i64: 1, 16, 256>}, {transform_indices = @transform_1, window_bounds = array<i64: 1, 16, 256>}, {pipeline_mode = #tpu.pipeline_mode<synchronous>, transform_indices = @transform_2, window_bounds = array<i64: 32, 16>}, {pipeline_mode = #tpu.pipeline_mode<synchronous>, transform_indices = @transform_3, window_bounds = array<i64: 32, 16>}, {pipeline_mode = #tpu.pipeline_mode<synchronous>, transform_indices = @transform_4, window_bounds = array<i64: 32, 1>}, {transform_indices = @transform_5, window_bounds = array<i64: 1, 32, 256>}]} {
    %c256_i32 = arith.constant 256 : i32
    %0 = arith.muli %arg1, %c256_i32 : i32
    %1 = tpu.assume_multiple %0, 256 : i32
    %c0 = arith.constant 0 : index
    %c0_0 = arith.constant 0 : index
    %c0_1 = arith.constant 0 : index
    %2 = vector.load %arg2[%c0, %c0_0, %c0_1] : memref<1x16x256xbf16, #tpu.memory_space<vmem>>, vector<1x16x256xbf16>
    %3 = vector.shape_cast %2 : vector<1x16x256xbf16> to vector<16x256xbf16>
    %c0_2 = arith.constant 0 : index
    %c0_3 = arith.constant 0 : index
    %c0_4 = arith.constant 0 : index
    %4 = vector.load %arg3[%c0_2, %c0_3, %c0_4] : memref<1x16x256xbf16, #tpu.memory_space<vmem>>, vector<1x16x256xbf16>
    %5 = vector.shape_cast %4 : vector<1x16x256xbf16> to vector<16x256xbf16>
    %c0_5 = arith.constant 0 : index
    %c0_6 = arith.constant 0 : index
    %6 = arith.index_cast %1 : i32 to index
    %7 = vector.load %arg2[%c0_5, %c0_6, %6] : memref<1x16x256xbf16, #tpu.memory_space<vmem>>, vector<1x16x256xbf16>
    %8 = vector.shape_cast %7 : vector<1x16x256xbf16> to vector<16x256xbf16>
    %c0_7 = arith.constant 0 : index
    %c0_8 = arith.constant 0 : index
    %9 = arith.index_cast %1 : i32 to index
    %10 = vector.load %arg3[%c0_7, %c0_8, %9] : memref<1x16x256xbf16, #tpu.memory_space<vmem>>, vector<1x16x256xbf16>
    %11 = vector.shape_cast %10 : vector<1x16x256xbf16> to vector<16x256xbf16>
    %cst = arith.constant dense<0.000000e+00> : vector<256x256xf32>
    %12 = tpu.matmul %11, %5, %cst {dimension_numbers = #tpu.dot_dimension_numbers<[0], [0], [1], [1], [0, 1, 1, 1], [], []>} : vector<16x256xbf16>, vector<16x256xbf16>, vector<256x256xf32> -> vector<256x256xf32>
    %13 = tpu.iota {dimensions = array<i32: 1>} : vector<256x256xi32>
    %c0_9 = arith.constant 0 : index
    %c0_10 = arith.constant 0 : index
    %14 = vector.load %arg4[%c0_9, %c0_10] : memref<32x16xbf16, #tpu.memory_space<vmem>>, vector<32x16xbf16>
    %cst_11 = arith.constant dense<0.000000e+00> : vector<32x256xf32>
    %15 = tpu.matmul %14, %8, %cst_11 {dimension_numbers = #tpu.dot_dimension_numbers<[1], [0], [0], [1], [0, 0, 1, 1], [], []>} : vector<32x16xbf16>, vector<16x256xbf16>, vector<32x256xf32> -> vector<32x256xf32>
    %c0_12 = arith.constant 0 : index
    %c0_13 = arith.constant 0 : index
    %16 = vector.load %arg6[%c0_12, %c0_13] : memref<32x1xf32, #tpu.memory_space<vmem>>, vector<32x1xf32>
    %17 = vector.broadcast %16 : vector<32x1xf32> to vector<32x256xf32>
    %18 = arith.addf %15, %17 : vector<32x256xf32>
    %19 = arith.sitofp %13 : vector<256x256xi32> to vector<256x256xf32>
    %c0_14 = arith.constant 0 : index
    %c0_15 = arith.constant 0 : index
    %20 = vector.load %arg5[%c0_14, %c0_15] : memref<32x16xbf16, #tpu.memory_space<vmem>>, vector<32x16xbf16>
    %cst_16 = arith.constant dense<0xFF800000> : vector<256xf32>
    %21 = vector.multi_reduction <maximumf>, %12, %cst_16 [1] : vector<256x256xf32> to vector<256xf32>
    %22 = vector.shape_cast %21 : vector<256xf32> to vector<256x1xf32>
    %23 = vector.broadcast %22 : vector<256x1xf32> to vector<256x256xf32>
    %24 = arith.cmpf oge, %12, %23 : vector<256x256xf32>
    %cst_17 = arith.constant 2.560000e+02 : f32
    %25 = vector.broadcast %cst_17 : f32 to vector<256x256xf32>
    %26 = arith.select %24, %19, %25 : vector<256x256xi1>, vector<256x256xf32>
    %cst_18 = arith.constant dense<0x7F800000> : vector<256xf32>
    %27 = vector.multi_reduction <minimumf>, %26, %cst_18 [1] : vector<256x256xf32> to vector<256xf32>
    %28 = vector.shape_cast %27 : vector<256xf32> to vector<256x1xf32>
    %29 = vector.broadcast %28 : vector<256x1xf32> to vector<256x256xf32>
    %30 = arith.cmpf oeq, %19, %29 : vector<256x256xf32>
    %31 = arith.extui %30 : vector<256x256xi1> to vector<256x256xi32>
    %32 = arith.sitofp %31 : vector<256x256xi32> to vector<256x256xf32>
    %33 = arith.truncf %32 : vector<256x256xf32> to vector<256x256xbf16>
    %cst_19 = arith.constant dense<0.000000e+00> : vector<16x256xf32>
    %34 = tpu.matmul %3, %33, %cst_19 {dimension_numbers = #tpu.dot_dimension_numbers<[1], [1], [0], [0], [0, 0, 1, 0], [], []>} : vector<16x256xbf16>, vector<256x256xbf16>, vector<16x256xf32> -> vector<16x256xf32>
    %35 = arith.truncf %34 : vector<16x256xf32> to vector<16x256xbf16>
    %cst_20 = arith.constant dense<0.000000e+00> : vector<32x256xf32>
    %36 = tpu.matmul %20, %35, %cst_20 {dimension_numbers = #tpu.dot_dimension_numbers<[1], [0], [0], [1], [0, 0, 1, 1], [], []>} : vector<32x16xbf16>, vector<16x256xbf16>, vector<32x256xf32> -> vector<32x256xf32>
    %cst_21 = arith.constant -3.000000e+38 : f32
    %37 = vector.broadcast %cst_21 : f32 to vector<256x256xf32>
    %38 = arith.select %30, %37, %12 : vector<256x256xi1>, vector<256x256xf32>
    %cst_22 = arith.constant dense<0xFF800000> : vector<256xf32>
    %39 = vector.multi_reduction <maximumf>, %38, %cst_22 [1] : vector<256x256xf32> to vector<256xf32>
    %40 = vector.shape_cast %39 : vector<256xf32> to vector<256x1xf32>
    %41 = vector.broadcast %40 : vector<256x1xf32> to vector<256x256xf32>
    %42 = arith.cmpf oge, %38, %41 : vector<256x256xf32>
    %cst_23 = arith.constant 2.560000e+02 : f32
    %43 = vector.broadcast %cst_23 : f32 to vector<256x256xf32>
    %44 = arith.select %42, %19, %43 : vector<256x256xi1>, vector<256x256xf32>
    %cst_24 = arith.constant dense<0x7F800000> : vector<256xf32>
    %45 = vector.multi_reduction <minimumf>, %44, %cst_24 [1] : vector<256x256xf32> to vector<256xf32>
    %46 = vector.shape_cast %45 : vector<256xf32> to vector<256x1xf32>
    %47 = vector.broadcast %46 : vector<256x1xf32> to vector<256x256xf32>
    %48 = arith.cmpf oeq, %19, %47 : vector<256x256xf32>
    %49 = arith.extui %48 : vector<256x256xi1> to vector<256x256xi32>
    %50 = arith.sitofp %49 : vector<256x256xi32> to vector<256x256xf32>
    %51 = arith.truncf %50 : vector<256x256xf32> to vector<256x256xbf16>
    %cst_25 = arith.constant dense<0.000000e+00> : vector<16x256xf32>
    %52 = tpu.matmul %3, %51, %cst_25 {dimension_numbers = #tpu.dot_dimension_numbers<[1], [1], [0], [0], [0, 0, 1, 0], [], []>} : vector<16x256xbf16>, vector<256x256xbf16>, vector<16x256xf32> -> vector<16x256xf32>
    %53 = arith.truncf %52 : vector<16x256xf32> to vector<16x256xbf16>
    %cst_26 = arith.constant dense<0.000000e+00> : vector<32x256xf32>
    %54 = tpu.matmul %20, %53, %cst_26 {dimension_numbers = #tpu.dot_dimension_numbers<[1], [0], [0], [1], [0, 0, 1, 1], [], []>} : vector<32x16xbf16>, vector<16x256xbf16>, vector<32x256xf32> -> vector<32x256xf32>
    %55 = arith.maximumf %36, %54 : vector<32x256xf32>
    %cst_27 = arith.constant -3.000000e+38 : f32
    %56 = vector.broadcast %cst_27 : f32 to vector<256x256xf32>
    %57 = arith.select %48, %56, %38 : vector<256x256xi1>, vector<256x256xf32>
    %cst_28 = arith.constant dense<0xFF800000> : vector<256xf32>
    %58 = vector.multi_reduction <maximumf>, %57, %cst_28 [1] : vector<256x256xf32> to vector<256xf32>
    %59 = vector.shape_cast %58 : vector<256xf32> to vector<256x1xf32>
    %60 = vector.broadcast %59 : vector<256x1xf32> to vector<256x256xf32>
    %61 = arith.cmpf oge, %57, %60 : vector<256x256xf32>
    %cst_29 = arith.constant 2.560000e+02 : f32
    %62 = vector.broadcast %cst_29 : f32 to vector<256x256xf32>
    %63 = arith.select %61, %19, %62 : vector<256x256xi1>, vector<256x256xf32>
    %cst_30 = arith.constant dense<0x7F800000> : vector<256xf32>
    %64 = vector.multi_reduction <minimumf>, %63, %cst_30 [1] : vector<256x256xf32> to vector<256xf32>
    %65 = vector.shape_cast %64 : vector<256xf32> to vector<256x1xf32>
    %66 = vector.broadcast %65 : vector<256x1xf32> to vector<256x256xf32>
    %67 = arith.cmpf oeq, %19, %66 : vector<256x256xf32>
    %68 = arith.extui %67 : vector<256x256xi1> to vector<256x256xi32>
    %69 = arith.sitofp %68 : vector<256x256xi32> to vector<256x256xf32>
    %70 = arith.truncf %69 : vector<256x256xf32> to vector<256x256xbf16>
    %cst_31 = arith.constant dense<0.000000e+00> : vector<16x256xf32>
    %71 = tpu.matmul %3, %70, %cst_31 {dimension_numbers = #tpu.dot_dimension_numbers<[1], [1], [0], [0], [0, 0, 1, 0], [], []>} : vector<16x256xbf16>, vector<256x256xbf16>, vector<16x256xf32> -> vector<16x256xf32>
    %72 = arith.truncf %71 : vector<16x256xf32> to vector<16x256xbf16>
    %cst_32 = arith.constant dense<0.000000e+00> : vector<32x256xf32>
    %73 = tpu.matmul %20, %72, %cst_32 {dimension_numbers = #tpu.dot_dimension_numbers<[1], [0], [0], [1], [0, 0, 1, 1], [], []>} : vector<32x16xbf16>, vector<16x256xbf16>, vector<32x256xf32> -> vector<32x256xf32>
    %74 = arith.maximumf %55, %73 : vector<32x256xf32>
    %cst_33 = arith.constant -3.000000e+38 : f32
    %75 = vector.broadcast %cst_33 : f32 to vector<256x256xf32>
    %76 = arith.select %67, %75, %57 : vector<256x256xi1>, vector<256x256xf32>
    %cst_34 = arith.constant dense<0xFF800000> : vector<256xf32>
    %77 = vector.multi_reduction <maximumf>, %76, %cst_34 [1] : vector<256x256xf32> to vector<256xf32>
    %78 = vector.shape_cast %77 : vector<256xf32> to vector<256x1xf32>
    %79 = vector.broadcast %78 : vector<256x1xf32> to vector<256x256xf32>
    %80 = arith.cmpf oge, %76, %79 : vector<256x256xf32>
    %cst_35 = arith.constant 2.560000e+02 : f32
    %81 = vector.broadcast %cst_35 : f32 to vector<256x256xf32>
    %82 = arith.select %80, %19, %81 : vector<256x256xi1>, vector<256x256xf32>
    %cst_36 = arith.constant dense<0x7F800000> : vector<256xf32>
    %83 = vector.multi_reduction <minimumf>, %82, %cst_36 [1] : vector<256x256xf32> to vector<256xf32>
    %84 = vector.shape_cast %83 : vector<256xf32> to vector<256x1xf32>
    %85 = vector.broadcast %84 : vector<256x1xf32> to vector<256x256xf32>
    %86 = arith.cmpf oeq, %19, %85 : vector<256x256xf32>
    %87 = arith.extui %86 : vector<256x256xi1> to vector<256x256xi32>
    %88 = arith.sitofp %87 : vector<256x256xi32> to vector<256x256xf32>
    %89 = arith.truncf %88 : vector<256x256xf32> to vector<256x256xbf16>
    %cst_37 = arith.constant dense<0.000000e+00> : vector<16x256xf32>
    %90 = tpu.matmul %3, %89, %cst_37 {dimension_numbers = #tpu.dot_dimension_numbers<[1], [1], [0], [0], [0, 0, 1, 0], [], []>} : vector<16x256xbf16>, vector<256x256xbf16>, vector<16x256xf32> -> vector<16x256xf32>
    %91 = arith.truncf %90 : vector<16x256xf32> to vector<16x256xbf16>
    %cst_38 = arith.constant dense<0.000000e+00> : vector<32x256xf32>
    %92 = tpu.matmul %20, %91, %cst_38 {dimension_numbers = #tpu.dot_dimension_numbers<[1], [0], [0], [1], [0, 0, 1, 1], [], []>} : vector<32x16xbf16>, vector<16x256xbf16>, vector<32x256xf32> -> vector<32x256xf32>
    %93 = arith.maximumf %74, %92 : vector<32x256xf32>
    %cst_39 = arith.constant -3.000000e+38 : f32
    %94 = vector.broadcast %cst_39 : f32 to vector<256x256xf32>
    %95 = arith.select %86, %94, %76 : vector<256x256xi1>, vector<256x256xf32>
    %cst_40 = arith.constant dense<0xFF800000> : vector<256xf32>
    %96 = vector.multi_reduction <maximumf>, %95, %cst_40 [1] : vector<256x256xf32> to vector<256xf32>
    %97 = vector.shape_cast %96 : vector<256xf32> to vector<256x1xf32>
    %98 = vector.broadcast %97 : vector<256x1xf32> to vector<256x256xf32>
    %99 = arith.cmpf oge, %95, %98 : vector<256x256xf32>
    %cst_41 = arith.constant 2.560000e+02 : f32
    %100 = vector.broadcast %cst_41 : f32 to vector<256x256xf32>
    %101 = arith.select %99, %19, %100 : vector<256x256xi1>, vector<256x256xf32>
    %cst_42 = arith.constant dense<0x7F800000> : vector<256xf32>
    %102 = vector.multi_reduction <minimumf>, %101, %cst_42 [1] : vector<256x256xf32> to vector<256xf32>
    %103 = vector.shape_cast %102 : vector<256xf32> to vector<256x1xf32>
    %104 = vector.broadcast %103 : vector<256x1xf32> to vector<256x256xf32>
    %105 = arith.cmpf oeq, %19, %104 : vector<256x256xf32>
    %106 = arith.extui %105 : vector<256x256xi1> to vector<256x256xi32>
    %107 = arith.sitofp %106 : vector<256x256xi32> to vector<256x256xf32>
    %108 = arith.truncf %107 : vector<256x256xf32> to vector<256x256xbf16>
    %cst_43 = arith.constant dense<0.000000e+00> : vector<16x256xf32>
    %109 = tpu.matmul %3, %108, %cst_43 {dimension_numbers = #tpu.dot_dimension_numbers<[1], [1], [0], [0], [0, 0, 1, 0], [], []>} : vector<16x256xbf16>, vector<256x256xbf16>, vector<16x256xf32> -> vector<16x256xf32>
    %110 = arith.truncf %109 : vector<16x256xf32> to vector<16x256xbf16>
    %cst_44 = arith.constant dense<0.000000e+00> : vector<32x256xf32>
    %111 = tpu.matmul %20, %110, %cst_44 {dimension_numbers = #tpu.dot_dimension_numbers<[1], [0], [0], [1], [0, 0, 1, 1], [], []>} : vector<32x16xbf16>, vector<16x256xbf16>, vector<32x256xf32> -> vector<32x256xf32>
    %112 = arith.maximumf %93, %111 : vector<32x256xf32>
    %cst_45 = arith.constant -3.000000e+38 : f32
    %113 = vector.broadcast %cst_45 : f32 to vector<256x256xf32>
    %114 = arith.select %105, %113, %95 : vector<256x256xi1>, vector<256x256xf32>
    %cst_46 = arith.constant dense<0xFF800000> : vector<256xf32>
    %115 = vector.multi_reduction <maximumf>, %114, %cst_46 [1] : vector<256x256xf32> to vector<256xf32>
    %116 = vector.shape_cast %115 : vector<256xf32> to vector<256x1xf32>
    %117 = vector.broadcast %116 : vector<256x1xf32> to vector<256x256xf32>
    %118 = arith.cmpf oge, %114, %117 : vector<256x256xf32>
    %cst_47 = arith.constant 2.560000e+02 : f32
    %119 = vector.broadcast %cst_47 : f32 to vector<256x256xf32>
    %120 = arith.select %118, %19, %119 : vector<256x256xi1>, vector<256x256xf32>
    %cst_48 = arith.constant dense<0x7F800000> : vector<256xf32>
    %121 = vector.multi_reduction <minimumf>, %120, %cst_48 [1] : vector<256x256xf32> to vector<256xf32>
    %122 = vector.shape_cast %121 : vector<256xf32> to vector<256x1xf32>
    %123 = vector.broadcast %122 : vector<256x1xf32> to vector<256x256xf32>
    %124 = arith.cmpf oeq, %19, %123 : vector<256x256xf32>
    %125 = arith.extui %124 : vector<256x256xi1> to vector<256x256xi32>
    %126 = arith.sitofp %125 : vector<256x256xi32> to vector<256x256xf32>
    %127 = arith.truncf %126 : vector<256x256xf32> to vector<256x256xbf16>
    %cst_49 = arith.constant dense<0.000000e+00> : vector<16x256xf32>
    %128 = tpu.matmul %3, %127, %cst_49 {dimension_numbers = #tpu.dot_dimension_numbers<[1], [1], [0], [0], [0, 0, 1, 0], [], []>} : vector<16x256xbf16>, vector<256x256xbf16>, vector<16x256xf32> -> vector<16x256xf32>
    %129 = arith.truncf %128 : vector<16x256xf32> to vector<16x256xbf16>
    %cst_50 = arith.constant dense<0.000000e+00> : vector<32x256xf32>
    %130 = tpu.matmul %20, %129, %cst_50 {dimension_numbers = #tpu.dot_dimension_numbers<[1], [0], [0], [1], [0, 0, 1, 1], [], []>} : vector<32x16xbf16>, vector<16x256xbf16>, vector<32x256xf32> -> vector<32x256xf32>
    %131 = arith.maximumf %112, %130 : vector<32x256xf32>
    %cst_51 = arith.constant -3.000000e+38 : f32
    %132 = vector.broadcast %cst_51 : f32 to vector<256x256xf32>
    %133 = arith.select %124, %132, %114 : vector<256x256xi1>, vector<256x256xf32>
    %cst_52 = arith.constant dense<0xFF800000> : vector<256xf32>
    %134 = vector.multi_reduction <maximumf>, %133, %cst_52 [1] : vector<256x256xf32> to vector<256xf32>
    %135 = vector.shape_cast %134 : vector<256xf32> to vector<256x1xf32>
    %136 = vector.broadcast %135 : vector<256x1xf32> to vector<256x256xf32>
    %137 = arith.cmpf oge, %133, %136 : vector<256x256xf32>
    %cst_53 = arith.constant 2.560000e+02 : f32
    %138 = vector.broadcast %cst_53 : f32 to vector<256x256xf32>
    %139 = arith.select %137, %19, %138 : vector<256x256xi1>, vector<256x256xf32>
    %cst_54 = arith.constant dense<0x7F800000> : vector<256xf32>
    %140 = vector.multi_reduction <minimumf>, %139, %cst_54 [1] : vector<256x256xf32> to vector<256xf32>
    %141 = vector.shape_cast %140 : vector<256xf32> to vector<256x1xf32>
    %142 = vector.broadcast %141 : vector<256x1xf32> to vector<256x256xf32>
    %143 = arith.cmpf oeq, %19, %142 : vector<256x256xf32>
    %144 = arith.extui %143 : vector<256x256xi1> to vector<256x256xi32>
    %145 = arith.sitofp %144 : vector<256x256xi32> to vector<256x256xf32>
    %146 = arith.truncf %145 : vector<256x256xf32> to vector<256x256xbf16>
    %cst_55 = arith.constant dense<0.000000e+00> : vector<16x256xf32>
    %147 = tpu.matmul %3, %146, %cst_55 {dimension_numbers = #tpu.dot_dimension_numbers<[1], [1], [0], [0], [0, 0, 1, 0], [], []>} : vector<16x256xbf16>, vector<256x256xbf16>, vector<16x256xf32> -> vector<16x256xf32>
    %148 = arith.truncf %147 : vector<16x256xf32> to vector<16x256xbf16>
    %cst_56 = arith.constant dense<0.000000e+00> : vector<32x256xf32>
    %149 = tpu.matmul %20, %148, %cst_56 {dimension_numbers = #tpu.dot_dimension_numbers<[1], [0], [0], [1], [0, 0, 1, 1], [], []>} : vector<32x16xbf16>, vector<16x256xbf16>, vector<32x256xf32> -> vector<32x256xf32>
    %150 = arith.maximumf %131, %149 : vector<32x256xf32>
    %cst_57 = arith.constant -3.000000e+38 : f32
    %151 = vector.broadcast %cst_57 : f32 to vector<256x256xf32>
    %152 = arith.select %143, %151, %133 : vector<256x256xi1>, vector<256x256xf32>
    %cst_58 = arith.constant dense<0xFF800000> : vector<256xf32>
    %153 = vector.multi_reduction <maximumf>, %152, %cst_58 [1] : vector<256x256xf32> to vector<256xf32>
    %154 = vector.shape_cast %153 : vector<256xf32> to vector<256x1xf32>
    %155 = vector.broadcast %154 : vector<256x1xf32> to vector<256x256xf32>
    %156 = arith.cmpf oge, %152, %155 : vector<256x256xf32>
    %cst_59 = arith.constant 2.560000e+02 : f32
    %157 = vector.broadcast %cst_59 : f32 to vector<256x256xf32>
    %158 = arith.select %156, %19, %157 : vector<256x256xi1>, vector<256x256xf32>
    %cst_60 = arith.constant dense<0x7F800000> : vector<256xf32>
    %159 = vector.multi_reduction <minimumf>, %158, %cst_60 [1] : vector<256x256xf32> to vector<256xf32>
    %160 = vector.shape_cast %159 : vector<256xf32> to vector<256x1xf32>
    %161 = vector.broadcast %160 : vector<256x1xf32> to vector<256x256xf32>
    %162 = arith.cmpf oeq, %19, %161 : vector<256x256xf32>
    %163 = arith.extui %162 : vector<256x256xi1> to vector<256x256xi32>
    %164 = arith.sitofp %163 : vector<256x256xi32> to vector<256x256xf32>
    %165 = arith.truncf %164 : vector<256x256xf32> to vector<256x256xbf16>
    %cst_61 = arith.constant dense<0.000000e+00> : vector<16x256xf32>
    %166 = tpu.matmul %3, %165, %cst_61 {dimension_numbers = #tpu.dot_dimension_numbers<[1], [1], [0], [0], [0, 0, 1, 0], [], []>} : vector<16x256xbf16>, vector<256x256xbf16>, vector<16x256xf32> -> vector<16x256xf32>
    %167 = arith.truncf %166 : vector<16x256xf32> to vector<16x256xbf16>
    %cst_62 = arith.constant dense<0.000000e+00> : vector<32x256xf32>
    %168 = tpu.matmul %20, %167, %cst_62 {dimension_numbers = #tpu.dot_dimension_numbers<[1], [0], [0], [1], [0, 0, 1, 1], [], []>} : vector<32x16xbf16>, vector<16x256xbf16>, vector<32x256xf32> -> vector<32x256xf32>
    %169 = arith.maximumf %150, %168 : vector<32x256xf32>
    %cst_63 = arith.constant -3.000000e+38 : f32
    %170 = vector.broadcast %cst_63 : f32 to vector<256x256xf32>
    %171 = arith.select %162, %170, %152 : vector<256x256xi1>, vector<256x256xf32>
    %cst_64 = arith.constant dense<0xFF800000> : vector<256xf32>
    %172 = vector.multi_reduction <maximumf>, %171, %cst_64 [1] : vector<256x256xf32> to vector<256xf32>
    %173 = vector.shape_cast %172 : vector<256xf32> to vector<256x1xf32>
    %174 = vector.broadcast %173 : vector<256x1xf32> to vector<256x256xf32>
    %175 = arith.cmpf oge, %171, %174 : vector<256x256xf32>
    %cst_65 = arith.constant 2.560000e+02 : f32
    %176 = vector.broadcast %cst_65 : f32 to vector<256x256xf32>
    %177 = arith.select %175, %19, %176 : vector<256x256xi1>, vector<256x256xf32>
    %cst_66 = arith.constant dense<0x7F800000> : vector<256xf32>
    %178 = vector.multi_reduction <minimumf>, %177, %cst_66 [1] : vector<256x256xf32> to vector<256xf32>
    %179 = vector.shape_cast %178 : vector<256xf32> to vector<256x1xf32>
    %180 = vector.broadcast %179 : vector<256x1xf32> to vector<256x256xf32>
    %181 = arith.cmpf oeq, %19, %180 : vector<256x256xf32>
    %182 = arith.extui %181 : vector<256x256xi1> to vector<256x256xi32>
    %183 = arith.sitofp %182 : vector<256x256xi32> to vector<256x256xf32>
    %184 = arith.truncf %183 : vector<256x256xf32> to vector<256x256xbf16>
    %cst_67 = arith.constant dense<0.000000e+00> : vector<16x256xf32>
    %185 = tpu.matmul %3, %184, %cst_67 {dimension_numbers = #tpu.dot_dimension_numbers<[1], [1], [0], [0], [0, 0, 1, 0], [], []>} : vector<16x256xbf16>, vector<256x256xbf16>, vector<16x256xf32> -> vector<16x256xf32>
    %186 = arith.truncf %185 : vector<16x256xf32> to vector<16x256xbf16>
    %cst_68 = arith.constant dense<0.000000e+00> : vector<32x256xf32>
    %187 = tpu.matmul %20, %186, %cst_68 {dimension_numbers = #tpu.dot_dimension_numbers<[1], [0], [0], [1], [0, 0, 1, 1], [], []>} : vector<32x16xbf16>, vector<16x256xbf16>, vector<32x256xf32> -> vector<32x256xf32>
    %188 = arith.maximumf %169, %187 : vector<32x256xf32>
    %189 = arith.addf %18, %188 : vector<32x256xf32>
    %cst_69 = arith.constant 0.000000e+00 : f32
    %190 = vector.broadcast %cst_69 : f32 to vector<32x256xf32>
    %191 = arith.maximumf %189, %190 : vector<32x256xf32>
    %c0_70 = arith.constant 0 : index
    %c0_71 = arith.constant 0 : index
    %c0_72 = arith.constant 0 : index
    %192 = vector.load %arg7[%c0_70, %c0_71, %c0_72] : memref<1x32x256xf32, #tpu.memory_space<vmem>>, vector<1x32x256xf32>
    %193 = vector.shape_cast %192 : vector<1x32x256xf32> to vector<32x256xf32>
    %194 = vector.shape_cast %191 : vector<32x256xf32> to vector<1x32x256xf32>
    tpu.vector_store %arg7[%c0_70, %c0_71, %c0_72], %194 {strides = array<i32>} : memref<1x32x256xf32, #tpu.memory_space<vmem>>, vector<1x32x256xf32>,
    return
  }
  func.func @transform_0(%arg0: i32, %arg1: i32) -> (i32, i32, i32) {
    %c0_i32 = arith.constant 0 : i32
    %c0_i32_0 = arith.constant 0 : i32
    %c0_i32_1 = arith.constant 0 : i32
    return %arg0, %c0_i32, %c0_i32_0 : i32, i32, i32
  }
  func.func @transform_1(%arg0: i32, %arg1: i32) -> (i32, i32, i32) {
    %c0_i32 = arith.constant 0 : i32
    %c0_i32_0 = arith.constant 0 : i32
    %c0_i32_1 = arith.constant 0 : i32
    return %arg0, %c0_i32, %c0_i32_0 : i32, i32, i32
  }
  func.func @transform_2(%arg0: i32, %arg1: i32) -> (i32, i32) {
    %c0_i32 = arith.constant 0 : i32
    %c0_i32_0 = arith.constant 0 : i32
    %c0_i32_1 = arith.constant 0 : i32
    return %c0_i32, %c0_i32_0 : i32, i32
  }
  func.func @transform_3(%arg0: i32, %arg1: i32) -> (i32, i32) {
    %c0_i32 = arith.constant 0 : i32
    %c0_i32_0 = arith.constant 0 : i32
    %c0_i32_1 = arith.constant 0 : i32
    return %c0_i32, %c0_i32_0 : i32, i32
  }
  func.func @transform_4(%arg0: i32, %arg1: i32) -> (i32, i32) {
    %c0_i32 = arith.constant 0 : i32
    %c0_i32_0 = arith.constant 0 : i32
    %c0_i32_1 = arith.constant 0 : i32
    return %c0_i32, %c0_i32_0 : i32, i32
  }
  func.func @transform_5(%arg0: i32, %arg1: i32) -> (i32, i32, i32) {
    %c0_i32 = arith.constant 0 : i32
    %c0_i32_0 = arith.constant 0 : i32
    return %arg0, %c0_i32, %arg1 : i32, i32, i32
  }
}

</mosaic_0001>

<bundles_post_ra>
// kernel: dygraph_conv2d.1
= control target key start
LH: loop header
LB: loop body
LE: loop exit
PB: predicated region body
PF: predicated region fallthrough
CT: control target
= control target key end

     0   :  { %s17439_s0 = inlined_call_operand.hbm [shape: bf16[2,16,256], index: 0, kind: input, shape index: {}]   ;;  %s17440_s1 = inlined_call_operand.hbm [shape: bf16[2,16,256], index: 1, kind: input, shape index: {}]   ;;  %s17441_s2 = inlined_call_operand.hbm [shape: bf16[32,16], index: 2, kind: input, shape index: {}]   ;;  %s17442_s3 = inlined_call_operand.hbm [shape: bf16[32,16], index: 3, kind: input, shape index: {}]   ;;  %s17443_s4 = inlined_call_operand.hbm [shape: f32[32,1], index: 4, kind: input, shape index: {}]   ;;  %s17444_s5 = inlined_call_operand.hbm [shape: f32[2,32,256], index: 5, kind: output, shape index: {}]  }
   0x1   :  { %18062 = sst [smem:[#allocation81_spill]] %s17439_s0 }
   0x2   :  { %18063 = sst [smem:[#allocation82_spill]] %s17441_s2 }
   0x3   :  { %18064 = sst [smem:[#allocation83_spill]] %s17442_s3 }
   0x4   :  { %10 = vsyncpa [#allocation3], 0 }
   0x5   :  { %12 = vsyncpa [#allocation3 + $0x1], 0 }
   0x6   :  { %13 = vsyncpa [#allocation6], 0 }
   0x7   :  { %15 = vsyncpa [#allocation6 + $0x1], 0 }
   0x8   :  { %16 = vsyncpa [#allocation9], 0 }
   0x9   :  { %17 = vsyncpa [#allocation4], 0 }
   0xa   :  { %19 = vsyncpa [#allocation4 + $0x1], 0  ;;  %s8976_s18 = smov 0   ;;  %s8978_s19 = smov 0  }
   0xb   :  { %s8980_s20 = smov 0   ;;  %s8982_s21 = smov 0  }
   0xc   :  { %s8984_s22 = smov 0   ;;  %s8986_s23 = smov 0  }
   0xd LB: > { %s9007_s24 = sadd.s32 4294967295, %s8930_s23   ;;  %s7327_s25 = sadd.s32 4294967294, %s8930_s23   ;;  %s8930_s23 = sphi %s8986_s23, %s25_s23   ;;  %s8926_s22 = sphi %s8984_s22, %s19257_s22   ;;  %s8922_s21 = sphi %s8982_s21, %s19256_s21   ;;  %s8918_s20 = sphi %s8980_s20, %s19255_s20   ;;  %s8914_s19 = sphi %s8978_s19, %s19254_s19   ;;  %s8910_s18 = sphi %s8976_s18, %s19253_s18  }
   0xe   : > { %p57_p0 = scmp.ne.s32.totalorder %s8914_s19, %s8910_s18  ;;  %p17445_p1 = scmp.eq.s32.totalorder %s9007_s24, 0 }
   0xf   : > { %p178_p3 = scmp.eq.s32.totalorder %s7327_s25, 1  ;;  %p7328_p5 = scmp.ge.s32.totalorder %s8930_s23, 1 }
  0x10   : > { %p9016_p4 = por %p17445_p1, %p57_p0  ;;  %p185_p7 = scmp.lt.s32.totalorder %s8930_s23, 3 }
  0x11   : > { %p9021_p6 = por %p178_p3, %p57_p0  ;;  %s8932_s29 = smov [#allocation7]  }
  0x12   : > { %s18065_s26 = scalar_select %p9016_p4, 1, 0 }
  0x13   : > { %s18066_s27 = scalar_select %p9021_p6, 1, 0 }
  0x14   : > { %p9026_p8 = pnand %p7328_p5, %p185_p7  ;;  %s197_s30 = sshll.u32 %s8932_s29, 4  ;;  %s9030_s30 = int_to_ptr.vmem [resolvable:$true] %s197_s30 }
  0x15   : > { %18067 = sst [smem:[#allocation17_spill]] %s18066_s27  ;;  %s8933_s7 = smov [#allocation8]  }
  0x16   : > { %s18068_s28 = scalar_select %p9026_p8, 1, 0 }
  0x17   : > { %p8572_p9 = pneg %p9026_p8  ;;  %s210_s8 = sshll.u32 %s8933_s7, 4  ;;  %s9041_s8 = int_to_ptr.vmem [resolvable:$true] %s210_s8 }
  0x18   : > { %s8934_s9 = smov [#allocation10]   ;;  %s18070_s2 = sld [smem:[#allocation82_spill]] }
  0x19   : > { %p9037_p11 = pnand %p8572_p9, %p17445_p1  ;;  %s9043_s10 = sshll.u32 %s8934_s9, 4  ;;  %s224_s10 = int_to_ptr.vmem [resolvable:$true] %s9043_s10 }
  0x1b   : > { %p9053_p13 = pneg %p9037_p11 }
  0x1e   : > { %s8692_s13 = scalar_lea.hbm %s18070_s2, 256 }
  0x1f   : > { %p8693_p12 = scmp.ne.s32.totalorder %s18070_s2, %s8692_s13  ;;  %p8699_p5 = scmp.lt.u32.totalorder %s8692_s13, %s18070_s2 }
  0x21   : > { %p8695_p0 = pnand %p9053_p13, %p8693_p12 }
  0x23   : > { %p8696_p3 = pneg %p8695_p0 }
  0x25   : > { %p8701_p7 = pnand %p8699_p5, %p8696_p3 }
  0x27   : > { %8704 = shalt.err (!%p8701_p7)
}
  0x28   : > { %s8705_s29 = scalar_lea.vmem %s9030_s30, 256  ;;  %p8713_p2 = scmp.lt.s32.totalorder %s9030_s30, %s9030_s30 }
  0x29   : > { %p8706_p9 = scmp.ne.s32.totalorder %s9030_s30, %s8705_s29  ;;  %p8714_p6 = scmp.lt.s32.totalorder %s8705_s29, %s8705_s29 }
  0x2b   : > { %p8708_p10 = pnand %p8706_p9, %p9053_p13  ;;  %p8715_p12 = por %p8714_p6, %p8713_p2 }
  0x2d   : > { %p8709_p1 = pneg %p8708_p10 }
  0x2f   : > { %p8716_p0 = pnand %p8715_p12, %p8709_p1 }
  0x31   : > { %8719 = shalt.err (!%p8716_p0)
}
  0x32   : > { %s8935_s7 = smov 64   ;;  %s8936_s9 = smov 4  }
  0x33   : > { %8575 = dma.hbm_to_vmem [thread:$0]  (!%p9037_p11), %s18070_s2, 256, %s9030_s30, [#allocation6], %s8935_s7, %s8935_s7, %s8936_s9  }
  0x34   : > { %s18072_s3 = sld [smem:[#allocation83_spill]] }
  0x3a   : > { %s8720_s15 = scalar_lea.hbm %s18072_s3, 256 }
  0x3b   : > { %p8721_p2 = scmp.ne.s32.totalorder %s18072_s3, %s8720_s15  ;;  %p8727_p10 = scmp.lt.u32.totalorder %s8720_s15, %s18072_s3 }
  0x3d   : > { %p8723_p1 = pnand %p8721_p2, %p9053_p13 }
  0x3f   : > { %p8724_p6 = pneg %p8723_p1 }
  0x41   : > { %p8729_p3 = pnand %p8727_p10, %p8724_p6 }
  0x43   : > { %8732 = shalt.err (!%p8729_p3)
}
  0x44   : > { %s8733_s30 = scalar_lea.vmem %s9041_s8, 256  ;;  %p8741_p12 = scmp.lt.s32.totalorder %s9041_s8, %s9041_s8 }
  0x45   : > { %p8734_p5 = scmp.ne.s32.totalorder %s9041_s8, %s8733_s30  ;;  %p8742_p0 = scmp.lt.s32.totalorder %s8733_s30, %s8733_s30 }
  0x47   : > { %p8736_p7 = pnand %p8734_p5, %p9053_p13  ;;  %p8743_p2 = por %p8742_p0, %p8741_p12 }
  0x49   : > { %p8737_p9 = pneg %p8736_p7 }
  0x4b   : > { %p8744_p1 = pnand %p8743_p2, %p8737_p9 }
  0x4d   : > { %8747 = shalt.err (!%p8744_p1)
}
  0x4e   : > { %8578 = dma.hbm_to_vmem [thread:$0]  (!%p9037_p11), %s18072_s3, 256, %s9041_s8, [#allocation9], %s8935_s7, %s8935_s7, %s8936_s9  }
  0x4f   : > { %s8748_s14 = scalar_lea.hbm %s17443_s4, 512 }
  0x50   : > { %p8749_p6 = scmp.ne.s32.totalorder %s17443_s4, %s8748_s14  ;;  %p8755_p5 = scmp.lt.u32.totalorder %s8748_s14, %s17443_s4 }
  0x52   : > { %p8751_p10 = pnand %p8749_p6, %p9053_p13 }
  0x54   : > { %p8752_p3 = pneg %p8751_p10 }
  0x56   : > { %p8757_p7 = pnand %p8755_p5, %p8752_p3 }
  0x58   : > { %8760 = shalt.err (!%p8757_p7)
}
  0x59   : > { %s8761_s30 = scalar_lea.vmem %s224_s10, 512  ;;  %p8769_p2 = scmp.lt.s32.totalorder %s224_s10, %s224_s10 }
  0x5a   : > { %p8762_p9 = scmp.ne.s32.totalorder %s224_s10, %s8761_s30  ;;  %p8770_p1 = scmp.lt.s32.totalorder %s8761_s30, %s8761_s30 }
  0x5c   : > { %p8764_p12 = pnand %p8762_p9, %p9053_p13  ;;  %p8771_p4 = por %p8770_p1, %p8769_p2 }
  0x5e   : > { %p8765_p0 = pneg %p8764_p12 }
  0x60   : > { %p8772_p8 = pnand %p8771_p4, %p8765_p0 }
  0x62   : > { %8775 = shalt.err (!%p8772_p8)
}
  0x63   : > { %s17449_s8 = smov 128   ;;  %s17451_s16 = smov 8  }
  0x64   : > { %8581 = dma.hbm_to_vmem [thread:$0]  (!%p9037_p11), %s17443_s4, 512, %s224_s10, [#allocation9], %s17449_s8, %s17449_s8, %s17451_s16  }
  0x65   : > { %s44_s27 = sadd.s32 1, %s8918_s20  ;;  %s37_s11 = sadd.s32 1, %s8926_s22 }
  0x66   : > { %p51_p4 = scmp.ne.s32.totalorder %s8918_s20, %s8914_s19  ;;  %p39_p8 = scmp.ge.s32.totalorder %s37_s11, 2 }
  0x67   : > { %p52_p13 = scmp.eq.s32.totalorder %s8930_s23, 0  ;;  %p18073_p6 = scmp.eq.s32.totalorder %s9007_s24, 1 }
  0x68   : > { %p8596_p3 = scmp.lt.s32.totalorder %s8930_s23, 2  ;;  %s19259_s11 = smov (%p39_p8, %s37_s11), 0 }
  0x69   : > { %p9126_p10 = por %p18073_p6, %p51_p4  ;;  %p53_p5 = por %p52_p13, %p51_p4 }
  0x6a   : > { %s237_s6 = sand.u32 1, %s8918_s20   ;;  %s41_s13 = ssub.s32 %s8926_s22, %s19259_s11 }
  0x6b   : > { %p42_p7 = scmp.eq.s32.totalorder %s41_s13, 0  ;;  %s7333_s10 = sshll.u32 %s237_s6, 4 }
  0x6c   : > { %s8551_s14 = sshll.u32 %s8926_s22, 8  ;;  %s18075_s0 = sld [smem:[#allocation81_spill]] }
  0x6d   : > { %s9138_s15 = scalar_select %p42_p7, %s8918_s20, %s44_s27  }
  0x6e   : > { %s241_s30 = scalar_lea.vmem [#allocation2], %s7333_s10  ;;  %p9149_p11 = pnand %p8596_p3, %p53_p5 }
  0x6f   : > { %s248_s7 = sshll.u32 %s241_s30, 4  ;;  %s9156_s17 = scalar_lea.hbm %s17440_s1, %s8551_s14  ;;  %s9145_s7 = int_to_ptr.vmem [resolvable:$true] %s248_s7 }
  0x70   : > { %s262_s25 = scalar_lea.vmem [#allocation5], %s7333_s10  ;;  %s9160_s16 = scalar_lea.sflag [#allocation3], %s237_s6 }
  0x71   : > { %s9158_s8 = sshll.u32 %s262_s25, 4  ;;  %p8778_p12 = pneg %p9149_p11  ;;  %s9192_s8 = int_to_ptr.vmem [resolvable:$true] %s9158_s8 }
  0x72   : > { %s9143_s29 = scalar_lea.hbm %s18075_s0, %s8551_s14  ;;  %s8781_s27 = scalar_lea.hbm %s18075_s0, 512 }
  0x73   : > { %s8776_s30 = scalar_lea.hbm %s9143_s29, 256  ;;  %p8782_p1 = scmp.lt.u32.totalorder %s9143_s29, %s18075_s0 }
  0x74   : > { %p8777_p9 = scmp.ne.s32.totalorder %s9143_s29, %s8776_s30  ;;  %p8783_p4 = scmp.lt.u32.totalorder %s8781_s27, %s8776_s30 }
  0x75   : > { %p8785_p13 = scmp.lt.u32.totalorder %s8776_s30, %s9143_s29 }
  0x76   : > { %p8779_p0 = pnand %p8778_p12, %p8777_p9  ;;  %p8784_p8 = por %p8783_p4, %p8782_p1 }
  0x78   : > { %p8780_p2 = pneg %p8779_p0  ;;  %p8786_p6 = por %p8785_p13, %p8784_p8 }
  0x7a   : > { %p8787_p3 = pnand %p8786_p6, %p8780_p2 }
  0x7c   : > { %8790 = shalt.err (!%p8787_p3)
}
  0x7d   : > { %s8791_s6 = scalar_lea.vmem %s9145_s7, 256  ;;  %s8939_s2 = smov [#allocation2]  }
  0x7e   : > { %p8792_p5 = scmp.ne.s32.totalorder %s9145_s7, %s8791_s6  ;;  %s8796_s3 = sshll.u32 %s8939_s2, 4  ;;  %s8797_s3 = int_to_ptr.vmem [resolvable:$false] %s8796_s3 }
  0x7f   : > { %s8798_s10 = scalar_lea.vmem %s8797_s3, 512  ;;  %p8799_p0 = scmp.lt.s32.totalorder %s9145_s7, %s8797_s3 }
  0x80   : > { %p8794_p7 = pnand %p8792_p5, %p8778_p12  ;;  %p8800_p1 = scmp.lt.s32.totalorder %s8798_s10, %s8791_s6 }
  0x82   : > { %p8795_p9 = pneg %p8794_p7  ;;  %p8801_p4 = por %p8800_p1, %p8799_p0 }
  0x84   : > { %p8802_p8 = pnand %p8801_p4, %p8795_p9 }
  0x86   : > { %8805 = shalt.err (!%p8802_p8)
}
  0x87   : > { %s18077_s25 = smov 8   ;;  %s18078_s30 = smov 128  }
  0x88   : > { %8585 = dma.hbm_to_vmem [thread:$0]  (!%p9149_p11), %s9143_s29, 256, %s9145_s7, %s9160_s16, %s18078_s30, %s18078_s30, %s18077_s25  }
  0x89   : > { %s258_s27 = sand.u32 1, %s8930_s23   ;;  %s8806_s14 = scalar_lea.hbm %s9156_s17, 256 }
  0x8a   : > { %s9195_s13 = scalar_lea.sflag [#allocation6], %s258_s27  ;;  %p8807_p2 = scmp.ne.s32.totalorder %s9156_s17, %s8806_s14 }
  0x8b   : > { %s8811_s3 = scalar_lea.hbm %s17440_s1, 512  ;;  %p8812_p3 = scmp.lt.u32.totalorder %s9156_s17, %s17440_s1 }
  0x8c   : > { %p8809_p13 = pnand %p8807_p2, %p8778_p12  ;;  %p8813_p5 = scmp.lt.u32.totalorder %s8811_s3, %s8806_s14 }
  0x8d   : > { %p8815_p9 = scmp.lt.u32.totalorder %s8806_s14, %s9156_s17 }
  0x8e   : > { %p8810_p6 = pneg %p8809_p13  ;;  %p8814_p7 = por %p8813_p5, %p8812_p3 }
  0x90   : > { %p8816_p0 = por %p8815_p9, %p8814_p7 }
  0x92   : > { %p8817_p1 = pnand %p8816_p0, %p8810_p6 }
  0x94   : > { %8820 = shalt.err (!%p8817_p1)
}
  0x95   : > { %s8821_s16 = scalar_lea.vmem %s9192_s8, 256  ;;  %s8940_s29 = smov [#allocation5]  }
  0x96   : > { %p8822_p4 = scmp.ne.s32.totalorder %s9192_s8, %s8821_s16  ;;  %s8826_s7 = sshll.u32 %s8940_s29, 4  ;;  %s8827_s7 = int_to_ptr.vmem [resolvable:$false] %s8826_s7 }
  0x97   : > { %s8828_s0 = scalar_lea.vmem %s8827_s7, 512  ;;  %p8829_p13 = scmp.lt.s32.totalorder %s9192_s8, %s8827_s7 }
  0x98   : > { %p8824_p8 = pnand %p8822_p4, %p8778_p12  ;;  %p8830_p3 = scmp.lt.s32.totalorder %s8828_s0, %s8821_s16 }
  0x9a   : > { %p8825_p2 = pneg %p8824_p8  ;;  %p8831_p5 = por %p8830_p3, %p8829_p13 }
  0x9c   : > { %p8832_p7 = pnand %p8831_p5, %p8825_p2 }
  0x9e   : > { %8835 = shalt.err (!%p8832_p7)
}
  0x9f   : > { %8588 = dma.hbm_to_vmem [thread:$0]  (!%p9149_p11), %s9156_s17, 256, %s9192_s8, %s9195_s13, %s18078_s30, %s18078_s30, %s18077_s25  }
  0xa0   : > { %p18079_p12 = scmp.ne.s32.totalorder %s18068_s28, 0 }
  0xa2   : > { %281 = sbr.rel (%p18079_p12) target bundleno = 3992 (0xf98), region = 40 }
  0xa9   : > { %s9227_s27 = sand.u32 1, %s8914_s19   ;;  %p18080_p6 = scmp.ne.s32.totalorder %s18065_s26, 0 }
  0xaa   : > { %s7340_s14 = sshll.u32 %s9227_s27, 4  ;;  %s284_s6 = scalar_lea.sflag [#allocation3], %s9227_s27 }
  0xab   : > { %s9231_s2 = scalar_lea.vmem [#allocation2], %s7340_s14 }
  0xac   : > { %8889 = dma.done.wait (%p18080_p6), %s284_s6, 256  }
  0xad   : > { %8891 = vsyncadd (%p18080_p6), %s284_s6, 4294967040  ;;  %s292_s8 = sand.u32 1, %s9007_s24   ;;  %s296_s9 = scalar_lea.vmem [#allocation5], %s7340_s14 }
  0xae   : > { %s293_s28 = scalar_lea.sflag [#allocation6], %s292_s8 }
  0xaf   : > { %8893 = dma.done.wait (%p18080_p6), %s293_s28, 256  }
  0xb0   : > { %8895 = vsyncadd (%p18080_p6), %s293_s28, 4294967040  ;;  %p18081_p11 = scmp.eq.s32.totalorder %s9007_s24, 0 }
  0xb2   : > { %8897 = dma.done.wait (%p18081_p11), [#allocation6], 256   ;;  %p18082_p9 = pmov %p18081_p11 }
  0xb4   : > { %8899 = vsyncadd (%p18082_p9), [#allocation6], 4294967040  ;;  %p18083_p0 = pmov %p18082_p9 }
  0xb6   : > { %8901 = dma.done.wait (%p18083_p0), [#allocation9], 768   ;;  %p18084_p1 = pmov %p18083_p0 }
  0xb7   : > { %v17453_v0 = vmov 0   ;;  %v8662_v1 = vld [vmem:[%s296_s9] ss:$8 sps:$4 sm:$0xff]   ;;  %v8664_v2 = vld [vmem:[%s296_s9 + $0x4] ss:$8 sps:$4 sm:$0xff]   ;;  %vm17485_vm0 = vcmask 130048  }
  0xb8   : > { %8903 = vsyncadd (%p18084_p1), [#allocation9], 4294966528  ;;  %490 = vmatprep.mubr.bf16.mxu0 %v17453_v0  ;;  %740 = vmatprep.mubr.bf16.mxu1 %v17453_v0  ;;  %s7345_s24 = sshll.u32 %s9227_s27, 6  ;;  %s8553_s25 = sshll.u32 %s8922_s21, 10 }
  0xb9   : > { %8661 = vset.pattern.permute.xlu1 %v17453_v0  ;;  %367 = vxpose.xlu0.c.b16.start.end [1/1] (short) %v8662_v1, 128  ;;  %s17369_s26 = scalar_lea.vmem [#allocation11], %s7345_s24  ;;  %s17387_s3 = scalar_lea.hbm %s17444_s5, %s8553_s25 }
  0xba   : > { %458 = vmatprep.subr.bf16.mxu0 %v8664_v2  ;;  %s7187_s17 = sshll.u32 %s17369_s26, 4  ;;  %s7172_s21 = scalar_lea.sflag [#allocation4], %s9227_s27  ;;  %s17381_s17 = int_to_ptr.vmem [resolvable:$true] %s7187_s17 }
  0xbb   : > { %459 = vmatpush1.bf16.msra.mxu0 %v8662_v1  ;;  %s8836_s10 = scalar_lea.vmem %s17381_s17, 1024  ;;  %s8943_s16 = smov [#allocation11]  }
  0xbc   : > { %p8837_p4 = scmp.ne.s32.totalorder %s17381_s17, %s8836_s10  ;;  %s8840_s29 = sshll.u32 %s8943_s16, 4  ;;  %s8841_s29 = int_to_ptr.vmem [resolvable:$false] %s8840_s29 }
  0xbd   : > { %s8842_s7 = scalar_lea.vmem %s8841_s29, 2048  ;;  %p8843_p13 = scmp.lt.s32.totalorder %s17381_s17, %s8841_s29 }
  0xbe   : > { %p8838_p8 = pnand %p8837_p4, %p9126_p10  ;;  %p8844_p3 = scmp.lt.s32.totalorder %s8842_s7, %s8836_s10 }
  0xc0   : > { %p8839_p2 = pneg %p8838_p8  ;;  %p8845_p5 = por %p8844_p3, %p8843_p13 }
  0xc2   : > { %p8846_p7 = pnand %p8845_p5, %p8839_p2 }
  0xd6   : > { %383 = vxpose.xlu0.c.b16.start.end [1/1] (short) %v8664_v2, 128 }
  0xdf   : > { %8660 = vset.pattern.permute.xlu0 %v17453_v0 }
 0x11f   : > { %v375_v3 = vpop.trf.xlu0 }
 0x120   : > { %7350 = vmatmul.mubr.msk.bf16.vlgmr.msra.gmra.mrb[0].mxu0 %vm17485_vm0, %v375_v3 }
 0x121   : > { %500 = vmatprep.mubr.bf16.mxu0 %v17453_v0 }
 0x123   : > { %v376_v4 = vpop.trf.xlu0 }
 0x127   : > { %v377_v5 = vpop.trf.xlu0 }
 0x128   : > { %7351 = vmatmul.mubr.msk.bf16.gmra.mrb[4].mxu0 %vm17485_vm0, %v376_v4 }
 0x129   : > { %510 = vmatprep.mubr.bf16.mxu0 %v17453_v0 }
 0x12b   : > { %v378_v6 = vpop.trf.xlu0 }
 0x12f   : > { %v379_v7 = vpop.trf.xlu0 }
 0x130   : > { %7352 = vmatmul.mubr.msk.bf16.gmra.mrb[8].mxu0 %vm17485_vm0, %v377_v5 }
 0x131   : > { %520 = vmatprep.mubr.bf16.mxu0 %v17453_v0 }
 0x133   : > { %v380_v8 = vpop.trf.xlu0 }
 0x137   : > { %v381_v9 = vpop.trf.xlu0 }
 0x138   : > { %7353 = vmatmul.mubr.msk.bf16.gmra.mrb[12].mxu0 %vm17485_vm0, %v378_v6 }
 0x139   : > { %530 = vmatprep.mubr.bf16.mxu0 %v17453_v0 }
 0x13b   : > { %v382_v10 = vpop.trf.xlu0 }
 0x13f   : > { %v391_v11 = vpop.trf.xlu0 }
 0x140   : > { %7354 = vmatmul.mubr.msk.bf16.gmra.mrb[16].mxu0 %vm17485_vm0, %v379_v7 }
 0x141   : > { %540 = vmatprep.mubr.bf16.mxu0 %v17453_v0 }
 0x143   : > { %v392_v12 = vpop.trf.xlu0 }
 0x147   : > { %v393_v13 = vpop.trf.xlu0 }
 0x148   : > { %7355 = vmatmul.mubr.msk.bf16.gmra.mrb[20].mxu0 %vm17485_vm0, %v380_v8 }
 0x149   : > { %550 = vmatprep.mubr.bf16.mxu0 %v17453_v0 }
 0x14b   : > { %v394_v14 = vpop.trf.xlu0 }
 0x14f   : > { %v395_v15 = vpop.trf.xlu0 }
 0x150   : > { %7356 = vmatmul.mubr.msk.bf16.gmra.mrb[24].mxu0 %vm17485_vm0, %v381_v9 }
 0x151   : > { %560 = vmatprep.mubr.bf16.mxu0 %v17453_v0 }
 0x153   : > { %v396_v16 = vpop.trf.xlu0 }
 0x157   : > { %v397_v17 = vpop.trf.xlu0 }
 0x158   : > { %7357 = vmatmul.mubr.msk.bf16.gmra.mrb[28].mxu0 %vm17485_vm0, %v382_v10 }
 0x159   : > { %570 = vmatprep.mubr.bf16.mxu0 %v17453_v0 }
 0x15b   : > { %v398_v18 = vpop.trf.xlu0 }
 0x160   : > { %7358 = vmatmul.mubr.msk.bf16.gmra.mrb[32].mxu0 %vm17485_vm0, %v391_v11 }
 0x161   : > { %580 = vmatprep.mubr.bf16.mxu0 %v17453_v0 }
 0x168   : > { %7359 = vmatmul.mubr.msk.bf16.gmra.mrb[36].mxu0 %vm17485_vm0, %v392_v12 }
 0x169   : > { %590 = vmatprep.mubr.bf16.mxu0 %v17453_v0 }
 0x170   : > { %7360 = vmatmul.mubr.msk.bf16.gmra.mrb[40].mxu0 %vm17485_vm0, %v393_v13 }
 0x171   : > { %600 = vmatprep.mubr.bf16.mxu0 %v17453_v0 }
 0x178   : > { %7361 = vmatmul.mubr.msk.bf16.gmra.mrb[44].mxu0 %vm17485_vm0, %v394_v14 }
 0x179   : > { %610 = vmatprep.mubr.bf16.mxu0 %v17453_v0 }
 0x180   : > { %7362 = vmatmul.mubr.msk.bf16.gmra.mrb[48].mxu0 %vm17485_vm0, %v395_v15 }
 0x181   : > { %620 = vmatprep.mubr.bf16.mxu0 %v17453_v0 }
 0x188   : > { %7363 = vmatmul.mubr.msk.bf16.gmra.mrb[52].mxu0 %vm17485_vm0, %v396_v16 }
 0x189   : > { %630 = vmatprep.mubr.bf16.mxu0 %v17453_v0 }
 0x190   : > { %7364 = vmatmul.mubr.msk.bf16.gmra.mrb[56].mxu0 %vm17485_vm0, %v397_v17 }
 0x191   : > { %640 = vmatprep.mubr.bf16.mxu0 %v17453_v0 }
 0x198   : > { %7365 = vmatmul.mubr.msk.bf16.gmra.mrb[60].mxu0 %vm17485_vm0, %v398_v18 }
 0x1f3   : > { %v9285_v19 = vpop.f32.mrb[0].mxu0 }
 0x1f4   : > { %v9287_v20 = vpop.f32.mrb[1].mxu0 }
 0x1f5   : > { %v9289_v21 = vpop.f32.mrb[2].mxu0  ;;  %v767_v22 = vmax.f32 %v9285_v19, %v9287_v20 }
 0x1f6   : > { %v9293_v23 = vpop.f32.mrb[3].mxu0 }
 0x1f7   : > { %768 = vmax.xlane.f32.xlu1 %v767_v22  ;;  %v770_v24 = vmax.f32 %v9289_v21, %v9293_v23 }
 0x1fb   : > { %771 = vmax.xlane.f32.xlu1 %v770_v24  ;;  %v9297_v25 = vpop.f32.mrb[4].mxu0 }
 0x1fc   : > { %v9299_v26 = vpop.f32.mrb[5].mxu0 }
 0x1fd   : > { %v9301_v27 = vpop.f32.mrb[6].mxu0  ;;  %v773_v28 = vmax.f32 %v9297_v25, %v9299_v26 }
 0x1fe   : > { %v9305_v29 = vpop.f32.mrb[7].mxu0 }
 0x1ff   : > { %774 = vmax.xlane.f32.xlu1 %v773_v28  ;;  %v776_v30 = vmax.f32 %v9301_v27, %v9305_v29 }
 0x203   : > { %777 = vmax.xlane.f32.xlu1 %v776_v30  ;;  %v9309_v31 = vpop.f32.mrb[8].mxu0 }
 0x204   : > { %v9311_v32 = vpop.f32.mrb[9].mxu0 }
 0x205   : > { %v9313_v33 = vpop.f32.mrb[10].mxu0  ;;  %v779_v34 = vmax.f32 %v9309_v31, %v9311_v32 }
 0x206   : > { %v9317_v35 = vpop.f32.mrb[11].mxu0 }
 0x207   : > { %780 = vmax.xlane.f32.xlu1 %v779_v34  ;;  %v782_v36 = vmax.f32 %v9313_v33, %v9317_v35 }
 0x20b   : > { %783 = vmax.xlane.f32.xlu1 %v782_v36  ;;  %v9321_v37 = vpop.f32.mrb[12].mxu0 }
 0x20c   : > { %v9323_v38 = vpop.f32.mrb[13].mxu0 }
 0x20d   : > { %v9325_v39 = vpop.f32.mrb[14].mxu0  ;;  %v785_v40 = vmax.f32 %v9321_v37, %v9323_v38 }
 0x20e   : > { %v9329_v41 = vpop.f32.mrb[15].mxu0 }
 0x20f   : > { %786 = vmax.xlane.f32.xlu1 %v785_v40  ;;  %v788_v42 = vmax.f32 %v9325_v39, %v9329_v41 }
 0x213   : > { %789 = vmax.xlane.f32.xlu1 %v788_v42  ;;  %v9333_v43 = vpop.f32.mrb[16].mxu0 }
 0x214   : > { %v9335_v44 = vpop.f32.mrb[17].mxu0 }
 0x215   : > { %v9337_v45 = vpop.f32.mrb[18].mxu0  ;;  %v791_v46 = vmax.f32 %v9333_v43, %v9335_v44 }
 0x216   : > { %v9341_v47 = vpop.f32.mrb[19].mxu0 }
 0x217   : > { %792 = vmax.xlane.f32.xlu1 %v791_v46  ;;  %v794_v48 = vmax.f32 %v9337_v45, %v9341_v47 }
 0x219   : > { %795 = vmax.xlane.f32.xlu0 %v794_v48 }
 0x21b   : > { %v9345_v49 = vpop.f32.mrb[20].mxu0 }
 0x21c   : > { %v9347_v50 = vpop.f32.mrb[21].mxu0 }
 0x21d   : > { %v9349_v51 = vpop.f32.mrb[22].mxu0  ;;  %v797_v52 = vmax.f32 %v9345_v49, %v9347_v50 }
 0x21e   : > { %v9353_v53 = vpop.f32.mrb[23].mxu0 }
 0x21f   : > { %798 = vmax.xlane.f32.xlu1 %v797_v52  ;;  %v800_v54 = vmax.f32 %v9349_v51, %v9353_v53 }
 0x223   : > { %801 = vmax.xlane.f32.xlu1 %v800_v54  ;;  %v9357_v55 = vpop.f32.mrb[24].mxu0 }
 0x224   : > { %v9359_v56 = vpop.f32.mrb[25].mxu0 }
 0x225   : > { %v803_v57 = vmax.f32 %v9357_v55, %v9359_v56  ;;  %v9363_v58 = vpop.f32.mrb[26].mxu0 }
 0x226   : > { %v9365_v59 = vpop.f32.mrb[27].mxu0 }
 0x227   : > { %804 = vmax.xlane.f32.xlu1 %v803_v57  ;;  %v806_v60 = vmax.f32 %v9363_v58, %v9365_v59 }
 0x22b   : > { %807 = vmax.xlane.f32.xlu1 %v806_v60  ;;  %v9369_v61 = vpop.f32.mrb[28].mxu0 }
 0x22c   : > { %v9371_v62 = vpop.f32.mrb[29].mxu0 }
 0x22d   : > { %v809_v63 = vmax.f32 %v9369_v61, %v9371_v62  ;;  %v9375_v1 = vpop.f32.mrb[30].mxu0 }
 0x22e   : > { %18085 = vst [vmem:[#allocation18_spill] sm:$0xff] %v9375_v1  ;;  %v9377_v2 = vpop.f32.mrb[31].mxu0 }
 0x22f   : > { %18086 = vst [vmem:[#allocation19_spill] sm:$0xff] %v9377_v2  ;;  %810 = vmax.xlane.f32.xlu1 %v809_v63  ;;  %v812_v3 = vmax.f32 %v9375_v1, %v9377_v2  ;;  %v651_v63 = vlaneseq }
 0x233   : > { %813 = vmax.xlane.f32.xlu1 %v812_v3  ;;  %v9381_v4 = vpop.f32.mrb[32].mxu0 }
 0x234   : > { %18087 = vst [vmem:[#allocation20_spill] sm:$0xff] %v9381_v4  ;;  %v9383_v5 = vpop.f32.mrb[33].mxu0 }
 0x235   : > { %18088 = vst [vmem:[#allocation21_spill] sm:$0xff] %v9383_v5  ;;  %v815_v6 = vmax.f32 %v9381_v4, %v9383_v5  ;;  %v9387_v7 = vpop.f32.mrb[34].mxu0 }
 0x236   : > { %18089 = vst [vmem:[#allocation22_spill] sm:$0xff] %v9387_v7  ;;  %v9389_v8 = vpop.f32.mrb[35].mxu0 }
 0x237   : > { %18090 = vst [vmem:[#allocation23_spill] sm:$0xff] %v9389_v8  ;;  %816 = vmax.xlane.f32.xlu1 %v815_v6  ;;  %v818_v9 = vmax.f32 %v9387_v7, %v9389_v8 }
 0x23b   : > { %819 = vmax.xlane.f32.xlu1 %v818_v9  ;;  %v9393_v10 = vpop.f32.mrb[36].mxu0 }
 0x23c   : > { %18091 = vst [vmem:[#allocation24_spill] sm:$0xff] %v9393_v10  ;;  %v9395_v11 = vpop.f32.mrb[37].mxu0 }
 0x23d   : > { %18092 = vst [vmem:[#allocation25_spill] sm:$0xff] %v9395_v11  ;;  %v821_v12 = vmax.f32 %v9393_v10, %v9395_v11  ;;  %v9399_v13 = vpop.f32.mrb[38].mxu0 }
 0x23e   : > { %18093 = vst [vmem:[#allocation26_spill] sm:$0xff] %v9399_v13  ;;  %v9401_v14 = vpop.f32.mrb[39].mxu0 }
 0x23f   : > { %18094 = vst [vmem:[#allocation27_spill] sm:$0xff] %v9401_v14  ;;  %822 = vmax.xlane.f32.xlu1 %v821_v12  ;;  %v824_v15 = vmax.f32 %v9399_v13, %v9401_v14  ;;  %v652_v13 = vand.u32 127, %v651_v63 }
 0x241   : > { %v653_v11 = vadd.s32 128, %v652_v13  ;;  %v9477_v10 = vcvt.s32.f32 %v652_v13 }
 0x243   : > { %825 = vmax.xlane.f32.xlu1 %v824_v15  ;;  %v9405_v16 = vpop.f32.mrb[40].mxu0 }
 0x244   : > { %18095 = vst [vmem:[#allocation28_spill] sm:$0xff] %v9405_v16  ;;  %v9407_v17 = vpop.f32.mrb[41].mxu0 }
 0x245   : > { %18096 = vst [vmem:[#allocation29_spill] sm:$0xff] %v9407_v17  ;;  %v9409_v18 = vpop.f32.mrb[42].mxu0  ;;  %v827_v22 = vmax.f32 %v9405_v16, %v9407_v17 }
 0x246   : > { %18097 = vst [vmem:[#allocation30_spill] sm:$0xff] %v9409_v18  ;;  %v9413_v24 = vpop.f32.mrb[43].mxu0 }
 0x247   : > { %18098 = vst [vmem:[#allocation31_spill] sm:$0xff] %v9413_v24  ;;  %v830_v28 = vmax.f32 %v9409_v18, %v9413_v24  ;;  %v9479_v24 = vcvt.s32.f32 %v653_v11 }
 0x24b   : > { %v9417_v30 = vpop.f32.mrb[44].mxu0 }
 0x24c   : > { %18099 = vst [vmem:[#allocation32_spill] sm:$0xff] %v9417_v30  ;;  %v9419_v34 = vpop.f32.mrb[45].mxu0 }
 0x24d   : > { %18100 = vst [vmem:[#allocation33_spill] sm:$0xff] %v9419_v34  ;;  %v9421_v36 = vpop.f32.mrb[46].mxu0  ;;  %v833_v40 = vmax.f32 %v9417_v30, %v9419_v34 }
 0x24e   : > { %v9425_v42 = vpop.f32.mrb[47].mxu0 }
 0x253   : > { %v9429_v48 = vpop.f32.mrb[48].mxu0 }
 0x254   : > { %18101 = vst [vmem:[#allocation34_spill] sm:$0xff] %v9429_v48  ;;  %v9431_v52 = vpop.f32.mrb[49].mxu0 }
 0x255   : > { %18102 = vst [vmem:[#allocation35_spill] sm:$0xff] %v9431_v52  ;;  %v9433_v54 = vpop.f32.mrb[50].mxu0 }
 0x256   : > { %v9437_v60 = vpop.f32.mrb[51].mxu0 }
 0x25b   : > { %v9441_v3 = vpop.f32.mrb[52].mxu0 }
 0x25c   : > { %18103 = vst [vmem:[#allocation36_spill] sm:$0xff] %v9441_v3  ;;  %v9443_v6 = vpop.f32.mrb[53].mxu0 }
 0x25d   : > { %18104 = vst [vmem:[#allocation37_spill] sm:$0xff] %v9443_v6  ;;  %v9445_v9 = vpop.f32.mrb[54].mxu0 }
 0x25e   : > { %v9449_v15 = vpop.f32.mrb[55].mxu0 }
 0x263   : > { %v9453_v57 = vpop.f32.mrb[56].mxu0 }
 0x264   : > { %18105 = vst [vmem:[#allocation38_spill] sm:$0xff] %v9453_v57  ;;  %v9455_v46 = vpop.f32.mrb[57].mxu0 }
 0x265   : > { %18106 = vst [vmem:[#allocation39_spill] sm:$0xff] %v9455_v46  ;;  %v9457_v34 = vpop.f32.mrb[58].mxu0 }
 0x266   : > { %v9461_v30 = vpop.f32.mrb[59].mxu0 }
 0x26b   : > { %v9465_v12 = vpop.f32.mrb[60].mxu0 }
 0x26c   : > { %18107 = vst [vmem:[#allocation40_spill] sm:$0xff] %v9465_v12  ;;  %v9467_v18 = vpop.f32.mrb[61].mxu0 }
 0x26d   : > { %18108 = vst [vmem:[#allocation41_spill] sm:$0xff] %v9467_v18  ;;  %v9469_v17 = vpop.f32.mrb[62].mxu0 }
 0x26e   : > { %v9473_v16 = vpop.f32.mrb[63].mxu0 }
 0x284   : > { %v769_v8 = vpop.xlane.xlu1 %768 }
 0x285   : > { %vm863_vm1 = vcmp.ge.f32.partialorder %v9285_v19, %v769_v8  ;;  %vm864_vm2 = vcmp.ge.f32.partialorder %v9287_v20, %v769_v8 }
 0x286   : > { %v927_v7 = vsel %vm863_vm1, %v9477_v10, 256.0  ;;  %v928_v0 = vsel %vm864_vm2, %v9479_v24, 256.0 }
 0x287   : > { %v991_v5 = vmin.f32 %v927_v7, %v928_v0 }
 0x288   : > { %v772_v4 = vpop.xlane.xlu1 %771 }
 0x289   : > { %992 = vmin.xlane.f32.xlu0 %v991_v5  ;;  %vm865_vm3 = vcmp.ge.f32.partialorder %v9289_v21, %v772_v4  ;;  %vm866_vm4 = vcmp.ge.f32.partialorder %v9293_v23, %v772_v4 }
 0x28a   : > { %v929_v13 = vsel %vm865_vm3, %v9477_v10, 256.0  ;;  %v930_v11 = vsel %vm866_vm4, %v9479_v24, 256.0 }
 0x28b   : > { %v994_v63 = vmin.f32 %v929_v13, %v930_v11 }
 0x28c   : > { %v775_v14 = vpop.xlane.xlu1 %774 }
 0x28d   : > { %995 = vmin.xlane.f32.xlu1 %v994_v63  ;;  %828 = vmax.xlane.f32.xlu0 %v827_v22  ;;  %vm867_vm5 = vcmp.ge.f32.partialorder %v9297_v25, %v775_v14  ;;  %vm868_vm6 = vcmp.ge.f32.partialorder %v9299_v26, %v775_v14 }
 0x28e   : > { %v931_v0 = vsel %vm867_vm5, %v9477_v10, 256.0  ;;  %v932_v5 = vsel %vm868_vm6, %v9479_v24, 256.0 }
 0x28f   : > { %v997_v7 = vmin.f32 %v931_v0, %v932_v5  ;;  %v18109_v5 = vmax.f32 %v9421_v36, %v9425_v42 }
 0x290   : > { %v778_v8 = vpop.xlane.xlu1 %777 }
 0x291   : > { %998 = vmin.xlane.f32.xlu0 %v997_v7  ;;  %831 = vmax.xlane.f32.xlu1 %v830_v28  ;;  %vm869_vm7 = vcmp.ge.f32.partialorder %v9301_v27, %v778_v8  ;;  %vm870_vm8 = vcmp.ge.f32.partialorder %v9305_v29, %v778_v8 }
 0x292   : > { %v933_v4 = vsel %vm869_vm7, %v9477_v10, 256.0  ;;  %v934_v22 = vsel %vm870_vm8, %v9479_v24, 256.0 }
 0x293   : > { %v1000_v13 = vmin.f32 %v933_v4, %v934_v22  ;;  %v18110_v22 = vmax.f32 %v9429_v48, %v9431_v52 }
 0x294   : > { %v781_v11 = vpop.xlane.xlu1 %780 }
 0x295   : > { %1001 = vmin.xlane.f32.xlu1 %v1000_v13  ;;  %834 = vmax.xlane.f32.xlu0 %v833_v40  ;;  %vm871_vm9 = vcmp.ge.f32.partialorder %v9309_v31, %v781_v11  ;;  %vm872_vm10 = vcmp.ge.f32.partialorder %v9311_v32, %v781_v11 }
 0x296   : > { %v935_v14 = vsel %vm871_vm9, %v9477_v10, 256.0  ;;  %v936_v28 = vsel %vm872_vm10, %v9479_v24, 256.0 }
 0x297   : > { %v1003_v63 = vmin.f32 %v935_v14, %v936_v28 }
 0x298   : > { %v784_v0 = vpop.xlane.xlu1 %783 }
 0x299   : > { %1004 = vmin.xlane.f32.xlu0 %v1003_v63  ;;  %837 = vmax.xlane.f32.xlu1 %v18109_v5  ;;  %vm873_vm11 = vcmp.ge.f32.partialorder %v9313_v33, %v784_v0  ;;  %vm874_vm12 = vcmp.ge.f32.partialorder %v9317_v35, %v784_v0  ;;  %v18111_v63 = vmax.f32 %v9433_v54, %v9437_v60 }
 0x29a   : > { %v937_v40 = vsel %vm873_vm11, %v9477_v10, 256.0  ;;  %v938_v7 = vsel %vm874_vm12, %v9479_v24, 256.0 }
 0x29b   : > { %v1006_v8 = vmin.f32 %v937_v40, %v938_v7 }
 0x29c   : > { %v787_v4 = vpop.xlane.xlu1 %786 }
 0x29d   : > { %1007 = vmin.xlane.f32.xlu1 %v1006_v8  ;;  %840 = vmax.xlane.f32.xlu0 %v18110_v22  ;;  %vm875_vm13 = vcmp.ge.f32.partialorder %v9321_v37, %v787_v4  ;;  %vm876_vm14 = vcmp.ge.f32.partialorder %v9323_v38, %v787_v4  ;;  %v18112_v8 = vmax.f32 %v9441_v3, %v9443_v6 }
 0x29e   : > { %v939_v13 = vsel %vm875_vm13, %v9477_v10, 256.0  ;;  %v940_v11 = vsel %vm876_vm14, %v9479_v24, 256.0 }
 0x29f   : > { %v1009_v14 = vmin.f32 %v939_v13, %v940_v11 }
 0x2a0   : > { %v790_v28 = vpop.xlane.xlu1 %789 }
 0x2a1   : > { %1010 = vmin.xlane.f32.xlu0 %v1009_v14  ;;  %843 = vmax.xlane.f32.xlu1 %v18111_v63  ;;  %vm877_vm15 = vcmp.ge.f32.partialorder %v9325_v39, %v790_v28  ;;  %vm878_vm1 = vcmp.ge.f32.partialorder %v9329_v41, %v790_v28  ;;  %v18113_v63 = vmax.f32 %v9445_v9, %v9449_v15 }
 0x2a2   : > { %v941_v0 = vsel %vm877_vm15, %v9477_v10, 256.0  ;;  %v942_v5 = vsel %vm878_vm1, %v9479_v24, 256.0 }
 0x2a3   : > { %v1012_v40 = vmin.f32 %v941_v0, %v942_v5 }
 0x2a4   : > { %v793_v7 = vpop.xlane.xlu1 %792 }
 0x2a5   : > { %1013 = vmin.xlane.f32.xlu1 %v1012_v40  ;;  %846 = vmax.xlane.f32.xlu0 %v18112_v8  ;;  %vm879_vm2 = vcmp.ge.f32.partialorder %v9333_v43, %v793_v7  ;;  %vm880_vm3 = vcmp.ge.f32.partialorder %v9335_v44, %v793_v7  ;;  %v18114_v40 = vmax.f32 %v9453_v57, %v9455_v46 }
 0x2a6   : > { %v796_v4 = vpop.xlane.xlu0 %795  ;;  %v943_v22 = vsel %vm879_vm2, %v9477_v10, 256.0  ;;  %v944_v13 = vsel %vm880_vm3, %v9479_v24, 256.0 }
 0x2a7   : > { %v1015_v11 = vmin.f32 %v943_v22, %v944_v13  ;;  %vm881_vm4 = vcmp.ge.f32.partialorder %v9337_v45, %v796_v4  ;;  %vm882_vm5 = vcmp.ge.f32.partialorder %v9341_v47, %v796_v4  ;;  %v18115_v13 = vmax.f32 %v9457_v34, %v9461_v30 }
 0x2a8   : > { %v945_v14 = vsel %vm881_vm4, %v9477_v10, 256.0  ;;  %v946_v28 = vsel %vm882_vm5, %v9479_v24, 256.0 }
 0x2a9   : > { %1016 = vmin.xlane.f32.xlu0 %v1015_v11  ;;  %849 = vmax.xlane.f32.xlu1 %v18113_v63  ;;  %v1018_v0 = vmin.f32 %v945_v14, %v946_v28 }
 0x2ac   : > { %v799_v5 = vpop.xlane.xlu1 %798 }
 0x2ad   : > { %1019 = vmin.xlane.f32.xlu1 %v1018_v0  ;;  %852 = vmax.xlane.f32.xlu0 %v18114_v40  ;;  %vm883_vm6 = vcmp.ge.f32.partialorder %v9345_v49, %v799_v5  ;;  %vm884_vm7 = vcmp.ge.f32.partialorder %v9347_v50, %v799_v5  ;;  %v18116_v0 = vmax.f32 %v9465_v12, %v9467_v18 }
 0x2ae   : > { %v947_v7 = vsel %vm883_vm6, %v9477_v10, 256.0  ;;  %v948_v8 = vsel %vm884_vm7, %v9479_v24, 256.0 }
 0x2af   : > { %v1021_v4 = vmin.f32 %v947_v7, %v948_v8 }
 0x2b0   : > { %v802_v22 = vpop.xlane.xlu1 %801 }
 0x2b1   : > { %1022 = vmin.xlane.f32.xlu0 %v1021_v4  ;;  %855 = vmax.xlane.f32.xlu1 %v18115_v13  ;;  %vm885_vm8 = vcmp.ge.f32.partialorder %v9349_v51, %v802_v22  ;;  %vm886_vm9 = vcmp.ge.f32.partialorder %v9353_v53, %v802_v22  ;;  %v18117_v4 = vmax.f32 %v9469_v17, %v9473_v16 }
 0x2b2   : > { %v949_v11 = vsel %vm885_vm8, %v9477_v10, 256.0  ;;  %v950_v14 = vsel %vm886_vm9, %v9479_v24, 256.0 }
 0x2b3   : > { %v1024_v28 = vmin.f32 %v949_v11, %v950_v14 }
 0x2b4   : > { %v805_v63 = vpop.xlane.xlu1 %804 }
 0x2b5   : > { %1025 = vmin.xlane.f32.xlu1 %v1024_v28  ;;  %858 = vmax.xlane.f32.xlu0 %v18116_v0  ;;  %vm887_vm10 = vcmp.ge.f32.partialorder %v9357_v55, %v805_v63  ;;  %vm888_vm11 = vcmp.ge.f32.partialorder %v9359_v56, %v805_v63 }
 0x2b6   : > { %v951_v5 = vsel %vm887_vm10, %v9477_v10, 256.0  ;;  %v952_v40 = vsel %vm888_vm11, %v9479_v24, 256.0 }
 0x2b7   : > { %v1027_v7 = vmin.f32 %v951_v5, %v952_v40 }
 0x2b8   : > { %v808_v8 = vpop.xlane.xlu1 %807 }
 0x2b9   : > { %1028 = vmin.xlane.f32.xlu0 %v1027_v7  ;;  %861 = vmax.xlane.f32.xlu1 %v18117_v4  ;;  %vm889_vm12 = vcmp.ge.f32.partialorder %v9363_v58, %v808_v8  ;;  %vm890_vm13 = vcmp.ge.f32.partialorder %v9365_v59, %v808_v8 }
 0x2ba   : > { %v953_v22 = vsel %vm889_vm12, %v9477_v10, 256.0  ;;  %v954_v13 = vsel %vm890_vm13, %v9479_v24, 256.0 }
 0x2bb   : > { %v1030_v11 = vmin.f32 %v953_v22, %v954_v13  ;;  %v18118_v22 = vld [vmem:[#allocation20_spill] sm:$0xff]  ;;  %v18119_v13 = vld [vmem:[#allocation21_spill] sm:$0xff] }
 0x2bc   : > { %v811_v14 = vpop.xlane.xlu1 %810 }
 0x2bd   : > { %1031 = vmin.xlane.f32.xlu1 %v1030_v11  ;;  %vm891_vm14 = vcmp.ge.f32.partialorder %v9369_v61, %v811_v14  ;;  %vm892_vm15 = vcmp.ge.f32.partialorder %v9371_v62, %v811_v14 }
 0x2be   : > { %v955_v28 = vsel %vm891_vm14, %v9477_v10, 256.0  ;;  %v956_v63 = vsel %vm892_vm15, %v9479_v24, 256.0 }
 0x2bf   : > { %v1033_v0 = vmin.f32 %v955_v28, %v956_v63 }
 0x2c0   : > { %v814_v5 = vpop.xlane.xlu1 %813 }
 0x2c1   : > { %1034 = vmin.xlane.f32.xlu0 %v1033_v0  ;;  %vm893_vm1 = vcmp.ge.f32.partialorder %v9375_v1, %v814_v5  ;;  %vm894_vm2 = vcmp.ge.f32.partialorder %v9377_v2, %v814_v5  ;;  %v18120_v0 = vld [vmem:[#allocation22_spill] sm:$0xff]  ;;  %v18121_v5 = vld [vmem:[#allocation23_spill] sm:$0xff]  ;;  %v18122_v1 = vld [vmem:[#allocation24_spill] sm:$0xff] }
 0x2c2   : > { %v957_v40 = vsel %vm893_vm1, %v9477_v10, 256.0  ;;  %v958_v7 = vsel %vm894_vm2, %v9479_v24, 256.0 }
 0x2c3   : > { %v1036_v8 = vmin.f32 %v957_v40, %v958_v7 }
 0x2c4   : > { %v817_v4 = vpop.xlane.xlu1 %816 }
 0x2c5   : > { %1037 = vmin.xlane.f32.xlu1 %v1036_v8  ;;  %vm895_vm3 = vcmp.ge.f32.partialorder %v18118_v22, %v817_v4  ;;  %vm896_vm4 = vcmp.ge.f32.partialorder %v18119_v13, %v817_v4  ;;  %v18123_v4 = vld [vmem:[#allocation25_spill] sm:$0xff] }
 0x2c6   : > { %v959_v11 = vsel %vm895_vm3, %v9477_v10, 256.0  ;;  %v960_v14 = vsel %vm896_vm4, %v9479_v24, 256.0 }
 0x2c7   : > { %v1039_v28 = vmin.f32 %v959_v11, %v960_v14 }
 0x2c8   : > { %v820_v63 = vpop.xlane.xlu1 %819 }
 0x2c9   : > { %1040 = vmin.xlane.f32.xlu0 %v1039_v28  ;;  %vm897_vm5 = vcmp.ge.f32.partialorder %v18120_v0, %v820_v63  ;;  %vm898_vm6 = vcmp.ge.f32.partialorder %v18121_v5, %v820_v63  ;;  %v18124_v0 = vld [vmem:[#allocation26_spill] sm:$0xff]  ;;  %v18125_v63 = vld [vmem:[#allocation27_spill] sm:$0xff] }
 0x2ca   : > { %v961_v2 = vsel %vm897_vm5, %v9477_v10, 256.0  ;;  %v962_v40 = vsel %vm898_vm6, %v9479_v24, 256.0 }
 0x2cb   : > { %v1042_v7 = vmin.f32 %v961_v2, %v962_v40 }
 0x2cc   : > { %v823_v8 = vpop.xlane.xlu1 %822 }
 0x2cd   : > { %1043 = vmin.xlane.f32.xlu1 %v1042_v7  ;;  %vm899_vm7 = vcmp.ge.f32.partialorder %v18122_v1, %v823_v8  ;;  %vm900_vm8 = vcmp.ge.f32.partialorder %v18123_v4, %v823_v8 }
 0x2ce   : > { %v963_v13 = vsel %vm899_vm7, %v9477_v10, 256.0  ;;  %v964_v11 = vsel %vm900_vm8, %v9479_v24, 256.0 }
 0x2cf   : > { %v1045_v14 = vmin.f32 %v963_v13, %v964_v11  ;;  %v18126_v11 = vld [vmem:[#allocation28_spill] sm:$0xff] }
 0x2d0   : > { %v826_v28 = vpop.xlane.xlu1 %825 }
 0x2d1   : > { %1046 = vmin.xlane.f32.xlu0 %v1045_v14  ;;  %vm901_vm9 = vcmp.ge.f32.partialorder %v18124_v0, %v826_v28  ;;  %vm902_vm10 = vcmp.ge.f32.partialorder %v18125_v63, %v826_v28  ;;  %v18127_v14 = vld [vmem:[#allocation29_spill] sm:$0xff]  ;;  %v18129_v63 = vld [vmem:[#allocation31_spill] sm:$0xff] }
 0x2d2   : > { %v965_v5 = vsel %vm901_vm9, %v9477_v10, 256.0  ;;  %v966_v2 = vsel %vm902_vm10, %v9479_v24, 256.0 }
 0x2d3   : > { %v1048_v40 = vmin.f32 %v965_v5, %v966_v2 }
 0x2d5   : > { %1049 = vmin.xlane.f32.xlu1 %v1048_v40  ;;  %v17515_v40 = vmov 1.0|1.0  }
 0x316   : > { %v9588_v7 = vpop.xlane.xlu0 %992 }
 0x317   : > { %vm1087_vm11 = vcmp.eq.f32.partialorder %v9477_v10, %v9588_v7  ;;  %vm1088_vm1 = vcmp.eq.f32.partialorder %v9479_v24, %v9588_v7 }
 0x31a   : > { %v9592_v8 = vpop.xlane.xlu1 %995  ;;  %v829_v13 = vpop.xlane.xlu0 %828 }
 0x31b   : > { %vm1089_vm12 = vcmp.eq.f32.partialorder %v9477_v10, %v9592_v8  ;;  %vm1090_vm13 = vcmp.eq.f32.partialorder %v9479_v24, %v9592_v8  ;;  %vm903_vm14 = vcmp.ge.f32.partialorder %v18126_v11, %v829_v13  ;;  %vm904_vm15 = vcmp.ge.f32.partialorder %v18127_v14, %v829_v13  ;;  %v18128_v11 = vld [vmem:[#allocation30_spill] sm:$0xff] }
 0x31c   : > { %vm7440_vm2 = vmpackc.low %vm1089_vm12, %vm1087_vm11  ;;  %v967_v5 = vsel %vm903_vm14, %v9477_v10, 256.0  ;;  %v968_v28 = vsel %vm904_vm15, %v9479_v24, 256.0 }
 0x31d   : > { %vm7438_vm3 = vmpackc.low %vm1090_vm13, %vm1088_vm1  ;;  %v1051_v2 = vmin.f32 %v967_v5, %v968_v28 }
 0x31e   : > { %7439 = vmatprep.subr.msk.bf16.mxu0 %vm7438_vm3, %v17515_v40  ;;  %v9617_v13 = vpop.xlane.xlu0 %998  ;;  %v832_v14 = vpop.xlane.xlu1 %831 }
 0x31f   : > { %7441 = vmatpush1.bf16.xpose.msk.msra.mxu0 %vm7440_vm2, %v17515_v40  ;;  %1052 = vmin.xlane.f32.xlu0 %v1051_v2  ;;  %vm905_vm4 = vcmp.ge.f32.partialorder %v18128_v11, %v832_v14  ;;  %vm906_vm5 = vcmp.ge.f32.partialorder %v18129_v63, %v832_v14  ;;  %vm1091_vm6 = vcmp.eq.f32.partialorder %v9477_v10, %v9617_v13  ;;  %v18130_v2 = vld [vmem:[#allocation32_spill] sm:$0xff]  ;;  %v18131_v14 = vld [vmem:[#allocation33_spill] sm:$0xff] }
 0x320   : > { %v969_v0 = vsel %vm905_vm4, %v9477_v10, 256.0  ;;  %v970_v4 = vsel %vm906_vm5, %v9479_v24, 256.0  ;;  %vm1092_vm14 = vcmp.eq.f32.partialorder %v9479_v24, %v9617_v13  ;;  %v9814_v7 = vsel %vm1091_vm6, -3e+38, %v9297_v25 }
 0x321   : > { %v1054_v1 = vmin.f32 %v969_v0, %v970_v4  ;;  %18134 = vst [vmem:[#allocation43_spill] sm:$0xff] %v9814_v7  ;;  %v9838_v25 = vsel %vm1090_vm13, -3e+38, %v9293_v23 }
 0x322   : > { %v9626_v5 = vpop.xlane.xlu1 %1001  ;;  %v835_v28 = vpop.xlane.xlu0 %834  ;;  %18137 = vst [vmem:[#allocation46_spill] sm:$0xff] %v9838_v25 }
 0x323   : > { %vm17491_vm7 = vcmp.eq.f32.partialorder %v9477_v10, %v9626_v5  ;;  %vm17490_vm8 = vcmp.eq.f32.partialorder %v9479_v24, %v9626_v5  ;;  %vm907_vm9 = vcmp.ge.f32.partialorder %v18130_v2, %v835_v28  ;;  %vm908_vm10 = vcmp.ge.f32.partialorder %v18131_v14, %v835_v28  ;;  %1055 = vmin.xlane.f32.xlu1 %v1054_v1 }
 0x324   : > { %vm7444_vm15 = vmpackc.low %vm17491_vm7, %vm1091_vm6  ;;  %v971_v0 = vsel %vm907_vm9, %v9477_v10, 256.0  ;;  %v972_v4 = vsel %vm908_vm10, %v9479_v24, 256.0  ;;  %vm18138_vm13 = vcmp.eq.f32.partialorder %v9477_v10, %v9626_v5 }
 0x325   : > { %vm7442_vm2 = vmpackc.low %vm17490_vm8, %vm1092_vm14  ;;  %v1057_v28 = vmin.f32 %v971_v0, %v972_v4  ;;  %v9876_v8 = vsel %vm18138_vm13, -3e+38, %v9301_v27 }
 0x326   : > { %7443 = vmatprep.subr.msk.bf16.mxu0 %vm7442_vm2, %v17515_v40  ;;  %v9651_v14 = vpop.xlane.xlu0 %1004  ;;  %v838_v2 = vpop.xlane.xlu1 %837 }
 0x327   : > { %7445 = vmatpush1.bf16.xpose.msk.msra.mxu0 %vm7444_vm15, %v17515_v40  ;;  %1058 = vmin.xlane.f32.xlu0 %v1057_v28  ;;  %vm909_vm3 = vcmp.ge.f32.partialorder %v9421_v36, %v838_v2  ;;  %vm910_vm4 = vcmp.ge.f32.partialorder %v9425_v42, %v838_v2  ;;  %vm1095_vm5 = vcmp.eq.f32.partialorder %v9477_v10, %v9651_v14 }
 0x328   : > { %v973_v1 = vsel %vm909_vm3, %v9477_v10, 256.0  ;;  %v974_v63 = vsel %vm910_vm4, %v9479_v24, 256.0  ;;  %vm1096_vm3 = vcmp.eq.f32.partialorder %v9479_v24, %v9651_v14 }
 0x329   : > { %v1060_v11 = vmin.f32 %v973_v1, %v974_v63 }
 0x32a   : > { %v9660_v0 = vpop.xlane.xlu1 %1007  ;;  %v841_v4 = vpop.xlane.xlu0 %840 }
 0x32b   : > { %vm17489_vm9 = vcmp.eq.f32.partialorder %v9477_v10, %v9660_v0  ;;  %vm17487_vm10 = vcmp.eq.f32.partialorder %v9479_v24, %v9660_v0  ;;  %vm911_vm15 = vcmp.ge.f32.partialorder %v9429_v48, %v841_v4  ;;  %vm912_vm2 = vcmp.ge.f32.partialorder %v9431_v52, %v841_v4  ;;  %1061 = vmin.xlane.f32.xlu1 %v1060_v11 }
 0x32c   : > { %vm7448_vm4 = vmpackc.low %vm17489_vm9, %vm1095_vm5  ;;  %v975_v63 = vsel %vm911_vm15, %v9477_v10, 256.0  ;;  %v976_v2 = vsel %vm912_vm2, %v9479_v24, 256.0  ;;  %vm18143_vm13 = vcmp.eq.f32.partialorder %v9479_v24, %v9660_v0 }
 0x32d   : > { %vm7446_vm0 = vmpackc.low %vm17487_vm10, %vm1096_vm3  ;;  %v1063_v28 = vmin.f32 %v975_v63, %v976_v2 }
 0x32e   : > { %7447 = vmatprep.subr.msk.bf16.mxu0 %vm7446_vm0, %v17515_v40  ;;  %v9685_v1 = vpop.xlane.xlu0 %1010  ;;  %v844_v4 = vpop.xlane.xlu1 %843 }
 0x32f   : > { %7449 = vmatpush1.bf16.xpose.msk.msra.mxu0 %vm7448_vm4, %v17515_v40  ;;  %1064 = vmin.xlane.f32.xlu0 %v1063_v28  ;;  %vm913_vm15 = vcmp.ge.f32.partialorder %v9433_v54, %v844_v4  ;;  %vm914_vm2 = vcmp.ge.f32.partialorder %v9437_v60, %v844_v4  ;;  %vm17497_vm10 = vcmp.eq.f32.partialorder %v9477_v10, %v9685_v1 }
 0x330   : > { %v977_v11 = vsel %vm913_vm15, %v9477_v10, 256.0  ;;  %v978_v52 = vsel %vm914_vm2, %v9479_v24, 256.0  ;;  %vm17496_vm15 = vcmp.eq.f32.partialorder %v9479_v24, %v9685_v1 }
 0x331   : > { %v1066_v48 = vmin.f32 %v977_v11, %v978_v52 }
 0x332   : > { %v9694_v63 = vpop.xlane.xlu1 %1013  ;;  %v847_v2 = vpop.xlane.xlu0 %846 }
 0x333   : > { %vm17495_vm0 = vcmp.eq.f32.partialorder %v9477_v10, %v9694_v63  ;;  %vm17493_vm4 = vcmp.eq.f32.partialorder %v9479_v24, %v9694_v63  ;;  %vm915_vm9 = vcmp.ge.f32.partialorder %v9441_v3, %v847_v2  ;;  %vm916_vm8 = vcmp.ge.f32.partialorder %v9443_v6, %v847_v2  ;;  %1067 = vmin.xlane.f32.xlu1 %v1066_v48 }
 0x334   : > { %vm7452_vm2 = vmpackc.low %vm17495_vm0, %vm17497_vm10  ;;  %v979_v52 = vsel %vm915_vm9, %v9477_v10, 256.0  ;;  %v980_v28 = vsel %vm916_vm8, %v9479_v24, 256.0 }
 0x335   : > { %vm7450_vm7 = vmpackc.low %vm17493_vm4, %vm17496_vm15  ;;  %v1069_v4 = vmin.f32 %v979_v52, %v980_v28 }
 0x336   : > { %7451 = vmatprep.subr.msk.bf16.mxu0 %vm7450_vm7, %v17515_v40  ;;  %v9719_v11 = vpop.xlane.xlu0 %1016  ;;  %v850_v2 = vpop.xlane.xlu1 %849 }
 0x337   : > { %7453 = vmatpush1.bf16.xpose.msk.msra.mxu0 %vm7452_vm2, %v17515_v40  ;;  %1070 = vmin.xlane.f32.xlu0 %v1069_v4  ;;  %vm917_vm9 = vcmp.ge.f32.partialorder %v9445_v9, %v850_v2  ;;  %vm918_vm8 = vcmp.ge.f32.partialorder %v9449_v15, %v850_v2  ;;  %vm17503_vm4 = vcmp.eq.f32.partialorder %v9477_v10, %v9719_v11 }
 0x338   : > { %v981_v48 = vsel %vm917_vm9, %v9477_v10, 256.0  ;;  %v982_v6 = vsel %vm918_vm8, %v9479_v24, 256.0  ;;  %vm17502_vm9 = vcmp.eq.f32.partialorder %v9479_v24, %v9719_v11 }
 0x339   : > { %v1072_v3 = vmin.f32 %v981_v48, %v982_v6 }
 0x33a   : > { %v9728_v52 = vpop.xlane.xlu1 %1019  ;;  %v853_v28 = vpop.xlane.xlu0 %852 }
 0x33b   : > { %vm17501_vm7 = vcmp.eq.f32.partialorder %v9477_v10, %v9728_v52  ;;  %vm17499_vm2 = vcmp.eq.f32.partialorder %v9479_v24, %v9728_v52  ;;  %vm919_vm0 = vcmp.ge.f32.partialorder %v9453_v57, %v853_v28  ;;  %vm920_vm15 = vcmp.ge.f32.partialorder %v9455_v46, %v853_v28  ;;  %1073 = vmin.xlane.f32.xlu1 %v1072_v3 }
 0x33c   : > { %vm7456_vm8 = vmpackc.low %vm17501_vm7, %vm17503_vm4  ;;  %v983_v6 = vsel %vm919_vm0, %v9477_v10, 256.0  ;;  %v984_v4 = vsel %vm920_vm15, %v9479_v24, 256.0 }
 0x33d   : > { %vm7454_vm10 = vmpackc.low %vm17499_vm2, %vm17502_vm9  ;;  %v1075_v2 = vmin.f32 %v983_v6, %v984_v4 }
 0x33e   : > { %7455 = vmatprep.subr.msk.bf16.mxu0 %vm7454_vm10, %v17515_v40  ;;  %v9753_v48 = vpop.xlane.xlu0 %1022  ;;  %v856_v28 = vpop.xlane.xlu1 %855 }
 0x33f   : > { %7457 = vmatpush1.bf16.xpose.msk.msra.mxu0 %vm7456_vm8, %v17515_v40  ;;  %1076 = vmin.xlane.f32.xlu0 %v1075_v2  ;;  %vm921_vm0 = vcmp.ge.f32.partialorder %v9457_v34, %v856_v28  ;;  %vm922_vm15 = vcmp.ge.f32.partialorder %v9461_v30, %v856_v28  ;;  %vm1107_vm2 = vcmp.eq.f32.partialorder %v9477_v10, %v9753_v48 }
 0x340   : > { %v985_v3 = vsel %vm921_vm0, %v9477_v10, 256.0  ;;  %v986_v46 = vsel %vm922_vm15, %v9479_v24, 256.0  ;;  %vm1108_vm0 = vcmp.eq.f32.partialorder %v9479_v24, %v9753_v48 }
 0x341   : > { %v1078_v57 = vmin.f32 %v985_v3, %v986_v46 }
 0x342   : > { %v9762_v6 = vpop.xlane.xlu1 %1025  ;;  %v859_v4 = vpop.xlane.xlu0 %858 }
 0x343   : > { %vm1109_vm10 = vcmp.eq.f32.partialorder %v9477_v10, %v9762_v6  ;;  %vm1110_vm8 = vcmp.eq.f32.partialorder %v9479_v24, %v9762_v6  ;;  %vm923_vm7 = vcmp.ge.f32.partialorder %v9465_v12, %v859_v4  ;;  %vm924_vm9 = vcmp.ge.f32.partialorder %v9467_v18, %v859_v4  ;;  %1079 = vmin.xlane.f32.xlu1 %v1078_v57 }
 0x344   : > { %vm7460_vm15 = vmpackc.low %vm1109_vm10, %vm1107_vm2  ;;  %v987_v46 = vsel %vm923_vm7, %v9477_v10, 256.0  ;;  %v988_v2 = vsel %vm924_vm9, %v9479_v24, 256.0  ;;  %v9791_v57 = vsel %vm1087_vm11, -3e+38, %v9285_v19  ;;  %v9797_v4 = vsel %vm1088_vm1, -3e+38, %v9287_v20 }
 0x345   : > { %vm7458_vm4 = vmpackc.low %vm1110_vm8, %vm1108_vm0  ;;  %v1081_v28 = vmin.f32 %v987_v46, %v988_v2  ;;  %18132 = vst [vmem:[#allocation20_spill] sm:$0xff] %v9791_v57  ;;  %v1499_v19 = vmax.f32 %v9791_v57, %v9797_v4  ;;  %v10022_v48 = vsel %vm1109_vm10, -3e+38, %v9349_v51 }
 0x346   : > { %7459 = vmatprep.subr.msk.bf16.mxu0 %vm7458_vm4, %v17515_v40  ;;  %v862_v3 = vpop.xlane.xlu1 %861  ;;  %18133 = vst [vmem:[#allocation42_spill] sm:$0xff] %v9797_v4  ;;  %v9801_v46 = vpop.xlane.xlu0 %1028 }
 0x347   : > { %7461 = vmatpush1.bf16.xpose.msk.msra.mxu0 %vm7460_vm15, %v17515_v40  ;;  %1082 = vmin.xlane.f32.xlu0 %v1081_v28  ;;  %vm925_vm7 = vcmp.ge.f32.partialorder %v9469_v17, %v862_v3  ;;  %vm926_vm4 = vcmp.ge.f32.partialorder %v9473_v16, %v862_v3  ;;  %v9820_v28 = vsel %vm1092_vm14, -3e+38, %v9299_v26  ;;  %v9826_v3 = vsel %vm1089_vm12, -3e+38, %v9289_v21 }
 0x348   : > { %v989_v2 = vsel %vm925_vm7, %v9477_v10, 256.0  ;;  %v990_v18 = vsel %vm926_vm4, %v9479_v24, 256.0  ;;  %18135 = vst [vmem:[#allocation44_spill] sm:$0xff] %v9820_v28  ;;  %18136 = vst [vmem:[#allocation45_spill] sm:$0xff] %v9826_v3  ;;  %vm1111_vm11 = vcmp.eq.f32.partialorder %v9477_v10, %v9801_v46  ;;  %vm1112_vm12 = vcmp.eq.f32.partialorder %v9479_v24, %v9801_v46 }
 0x349   : > { %v1084_v20 = vmin.f32 %v989_v2, %v990_v18  ;;  %v1505_v21 = vmax.f32 %v9814_v7, %v9820_v28  ;;  %v1502_v23 = vmax.f32 %v9826_v3, %v9838_v25  ;;  %v9863_v26 = vsel %vm1095_vm5, -3e+38, %v9309_v31 }
 0x34a   : > { %v9808_v12 = vpop.xlane.xlu1 %1031  ;;  %v9869_v18 = vsel %vm1096_vm3, -3e+38, %v9311_v32  ;;  %vm18139_vm5 = vcmp.eq.f32.partialorder %v9479_v24, %v9626_v5  ;;  %vm18140_vm3 = vcmp.eq.f32.partialorder %v9477_v10, %v9685_v1  ;;  %vm18141_vm15 = vcmp.eq.f32.partialorder %v9479_v24, %v9685_v1 }
 0x34b   : > { %vm1113_vm1 = vcmp.eq.f32.partialorder %v9477_v10, %v9808_v12  ;;  %vm1114_vm6 = vcmp.eq.f32.partialorder %v9479_v24, %v9808_v12  ;;  %1500 = vmax.xlane.f32.xlu0 %v1499_v19  ;;  %1085 = vmin.xlane.f32.xlu1 %v1084_v20  ;;  %v9882_v31 = vsel %vm18139_vm5, -3e+38, %v9305_v29  ;;  %v1511_v32 = vmax.f32 %v9863_v26, %v9869_v18 }
 0x34c   : > { %vm7464_vm14 = vmpackc.low %vm1113_vm1, %vm1111_vm11  ;;  %v1508_v2 = vmax.f32 %v9876_v8, %v9882_v31  ;;  %v9894_v27 = vsel %vm18140_vm3, -3e+38, %v9321_v37  ;;  %v9900_v29 = vsel %vm18141_vm15, -3e+38, %v9323_v38  ;;  %vm18142_vm7 = vcmp.eq.f32.partialorder %v9477_v10, %v9660_v0 }
 0x34d   : > { %vm7462_vm9 = vmpackc.low %vm1114_vm6, %vm1112_vm12  ;;  %v9906_v5 = vsel %vm18142_vm7, -3e+38, %v9313_v33  ;;  %v9917_v37 = vsel %vm18143_vm13, -3e+38, %v9317_v35  ;;  %v1517_v33 = vmax.f32 %v9894_v27, %v9900_v29  ;;  %vm18144_vm7 = vcmp.eq.f32.partialorder %v9477_v10, %v9719_v11 }
 0x34e   : > { %7463 = vmatprep.subr.msk.bf16.mxu0 %vm7462_vm9, %v17515_v40  ;;  %v1035_v13 = vpop.xlane.xlu0 %1034  ;;  %v1514_v35 = vmax.f32 %v9906_v5, %v9917_v37  ;;  %v9939_v38 = vsel %vm18144_vm7, -3e+38, %v9333_v43  ;;  %vm18145_vm13 = vcmp.eq.f32.partialorder %v9479_v24, %v9719_v11  ;;  %vm18147_vm7 = vcmp.eq.f32.partialorder %v9479_v24, %v9694_v63 }
 0x34f   : > { %7465 = vmatpush1.bf16.xpose.msk.msra.mxu0 %vm7464_vm14, %v17515_v40  ;;  %1506 = vmax.xlane.f32.xlu0 %v1505_v21  ;;  %vm1115_vm4 = vcmp.eq.f32.partialorder %v9477_v10, %v1035_v13  ;;  %vm1116_vm5 = vcmp.eq.f32.partialorder %v9479_v24, %v1035_v13  ;;  %v9945_v0 = vsel %vm18145_vm13, -3e+38, %v9335_v44  ;;  %v9958_v43 = vsel %vm18147_vm7, -3e+38, %v9329_v41  ;;  %v18155_v13 = vld [vmem:[#allocation21_spill] sm:$0xff] }
 0x350   : > { %1503 = vmax.xlane.f32.xlu1 %v1502_v23  ;;  %v1523_v44 = vmax.f32 %v9939_v38, %v9945_v0  ;;  %v9974_v41 = vsel %vm1108_vm0, -3e+38, %v9347_v50  ;;  %v10009_v50 = vsel %vm1111_vm11, -3e+38, %v9357_v55  ;;  %v10028_v55 = vsel %vm1110_vm8, -3e+38, %v9353_v53 }
 0x351   : > { %v10036_v46 = vsel %vm1113_vm1, -3e+38, %v9363_v58  ;;  %v1532_v23 = vmax.f32 %v10022_v48, %v10028_v55  ;;  %v10043_v53 = vsel %vm1115_vm4, -3e+38, %v9369_v61  ;;  %v10048_v6 = vsel %vm1116_vm5, -3e+38, %v9371_v62 }
 0x352   : > { %v9886_v14 = vpop.xlane.xlu1 %1037  ;;  %18150 = vst [vmem:[#allocation47_spill] sm:$0xff] %v10036_v46  ;;  %18151 = vst [vmem:[#allocation48_spill] sm:$0xff] %v10043_v53  ;;  %v10060_v58 = vsel %vm1114_vm6, -3e+38, %v9365_v59  ;;  %v10069_v61 = vld [vmem:[%s9231_s2] ss:$8 sps:$4 sm:$0xff]   ;;  %v1541_v59 = vmax.f32 %v10043_v53, %v10048_v6 }
 0x353   : > { %vm1117_vm14 = vcmp.eq.f32.partialorder %v9477_v10, %v9886_v14  ;;  %vm17506_vm9 = vcmp.eq.f32.partialorder %v9479_v24, %v9886_v14  ;;  %1512 = vmax.xlane.f32.xlu0 %v1511_v32  ;;  %18152 = vst [vmem:[#allocation49_spill] sm:$0xff] %v10048_v6  ;;  %v10051_v32 = vld [vmem:[%s9231_s2 + $0x4] ss:$8 sps:$4 sm:$0xff]   ;;  %18153 = vst [vmem:[#allocation50_spill] sm:$0xff] %v10060_v58  ;;  %v1538_v62 = vmax.f32 %v10036_v46, %v10060_v58 }
 0x354   : > { %vm7468_vm3 = vmpackc.low %vm1117_vm14, %vm1115_vm4  ;;  %1509 = vmax.xlane.f32.xlu1 %v1508_v2  ;;  %1353 = vmatprep.mubr.bf16.mxu0 %v10051_v32  ;;  %vm18160_vm6 = vcmp.eq.f32.partialorder %v9479_v24, %v9886_v14  ;;  %v18166_v14 = vld [vmem:[#allocation22_spill] sm:$0xff] }
 0x355   : > { %vm7466_vm15 = vmpackc.low %vm17506_vm9, %vm1116_vm5  ;;  %708 = vmatprep.subr.bf16.mxu1 %v10051_v32 }
 0x356   : > { %7467 = vmatprep.subr.msk.bf16.mxu0 %vm7466_vm15, %v17515_v40  ;;  %vm18146_vm15 = vcmp.eq.f32.partialorder %v9477_v10, %v9694_v63  ;;  %v1041_v19 = vpop.xlane.xlu0 %1040  ;;  %709 = vmatpush1.bf16.msra.mxu1 %v10069_v61 }
 0x357   : > { %7469 = vmatpush1.bf16.xpose.msk.msra.mxu0 %vm7468_vm3, %v17515_v40  ;;  %1518 = vmax.xlane.f32.xlu0 %v1517_v33  ;;  %v9952_v1 = vsel %vm18146_vm15, -3e+38, %v9325_v39  ;;  %v9968_v39 = vsel %vm1107_vm2, -3e+38, %v9345_v49  ;;  %vm18148_vm3 = vcmp.eq.f32.partialorder %v9477_v10, %v9728_v52  ;;  %vm1119_vm13 = vcmp.eq.f32.partialorder %v9477_v10, %v1041_v19  ;;  %v18157_v33 = vld [vmem:[#allocation18_spill] sm:$0xff] }
 0x358   : > { %1515 = vmax.xlane.f32.xlu1 %v1514_v35  ;;  %v1520_v20 = vmax.f32 %v9952_v1, %v9958_v43  ;;  %v9980_v63 = vsel %vm18148_vm3, -3e+38, %v9337_v45  ;;  %vm18149_vm2 = vcmp.eq.f32.partialorder %v9479_v24, %v9728_v52  ;;  %vm1120_vm0 = vcmp.eq.f32.partialorder %v9479_v24, %v1041_v19 }
 0x359   : > { %v9989_v49 = vsel %vm18149_vm2, -3e+38, %v9341_v47  ;;  %v1529_v45 = vmax.f32 %v9968_v39, %v9974_v41  ;;  %v10015_v52 = vsel %vm1112_vm12, -3e+38, %v9359_v56  ;;  %v10084_v12 = vsel %vm1119_vm13, -3e+38, %v18118_v22 }
 0x35a   : > { %v1044_v11 = vpop.xlane.xlu1 %1043  ;;  %v1526_v47 = vmax.f32 %v9980_v63, %v9989_v49  ;;  %v1535_v56 = vmax.f32 %v10009_v50, %v10015_v52  ;;  %18154 = vst [vmem:[#allocation51_spill] sm:$0xff] %v10084_v12  ;;  %v10089_v2 = vsel %vm1120_vm0, -3e+38, %v18155_v13  ;;  %v10097_v35 = vsel %vm1117_vm14, -3e+38, %v18157_v33 }
 0x35b   : > { %vm1121_vm15 = vcmp.eq.f32.partialorder %v9477_v10, %v1044_v11  ;;  %vm1122_vm7 = vcmp.eq.f32.partialorder %v9479_v24, %v1044_v11  ;;  %1524 = vmax.xlane.f32.xlu0 %v1523_v44  ;;  %18156 = vst [vmem:[#allocation21_spill] sm:$0xff] %v10089_v2  ;;  %18158 = vst [vmem:[#allocation18_spill] sm:$0xff] %v10097_v35  ;;  %v18159_v44 = vld [vmem:[#allocation19_spill] sm:$0xff]  ;;  %v1547_v19 = vmax.f32 %v10084_v12, %v10089_v2 }
 0x35c   : > { %vm7472_vm3 = vmpackc.low %vm1121_vm15, %vm1119_vm13  ;;  %1521 = vmax.xlane.f32.xlu1 %v1520_v20  ;;  %v10103_v22 = vsel %vm18160_vm6, -3e+38, %v18159_v44  ;;  %v18170_v44 = vld [vmem:[#allocation26_spill] sm:$0xff] }
 0x35d   : > { %vm7470_vm9 = vmpackc.low %vm1122_vm7, %vm1120_vm0  ;;  %18161 = vst [vmem:[#allocation19_spill] sm:$0xff] %v10103_v22  ;;  %v1544_v20 = vmax.f32 %v10097_v35, %v10103_v22  ;;  %v18177_v22 = vld [vmem:[#allocation29_spill] sm:$0xff] }
 0x35e   : > { %7471 = vmatprep.subr.msk.bf16.mxu0 %vm7470_vm9, %v17515_v40  ;;  %v1047_v21 = vpop.xlane.xlu0 %1046 }
 0x35f   : > { %7473 = vmatpush1.bf16.xpose.msk.msra.mxu0 %vm7472_vm3, %v17515_v40  ;;  %1530 = vmax.xlane.f32.xlu0 %v1529_v45  ;;  %vm1123_vm10 = vcmp.eq.f32.partialorder %v9477_v10, %v1047_v21  ;;  %vm1124_vm1 = vcmp.eq.f32.partialorder %v9479_v24, %v1047_v21  ;;  %v18162_v45 = vld [vmem:[#allocation24_spill] sm:$0xff] }
 0x360   : > { %1527 = vmax.xlane.f32.xlu1 %v1526_v47  ;;  %v10112_v47 = vsel %vm1123_vm10, -3e+38, %v18162_v45 }
 0x361   : > { %18163 = vst [vmem:[#allocation24_spill] sm:$0xff] %v10112_v47 }
 0x362   : > { %v1050_v51 = vpop.xlane.xlu1 %1049 }
 0x363   : > { %vm1125_vm8 = vcmp.eq.f32.partialorder %v9477_v10, %v1050_v51  ;;  %vm1126_vm11 = vcmp.eq.f32.partialorder %v9479_v24, %v1050_v51  ;;  %1536 = vmax.xlane.f32.xlu0 %v1535_v56  ;;  %v18164_v56 = vld [vmem:[#allocation25_spill] sm:$0xff] }
 0x364   : > { %vm7476_vm12 = vmpackc.low %vm1125_vm8, %vm1123_vm10  ;;  %1533 = vmax.xlane.f32.xlu1 %v1532_v23  ;;  %v10117_v23 = vsel %vm1124_vm1, -3e+38, %v18164_v56  ;;  %v10136_v45 = vsel %vm1125_vm8, -3e+38, %v18170_v44  ;;  %v18172_v56 = vld [vmem:[#allocation27_spill] sm:$0xff] }
 0x365   : > { %vm7474_vm4 = vmpackc.low %vm1126_vm11, %vm1124_vm1  ;;  %18165 = vst [vmem:[#allocation25_spill] sm:$0xff] %v10117_v23  ;;  %v1553_v33 = vmax.f32 %v10112_v47, %v10117_v23 }
 0x366   : > { %7475 = vmatprep.subr.msk.bf16.mxu0 %vm7474_vm4, %v17515_v40  ;;  %18171 = vst [vmem:[#allocation26_spill] sm:$0xff] %v10136_v45 }
 0x367   : > { %7477 = vmatpush1.bf16.xpose.msk.msra.mxu0 %vm7476_vm12, %v17515_v40  ;;  %1542 = vmax.xlane.f32.xlu0 %v1541_v59  ;;  %v10122_v59 = vsel %vm1121_vm15, -3e+38, %v18166_v14  ;;  %v10141_v14 = vsel %vm1126_vm11, -3e+38, %v18172_v56 }
 0x368   : > { %1539 = vmax.xlane.f32.xlu1 %v1538_v62  ;;  %18167 = vst [vmem:[#allocation22_spill] sm:$0xff] %v10122_v59  ;;  %v18168_v62 = vld [vmem:[#allocation23_spill] sm:$0xff]  ;;  %18173 = vst [vmem:[#allocation27_spill] sm:$0xff] %v10141_v14  ;;  %v1556_v11 = vmax.f32 %v10136_v45, %v10141_v14  ;;  %v18174_v45 = vmov 1.0|1.0  }
 0x369   : > { %v10127_v13 = vsel %vm1122_vm7, -3e+38, %v18168_v62 }
 0x36a   : > { %18169 = vst [vmem:[#allocation23_spill] sm:$0xff] %v10127_v13  ;;  %v1550_v21 = vmax.f32 %v10122_v59, %v10127_v13 }
 0x36b   : > { %1548 = vmax.xlane.f32.xlu0 %v1547_v19 }
 0x36c   : > { %1545 = vmax.xlane.f32.xlu1 %v1544_v20 }
 0x36f   : > { %1554 = vmax.xlane.f32.xlu0 %v1553_v33 }
 0x370   : > { %1551 = vmax.xlane.f32.xlu1 %v1550_v21 }
 0x374   : > { %1557 = vmax.xlane.f32.xlu1 %v1556_v11 }
 0x3ac   : > { %v10145_v19 = vpop.xlane.xlu0 %1052 }
 0x3ad   : > { %vm1127_vm14 = vcmp.eq.f32.partialorder %v9477_v10, %v10145_v19  ;;  %vm1128_vm13 = vcmp.eq.f32.partialorder %v9479_v24, %v10145_v19 }
 0x3ae   : > { %v10307_v35 = vsel %vm1128_vm13, -3e+38, %v18177_v22 }
 0x3af   : > { %18178 = vst [vmem:[#allocation29_spill] sm:$0xff] %v10307_v35 }
 0x3b0   : > { %v10147_v20 = vpop.xlane.xlu1 %1055 }
 0x3b1   : > { %vm1129_vm9 = vcmp.eq.f32.partialorder %v9477_v10, %v10147_v20  ;;  %vm1130_vm5 = vcmp.eq.f32.partialorder %v9479_v24, %v10147_v20 }
 0x3b2   : > { %vm7480_vm15 = vmpackc.low %vm1129_vm9, %vm1127_vm14 }
 0x3b3   : > { %vm7478_vm7 = vmpackc.low %vm1130_vm5, %vm1128_vm13 }
 0x3b4   : > { %7479 = vmatprep.subr.msk.bf16.mxu0 %vm7478_vm7, %v17515_v40  ;;  %v10171_v51 = vpop.xlane.xlu0 %1058 }
 0x3b5   : > { %7481 = vmatpush1.bf16.xpose.msk.msra.mxu0 %vm7480_vm15, %v17515_v40  ;;  %vm1131_vm2 = vcmp.eq.f32.partialorder %v9477_v10, %v10171_v51  ;;  %vm1132_vm10 = vcmp.eq.f32.partialorder %v9479_v24, %v10171_v51 }
 0x3b8   : > { %v10173_v62 = vpop.xlane.xlu1 %1061 }
 0x3b9   : > { %vm1133_vm0 = vcmp.eq.f32.partialorder %v9477_v10, %v10173_v62  ;;  %vm1134_vm3 = vcmp.eq.f32.partialorder %v9479_v24, %v10173_v62 }
 0x3ba   : > { %vm7484_vm8 = vmpackc.low %vm1133_vm0, %vm1131_vm2 }
 0x3bb   : > { %vm7482_vm11 = vmpackc.low %vm1134_vm3, %vm1132_vm10 }
 0x3bc   : > { %7483 = vmatprep.subr.msk.bf16.mxu0 %vm7482_vm11, %v17515_v40  ;;  %v10197_v33 = vpop.xlane.xlu0 %1064 }
 0x3bd   : > { %7485 = vmatpush1.bf16.xpose.msk.msra.mxu0 %vm7484_vm8, %v17515_v40  ;;  %vm17522_vm1 = vcmp.eq.f32.partialorder %v9477_v10, %v10197_v33  ;;  %vm17511_vm6 = vcmp.eq.f32.partialorder %v9479_v24, %v10197_v33 }
 0x3c0   : > { %v10199_v21 = vpop.xlane.xlu1 %1067 }
 0x3c1   : > { %vm17507_vm12 = vcmp.eq.f32.partialorder %v9477_v10, %v10199_v21  ;;  %vm17508_vm4 = vcmp.eq.f32.partialorder %v9479_v24, %v10199_v21 }
 0x3c2   : > { %vm7488_vm15 = vmpackc.low %vm17507_vm12, %vm17522_vm1 }
 0x3c3   : > { %vm7486_vm7 = vmpackc.low %vm17508_vm4, %vm17511_vm6 }
 0x3c4   : > { %7487 = vmatprep.subr.msk.bf16.mxu0 %vm7486_vm7, %v17515_v40  ;;  %v10223_v44 = vpop.xlane.xlu0 %1070 }
 0x3c5   : > { %7489 = vmatpush1.bf16.xpose.msk.msra.mxu0 %vm7488_vm15, %v17515_v40  ;;  %vm17513_vm8 = vcmp.eq.f32.partialorder %v9477_v10, %v10223_v44  ;;  %vm17521_vm4 = vcmp.eq.f32.partialorder %v9479_v24, %v10223_v44 }
 0x3c8   : > { %v10225_v56 = vpop.xlane.xlu1 %1073 }
 0x3c9   : > { %vm17512_vm11 = vcmp.eq.f32.partialorder %v9477_v10, %v10225_v56  ;;  %vm17514_vm12 = vcmp.eq.f32.partialorder %v9479_v24, %v10225_v56 }
 0x3ca   : > { %vm7492_vm15 = vmpackc.low %vm17512_vm11, %vm17513_vm8 }
 0x3cb   : > { %vm7490_vm7 = vmpackc.low %vm17514_vm12, %vm17521_vm4 }
 0x3cc   : > { %7491 = vmatprep.subr.msk.bf16.mxu0 %vm7490_vm7, %v17515_v40  ;;  %v10249_v11 = vpop.xlane.xlu0 %1076 }
 0x3cd   : > { %7493 = vmatpush1.bf16.xpose.msk.msra.mxu0 %vm7492_vm15, %v17515_v40  ;;  %vm1143_vm6 = vcmp.eq.f32.partialorder %v9477_v10, %v10249_v11  ;;  %vm17531_vm12 = vcmp.eq.f32.partialorder %v9479_v24, %v10249_v11 }
 0x3d0   : > { %v10251_v14 = vpop.xlane.xlu1 %1079 }
 0x3d1   : > { %vm17523_vm11 = vcmp.eq.f32.partialorder %v9477_v10, %v10251_v14  ;;  %vm17530_vm8 = vcmp.eq.f32.partialorder %v9479_v24, %v10251_v14 }
 0x3d2   : > { %vm7496_vm15 = vmpackc.low %vm17523_vm11, %vm1143_vm6 }
 0x3d3   : > { %vm7494_vm7 = vmpackc.low %vm17530_vm8, %vm17531_vm12 }
 0x3d4   : > { %v10273_v40 = vpop.xlane.xlu0 %1082  ;;  %7495 = vmatprep.subr.msk.bf16.mxu0 %vm7494_vm7, %v18174_v45 }
 0x3d5   : > { %7497 = vmatpush1.bf16.xpose.msk.msra.mxu0 %vm7496_vm15, %v18174_v45  ;;  %vm1147_vm4 = vcmp.eq.f32.partialorder %v9477_v10, %v10273_v40  ;;  %vm1148_vm7 = vcmp.eq.f32.partialorder %v9479_v24, %v10273_v40 }
 0x3d8   : > { %v1501_v13 = vpop.xlane.xlu0 %1500  ;;  %v10281_v59 = vpop.xlane.xlu1 %1085 }
 0x3d9   : > { %vm1595_vm1 = vcmp.ge.f32.partialorder %v9791_v57, %v1501_v13  ;;  %vm1596_vm11 = vcmp.ge.f32.partialorder %v9797_v4, %v1501_v13  ;;  %vm17538_vm8 = vcmp.eq.f32.partialorder %v9477_v10, %v10281_v59  ;;  %vm1150_vm15 = vcmp.eq.f32.partialorder %v9479_v24, %v10281_v59  ;;  %v18175_v4 = vld [vmem:[#allocation28_spill] sm:$0xff] }
 0x3da   : > { %v1659_v23 = vsel %vm1595_vm1, %v9477_v10, 256.0  ;;  %v1660_v47 = vsel %vm1596_vm11, %v9479_v24, 256.0  ;;  %vm7500_vm12 = vmpackc.low %vm17538_vm8, %vm1147_vm4  ;;  %v10301_v57 = vsel %vm1127_vm14, -3e+38, %v18175_v4 }
 0x3db   : > { %v1723_v13 = vmin.f32 %v1659_v23, %v1660_v47  ;;  %18176 = vst [vmem:[#allocation28_spill] sm:$0xff] %v10301_v57  ;;  %vm7498_vm1 = vmpackc.low %vm1150_vm15, %vm1148_vm7  ;;  %v1559_v19 = vmax.f32 %v10301_v57, %v10307_v35  ;;  %v18183_v35 = vld [vmem:[#allocation33_spill] sm:$0xff] }
 0x3dc   : > { %v1507_v47 = vpop.xlane.xlu0 %1506  ;;  %7499 = vmatprep.subr.msk.bf16.mxu0 %vm7498_vm1, %v18174_v45  ;;  %vm18187_vm1 = vcmp.eq.f32.partialorder %v9477_v10, %v10197_v33 }
 0x3dd   : > { %vm1599_vm11 = vcmp.ge.f32.partialorder %v9814_v7, %v1507_v47  ;;  %vm1600_vm14 = vcmp.ge.f32.partialorder %v9820_v28, %v1507_v47  ;;  %v1504_v4 = vpop.xlane.xlu1 %1503  ;;  %1724 = vmin.xlane.f32.xlu0 %v1723_v13  ;;  %7501 = vmatpush1.bf16.xpose.msk.msra.mxu0 %vm7500_vm12, %v18174_v45  ;;  %v18179_v28 = vld [vmem:[#allocation30_spill] sm:$0xff]  ;;  %v18181_v45 = vld [vmem:[#allocation31_spill] sm:$0xff] }
 0x3de   : > { %vm1597_vm13 = vcmp.ge.f32.partialorder %v9826_v3, %v1504_v4  ;;  %vm1598_vm8 = vcmp.ge.f32.partialorder %v9838_v25, %v1504_v4  ;;  %v1663_v2 = vsel %vm1599_vm11, %v9477_v10, 256.0  ;;  %v1664_v7 = vsel %vm1600_vm14, %v9479_v24, 256.0 }
 0x3df   : > { %v1661_v22 = vsel %vm1597_vm13, %v9477_v10, 256.0  ;;  %v1662_v23 = vsel %vm1598_vm8, %v9479_v24, 256.0  ;;  %v10331_v13 = vsel %vm1129_vm9, -3e+38, %v18179_v28  ;;  %v10337_v4 = vsel %vm1130_vm5, -3e+38, %v18181_v45 }
 0x3e0   : > { %v1726_v47 = vmin.f32 %v1661_v22, %v1662_v23  ;;  %18180 = vst [vmem:[#allocation30_spill] sm:$0xff] %v10331_v13  ;;  %v1513_v3 = vpop.xlane.xlu0 %1512  ;;  %v1729_v22 = vmin.f32 %v1663_v2, %v1664_v7  ;;  %v18182_v23 = vld [vmem:[#allocation32_spill] sm:$0xff]  ;;  %v10351_v45 = vsel %vm1132_vm10, -3e+38, %v18183_v35  ;;  %v1562_v20 = vmax.f32 %v10331_v13, %v10337_v4 }
 0x3e1   : > { %v1510_v25 = vpop.xlane.xlu1 %1509  ;;  %1560 = vmax.xlane.f32.xlu0 %v1559_v19  ;;  %v10345_v28 = vsel %vm1131_vm2, -3e+38, %v18182_v23  ;;  %18184 = vst [vmem:[#allocation31_spill] sm:$0xff] %v10351_v45  ;;  %vm1603_vm9 = vcmp.ge.f32.partialorder %v9863_v26, %v1513_v3  ;;  %vm1604_vm5 = vcmp.ge.f32.partialorder %v9869_v18, %v1513_v3  ;;  %v10369_v3 = vsel %vm1133_vm0, -3e+38, %v9421_v36  ;;  %v18186_v23 = vld [vmem:[#allocation34_spill] sm:$0xff] }
 0x3e2   : > { %vm1601_vm12 = vcmp.ge.f32.partialorder %v9876_v8, %v1510_v25  ;;  %vm1602_vm8 = vcmp.ge.f32.partialorder %v9882_v31, %v1510_v25  ;;  %1727 = vmin.xlane.f32.xlu1 %v1726_v47  ;;  %v1565_v35 = vmax.f32 %v10345_v28, %v10351_v45  ;;  %v1667_v51 = vsel %vm1603_vm9, %v9477_v10, 256.0  ;;  %18185 = vst [vmem:[#allocation32_spill] sm:$0xff] %v10369_v3 }
 0x3e3   : > { %v1665_v7 = vsel %vm1601_vm12, %v9477_v10, 256.0  ;;  %v1666_v25 = vsel %vm1602_vm8, %v9479_v24, 256.0  ;;  %v1668_v19 = vsel %vm1604_vm5, %v9479_v24, 256.0  ;;  %v10383_v36 = vsel %vm18187_vm1, -3e+38, %v18186_v23 }
 0x3e4   : > { %1354 = vmatmul.mubr.bf16.vlgmr.msra.gmra.mrb[64].mxu0 %v10069_v61  ;;  %v1732_v47 = vmin.f32 %v1665_v7, %v1666_v25  ;;  %v1519_v61 = vpop.xlane.xlu0 %1518  ;;  %vm18189_vm0 = vcmp.eq.f32.partialorder %v9479_v24, %v10197_v33  ;;  %vm18191_vm14 = vcmp.eq.f32.partialorder %v9477_v10, %v10199_v21  ;;  %vm18193_vm13 = vcmp.eq.f32.partialorder %v9479_v24, %v10199_v21 }
 0x3e5   : > { %1730 = vmin.xlane.f32.xlu0 %v1729_v22  ;;  %2789 = vmatprep.mubr.bf16.mxu0 %v10051_v32  ;;  %v1516_v2 = vpop.xlane.xlu1 %1515  ;;  %v10375_v32 = vsel %vm1134_vm3, -3e+38, %v9425_v42  ;;  %v1735_v22 = vmin.f32 %v1667_v51, %v1668_v19  ;;  %vm1607_vm3 = vcmp.ge.f32.partialorder %v9894_v27, %v1519_v61  ;;  %vm1608_vm11 = vcmp.ge.f32.partialorder %v9900_v29, %v1519_v61 }
 0x3e6   : > { %1563 = vmax.xlane.f32.xlu1 %v1562_v20  ;;  %vm1605_vm2 = vcmp.ge.f32.partialorder %v9906_v5, %v1516_v2  ;;  %vm1606_vm10 = vcmp.ge.f32.partialorder %v9917_v37, %v1516_v2  ;;  %v18188_v20 = vld [vmem:[#allocation35_spill] sm:$0xff]  ;;  %v1568_v62 = vmax.f32 %v10369_v3, %v10375_v32  ;;  %v1671_v33 = vsel %vm1607_vm3, %v9477_v10, 256.0 }
 0x3e7   : > { %v10389_v42 = vsel %vm18189_vm0, -3e+38, %v18188_v20  ;;  %v1669_v7 = vsel %vm1605_vm2, %v9477_v10, 256.0  ;;  %v1670_v25 = vsel %vm1606_vm10, %v9479_v24, 256.0  ;;  %v1672_v51 = vsel %vm1608_vm11, %v9479_v24, 256.0  ;;  %v18194_v20 = vld [vmem:[#allocation36_spill] sm:$0xff] }
 0x3e8   : > { %18190 = vst [vmem:[#allocation33_spill] sm:$0xff] %v10389_v42  ;;  %v1525_v19 = vpop.xlane.xlu0 %1524  ;;  %v10405_v61 = vsel %vm18191_vm14, -3e+38, %v9433_v54  ;;  %v1741_v23 = vmin.f32 %v1671_v33, %v1672_v51  ;;  %vm18195_vm9 = vcmp.eq.f32.partialorder %v9477_v10, %v10223_v44  ;;  %v18196_v54 = vld [vmem:[#allocation37_spill] sm:$0xff]  ;;  %vm18197_vm5 = vcmp.eq.f32.partialorder %v9479_v24, %v10223_v44 }
 0x3e9   : > { %1566 = vmax.xlane.f32.xlu0 %v1565_v35  ;;  %v1522_v2 = vpop.xlane.xlu1 %1521  ;;  %v1571_v35 = vmax.f32 %v10383_v36, %v10389_v42  ;;  %18192 = vst [vmem:[#allocation34_spill] sm:$0xff] %v10405_v61  ;;  %v10425_v21 = vsel %vm18197_vm5, -3e+38, %v18196_v54  ;;  %vm1611_vm2 = vcmp.ge.f32.partialorder %v9939_v38, %v1525_v19  ;;  %vm1612_vm10 = vcmp.ge.f32.partialorder %v9945_v0, %v1525_v19 }
 0x3ea   : > { %1733 = vmin.xlane.f32.xlu1 %v1732_v47  ;;  %v1738_v47 = vmin.f32 %v1669_v7, %v1670_v25  ;;  %vm1609_vm12 = vcmp.ge.f32.partialorder %v9952_v1, %v1522_v2  ;;  %vm1610_vm8 = vcmp.ge.f32.partialorder %v9958_v43, %v1522_v2  ;;  %18198 = vst [vmem:[#allocation35_spill] sm:$0xff] %v10425_v21  ;;  %v1675_v33 = vsel %vm1611_vm2, %v9477_v10, 256.0 }
 0x3eb   : > { %v1673_v7 = vsel %vm1609_vm12, %v9477_v10, 256.0  ;;  %v1674_v25 = vsel %vm1610_vm8, %v9479_v24, 256.0  ;;  %v1676_v51 = vsel %vm1612_vm10, %v9479_v24, 256.0  ;;  %vm18199_vm1 = vcmp.eq.f32.partialorder %v9477_v10, %v10225_v56 }
 0x3ec   : > { %v10441_v19 = vsel %vm18199_vm1, -3e+38, %v9445_v9  ;;  %vm18201_vm0 = vcmp.eq.f32.partialorder %v9479_v24, %v10225_v56  ;;  %v1747_v54 = vmin.f32 %v1675_v33, %v1676_v51  ;;  %vm18204_vm14 = vcmp.eq.f32.partialorder %v9479_v24, %v10249_v11 }
 0x3ed   : > { %1736 = vmin.xlane.f32.xlu0 %v1735_v22  ;;  %v10411_v22 = vsel %vm18193_vm13, -3e+38, %v9437_v60  ;;  %v1528_v2 = vpop.xlane.xlu1 %1527  ;;  %18200 = vst [vmem:[#allocation36_spill] sm:$0xff] %v10441_v19  ;;  %vm18208_vm8 = vcmp.eq.f32.partialorder %v9479_v24, %v10251_v14 }
 0x3ee   : > { %1569 = vmax.xlane.f32.xlu1 %v1568_v62  ;;  %v10419_v62 = vsel %vm18195_vm9, -3e+38, %v18194_v20  ;;  %v1574_v60 = vmax.f32 %v10405_v61, %v10411_v22  ;;  %vm1613_vm3 = vcmp.ge.f32.partialorder %v9980_v63, %v1528_v2  ;;  %vm1614_vm11 = vcmp.ge.f32.partialorder %v9989_v49, %v1528_v2 }
 0x3ef   : > { %v1577_v44 = vmax.f32 %v10419_v62, %v10425_v21  ;;  %v1677_v2 = vsel %vm1613_vm3, %v9477_v10, 256.0 }
 0x3f1   : > { %1572 = vmax.xlane.f32.xlu0 %v1571_v35  ;;  %v1531_v35 = vpop.xlane.xlu0 %1530  ;;  %v1534_v20 = vpop.xlane.xlu1 %1533 }
 0x3f2   : > { %1739 = vmin.xlane.f32.xlu1 %v1738_v47  ;;  %v1744_v47 = vmin.f32 %v1673_v7, %v1674_v25  ;;  %v18203_v7 = vld [vmem:[#allocation39_spill] sm:$0xff]  ;;  %vm1615_vm13 = vcmp.ge.f32.partialorder %v9968_v39, %v1531_v35  ;;  %vm1616_vm12 = vcmp.ge.f32.partialorder %v9974_v41, %v1531_v35  ;;  %v10483_v35 = vsel %vm18208_vm8, -3e+38, %v9461_v30 }
 0x3f3   : > { %v1679_v11 = vsel %vm1615_vm13, %v9477_v10, 256.0  ;;  %v1680_v51 = vsel %vm1616_vm12, %v9479_v24, 256.0  ;;  %vm1617_vm9 = vcmp.ge.f32.partialorder %v10022_v48, %v1534_v20  ;;  %vm1618_vm5 = vcmp.ge.f32.partialorder %v10028_v55, %v1534_v20 }
 0x3f4   : > { %v1681_v20 = vsel %vm1617_vm9, %v9477_v10, 256.0 }
 0x3f5   : > { %1742 = vmin.xlane.f32.xlu0 %v1741_v23  ;;  %v10447_v23 = vsel %vm18201_vm0, -3e+38, %v9449_v15  ;;  %v10461_v15 = vsel %vm18204_vm14, -3e+38, %v18203_v7  ;;  %v1537_v56 = vpop.xlane.xlu0 %1536 }
 0x3f6   : > { %1575 = vmax.xlane.f32.xlu1 %v1574_v60  ;;  %v18202_v60 = vld [vmem:[#allocation38_spill] sm:$0xff]  ;;  %18205 = vst [vmem:[#allocation37_spill] sm:$0xff] %v10461_v15  ;;  %v1580_v25 = vmax.f32 %v10441_v19, %v10447_v23  ;;  %vm1619_vm2 = vcmp.ge.f32.partialorder %v10009_v50, %v1537_v56  ;;  %vm1620_vm10 = vcmp.ge.f32.partialorder %v10015_v52, %v1537_v56 }
 0x3f7   : > { %v10455_v9 = vsel %vm1143_vm6, -3e+38, %v18202_v60  ;;  %vm18206_vm6 = vcmp.eq.f32.partialorder %v9477_v10, %v10251_v14  ;;  %v1683_v40 = vsel %vm1619_vm2, %v9477_v10, 256.0 }
 0x3f8   : > { %v1583_v33 = vmax.f32 %v10455_v9, %v10461_v15  ;;  %v10477_v60 = vsel %vm18206_vm6, -3e+38, %v9457_v34 }
 0x3f9   : > { %1578 = vmax.xlane.f32.xlu0 %v1577_v44  ;;  %v1678_v44 = vsel %vm1614_vm11, %v9479_v24, 256.0  ;;  %18207 = vst [vmem:[#allocation38_spill] sm:$0xff] %v10477_v60  ;;  %v1543_v7 = vpop.xlane.xlu0 %1542  ;;  %v1586_v14 = vmax.f32 %v10477_v60, %v10483_v35 }
 0x3fa   : > { %1745 = vmin.xlane.f32.xlu1 %v1744_v47  ;;  %v1750_v47 = vmin.f32 %v1677_v2, %v1678_v44  ;;  %v18209_v2 = vld [vmem:[#allocation40_spill] sm:$0xff]  ;;  %v18210_v44 = vld [vmem:[#allocation41_spill] sm:$0xff]  ;;  %vm1624_vm1 = vcmp.ge.f32.partialorder %v10048_v6, %v1543_v7 }
 0x3fb   : > { %v10491_v34 = vsel %vm1147_vm4, -3e+38, %v18209_v2  ;;  %v10497_v30 = vsel %vm1148_vm7, -3e+38, %v18210_v44  ;;  %vm18212_vm4 = vcmp.eq.f32.partialorder %v9477_v10, %v10281_v59  ;;  %vm1623_vm7 = vcmp.ge.f32.partialorder %v10043_v53, %v1543_v7  ;;  %v18215_v7 = vld [vmem:[#allocation21_spill] sm:$0xff] }
 0x3fc   : > { %18211 = vst [vmem:[#allocation39_spill] sm:$0xff] %v10497_v30  ;;  %v10513_v56 = vsel %vm18212_vm4, -3e+38, %v9469_v17  ;;  %v1687_v17 = vsel %vm1623_vm7, %v9477_v10, 256.0 }
 0x3fd   : > { %1748 = vmin.xlane.f32.xlu0 %v1747_v54  ;;  %v1540_v54 = vpop.xlane.xlu1 %1539  ;;  %v1549_v2 = vpop.xlane.xlu0 %1548  ;;  %18213 = vst [vmem:[#allocation40_spill] sm:$0xff] %v10513_v56 }
 0x3fe   : > { %1581 = vmax.xlane.f32.xlu1 %v1580_v25  ;;  %v1753_v25 = vmin.f32 %v1679_v11, %v1680_v51  ;;  %v1589_v51 = vmax.f32 %v10491_v34, %v10497_v30  ;;  %vm1621_vm0 = vcmp.ge.f32.partialorder %v10036_v46, %v1540_v54  ;;  %vm1622_vm3 = vcmp.ge.f32.partialorder %v10060_v58, %v1540_v54  ;;  %v18216_v54 = vld [vmem:[#allocation18_spill] sm:$0xff] }
 0x3ff   : > { %vm1628_vm11 = vcmp.ge.f32.partialorder %v18215_v7, %v1549_v2 }
 0x400   : > { %v1692_v46 = vsel %vm1628_vm11, %v9479_v24, 256.0 }
 0x401   : > { %1584 = vmax.xlane.f32.xlu0 %v1583_v33  ;;  %v1682_v33 = vsel %vm1618_vm5, %v9479_v24, 256.0  ;;  %v1546_v11 = vpop.xlane.xlu1 %1545 }
 0x402   : > { %1751 = vmin.xlane.f32.xlu1 %v1750_v47  ;;  %v1684_v47 = vsel %vm1620_vm10, %v9479_v24, 256.0  ;;  %v1756_v44 = vmin.f32 %v1681_v20, %v1682_v33  ;;  %v1688_v20 = vsel %vm1624_vm1, %v9479_v24, 256.0  ;;  %v1686_v33 = vsel %vm1622_vm3, %v9479_v24, 256.0 }
 0x403   : > { %vm1625_vm14 = vcmp.ge.f32.partialorder %v18216_v54, %v1546_v11  ;;  %vm18224_vm10 = vcmask 130048  }
 0x404   : > { %v1689_v53 = vsel %vm1625_vm14, %v9477_v10, 256.0  ;;  %vm18226_vm4 = vmmov %vm18224_vm10 }
 0x405   : > { %1754 = vmin.xlane.f32.xlu0 %v1753_v25  ;;  %v10519_v25 = vsel %vm1150_vm15, -3e+38, %v9473_v16  ;;  %v1685_v16 = vsel %vm1621_vm0, %v9477_v10, 256.0  ;;  %vm1627_vm15 = vcmp.ge.f32.partialorder %v10084_v12, %v1549_v2  ;;  %v18219_v2 = vld [vmem:[#allocation25_spill] sm:$0xff] }
 0x406   : > { %1587 = vmax.xlane.f32.xlu1 %v1586_v14  ;;  %18214 = vst [vmem:[#allocation41_spill] sm:$0xff] %v10519_v25  ;;  %v1759_v14 = vmin.f32 %v1683_v40, %v1684_v47  ;;  %v1592_v59 = vmax.f32 %v10513_v56, %v10519_v25  ;;  %v18217_v40 = vld [vmem:[#allocation19_spill] sm:$0xff]  ;;  %v1555_v47 = vpop.xlane.xlu0 %1554  ;;  %v1691_v58 = vsel %vm1627_vm15, %v9477_v10, 256.0  ;;  %v1762_v6 = vmin.f32 %v1685_v16, %v1686_v33  ;;  %v18218_v25 = vld [vmem:[#allocation24_spill] sm:$0xff] }
 0x407   : > { %vm1626_vm13 = vcmp.ge.f32.partialorder %v18217_v40, %v1546_v11  ;;  %vm1631_vm12 = vcmp.ge.f32.partialorder %v18218_v25, %v1555_v47  ;;  %vm1632_vm6 = vcmp.ge.f32.partialorder %v18219_v2, %v1555_v47  ;;  %v18221_v11 = vld [vmem:[#allocation23_spill] sm:$0xff]  ;;  %v18222_v25 = vld [vmem:[#allocation26_spill] sm:$0xff] }
 0x408   : > { %v1690_v12 = vsel %vm1626_vm13, %v9479_v24, 256.0  ;;  %v1696_v16 = vsel %vm1632_vm6, %v9479_v24, 256.0  ;;  %v18223_v47 = vld [vmem:[#allocation27_spill] sm:$0xff] }
 0x409   : > { %1590 = vmax.xlane.f32.xlu0 %v1589_v51  ;;  %v1552_v51 = vpop.xlane.xlu1 %1551  ;;  %v1768_v33 = vmin.f32 %v1689_v53, %v1690_v12  ;;  %v8668_v53 = vld [vmem:[#allocation7] sm:$0xff]   ;;  %v18225_v12 = vmov 0  }
 0x40a   : > { %1757 = vmin.xlane.f32.xlu1 %v1756_v44  ;;  %v1765_v44 = vmin.f32 %v1687_v17, %v1688_v20  ;;  %vm1630_vm9 = vcmp.ge.f32.partialorder %v18221_v11, %v1552_v51  ;;  %v1771_v20 = vmin.f32 %v1691_v58, %v1692_v46  ;;  %7370 = vmatmul.mubr.msk.bf16.vlgmr.msra.gmra.mrb[0].mxu1 %vm18224_vm10, %v8668_v53 }
 0x40b   : > { %v1694_v54 = vsel %vm1630_vm9, %v9479_v24, 256.0  ;;  %750 = vmatprep.mubr.bf16.mxu1 %v18225_v12 }
 0x40d   : > { %1760 = vmin.xlane.f32.xlu0 %v1759_v14  ;;  %v18220_v14 = vld [vmem:[#allocation22_spill] sm:$0xff]  ;;  %v1558_v17 = vpop.xlane.xlu1 %1557 }
 0x40e   : > { %1593 = vmax.xlane.f32.xlu1 %v1592_v59  ;;  %vm1629_vm8 = vcmp.ge.f32.partialorder %v18220_v14, %v1552_v51  ;;  %v1695_v59 = vsel %vm1631_vm12, %v9477_v10, 256.0  ;;  %vm1633_vm5 = vcmp.ge.f32.partialorder %v18222_v25, %v1558_v17  ;;  %vm1634_vm2 = vcmp.ge.f32.partialorder %v18223_v47, %v1558_v17 }
 0x40f   : > { %v1693_v40 = vsel %vm1629_vm8, %v9477_v10, 256.0  ;;  %v1698_v46 = vsel %vm1634_vm2, %v9479_v24, 256.0 }
 0x410   : > { %v1774_v51 = vmin.f32 %v1693_v40, %v1694_v54  ;;  %v18227_v54 = vld [vmem:[#allocation20_spill] sm:$0xff] }
 0x411   : > { %1766 = vmin.xlane.f32.xlu0 %v1765_v44  ;;  %v1777_v44 = vmin.f32 %v1695_v59, %v1696_v16  ;;  %v18228_v59 = vld [vmem:[#allocation42_spill] sm:$0xff] }
 0x412   : > { %1763 = vmin.xlane.f32.xlu1 %v1762_v6  ;;  %v1697_v6 = vsel %vm1633_vm5, %v9477_v10, 256.0 }
 0x413   : > { %v1780_v58 = vmin.f32 %v1697_v6, %v1698_v46 }
 0x415   : > { %1772 = vmin.xlane.f32.xlu0 %v1771_v20  ;;  %v8669_v20 = vld [vmem:[#allocation7 + $0x8] sm:$0xff]  }
 0x416   : > { %1769 = vmin.xlane.f32.xlu1 %v1768_v33  ;;  %7371 = vmatmul.mubr.msk.bf16.gmra.mrb[4].mxu1 %vm18226_vm4, %v8669_v20  ;;  %v18233_v20 = vld [vmem:[#allocation45_spill] sm:$0xff] }
 0x417   : > { %1414 = vmatprep.mubr.bf16.mxu1 %v18225_v12 }
 0x419   : > { %1778 = vmin.xlane.f32.xlu0 %v1777_v44 }
 0x41a   : > { %1775 = vmin.xlane.f32.xlu1 %v1774_v51  ;;  %v18230_v51 = vld [vmem:[#allocation29_spill] sm:$0xff] }
 0x41e   : > { %1781 = vmin.xlane.f32.xlu1 %v1780_v58 }
 0x46a   : > { %v1725_v17 = vpop.xlane.xlu0 %1724 }
 0x46b   : > { %vm1819_vm7 = vcmp.eq.f32.partialorder %v9477_v10, %v1725_v17  ;;  %vm1820_vm1 = vcmp.eq.f32.partialorder %v9479_v24, %v1725_v17 }
 0x46c   : > { %v10558_v40 = vsel %vm1819_vm7, -3e+38, %v18227_v54  ;;  %v10563_v16 = vsel %vm1820_vm1, -3e+38, %v18228_v59  ;;  %v18235_v59 = vld [vmem:[#allocation46_spill] sm:$0xff] }
 0x46d   : > { %18229 = vst [vmem:[#allocation21_spill] sm:$0xff] %v10563_v16  ;;  %v2213_v33 = vmax.f32 %v10558_v40, %v10563_v16 }
 0x46e   : > { %v1561_v44 = vpop.xlane.xlu0 %1560 }
 0x46f   : > { %vm1635_vm0 = vcmp.ge.f32.partialorder %v10301_v57, %v1561_v44  ;;  %vm1636_vm3 = vcmp.ge.f32.partialorder %v18230_v51, %v1561_v44  ;;  %v1728_v6 = vpop.xlane.xlu1 %1727  ;;  %2214 = vmax.xlane.f32.xlu0 %v2213_v33 }
 0x470   : > { %v1699_v46 = vsel %vm1635_vm0, %v9477_v10, 256.0  ;;  %v1700_v58 = vsel %vm1636_vm3, %v9479_v24, 256.0  ;;  %vm1821_vm15 = vcmp.eq.f32.partialorder %v9477_v10, %v1728_v6  ;;  %vm1822_vm11 = vcmp.eq.f32.partialorder %v9479_v24, %v1728_v6 }
 0x471   : > { %vm10573_vm14 = vmpackc.low %vm1821_vm15, %vm1819_vm7  ;;  %v10578_v54 = vsel %vm1821_vm15, -3e+38, %v18233_v20  ;;  %v10581_v57 = vsel %vm1822_vm11, -3e+38, %v18235_v59  ;;  %v1783_v44 = vmin.f32 %v1699_v46, %v1700_v58  ;;  %v18239_v20 = vld [vmem:[#allocation43_spill] sm:$0xff]  ;;  %v18240_v58 = vld [vmem:[#allocation44_spill] sm:$0xff] }
 0x472   : > { %18234 = vst [vmem:[#allocation25_spill] sm:$0xff] %v10578_v54  ;;  %18236 = vst [vmem:[#allocation22_spill] sm:$0xff] %v10581_v57  ;;  %v1731_v33 = vpop.xlane.xlu0 %1730  ;;  %v2216_v51 = vmax.f32 %v10578_v54, %v10581_v57 }
 0x473   : > { %vm10587_vm13 = vmpackc.low %vm1822_vm11, %vm1820_vm1  ;;  %vm1823_vm12 = vcmp.eq.f32.partialorder %v9477_v10, %v1731_v33  ;;  %vm1824_vm6 = vcmp.eq.f32.partialorder %v9479_v24, %v1731_v33  ;;  %v1564_v6 = vpop.xlane.xlu1 %1563  ;;  %1784 = vmin.xlane.f32.xlu0 %v1783_v44 }
 0x474   : > { %v10596_v46 = vsel %vm1823_vm12, -3e+38, %v18239_v20  ;;  %v10601_v59 = vsel %vm1824_vm6, -3e+38, %v18240_v58  ;;  %vm1637_vm8 = vcmp.ge.f32.partialorder %v10331_v13, %v1564_v6  ;;  %vm1638_vm9 = vcmp.ge.f32.partialorder %v10337_v4, %v1564_v6  ;;  %2217 = vmax.xlane.f32.xlu1 %v2216_v51  ;;  %v18326_v16 = vld [vmem:[#allocation21_spill] sm:$0xff] }
 0x475   : > { %v1701_v17 = vsel %vm1637_vm8, %v9477_v10, 256.0  ;;  %v1702_v57 = vsel %vm1638_vm9, %v9479_v24, 256.0  ;;  %v2219_v44 = vmax.f32 %v10596_v46, %v10601_v59 }
 0x476   : > { %v1567_v54 = vpop.xlane.xlu0 %1566  ;;  %v1786_v20 = vmin.f32 %v1701_v17, %v1702_v57 }
 0x477   : > { %vm1639_vm5 = vcmp.ge.f32.partialorder %v10345_v28, %v1567_v54  ;;  %vm1640_vm2 = vcmp.ge.f32.partialorder %v10351_v45, %v1567_v54  ;;  %v1734_v58 = vpop.xlane.xlu1 %1733  ;;  %2220 = vmax.xlane.f32.xlu0 %v2219_v44 }
 0x478   : > { %v1703_v13 = vsel %vm1639_vm5, %v9477_v10, 256.0  ;;  %v1704_v6 = vsel %vm1640_vm2, %v9479_v24, 256.0  ;;  %vm1825_vm10 = vcmp.eq.f32.partialorder %v9477_v10, %v1734_v58  ;;  %vm1826_vm4 = vcmp.eq.f32.partialorder %v9479_v24, %v1734_v58  ;;  %1787 = vmin.xlane.f32.xlu1 %v1786_v20 }
 0x479   : > { %vm10617_vm7 = vmpackc.low %vm1825_vm10, %vm1823_vm12  ;;  %v10622_v57 = vsel %vm1825_vm10, -3e+38, %v9876_v8  ;;  %v10625_v54 = vsel %vm1826_vm4, -3e+38, %v9882_v31  ;;  %v1789_v17 = vmin.f32 %v1703_v13, %v1704_v6 }
 0x47a   : > { %v1737_v44 = vpop.xlane.xlu0 %1736  ;;  %v2222_v45 = vmax.f32 %v10622_v57, %v10625_v54  ;;  %vm10631_vm1 = vmpackc.low %vm1826_vm4, %vm1824_vm6 }
 0x47b   : > { %vm1827_vm0 = vcmp.eq.f32.partialorder %v9477_v10, %v1737_v44  ;;  %vm1828_vm3 = vcmp.eq.f32.partialorder %v9479_v24, %v1737_v44  ;;  %v1570_v8 = vpop.xlane.xlu1 %1569  ;;  %1790 = vmin.xlane.f32.xlu0 %v1789_v17 }
 0x47c   : > { %v10640_v31 = vsel %vm1827_vm0, -3e+38, %v9863_v26  ;;  %v10645_v13 = vsel %vm1828_vm3, -3e+38, %v9869_v18  ;;  %vm1641_vm15 = vcmp.ge.f32.partialorder %v10369_v3, %v1570_v8  ;;  %vm1642_vm11 = vcmp.ge.f32.partialorder %v10375_v32, %v1570_v8  ;;  %2223 = vmax.xlane.f32.xlu1 %v2222_v45 }
 0x47d   : > { %v1705_v33 = vsel %vm1641_vm15, %v9477_v10, 256.0  ;;  %v1706_v58 = vsel %vm1642_vm11, %v9479_v24, 256.0  ;;  %v2225_v6 = vmax.f32 %v10640_v31, %v10645_v13 }
 0x47e   : > { %v1573_v17 = vpop.xlane.xlu0 %1572  ;;  %v1792_v26 = vmin.f32 %v1705_v33, %v1706_v58 }
 0x47f   : > { %vm1643_vm12 = vcmp.ge.f32.partialorder %v10383_v36, %v1573_v17  ;;  %vm1644_vm6 = vcmp.ge.f32.partialorder %v10389_v42, %v1573_v17  ;;  %v1740_v18 = vpop.xlane.xlu1 %1739  ;;  %2226 = vmax.xlane.f32.xlu0 %v2225_v6 }
 0x480   : > { %v1707_v3 = vsel %vm1643_vm12, %v9477_v10, 256.0  ;;  %v1708_v8 = vsel %vm1644_vm6, %v9479_v24, 256.0  ;;  %vm1829_vm8 = vcmp.eq.f32.partialorder %v9477_v10, %v1740_v18  ;;  %vm1830_vm9 = vcmp.eq.f32.partialorder %v9479_v24, %v1740_v18  ;;  %1793 = vmin.xlane.f32.xlu1 %v1792_v26 }
 0x481   : > { %vm10661_vm5 = vmpackc.low %vm1829_vm8, %vm1827_vm0  ;;  %v10666_v33 = vsel %vm1829_vm8, -3e+38, %v9906_v5  ;;  %v10669_v58 = vsel %vm1830_vm9, -3e+38, %v9917_v37  ;;  %v1795_v6 = vmin.f32 %v1707_v3, %v1708_v8 }
 0x482   : > { %v1743_v17 = vpop.xlane.xlu0 %1742  ;;  %v2228_v42 = vmax.f32 %v10666_v33, %v10669_v58  ;;  %vm10675_vm2 = vmpackc.low %vm1830_vm9, %vm1828_vm3 }
 0x483   : > { %vm1831_vm10 = vcmp.eq.f32.partialorder %v9477_v10, %v1743_v17  ;;  %vm1832_vm4 = vcmp.eq.f32.partialorder %v9479_v24, %v1743_v17  ;;  %v1576_v5 = vpop.xlane.xlu1 %1575  ;;  %1796 = vmin.xlane.f32.xlu0 %v1795_v6 }
 0x484   : > { %v10684_v37 = vsel %vm1831_vm10, -3e+38, %v9894_v27  ;;  %v10689_v3 = vsel %vm1832_vm4, -3e+38, %v9900_v29  ;;  %vm1645_vm0 = vcmp.ge.f32.partialorder %v10405_v61, %v1576_v5  ;;  %vm1646_vm3 = vcmp.ge.f32.partialorder %v10411_v22, %v1576_v5  ;;  %2229 = vmax.xlane.f32.xlu1 %v2228_v42  ;;  %v18328_v42 = vld [vmem:[#allocation28_spill] sm:$0xff] }
 0x485   : > { %v1709_v44 = vsel %vm1645_vm0, %v9477_v10, 256.0  ;;  %v1710_v18 = vsel %vm1646_vm3, %v9479_v24, 256.0  ;;  %v2231_v8 = vmax.f32 %v10684_v37, %v10689_v3 }
 0x486   : > { %v1579_v6 = vpop.xlane.xlu0 %1578  ;;  %v1798_v27 = vmin.f32 %v1709_v44, %v1710_v18 }
 0x487   : > { %vm1647_vm15 = vcmp.ge.f32.partialorder %v10419_v62, %v1579_v6  ;;  %vm1648_vm11 = vcmp.ge.f32.partialorder %v10425_v21, %v1579_v6  ;;  %v1746_v29 = vpop.xlane.xlu1 %1745  ;;  %2232 = vmax.xlane.f32.xlu0 %v2231_v8 }
 0x488   : > { %v1711_v61 = vsel %vm1647_vm15, %v9477_v10, 256.0  ;;  %v1712_v5 = vsel %vm1648_vm11, %v9479_v24, 256.0  ;;  %vm1833_vm12 = vcmp.eq.f32.partialorder %v9477_v10, %v1746_v29  ;;  %vm1834_vm6 = vcmp.eq.f32.partialorder %v9479_v24, %v1746_v29  ;;  %1799 = vmin.xlane.f32.xlu1 %v1798_v27 }
 0x489   : > { %vm10705_vm8 = vmpackc.low %vm1833_vm12, %vm1831_vm10  ;;  %v10710_v44 = vsel %vm1833_vm12, -3e+38, %v9952_v1  ;;  %v10713_v18 = vsel %vm1834_vm6, -3e+38, %v9958_v43  ;;  %v1801_v8 = vmin.f32 %v1711_v61, %v1712_v5 }
 0x48a   : > { %18251 = vst [vmem:[#allocation23_spill] sm:$0xff] %v10710_v44  ;;  %18252 = vst [vmem:[#allocation26_spill] sm:$0xff] %v10713_v18  ;;  %v1749_v6 = vpop.xlane.xlu0 %1748  ;;  %v2234_v21 = vmax.f32 %v10710_v44, %v10713_v18 }
 0x48b   : > { %vm10719_vm9 = vmpackc.low %vm1834_vm6, %vm1832_vm4  ;;  %vm1835_vm10 = vcmp.eq.f32.partialorder %v9477_v10, %v1749_v6  ;;  %vm1836_vm0 = vcmp.eq.f32.partialorder %v9479_v24, %v1749_v6  ;;  %v1582_v1 = vpop.xlane.xlu1 %1581  ;;  %1802 = vmin.xlane.f32.xlu0 %v1801_v8 }
 0x48c   : > { %v10728_v43 = vsel %vm1835_vm10, -3e+38, %v9939_v38  ;;  %v10733_v61 = vsel %vm1836_vm0, -3e+38, %v9945_v0  ;;  %vm1649_vm4 = vcmp.ge.f32.partialorder %v10441_v19, %v1582_v1  ;;  %vm1650_vm3 = vcmp.ge.f32.partialorder %v10447_v23, %v1582_v1  ;;  %2235 = vmax.xlane.f32.xlu1 %v2234_v21 }
 0x48d   : > { %18255 = vst [vmem:[#allocation27_spill] sm:$0xff] %v10733_v61  ;;  %v1713_v17 = vsel %vm1649_vm4, %v9477_v10, 256.0  ;;  %v1714_v29 = vsel %vm1650_vm3, %v9479_v24, 256.0  ;;  %v2237_v5 = vmax.f32 %v10728_v43, %v10733_v61  ;;  %v18256_v21 = vmov 0 }
 0x48e   : > { %v1585_v8 = vpop.xlane.xlu0 %1584  ;;  %v1804_v38 = vmin.f32 %v1713_v17, %v1714_v29 }
 0x48f   : > { %vm1651_vm15 = vcmp.ge.f32.partialorder %v10455_v9, %v1585_v8  ;;  %vm1652_vm11 = vcmp.ge.f32.partialorder %v10461_v15, %v1585_v8  ;;  %v1752_v0 = vpop.xlane.xlu1 %1751  ;;  %2238 = vmax.xlane.f32.xlu0 %v2237_v5 }
 0x490   : > { %v1715_v19 = vsel %vm1651_vm15, %v9477_v10, 256.0  ;;  %v1716_v1 = vsel %vm1652_vm11, %v9479_v24, 256.0  ;;  %vm1837_vm12 = vcmp.eq.f32.partialorder %v9477_v10, %v1752_v0  ;;  %vm1838_vm6 = vcmp.eq.f32.partialorder %v9479_v24, %v1752_v0  ;;  %1805 = vmin.xlane.f32.xlu1 %v1804_v38 }
 0x491   : > { %vm10749_vm4 = vmpackc.low %vm1837_vm12, %vm1835_vm10  ;;  %v10754_v17 = vsel %vm1837_vm12, -3e+38, %v9980_v63  ;;  %v10757_v29 = vsel %vm1838_vm6, -3e+38, %v9989_v49  ;;  %v1807_v5 = vmin.f32 %v1715_v19, %v1716_v1 }
 0x492   : > { %v18257_v21 = vsel %vm10749_vm4, 4294967295, %v18256_v21  ;;  %18258 = vst [vmem:[#allocation20_spill] sm:$0xff] %v10754_v17  ;;  %18259 = vst [vmem:[#allocation42_spill] sm:$0xff] %v10757_v29  ;;  %v1755_v8 = vpop.xlane.xlu0 %1754  ;;  %v2240_v15 = vmax.f32 %v10754_v17, %v10757_v29 }
 0x493   : > { %vm10763_vm3 = vmpackc.low %vm1838_vm6, %vm1836_vm0  ;;  %vm1839_vm10 = vcmp.eq.f32.partialorder %v9477_v10, %v1755_v8  ;;  %vm17571_vm15 = vcmp.eq.f32.partialorder %v9479_v24, %v1755_v8  ;;  %v1588_v63 = vpop.xlane.xlu1 %1587  ;;  %1808 = vmin.xlane.f32.xlu0 %v1807_v5 }
 0x494   : > { %v10772_v49 = vsel %vm1839_vm10, -3e+38, %v9968_v39  ;;  %v10777_v19 = vsel %vm17571_vm15, -3e+38, %v9974_v41  ;;  %vm1653_vm0 = vcmp.ge.f32.partialorder %v10477_v60, %v1588_v63  ;;  %vm1654_vm11 = vcmp.ge.f32.partialorder %v10483_v35, %v1588_v63  ;;  %2241 = vmax.xlane.f32.xlu1 %v2240_v15 }
 0x495   : > { %18262 = vst [vmem:[#allocation45_spill] sm:$0xff] %v10772_v49  ;;  %18263 = vst [vmem:[#allocation46_spill] sm:$0xff] %v10777_v19  ;;  %v1717_v6 = vsel %vm1653_vm0, %v9477_v10, 256.0  ;;  %v1718_v0 = vsel %vm1654_vm11, %v9479_v24, 256.0  ;;  %v2243_v1 = vmax.f32 %v10772_v49, %v10777_v19  ;;  %v18264_v15 = vmov 0 }
 0x496   : > { %v1591_v5 = vpop.xlane.xlu0 %1590  ;;  %v1810_v39 = vmin.f32 %v1717_v6, %v1718_v0 }
 0x497   : > { %vm1655_vm12 = vcmp.ge.f32.partialorder %v10491_v34, %v1591_v5  ;;  %vm1656_vm6 = vcmp.ge.f32.partialorder %v10497_v30, %v1591_v5  ;;  %v1758_v41 = vpop.xlane.xlu1 %1757  ;;  %2244 = vmax.xlane.f32.xlu0 %v2243_v1 }
 0x498   : > { %v1719_v60 = vsel %vm1655_vm12, %v9477_v10, 256.0  ;;  %v1720_v63 = vsel %vm1656_vm6, %v9479_v24, 256.0  ;;  %vm1841_vm15 = vcmp.eq.f32.partialorder %v9477_v10, %v1758_v41  ;;  %vm1842_vm0 = vcmp.eq.f32.partialorder %v9479_v24, %v1758_v41  ;;  %1811 = vmin.xlane.f32.xlu1 %v1810_v39 }
 0x499   : > { %vm10793_vm11 = vmpackc.low %vm1841_vm15, %vm1839_vm10  ;;  %v10798_v6 = vsel %vm1841_vm15, -3e+38, %v10022_v48  ;;  %v10801_v0 = vsel %vm1842_vm0, -3e+38, %v10028_v55  ;;  %v1813_v1 = vmin.f32 %v1719_v60, %v1720_v63  ;;  %vm18268_vm12 = vcmp.eq.f32.partialorder %v9479_v24, %v1755_v8  ;;  %v18273_v8 = vld [vmem:[#allocation41_spill] sm:$0xff] }
 0x49a   : > { %v18265_v15 = vsel %vm10793_vm11, 4294967295, %v18264_v15  ;;  %18266 = vst [vmem:[#allocation43_spill] sm:$0xff] %v10798_v6  ;;  %18267 = vst [vmem:[#allocation44_spill] sm:$0xff] %v10801_v0  ;;  %v1761_v5 = vpop.xlane.xlu0 %1760  ;;  %v2246_v30 = vmax.f32 %v10798_v6, %v10801_v0  ;;  %v18269_v39 = vmov 0  ;;  %v18274_v6 = vld [vmem:[#allocation48_spill] sm:$0xff] }
 0x49b   : > { %vm10807_vm6 = vmpackc.low %vm1842_vm0, %vm18268_vm12  ;;  %vm17575_vm10 = vcmp.eq.f32.partialorder %v9477_v10, %v1761_v5  ;;  %vm17578_vm11 = vcmp.eq.f32.partialorder %v9479_v24, %v1761_v5  ;;  %v1594_v48 = vpop.xlane.xlu1 %1593  ;;  %1814 = vmin.xlane.f32.xlu0 %v1813_v1 }
 0x49c   : > { %v18270_v39 = vsel %vm10807_vm6, 4294967295, %v18269_v39  ;;  %v10816_v55 = vsel %vm17575_vm10, -3e+38, %v10009_v50  ;;  %v10821_v60 = vsel %vm17578_vm11, -3e+38, %v10015_v52  ;;  %vm1657_vm15 = vcmp.ge.f32.partialorder %v10513_v56, %v1594_v48  ;;  %2247 = vmax.xlane.f32.xlu1 %v2246_v30  ;;  %v18276_v30 = vld [vmem:[#allocation49_spill] sm:$0xff] }
 0x49d   : > { %18271 = vst [vmem:[#allocation52_spill] sm:$0xff] %v10816_v55  ;;  %18272 = vst [vmem:[#allocation53_spill] sm:$0xff] %v10821_v60  ;;  %vm1658_vm0 = vcmp.ge.f32.partialorder %v18273_v8, %v1594_v48  ;;  %v1721_v41 = vsel %vm1657_vm15, %v9477_v10, 256.0  ;;  %v2249_v1 = vmax.f32 %v10816_v55, %v10821_v60  ;;  %vm18278_vm11 = vcmp.eq.f32.partialorder %v9477_v10, %v1761_v5 }
 0x49e   : > { %v1722_v63 = vsel %vm1658_vm0, %v9479_v24, 256.0  ;;  %v1767_v0 = vpop.xlane.xlu0 %1766 }
 0x49f   : > { %v1816_v50 = vmin.f32 %v1721_v41, %v1722_v63  ;;  %vm17583_vm12 = vcmp.eq.f32.partialorder %v9477_v10, %v1767_v0  ;;  %vm17582_vm10 = vcmp.eq.f32.partialorder %v9479_v24, %v1767_v0  ;;  %v1764_v52 = vpop.xlane.xlu1 %1763  ;;  %2250 = vmax.xlane.f32.xlu0 %v2249_v1  ;;  %v18279_v41 = vmov 0  ;;  %v18281_v63 = vld [vmem:[#allocation47_spill] sm:$0xff] }
 0x4a0   : > { %v10834_v48 = vsel %vm17583_vm12, -3e+38, %v18274_v6  ;;  %v10839_v8 = vsel %vm17582_vm10, -3e+38, %v18276_v30  ;;  %vm1845_vm15 = vcmp.eq.f32.partialorder %v9477_v10, %v1764_v52  ;;  %vm1846_vm0 = vcmp.eq.f32.partialorder %v9479_v24, %v1764_v52  ;;  %v18283_v6 = vld [vmem:[#allocation50_spill] sm:$0xff] }
 0x4a1   : > { %18275 = vst [vmem:[#allocation48_spill] sm:$0xff] %v10834_v48  ;;  %18277 = vst [vmem:[#allocation49_spill] sm:$0xff] %v10839_v8  ;;  %1817 = vmin.xlane.f32.xlu1 %v1816_v50  ;;  %v10850_v1 = vsel %vm1845_vm15, -3e+38, %v18281_v63  ;;  %v10853_v56 = vsel %vm1846_vm0, -3e+38, %v18283_v6  ;;  %v2255_v30 = vmax.f32 %v10834_v48, %v10839_v8  ;;  %vm18285_vm10 = vcmp.eq.f32.partialorder %v9479_v24, %v1761_v5 }
 0x4a2   : > { %vm10845_vm6 = vmpackc.low %vm1845_vm15, %vm18278_vm11  ;;  %18282 = vst [vmem:[#allocation47_spill] sm:$0xff] %v10850_v1  ;;  %v1773_v60 = vpop.xlane.xlu0 %1772  ;;  %v2252_v52 = vmax.f32 %v10850_v1, %v10853_v56  ;;  %v18286_v50 = vmov 0  ;;  %v18288_v6 = vld [vmem:[#allocation51_spill] sm:$0xff]  ;;  %v18292_v5 = vmov 0 }
 0x4a3   : > { %v18280_v41 = vsel %vm10845_vm6, 4294967295, %v18279_v41  ;;  %18284 = vst [vmem:[#allocation50_spill] sm:$0xff] %v10853_v56  ;;  %vm10861_vm12 = vmpackc.low %vm1846_vm0, %vm18285_vm10  ;;  %vm17595_vm11 = vcmp.eq.f32.partialorder %v9477_v10, %v1773_v60  ;;  %vm17594_vm15 = vcmp.eq.f32.partialorder %v9479_v24, %v1773_v60  ;;  %v1770_v63 = vpop.xlane.xlu1 %1769  ;;  %2256 = vmax.xlane.f32.xlu0 %v2255_v30  ;;  %vm18291_vm6 = vcmp.eq.f32.partialorder %v9477_v10, %v1767_v0  ;;  %v18294_v30 = vld [vmem:[#allocation18_spill] sm:$0xff] }
 0x4a4   : > { %v18287_v50 = vsel %vm10861_vm12, 4294967295, %v18286_v50  ;;  %v10870_v8 = vsel %vm17595_vm11, -3e+38, %v18288_v6  ;;  %v10875_v56 = vsel %vm17594_vm15, -3e+38, %v18215_v7  ;;  %vm1849_vm10 = vcmp.eq.f32.partialorder %v9477_v10, %v1770_v63  ;;  %v18296_v6 = vld [vmem:[#allocation19_spill] sm:$0xff] }
 0x4a5   : > { %18289 = vst [vmem:[#allocation51_spill] sm:$0xff] %v10870_v8  ;;  %18290 = vst [vmem:[#allocation54_spill] sm:$0xff] %v10875_v56  ;;  %vm1850_vm0 = vcmp.eq.f32.partialorder %v9479_v24, %v1770_v63  ;;  %2253 = vmax.xlane.f32.xlu1 %v2252_v52  ;;  %v10886_v1 = vsel %vm1849_vm10, -3e+38, %v18294_v30  ;;  %v2261_v7 = vmax.f32 %v10870_v8, %v10875_v56  ;;  %v18299_v52 = vmov 0  ;;  %v8670_v8 = vld [vmem:[#allocation8] sm:$0xff]  }
 0x4a6   : > { %vm10881_vm12 = vmpackc.low %vm1849_vm10, %vm18291_vm6  ;;  %18295 = vst [vmem:[#allocation18_spill] sm:$0xff] %v10886_v1  ;;  %v10889_v48 = vsel %vm1850_vm0, -3e+38, %v18296_v6  ;;  %v1779_v55 = vpop.xlane.xlu0 %1778  ;;  %vm18298_vm15 = vcmp.eq.f32.partialorder %v9479_v24, %v1767_v0  ;;  %v18301_v6 = vld [vmem:[#allocation24_spill] sm:$0xff]  ;;  %v18305_v0 = vmov 0 }
 0x4a7   : > { %v18293_v5 = vsel %vm10881_vm12, 4294967295, %v18292_v5  ;;  %18297 = vst [vmem:[#allocation19_spill] sm:$0xff] %v10889_v48  ;;  %v2258_v63 = vmax.f32 %v10886_v1, %v10889_v48  ;;  %vm10897_vm11 = vmpackc.low %vm1850_vm0, %vm18298_vm15  ;;  %vm17603_vm6 = vcmp.eq.f32.partialorder %v9477_v10, %v1779_v55  ;;  %vm17602_vm10 = vcmp.eq.f32.partialorder %v9479_v24, %v1779_v55  ;;  %v1776_v30 = vpop.xlane.xlu1 %1775  ;;  %2262 = vmax.xlane.f32.xlu0 %v2261_v7 }
 0x4a8   : > { %v18300_v52 = vsel %vm10897_vm11, 4294967295, %v18299_v52  ;;  %v10906_v56 = vsel %vm17603_vm6, -3e+38, %v18301_v6  ;;  %v10911_v48 = vsel %vm17602_vm10, -3e+38, %v18219_v2  ;;  %vm1853_vm15 = vcmp.eq.f32.partialorder %v9477_v10, %v1776_v30 }
 0x4a9   : > { %18302 = vst [vmem:[#allocation24_spill] sm:$0xff] %v10906_v56  ;;  %18303 = vst [vmem:[#allocation55_spill] sm:$0xff] %v10911_v48  ;;  %vm1854_vm0 = vcmp.eq.f32.partialorder %v9479_v24, %v1776_v30  ;;  %2259 = vmax.xlane.f32.xlu1 %v2258_v63  ;;  %vm18304_vm12 = vcmp.eq.f32.partialorder %v9477_v10, %v1773_v60  ;;  %v10922_v7 = vsel %vm1853_vm15, -3e+38, %v18220_v14 }
 0x4aa   : > { %vm10917_vm11 = vmpackc.low %vm1853_vm15, %vm18304_vm12  ;;  %18307 = vst [vmem:[#allocation56_spill] sm:$0xff] %v10922_v7  ;;  %v10925_v6 = vsel %vm1854_vm0, -3e+38, %v18221_v11  ;;  %v2267_v2 = vmax.f32 %v10906_v56, %v10911_v48  ;;  %vm18309_vm10 = vcmp.eq.f32.partialorder %v9479_v24, %v1773_v60 }
 0x4ab   : > { %v18306_v0 = vsel %vm10917_vm11, 4294967295, %v18305_v0  ;;  %18308 = vst [vmem:[#allocation57_spill] sm:$0xff] %v10925_v6  ;;  %v2264_v1 = vmax.f32 %v10922_v7, %v10925_v6  ;;  %vm10933_vm6 = vmpackc.low %vm1854_vm0, %vm18309_vm10  ;;  %v1782_v30 = vpop.xlane.xlu1 %1781  ;;  %vm18312_vm11 = vcmp.eq.f32.partialorder %v9477_v10, %v1779_v55  ;;  %vm18315_vm10 = vcmp.eq.f32.partialorder %v9479_v24, %v1779_v55 }
 0x4ac   : > { %2268 = vmax.xlane.f32.xlu0 %v2267_v2  ;;  %vm1857_vm12 = vcmp.eq.f32.partialorder %v9477_v10, %v1782_v30  ;;  %vm1858_vm15 = vcmp.eq.f32.partialorder %v9479_v24, %v1782_v30 }
 0x4ad   : > { %2265 = vmax.xlane.f32.xlu1 %v2264_v1  ;;  %vm10941_vm4 = vmpackc.low %vm1857_vm12, %vm18312_vm11  ;;  %v10946_v11 = vsel %vm1857_vm12, -3e+38, %v18222_v25  ;;  %v10949_v60 = vsel %vm1858_vm15, -3e+38, %v18223_v47  ;;  %v18318_v47 = vmov 1.0|1.0  }
 0x4ae   : > { %v2270_v2 = vmax.f32 %v10946_v11, %v10949_v60  ;;  %vm10955_vm0 = vmpackc.low %vm1858_vm15, %vm18315_vm10  ;;  %vm18319_vm11 = vcmask 130048  }
 0x4b1   : > { %2271 = vmax.xlane.f32.xlu1 %v2270_v2 }
 0x4b7   : > { %v1355_v1 = vpop.f32.mrb[64].mxu0 }
 0x4b8   : > { %v1357_v6 = vpop.f32.mrb[65].mxu0 }
 0x4b9   : > { %v1359_v7 = vpop.f32.mrb[66].mxu0 }
 0x4ba   : > { %v1364_v48 = vpack.c.bf16 %v1359_v7, %v1355_v1  ;;  %v1361_v56 = vpop.f32.mrb[67].mxu0 }
 0x4bb   : > { %v1365_v25 = vpack.c.bf16 %v1361_v56, %v1357_v6  ;;  %v18332_v6 = vld [vmem:[#allocation30_spill] sm:$0xff] }
 0x4bd   : > { %1382 = vmatprep.subr.bf16.mxu1 %v1365_v25 }
 0x4be   : > { %1383 = vmatpush1.bf16.msra.mxu1 %v1364_v48 }
 0x4bf   : > { %7571 = vmatprep.subr.msk.bf16.mxu1 %vm10587_vm13, %v18318_v47  ;;  %vm18321_vm13 = vnez %v18270_v39  ;;  %v18331_v39 = vld [vmem:[#allocation22_spill] sm:$0xff] }
 0x4c1   : > { %7504 = vmatmul.mubr.msk.bf16.vlgmr.msra.gmra.mrb[8].mxu1 %vm18319_vm11, %v8670_v8 }
 0x4c2   : > { %1424 = vmatprep.mubr.bf16.mxu1 %v18225_v12 }
 0x4c7   : > { %7573 = vmatpush1.bf16.xpose.msk.msra.mxu1 %vm10573_vm14, %v18318_v47  ;;  %vm18320_vm14 = vnez %v18257_v21  ;;  %v18329_v21 = vld [vmem:[#allocation29_spill] sm:$0xff] }
 0x4c8   : > { %7575 = vmatprep.subr.msk.bf16.mxu1 %vm10631_vm1, %v18318_v47  ;;  %vm18323_vm1 = vnez %v18287_v50 }
 0x4cf   : > { %7577 = vmatpush1.bf16.xpose.msk.msra.mxu1 %vm10617_vm7, %v18318_v47  ;;  %vm18322_vm7 = vnez %v18265_v15  ;;  %v18330_v15 = vld [vmem:[#allocation25_spill] sm:$0xff] }
 0x4d0   : > { %7579 = vmatprep.subr.msk.bf16.mxu1 %vm10675_vm2, %v18318_v47  ;;  %vm18325_vm2 = vnez %v18300_v52 }
 0x4d7   : > { %7581 = vmatpush1.bf16.xpose.msk.msra.mxu1 %vm10661_vm5, %v18318_v47  ;;  %vm18324_vm5 = vnez %v18280_v41 }
 0x4d8   : > { %7583 = vmatprep.subr.msk.bf16.mxu1 %vm10719_vm9, %v18318_v47 }
 0x4df   : > { %7585 = vmatpush1.bf16.xpose.msk.msra.mxu1 %vm10705_vm8, %v18318_v47 }
 0x4e0   : > { %7587 = vmatprep.subr.msk.bf16.mxu1 %vm10763_vm3, %v18318_v47  ;;  %vm18327_vm3 = vnez %v18293_v5 }
 0x4e7   : > { %7589 = vmatpush1.bf16.xpose.msk.msra.mxu1 %vm18320_vm14, %v18318_v47 }
 0x4e8   : > { %7591 = vmatprep.subr.msk.bf16.mxu1 %vm18321_vm13, %v18318_v47 }
 0x4ef   : > { %7593 = vmatpush1.bf16.xpose.msk.msra.mxu1 %vm18322_vm7, %v18318_v47 }
 0x4f0   : > { %7595 = vmatprep.subr.msk.bf16.mxu1 %vm18323_vm1, %v18318_v47  ;;  %vm18333_vm1 = vnez %v18306_v0 }
 0x4f7   : > { %7597 = vmatpush1.bf16.xpose.msk.msra.mxu1 %vm18324_vm5, %v18318_v47 }
 0x4f8   : > { %7599 = vmatprep.subr.msk.bf16.mxu1 %vm18325_vm2, %v18318_v47 }
 0x4fc   : > { %v2215_v56 = vpop.xlane.xlu0 %2214 }
 0x4fd   : > { %vm2309_vm8 = vcmp.ge.f32.partialorder %v10558_v40, %v2215_v56  ;;  %vm2310_vm9 = vcmp.ge.f32.partialorder %v18326_v16, %v2215_v56 }
 0x4fe   : > { %v2373_v53 = vsel %vm2309_vm8, %v9477_v10, 256.0  ;;  %v2374_v51 = vsel %vm2310_vm9, %v9479_v24, 256.0 }
 0x4ff   : > { %v2437_v20 = vmin.f32 %v2373_v53, %v2374_v51  ;;  %7601 = vmatpush1.bf16.xpose.msk.msra.mxu1 %vm18327_vm3, %v18318_v47  ;;  %v18334_v53 = vld [vmem:[#allocation31_spill] sm:$0xff] }
 0x500   : > { %v11013_v45 = vpop.xlane.xlu0 %1784  ;;  %7603 = vmatprep.subr.msk.bf16.mxu1 %vm10933_vm6, %v18318_v47 }
 0x501   : > { %vm1859_vm12 = vcmp.eq.f32.partialorder %v9477_v10, %v11013_v45  ;;  %vm1860_vm15 = vcmp.eq.f32.partialorder %v9479_v24, %v11013_v45  ;;  %v2218_v26 = vpop.xlane.xlu1 %2217  ;;  %2438 = vmin.xlane.f32.xlu0 %v2437_v20 }
 0x502   : > { %v11026_v27 = vsel %vm1859_vm12, -3e+38, %v18328_v42  ;;  %v11032_v38 = vsel %vm1860_vm15, -3e+38, %v18329_v21  ;;  %vm2311_vm6 = vcmp.ge.f32.partialorder %v18330_v15, %v2218_v26  ;;  %vm2312_vm10 = vcmp.ge.f32.partialorder %v18331_v39, %v2218_v26 }
 0x503   : > { %v2375_v55 = vsel %vm2311_vm6, %v9477_v10, 256.0  ;;  %v2376_v8 = vsel %vm2312_vm10, %v9479_v24, 256.0  ;;  %v2273_v48 = vmax.f32 %v11026_v27, %v11032_v38 }
 0x504   : > { %v2221_v41 = vpop.xlane.xlu0 %2220  ;;  %v2440_v50 = vmin.f32 %v2375_v55, %v2376_v8 }
 0x505   : > { %vm2313_vm11 = vcmp.ge.f32.partialorder %v10596_v46, %v2221_v41  ;;  %vm2314_vm14 = vcmp.ge.f32.partialorder %v10601_v59, %v2221_v41  ;;  %v11042_v5 = vpop.xlane.xlu1 %1787  ;;  %2274 = vmax.xlane.f32.xlu0 %v2273_v48  ;;  %v18335_v48 = vld [vmem:[#allocation32_spill] sm:$0xff] }
 0x506   : > { %v2377_v52 = vsel %vm2313_vm11, %v9477_v10, 256.0  ;;  %v2378_v7 = vsel %vm2314_vm14, %v9479_v24, 256.0  ;;  %vm1861_vm13 = vcmp.eq.f32.partialorder %v9477_v10, %v11042_v5  ;;  %vm1862_vm7 = vcmp.eq.f32.partialorder %v9479_v24, %v11042_v5  ;;  %2441 = vmin.xlane.f32.xlu1 %v2440_v50 }
 0x507   : > { %v11054_v63 = vsel %vm1861_vm13, -3e+38, %v18332_v6  ;;  %v11060_v2 = vsel %vm1862_vm7, -3e+38, %v10337_v4  ;;  %v2443_v1 = vmin.f32 %v2377_v52, %v2378_v7  ;;  %7605 = vmatpush1.bf16.xpose.msk.msra.mxu1 %vm18333_vm1, %v18318_v47  ;;  %vm7610_vm11 = vmpackc.low %vm1862_vm7, %vm1860_vm15 }
 0x508   : > { %v11065_v25 = vpop.xlane.xlu0 %1790  ;;  %v2276_v56 = vmax.f32 %v11054_v63, %v11060_v2  ;;  %7607 = vmatprep.subr.msk.bf16.mxu1 %vm10955_vm0, %v18318_v47 }
 0x509   : > { %vm1863_vm5 = vcmp.eq.f32.partialorder %v9477_v10, %v11065_v25  ;;  %vm1864_vm2 = vcmp.eq.f32.partialorder %v9479_v24, %v11065_v25  ;;  %v2224_v4 = vpop.xlane.xlu1 %2223  ;;  %2444 = vmin.xlane.f32.xlu0 %v2443_v1  ;;  %v18336_v1 = vld [vmem:[#allocation33_spill] sm:$0xff] }
 0x50a   : > { %v11080_v0 = vsel %vm1863_vm5, -3e+38, %v10345_v28  ;;  %v11086_v30 = vsel %vm1864_vm2, -3e+38, %v18334_v53  ;;  %vm2315_vm0 = vcmp.ge.f32.partialorder %v10622_v57, %v2224_v4  ;;  %vm2316_vm8 = vcmp.ge.f32.partialorder %v10625_v54, %v2224_v4  ;;  %2277 = vmax.xlane.f32.xlu1 %v2276_v56 }
 0x50b   : > { %v2379_v51 = vsel %vm2315_vm0, %v9477_v10, 256.0  ;;  %v2380_v20 = vsel %vm2316_vm8, %v9479_v24, 256.0  ;;  %v2279_v26 = vmax.f32 %v11080_v0, %v11086_v30 }
 0x50c   : > { %v2227_v28 = vpop.xlane.xlu0 %2226  ;;  %v2446_v42 = vmin.f32 %v2379_v51, %v2380_v20 }
 0x50d   : > { %vm2317_vm9 = vcmp.ge.f32.partialorder %v10640_v31, %v2227_v28  ;;  %vm2318_vm3 = vcmp.ge.f32.partialorder %v10645_v13, %v2227_v28  ;;  %v11096_v21 = vpop.xlane.xlu1 %1793  ;;  %2280 = vmax.xlane.f32.xlu0 %v2279_v26 }
 0x50e   : > { %v2381_v55 = vsel %vm2317_vm9, %v9477_v10, 256.0  ;;  %v2382_v8 = vsel %vm2318_vm3, %v9479_v24, 256.0  ;;  %vm1865_vm6 = vcmp.eq.f32.partialorder %v9477_v10, %v11096_v21  ;;  %vm1866_vm10 = vcmp.eq.f32.partialorder %v9479_v24, %v11096_v21  ;;  %2447 = vmin.xlane.f32.xlu1 %v2446_v42  ;;  %vm7612_vm3 = vmpackc.low %vm1861_vm13, %vm1859_vm12 }
 0x50f   : > { %v11108_v41 = vsel %vm1865_vm6, -3e+38, %v18335_v48  ;;  %v11114_v50 = vsel %vm1866_vm10, -3e+38, %v10375_v32  ;;  %v2449_v52 = vmin.f32 %v2381_v55, %v2382_v8  ;;  %7609 = vmatpush1.bf16.xpose.msk.msra.mxu1 %vm10941_vm4, %v18318_v47  ;;  %v18337_v55 = vld [vmem:[#allocation34_spill] sm:$0xff]  ;;  %vm7614_vm12 = vmpackc.low %vm1866_vm10, %vm1864_vm2 }
 0x510   : > { %v11125_v7 = vpop.xlane.xlu0 %1796  ;;  %v2282_v6 = vmax.f32 %v11108_v41, %v11114_v50  ;;  %7611 = vmatprep.subr.msk.bf16.mxu1 %vm7610_vm11, %v18318_v47 }
 0x511   : > { %vm1867_vm14 = vcmp.eq.f32.partialorder %v9477_v10, %v11125_v7  ;;  %vm1868_vm4 = vcmp.eq.f32.partialorder %v9479_v24, %v11125_v7  ;;  %v2230_v32 = vpop.xlane.xlu1 %2229  ;;  %2450 = vmin.xlane.f32.xlu0 %v2449_v52 }
 0x512   : > { %v11138_v14 = vsel %vm1867_vm14, -3e+38, %v10383_v36  ;;  %v11144_v56 = vsel %vm1868_vm4, -3e+38, %v18336_v1  ;;  %vm2319_vm15 = vcmp.ge.f32.partialorder %v10666_v33, %v2230_v32  ;;  %vm2320_vm7 = vcmp.ge.f32.partialorder %v10669_v58, %v2230_v32  ;;  %2283 = vmax.xlane.f32.xlu1 %v2282_v6  ;;  %v18339_v32 = vld [vmem:[#allocation35_spill] sm:$0xff] }
 0x513   : > { %v2383_v4 = vsel %vm2319_vm15, %v9477_v10, 256.0  ;;  %v2384_v53 = vsel %vm2320_vm7, %v9479_v24, 256.0  ;;  %v2285_v51 = vmax.f32 %v11138_v14, %v11144_v56 }
 0x514   : > { %v2233_v36 = vpop.xlane.xlu0 %2232  ;;  %v2452_v20 = vmin.f32 %v2383_v4, %v2384_v53 }
 0x515   : > { %vm2321_vm1 = vcmp.ge.f32.partialorder %v10684_v37, %v2233_v36  ;;  %vm2322_vm0 = vcmp.ge.f32.partialorder %v10689_v3, %v2233_v36  ;;  %v11154_v26 = vpop.xlane.xlu1 %1799  ;;  %2286 = vmax.xlane.f32.xlu0 %v2285_v51 }
 0x516   : > { %v2385_v28 = vsel %vm2321_vm1, %v9477_v10, 256.0  ;;  %v2386_v42 = vsel %vm2322_vm0, %v9479_v24, 256.0  ;;  %vm1869_vm8 = vcmp.eq.f32.partialorder %v9477_v10, %v11154_v26  ;;  %vm1870_vm9 = vcmp.eq.f32.partialorder %v9479_v24, %v11154_v26  ;;  %2453 = vmin.xlane.f32.xlu1 %v2452_v20 }
 0x517   : > { %v11172_v8 = vsel %vm1869_vm8, -3e+38, %v18337_v55  ;;  %v11178_v48 = vsel %vm1870_vm9, -3e+38, %v10411_v22  ;;  %v2455_v52 = vmin.f32 %v2385_v28, %v2386_v42  ;;  %7613 = vmatpush1.bf16.xpose.msk.msra.mxu1 %vm7612_vm3, %v18318_v47  ;;  %vm7616_vm3 = vmpackc.low %vm1865_vm6, %vm1863_vm5  ;;  %v18341_v55 = vld [vmem:[#allocation36_spill] sm:$0xff] }
 0x518   : > { %18338 = vst [vmem:[#allocation21_spill] sm:$0xff] %v11172_v8  ;;  %v11187_v45 = vpop.xlane.xlu0 %1802  ;;  %v2288_v5 = vmax.f32 %v11172_v8, %v11178_v48  ;;  %7615 = vmatprep.subr.msk.bf16.mxu1 %vm7614_vm12, %v18318_v47  ;;  %vm7618_vm5 = vmpackc.low %vm1870_vm9, %vm1868_vm4 }
 0x519   : > { %vm1871_vm13 = vcmp.eq.f32.partialorder %v9477_v10, %v11187_v45  ;;  %vm1872_vm11 = vcmp.eq.f32.partialorder %v9479_v24, %v11187_v45  ;;  %v2236_v22 = vpop.xlane.xlu1 %2235  ;;  %2456 = vmin.xlane.f32.xlu0 %v2455_v52 }
 0x51a   : > { %v11200_v6 = vsel %vm1871_vm13, -3e+38, %v10419_v62  ;;  %v11206_v1 = vsel %vm1872_vm11, -3e+38, %v18339_v32  ;;  %vm2323_vm2 = vcmp.ge.f32.partialorder %v10710_v44, %v2236_v22  ;;  %vm2324_vm10 = vcmp.ge.f32.partialorder %v10713_v18, %v2236_v22  ;;  %2289 = vmax.xlane.f32.xlu1 %v2288_v5  ;;  %v18365_v44 = vld [vmem:[#allocation51_spill] sm:$0xff] }
 0x51b   : > { %18340 = vst [vmem:[#allocation28_spill] sm:$0xff] %v11206_v1  ;;  %v2387_v4 = vsel %vm2323_vm2, %v9477_v10, 256.0  ;;  %v2388_v53 = vsel %vm2324_vm10, %v9479_v24, 256.0  ;;  %v2291_v51 = vmax.f32 %v11200_v6, %v11206_v1 }
 0x51c   : > { %v2239_v62 = vpop.xlane.xlu0 %2238  ;;  %v2458_v36 = vmin.f32 %v2387_v4, %v2388_v53  ;;  %v18345_v4 = vld [vmem:[#allocation37_spill] sm:$0xff] }
 0x51d   : > { %vm2325_vm15 = vcmp.ge.f32.partialorder %v10728_v43, %v2239_v62  ;;  %vm2326_vm7 = vcmp.ge.f32.partialorder %v10733_v61, %v2239_v62  ;;  %v11216_v20 = vpop.xlane.xlu1 %1805  ;;  %2292 = vmax.xlane.f32.xlu0 %v2291_v51  ;;  %v18367_v61 = vld [vmem:[#allocation18_spill] sm:$0xff] }
 0x51e   : > { %v2389_v28 = vsel %vm2325_vm15, %v9477_v10, 256.0  ;;  %v2390_v42 = vsel %vm2326_vm7, %v9479_v24, 256.0  ;;  %vm1873_vm1 = vcmp.eq.f32.partialorder %v9477_v10, %v11216_v20  ;;  %vm1874_vm0 = vcmp.eq.f32.partialorder %v9479_v24, %v11216_v20  ;;  %2459 = vmin.xlane.f32.xlu1 %v2458_v36 }
 0x51f   : > { %v11234_v52 = vsel %vm1873_vm1, -3e+38, %v18341_v55  ;;  %v11240_v5 = vsel %vm1874_vm0, -3e+38, %v10447_v23  ;;  %v2461_v22 = vmin.f32 %v2389_v28, %v2390_v42  ;;  %7617 = vmatpush1.bf16.xpose.msk.msra.mxu1 %vm7616_vm3, %v18318_v47  ;;  %vm7620_vm3 = vmpackc.low %vm1869_vm8, %vm1867_vm14 }
 0x520   : > { %18342 = vst [vmem:[#allocation29_spill] sm:$0xff] %v11234_v52  ;;  %18343 = vst [vmem:[#allocation25_spill] sm:$0xff] %v11240_v5  ;;  %v11249_v25 = vpop.xlane.xlu0 %1808  ;;  %v2294_v21 = vmax.f32 %v11234_v52, %v11240_v5  ;;  %7619 = vmatprep.subr.msk.bf16.mxu1 %vm7618_vm5, %v18318_v47 }
 0x521   : > { %vm1875_vm6 = vcmp.eq.f32.partialorder %v9477_v10, %v11249_v25  ;;  %vm1876_vm12 = vcmp.eq.f32.partialorder %v9479_v24, %v11249_v25  ;;  %v2242_v23 = vpop.xlane.xlu1 %2241  ;;  %2462 = vmin.xlane.f32.xlu0 %v2461_v22  ;;  %vm7622_vm14 = vmpackc.low %vm1874_vm0, %vm1872_vm11 }
 0x522   : > { %v11262_v32 = vsel %vm1875_vm6, -3e+38, %v10455_v9  ;;  %v11268_v53 = vsel %vm1876_vm12, -3e+38, %v18345_v4  ;;  %vm2327_vm4 = vcmp.ge.f32.partialorder %v10754_v17, %v2242_v23  ;;  %vm2328_vm9 = vcmp.ge.f32.partialorder %v10757_v29, %v2242_v23  ;;  %2295 = vmax.xlane.f32.xlu1 %v2294_v21  ;;  %v18347_v21 = vld [vmem:[#allocation38_spill] sm:$0xff]  ;;  %v18355_v29 = vld [vmem:[#allocation52_spill] sm:$0xff] }
 0x523   : > { %18344 = vst [vmem:[#allocation22_spill] sm:$0xff] %v11262_v32  ;;  %18346 = vst [vmem:[#allocation30_spill] sm:$0xff] %v11268_v53  ;;  %v2391_v51 = vsel %vm2327_vm4, %v9477_v10, 256.0  ;;  %v2392_v62 = vsel %vm2328_vm9, %v9479_v24, 256.0  ;;  %v2297_v36 = vmax.f32 %v11262_v32, %v11268_v53  ;;  %v18356_v17 = vld [vmem:[#allocation53_spill] sm:$0xff] }
 0x524   : > { %v2245_v9 = vpop.xlane.xlu0 %2244  ;;  %v2464_v28 = vmin.f32 %v2391_v51, %v2392_v62 }
 0x525   : > { %vm2329_vm2 = vcmp.ge.f32.partialorder %v10772_v49, %v2245_v9  ;;  %vm2330_vm10 = vcmp.ge.f32.partialorder %v10777_v19, %v2245_v9  ;;  %v11278_v42 = vpop.xlane.xlu1 %1811  ;;  %2298 = vmax.xlane.f32.xlu0 %v2297_v36  ;;  %v18351_v36 = vld [vmem:[#allocation39_spill] sm:$0xff] }
 0x526   : > { %v2393_v55 = vsel %vm2329_vm2, %v9477_v10, 256.0  ;;  %v2394_v22 = vsel %vm2330_vm10, %v9479_v24, 256.0  ;;  %vm1877_vm15 = vcmp.eq.f32.partialorder %v9477_v10, %v11278_v42  ;;  %vm1878_vm7 = vcmp.eq.f32.partialorder %v9479_v24, %v11278_v42  ;;  %2465 = vmin.xlane.f32.xlu1 %v2464_v28  ;;  %v18353_v28 = vld [vmem:[#allocation43_spill] sm:$0xff]  ;;  %v18369_v42 = vld [vmem:[#allocation24_spill] sm:$0xff] }
 0x527   : > { %v11296_v23 = vsel %vm1877_vm15, -3e+38, %v18347_v21  ;;  %v11302_v4 = vsel %vm1878_vm7, -3e+38, %v10483_v35  ;;  %v2467_v51 = vmin.f32 %v2393_v55, %v2394_v22  ;;  %7621 = vmatpush1.bf16.xpose.msk.msra.mxu1 %vm7620_vm3, %v18318_v47  ;;  %v18354_v55 = vld [vmem:[#allocation44_spill] sm:$0xff]  ;;  %vm7624_vm3 = vmpackc.low %vm1873_vm1, %vm1871_vm13 }
 0x528   : > { %18348 = vst [vmem:[#allocation31_spill] sm:$0xff] %v11296_v23  ;;  %18349 = vst [vmem:[#allocation32_spill] sm:$0xff] %v11302_v4  ;;  %v11311_v7 = vpop.xlane.xlu0 %1814  ;;  %v2300_v26 = vmax.f32 %v11296_v23, %v11302_v4  ;;  %7623 = vmatprep.subr.msk.bf16.mxu1 %vm7622_vm14, %v18318_v47 }
 0x529   : > { %vm1879_vm8 = vcmp.eq.f32.partialorder %v9477_v10, %v11311_v7  ;;  %vm1880_vm5 = vcmp.eq.f32.partialorder %v9479_v24, %v11311_v7  ;;  %v2248_v35 = vpop.xlane.xlu1 %2247  ;;  %2468 = vmin.xlane.f32.xlu0 %v2467_v51  ;;  %vm7626_vm13 = vmpackc.low %vm1878_vm7, %vm1876_vm12 }
 0x52a   : > { %v11324_v62 = vsel %vm1879_vm8, -3e+38, %v10491_v34  ;;  %v11330_v9 = vsel %vm1880_vm5, -3e+38, %v18351_v36  ;;  %vm2331_vm11 = vcmp.ge.f32.partialorder %v18353_v28, %v2248_v35  ;;  %vm2332_vm0 = vcmp.ge.f32.partialorder %v18354_v55, %v2248_v35  ;;  %2301 = vmax.xlane.f32.xlu1 %v2300_v26  ;;  %v18357_v35 = vld [vmem:[#allocation40_spill] sm:$0xff]  ;;  %v18363_v55 = vld [vmem:[#allocation47_spill] sm:$0xff] }
 0x52b   : > { %18350 = vst [vmem:[#allocation33_spill] sm:$0xff] %v11324_v62  ;;  %18352 = vst [vmem:[#allocation34_spill] sm:$0xff] %v11330_v9  ;;  %v2395_v22 = vsel %vm2331_vm11, %v9477_v10, 256.0  ;;  %v2396_v21 = vsel %vm2332_vm0, %v9479_v24, 256.0  ;;  %v2303_v51 = vmax.f32 %v11324_v62, %v11330_v9 }
 0x52c   : > { %v2251_v34 = vpop.xlane.xlu0 %2250  ;;  %v2470_v12 = vmin.f32 %v2395_v22, %v2396_v21  ;;  %v18359_v21 = vld [vmem:[#allocation41_spill] sm:$0xff] }
 0x52d   : > { %vm2333_vm4 = vcmp.ge.f32.partialorder %v18355_v29, %v2251_v34  ;;  %vm2334_vm9 = vcmp.ge.f32.partialorder %v18356_v17, %v2251_v34  ;;  %2304 = vmax.xlane.f32.xlu0 %v2303_v51  ;;  %v18361_v34 = vld [vmem:[#allocation48_spill] sm:$0xff]  ;;  %v18364_v17 = vld [vmem:[#allocation50_spill] sm:$0xff] }
 0x52e   : > { %v11340_v36 = vpop.xlane.xlu1 %1817  ;;  %v2397_v28 = vsel %vm2333_vm4, %v9477_v10, 256.0  ;;  %v2398_v26 = vsel %vm2334_vm9, %v9479_v24, 256.0  ;;  %2471 = vmin.xlane.f32.xlu1 %v2470_v12 }
 0x52f   : > { %vm1881_vm2 = vcmp.eq.f32.partialorder %v9477_v10, %v11340_v36  ;;  %vm1882_vm10 = vcmp.eq.f32.partialorder %v9479_v24, %v11340_v36  ;;  %v2473_v12 = vmin.f32 %v2397_v28, %v2398_v26  ;;  %7625 = vmatpush1.bf16.xpose.msk.msra.mxu1 %vm7624_vm3, %v18318_v47  ;;  %vm7628_vm3 = vmpackc.low %vm1877_vm15, %vm1875_vm6 }
 0x530   : > { %v11358_v22 = vsel %vm1881_vm2, -3e+38, %v18357_v35  ;;  %v11364_v51 = vsel %vm1882_vm10, -3e+38, %v18359_v21  ;;  %v2257_v45 = vpop.xlane.xlu0 %2256  ;;  %7627 = vmatprep.subr.msk.bf16.mxu1 %vm7626_vm13, %v18318_v47  ;;  %v18362_v35 = vld [vmem:[#allocation49_spill] sm:$0xff]  ;;  %vm7630_vm13 = vmpackc.low %vm1882_vm10, %vm1880_vm5 }
 0x531   : > { %18358 = vst [vmem:[#allocation35_spill] sm:$0xff] %v11358_v22  ;;  %18360 = vst [vmem:[#allocation36_spill] sm:$0xff] %v11364_v51  ;;  %v2306_v20 = vmax.f32 %v11358_v22, %v11364_v51  ;;  %vm2337_vm1 = vcmp.ge.f32.partialorder %v18361_v34, %v2257_v45  ;;  %vm2338_vm14 = vcmp.ge.f32.partialorder %v18362_v35, %v2257_v45  ;;  %2474 = vmin.xlane.f32.xlu0 %v2473_v12  ;;  %v18366_v45 = vld [vmem:[#allocation54_spill] sm:$0xff] }
 0x532   : > { %v2254_v28 = vpop.xlane.xlu1 %2253  ;;  %v2401_v26 = vsel %vm2337_vm1, %v9477_v10, 256.0  ;;  %v2402_v21 = vsel %vm2338_vm14, %v9479_v24, 256.0 }
 0x533   : > { %vm2335_vm11 = vcmp.ge.f32.partialorder %v18363_v55, %v2254_v28  ;;  %vm2336_vm12 = vcmp.ge.f32.partialorder %v18364_v17, %v2254_v28  ;;  %2307 = vmax.xlane.f32.xlu1 %v2306_v20  ;;  %v2479_v49 = vmin.f32 %v2401_v26, %v2402_v21  ;;  %v18368_v20 = vld [vmem:[#allocation19_spill] sm:$0xff]  ;;  %v18371_v26 = vld [vmem:[#allocation56_spill] sm:$0xff]  ;;  %v18372_v21 = vld [vmem:[#allocation57_spill] sm:$0xff] }
 0x534   : > { %v2399_v29 = vsel %vm2335_vm11, %v9477_v10, 256.0  ;;  %v2400_v19 = vsel %vm2336_vm12, %v9479_v24, 256.0  ;;  %v2263_v18 = vpop.xlane.xlu0 %2262  ;;  %vm7632_vm11 = vmpackc.low %vm1881_vm2, %vm1879_vm8 }
 0x535   : > { %v2476_v34 = vmin.f32 %v2399_v29, %v2400_v19  ;;  %vm2341_vm7 = vcmp.ge.f32.partialorder %v18365_v44, %v2263_v18  ;;  %vm2342_vm0 = vcmp.ge.f32.partialorder %v18366_v45, %v2263_v18  ;;  %2480 = vmin.xlane.f32.xlu0 %v2479_v49 }
 0x536   : > { %v2260_v12 = vpop.xlane.xlu1 %2259  ;;  %v2405_v35 = vsel %vm2341_vm7, %v9477_v10, 256.0  ;;  %v2406_v55 = vsel %vm2342_vm0, %v9479_v24, 256.0 }
 0x537   : > { %vm2339_vm4 = vcmp.ge.f32.partialorder %v18367_v61, %v2260_v12  ;;  %vm2340_vm9 = vcmp.ge.f32.partialorder %v18368_v20, %v2260_v12  ;;  %2477 = vmin.xlane.f32.xlu1 %v2476_v34  ;;  %v2485_v49 = vmin.f32 %v2405_v35, %v2406_v55  ;;  %7629 = vmatpush1.bf16.xpose.msk.msra.mxu1 %vm7628_vm3, %v18318_v47  ;;  %v18370_v34 = vld [vmem:[#allocation55_spill] sm:$0xff] }
 0x538   : > { %v2403_v18 = vsel %vm2339_vm4, %v9477_v10, 256.0  ;;  %v2404_v29 = vsel %vm2340_vm9, %v9479_v24, 256.0  ;;  %7631 = vmatprep.subr.msk.bf16.mxu1 %vm7630_vm13, %v18318_v47 }
 0x539   : > { %v2269_v19 = vpop.xlane.xlu0 %2268  ;;  %v2482_v25 = vmin.f32 %v2403_v18, %v2404_v29  ;;  %2486 = vmin.xlane.f32.xlu0 %v2485_v49 }
 0x53a   : > { %vm2345_vm6 = vcmp.ge.f32.partialorder %v18369_v42, %v2269_v19  ;;  %vm2346_vm15 = vcmp.ge.f32.partialorder %v18370_v34, %v2269_v19  ;;  %v2266_v28 = vpop.xlane.xlu1 %2265 }
 0x53b   : > { %v2409_v55 = vsel %vm2345_vm6, %v9477_v10, 256.0  ;;  %v2410_v35 = vsel %vm2346_vm15, %v9479_v24, 256.0  ;;  %vm2343_vm1 = vcmp.ge.f32.partialorder %v18371_v26, %v2266_v28  ;;  %vm2344_vm14 = vcmp.ge.f32.partialorder %v18372_v21, %v2266_v28  ;;  %2483 = vmin.xlane.f32.xlu1 %v2482_v25 }
 0x53c   : > { %v2407_v12 = vsel %vm2343_vm1, %v9477_v10, 256.0  ;;  %v2408_v18 = vsel %vm2344_vm14, %v9479_v24, 256.0  ;;  %v2491_v29 = vmin.f32 %v2409_v55, %v2410_v35 }
 0x53d   : > { %v2488_v20 = vmin.f32 %v2407_v12, %v2408_v18 }
 0x53e   : > { %v2272_v42 = vpop.xlane.xlu1 %2271  ;;  %2492 = vmin.xlane.f32.xlu0 %v2491_v29 }
 0x53f   : > { %vm2347_vm5 = vcmp.ge.f32.partialorder %v10946_v11, %v2272_v42  ;;  %vm2348_vm10 = vcmp.ge.f32.partialorder %v10949_v60, %v2272_v42  ;;  %2489 = vmin.xlane.f32.xlu1 %v2488_v20  ;;  %7633 = vmatpush1.bf16.xpose.msk.msra.mxu1 %vm7632_vm11, %v18318_v47 }
 0x540   : > { %v2411_v49 = vsel %vm2347_vm5, %v9477_v10, 256.0  ;;  %v2412_v19 = vsel %vm2348_vm10, %v9479_v24, 256.0 }
 0x541   : > { %v2494_v25 = vmin.f32 %v2411_v49, %v2412_v19 }
 0x543   : > { %2495 = vmin.xlane.f32.xlu1 %v2494_v25 }
 0x58e   : > { %v11425_v28 = vpop.xlane.xlu0 %2438 }
 0x58f   : > { %vm2533_vm12 = vcmp.eq.f32.partialorder %v9477_v10, %v11425_v28  ;;  %vm2534_vm4 = vcmp.eq.f32.partialorder %v9479_v24, %v11425_v28 }
 0x592   : > { %v2275_v55 = vpop.xlane.xlu0 %2274 }
 0x593   : > { %vm2349_vm7 = vcmp.ge.f32.partialorder %v11026_v27, %v2275_v55  ;;  %vm2350_vm0 = vcmp.ge.f32.partialorder %v11032_v38, %v2275_v55  ;;  %v11431_v7 = vpop.xlane.xlu1 %2441 }
 0x594   : > { %v2413_v36 = vsel %vm2349_vm7, %v9477_v10, 256.0  ;;  %v2414_v20 = vsel %vm2350_vm0, %v9479_v24, 256.0  ;;  %vm2535_vm8 = vcmp.eq.f32.partialorder %v9477_v10, %v11431_v7  ;;  %vm2536_vm2 = vcmp.eq.f32.partialorder %v9479_v24, %v11431_v7 }
 0x595   : > { %vm7702_vm9 = vmpackc.low %vm2535_vm8, %vm2533_vm12  ;;  %v2497_v42 = vmin.f32 %v2413_v36, %v2414_v20 }
 0x596   : > { %vm7700_vm3 = vmpackc.low %vm2536_vm2, %vm2534_vm4  ;;  %v11453_v35 = vpop.xlane.xlu0 %2444 }
 0x597   : > { %7701 = vmatprep.subr.msk.bf16.mxu0 %vm7700_vm3, %v18318_v47  ;;  %v2278_v12 = vpop.xlane.xlu1 %2277  ;;  %2498 = vmin.xlane.f32.xlu0 %v2497_v42  ;;  %vm2537_vm15 = vcmp.eq.f32.partialorder %v9477_v10, %v11453_v35  ;;  %vm2538_vm11 = vcmp.eq.f32.partialorder %v9479_v24, %v11453_v35 }
 0x598   : > { %vm2351_vm13 = vcmp.ge.f32.partialorder %v11054_v63, %v2278_v12  ;;  %vm2352_vm6 = vcmp.ge.f32.partialorder %v11060_v2, %v2278_v12  ;;  %7703 = vmatpush1.bf16.xpose.msk.msra.mxu0 %vm7702_vm9, %v18318_v47 }
 0x599   : > { %v2415_v18 = vsel %vm2351_vm13, %v9477_v10, 256.0  ;;  %v2416_v29 = vsel %vm2352_vm6, %v9479_v24, 256.0 }
 0x59a   : > { %v2281_v49 = vpop.xlane.xlu0 %2280  ;;  %v2500_v19 = vmin.f32 %v2415_v18, %v2416_v29 }
 0x59b   : > { %vm2353_vm1 = vcmp.ge.f32.partialorder %v11080_v0, %v2281_v49  ;;  %vm2354_vm14 = vcmp.ge.f32.partialorder %v11086_v30, %v2281_v49  ;;  %v11465_v25 = vpop.xlane.xlu1 %2447 }
 0x59c   : > { %v2417_v55 = vsel %vm2353_vm1, %v9477_v10, 256.0  ;;  %v2418_v36 = vsel %vm2354_vm14, %v9479_v24, 256.0  ;;  %vm17626_vm5 = vcmp.eq.f32.partialorder %v9477_v10, %v11465_v25  ;;  %vm17625_vm10 = vcmp.eq.f32.partialorder %v9479_v24, %v11465_v25  ;;  %2501 = vmin.xlane.f32.xlu1 %v2500_v19 }
 0x59d   : > { %vm7706_vm7 = vmpackc.low %vm17626_vm5, %vm2537_vm15  ;;  %v2503_v20 = vmin.f32 %v2417_v55, %v2418_v36 }
 0x59e   : > { %vm7704_vm0 = vmpackc.low %vm17625_vm10, %vm2538_vm11  ;;  %v11487_v42 = vpop.xlane.xlu0 %2450 }
 0x59f   : > { %7705 = vmatprep.subr.msk.bf16.mxu0 %vm7704_vm0, %v18318_v47  ;;  %v2284_v12 = vpop.xlane.xlu1 %2283  ;;  %2504 = vmin.xlane.f32.xlu0 %v2503_v20  ;;  %vm2541_vm13 = vcmp.eq.f32.partialorder %v9477_v10, %v11487_v42  ;;  %vm2542_vm0 = vcmp.eq.f32.partialorder %v9479_v24, %v11487_v42 }
 0x5a0   : > { %vm2355_vm9 = vcmp.ge.f32.partialorder %v11108_v41, %v2284_v12  ;;  %vm2356_vm3 = vcmp.ge.f32.partialorder %v11114_v50, %v2284_v12  ;;  %7707 = vmatpush1.bf16.xpose.msk.msra.mxu0 %vm7706_vm7, %v18318_v47 }
 0x5a1   : > { %v2419_v18 = vsel %vm2355_vm9, %v9477_v10, 256.0  ;;  %v2420_v29 = vsel %vm2356_vm3, %v9479_v24, 256.0 }
 0x5a2   : > { %v2287_v49 = vpop.xlane.xlu0 %2286  ;;  %v2506_v19 = vmin.f32 %v2419_v18, %v2420_v29 }
 0x5a3   : > { %vm2357_vm6 = vcmp.ge.f32.partialorder %v11138_v14, %v2287_v49  ;;  %vm2358_vm1 = vcmp.ge.f32.partialorder %v11144_v56, %v2287_v49  ;;  %v11499_v55 = vpop.xlane.xlu1 %2453 }
 0x5a4   : > { %v2421_v36 = vsel %vm2357_vm6, %v9477_v10, 256.0  ;;  %v2422_v20 = vsel %vm2358_vm1, %v9479_v24, 256.0  ;;  %vm17623_vm14 = vcmp.eq.f32.partialorder %v9477_v10, %v11499_v55  ;;  %vm17622_vm7 = vcmp.eq.f32.partialorder %v9479_v24, %v11499_v55  ;;  %2507 = vmin.xlane.f32.xlu1 %v2506_v19 }
 0x5a5   : > { %vm7710_vm9 = vmpackc.low %vm17623_vm14, %vm2541_vm13  ;;  %v2509_v12 = vmin.f32 %v2421_v36, %v2422_v20 }
 0x5a6   : > { %vm7708_vm3 = vmpackc.low %vm17622_vm7, %vm2542_vm0  ;;  %v11521_v18 = vpop.xlane.xlu0 %2456 }
 0x5a7   : > { %7709 = vmatprep.subr.msk.bf16.mxu0 %vm7708_vm3, %v18318_v47  ;;  %v2290_v29 = vpop.xlane.xlu1 %2289  ;;  %2510 = vmin.xlane.f32.xlu0 %v2509_v12  ;;  %vm17632_vm7 = vcmp.eq.f32.partialorder %v9477_v10, %v11521_v18 }
 0x5a8   : > { %vm2359_vm6 = vcmp.ge.f32.partialorder %v11172_v8, %v2290_v29  ;;  %vm2360_vm1 = vcmp.ge.f32.partialorder %v11178_v48, %v2290_v29  ;;  %7711 = vmatpush1.bf16.xpose.msk.msra.mxu0 %vm7710_vm9, %v18318_v47 }
 0x5a9   : > { %v2423_v49 = vsel %vm2359_vm6, %v9477_v10, 256.0  ;;  %v2424_v19 = vsel %vm2360_vm1, %v9479_v24, 256.0  ;;  %vm17631_vm1 = vcmp.eq.f32.partialorder %v9479_v24, %v11521_v18 }
 0x5aa   : > { %v2293_v36 = vpop.xlane.xlu0 %2292  ;;  %v2512_v20 = vmin.f32 %v2423_v49, %v2424_v19 }
 0x5ab   : > { %vm2361_vm14 = vcmp.ge.f32.partialorder %v11200_v6, %v2293_v36  ;;  %vm2362_vm3 = vcmp.ge.f32.partialorder %v11206_v1, %v2293_v36  ;;  %v11533_v12 = vpop.xlane.xlu1 %2459 }
 0x5ac   : > { %v2425_v8 = vsel %vm2361_vm14, %v9477_v10, 256.0  ;;  %v2426_v29 = vsel %vm2362_vm3, %v9479_v24, 256.0  ;;  %vm17629_vm9 = vcmp.eq.f32.partialorder %v9477_v10, %v11533_v12  ;;  %vm17628_vm6 = vcmp.eq.f32.partialorder %v9479_v24, %v11533_v12  ;;  %2513 = vmin.xlane.f32.xlu1 %v2512_v20 }
 0x5ad   : > { %vm7714_vm10 = vmpackc.low %vm17629_vm9, %vm17632_vm7  ;;  %v2515_v49 = vmin.f32 %v2425_v8, %v2426_v29 }
 0x5ae   : > { %vm7712_vm14 = vmpackc.low %vm17628_vm6, %vm17631_vm1  ;;  %v11555_v19 = vpop.xlane.xlu0 %2462 }
 0x5af   : > { %7713 = vmatprep.subr.msk.bf16.mxu0 %vm7712_vm14, %v18318_v47  ;;  %v2296_v36 = vpop.xlane.xlu1 %2295  ;;  %2516 = vmin.xlane.f32.xlu0 %v2515_v49  ;;  %vm2549_vm6 = vcmp.eq.f32.partialorder %v9477_v10, %v11555_v19 }
 0x5b0   : > { %vm2363_vm3 = vcmp.ge.f32.partialorder %v11234_v52, %v2296_v36  ;;  %vm2364_vm5 = vcmp.ge.f32.partialorder %v11240_v5, %v2296_v36  ;;  %7715 = vmatpush1.bf16.xpose.msk.msra.mxu0 %vm7714_vm10, %v18318_v47 }
 0x5b1   : > { %v2427_v8 = vsel %vm2363_vm3, %v9477_v10, 256.0  ;;  %v2428_v20 = vsel %vm2364_vm5, %v9479_v24, 256.0  ;;  %vm17637_vm3 = vcmp.eq.f32.partialorder %v9479_v24, %v11555_v19 }
 0x5b2   : > { %v2299_v29 = vpop.xlane.xlu0 %2298  ;;  %v2518_v1 = vmin.f32 %v2427_v8, %v2428_v20 }
 0x5b3   : > { %vm2365_vm9 = vcmp.ge.f32.partialorder %v11262_v32, %v2299_v29  ;;  %vm2366_vm14 = vcmp.ge.f32.partialorder %v11268_v53, %v2299_v29  ;;  %v11567_v49 = vpop.xlane.xlu1 %2465  ;;  %v18400_v32 = vmov 0  }
 0x5b4   : > { %v2429_v52 = vsel %vm2365_vm9, %v9477_v10, 256.0  ;;  %v2430_v36 = vsel %vm2366_vm14, %v9479_v24, 256.0  ;;  %vm17635_vm10 = vcmp.eq.f32.partialorder %v9477_v10, %v11567_v49  ;;  %vm17634_vm5 = vcmp.eq.f32.partialorder %v9479_v24, %v11567_v49  ;;  %2519 = vmin.xlane.f32.xlu1 %v2518_v1 }
 0x5b5   : > { %vm7718_vm1 = vmpackc.low %vm17635_vm10, %vm2549_vm6  ;;  %v2521_v8 = vmin.f32 %v2429_v52, %v2430_v36 }
 0x5b6   : > { %vm7716_vm9 = vmpackc.low %vm17634_vm5, %vm17637_vm3  ;;  %v11589_v20 = vpop.xlane.xlu0 %2468 }
 0x5b7   : > { %7717 = vmatprep.subr.msk.bf16.mxu0 %vm7716_vm9, %v18318_v47  ;;  %v2302_v1 = vpop.xlane.xlu1 %2301  ;;  %2522 = vmin.xlane.f32.xlu0 %v2521_v8  ;;  %vm2553_vm5 = vcmp.eq.f32.partialorder %v9477_v10, %v11589_v20 }
 0x5b8   : > { %vm2367_vm14 = vcmp.ge.f32.partialorder %v11296_v23, %v2302_v1  ;;  %vm2368_vm7 = vcmp.ge.f32.partialorder %v11302_v4, %v2302_v1  ;;  %7719 = vmatpush1.bf16.xpose.msk.msra.mxu0 %vm7718_vm1, %v18318_v47  ;;  %v18397_v4 = vld [vmem:[#allocation42_spill] sm:$0xff] }
 0x5b9   : > { %v2431_v52 = vsel %vm2367_vm14, %v9477_v10, 256.0  ;;  %v2432_v29 = vsel %vm2368_vm7, %v9479_v24, 256.0  ;;  %vm2554_vm14 = vcmp.eq.f32.partialorder %v9479_v24, %v11589_v20 }
 0x5ba   : > { %v2305_v36 = vpop.xlane.xlu0 %2304  ;;  %v2524_v53 = vmin.f32 %v2431_v52, %v2432_v29  ;;  %v11621_v29 = vsel %vm2533_vm12, -3e+38, %v10558_v40 }
 0x5bb   : > { %vm2369_vm10 = vcmp.ge.f32.partialorder %v11324_v62, %v2305_v36  ;;  %vm2370_vm9 = vcmp.ge.f32.partialorder %v11330_v9, %v2305_v36  ;;  %v11601_v8 = vpop.xlane.xlu1 %2471  ;;  %18373 = vst [vmem:[#allocation37_spill] sm:$0xff] %v11621_v29  ;;  %v18395_v9 = vld [vmem:[#allocation20_spill] sm:$0xff] }
 0x5bc   : > { %v2433_v23 = vsel %vm2369_vm10, %v9477_v10, 256.0  ;;  %v2434_v1 = vsel %vm2370_vm9, %v9479_v24, 256.0  ;;  %vm2555_vm1 = vcmp.eq.f32.partialorder %v9477_v10, %v11601_v8  ;;  %vm2556_vm7 = vcmp.eq.f32.partialorder %v9479_v24, %v11601_v8  ;;  %2525 = vmin.xlane.f32.xlu1 %v2524_v53 }
 0x5bd   : > { %vm7722_vm3 = vmpackc.low %vm2555_vm1, %vm2553_vm5  ;;  %v2527_v52 = vmin.f32 %v2433_v23, %v2434_v1  ;;  %v11627_v53 = vsel %vm2534_vm4, -3e+38, %v18326_v16  ;;  %v11649_v1 = vsel %vm2537_vm15, -3e+38, %v10596_v46 }
 0x5be   : > { %18374 = vst [vmem:[#allocation38_spill] sm:$0xff] %v11627_v53  ;;  %vm7720_vm10 = vmpackc.low %vm2556_vm7, %vm2554_vm14  ;;  %v11636_v36 = vpop.xlane.xlu0 %2474  ;;  %v2927_v28 = vmax.f32 %v11621_v29, %v11627_v53 }
 0x5bf   : > { %7721 = vmatprep.subr.msk.bf16.mxu0 %vm7720_vm10, %v18318_v47  ;;  %2528 = vmin.xlane.f32.xlu0 %v2527_v52  ;;  %18375 = vst [vmem:[#allocation39_spill] sm:$0xff] %v11649_v1  ;;  %v11655_v52 = vsel %vm2538_vm11, -3e+38, %v10601_v59  ;;  %vm2557_vm4 = vcmp.eq.f32.partialorder %v9477_v10, %v11636_v36 }
 0x5c0   : > { %v2308_v23 = vpop.xlane.xlu1 %2307  ;;  %7723 = vmatpush1.bf16.xpose.msk.msra.mxu0 %vm7722_vm3, %v18318_v47  ;;  %18376 = vst [vmem:[#allocation40_spill] sm:$0xff] %v11655_v52  ;;  %v2933_v59 = vmax.f32 %v11649_v1, %v11655_v52 }
 0x5c1   : > { %vm2371_vm12 = vcmp.ge.f32.partialorder %v11358_v22, %v2308_v23  ;;  %vm2372_vm9 = vcmp.ge.f32.partialorder %v11364_v51, %v2308_v23  ;;  %v11661_v51 = vsel %vm2535_vm8, -3e+38, %v18330_v15  ;;  %v11667_v22 = vsel %vm2536_vm2, -3e+38, %v18331_v39 }
 0x5c2   : > { %v2435_v40 = vsel %vm2371_vm12, %v9477_v10, 256.0  ;;  %v2436_v16 = vsel %vm2372_vm9, %v9479_v24, 256.0  ;;  %vm2558_vm8 = vcmp.eq.f32.partialorder %v9479_v24, %v11636_v36  ;;  %v11691_v15 = vsel %vm2541_vm13, -3e+38, %v10640_v31  ;;  %v11699_v7 = vpop.xlane.xlu0 %2480  ;;  %v18408_v36 = vld [vmem:[#allocation48_spill] sm:$0xff] }
 0x5c3   : > { %v2530_v23 = vmin.f32 %v2435_v40, %v2436_v16  ;;  %2928 = vmax.xlane.f32.xlu0 %v2927_v28  ;;  %v11697_v39 = vsel %vm2542_vm0, -3e+38, %v10645_v13  ;;  %v2930_v35 = vmax.f32 %v11661_v51, %v11667_v22  ;;  %vm18377_vm13 = vcmp.eq.f32.partialorder %v9477_v10, %v11465_v25 }
 0x5c4   : > { %v11669_v46 = vpop.xlane.xlu1 %2477  ;;  %v11713_v31 = vsel %vm18377_vm13, -3e+38, %v10622_v57  ;;  %vm18378_vm0 = vcmp.eq.f32.partialorder %v9479_v24, %v11465_v25  ;;  %vm2562_vm12 = vcmp.eq.f32.partialorder %v9479_v24, %v11699_v7  ;;  %v2939_v57 = vmax.f32 %v11691_v15, %v11697_v39  ;;  %v11731_v25 = vld [vmem:[#allocation8 + $0x8] sm:$0xff]  }
 0x5c5   : > { %vm2559_vm15 = vcmp.eq.f32.partialorder %v9477_v10, %v11669_v46  ;;  %vm2560_vm11 = vcmp.eq.f32.partialorder %v9479_v24, %v11669_v46  ;;  %2531 = vmin.xlane.f32.xlu1 %v2530_v23  ;;  %v11719_v13 = vsel %vm18378_vm0, -3e+38, %v10625_v54  ;;  %18379 = vst [vmem:[#allocation41_spill] sm:$0xff] %v11731_v25  ;;  %vm18380_vm9 = vcmp.eq.f32.partialorder %v9477_v10, %v11521_v18  ;;  %v18385_v23 = vld [vmem:[#allocation27_spill] sm:$0xff] }
 0x5c6   : > { %vm7726_vm2 = vmpackc.low %vm2559_vm15, %vm2557_vm4  ;;  %v11737_v54 = vsel %vm18380_vm9, -3e+38, %v10684_v37  ;;  %v2936_v16 = vmax.f32 %v11713_v31, %v11719_v13  ;;  %vm18382_vm13 = vcmp.eq.f32.partialorder %v9477_v10, %v11499_v55  ;;  %vm18383_vm0 = vcmp.eq.f32.partialorder %v9479_v24, %v11499_v55  ;;  %v2487_v28 = vpop.xlane.xlu0 %2486 }
 0x5c7   : > { %vm7724_vm3 = vmpackc.low %vm2560_vm11, %vm2558_vm8  ;;  %2934 = vmax.xlane.f32.xlu0 %v2933_v59  ;;  %v11757_v37 = vsel %vm18382_vm13, -3e+38, %v10666_v33  ;;  %v11784_v55 = vsel %vm2549_vm6, -3e+38, %v10728_v43  ;;  %v18389_v43 = vld [vmem:[#allocation26_spill] sm:$0xff]  ;;  %vm18390_vm6 = vcmp.eq.f32.partialorder %v9479_v24, %v11533_v12 }
 0x5c8   : > { %7725 = vmatprep.subr.msk.bf16.mxu0 %vm7724_vm3, %v18318_v47  ;;  %v11722_v42 = vpop.xlane.xlu1 %2483 }
 0x5c9   : > { %vm17641_vm10 = vcmp.eq.f32.partialorder %v9479_v24, %v11722_v42  ;;  %7727 = vmatpush1.bf16.xpose.msk.msra.mxu0 %vm7726_vm2, %v18318_v47  ;;  %2931 = vmax.xlane.f32.xlu1 %v2930_v35  ;;  %vm18381_vm2 = vcmp.eq.f32.partialorder %v9479_v24, %v11521_v18  ;;  %vm2563_vm9 = vcmp.eq.f32.partialorder %v9477_v10, %v11722_v42 }
 0x5ca   : > { %v11743_v40 = vsel %vm18381_vm2, -3e+38, %v10689_v3  ;;  %vm7728_vm3 = vmpackc.low %vm17641_vm10, %vm2562_vm12  ;;  %v11763_v3 = vsel %vm18383_vm0, -3e+38, %v10669_v58  ;;  %vm18384_vm2 = vcmask 130048   ;;  %vm2561_vm0 = vcmp.eq.f32.partialorder %v9477_v10, %v11699_v7 }
 0x5cb   : > { %7729 = vmatprep.subr.msk.bf16.mxu0 %vm7728_vm3, %v18318_v47  ;;  %2940 = vmax.xlane.f32.xlu0 %v2939_v57  ;;  %v2945_v33 = vmax.f32 %v11737_v54, %v11743_v40  ;;  %v11777_v58 = vld [vmem:[%s9231_s2 + $0x4] ss:$8 sps:$4 sm:$0xff]   ;;  %vm18386_vm3 = vcmp.eq.f32.partialorder %v9479_v24, %v11555_v19  ;;  %v2942_v35 = vmax.f32 %v11757_v37, %v11763_v3  ;;  %vm7730_vm10 = vmpackc.low %vm2563_vm9, %vm2561_vm0  ;;  %v2493_v20 = vpop.xlane.xlu0 %2492  ;;  %v11947_v46 = vsel %vm2563_vm9, -3e+38, %v18367_v61 }
 0x5cc   : > { %v11766_v18 = vpop.xlane.xlu1 %2489  ;;  %7505 = vmatmul.mubr.msk.bf16.gmra.mrb[12].mxu1 %vm18384_vm2, %v11731_v25  ;;  %v11790_v59 = vsel %vm18386_vm3, -3e+38, %v18385_v23  ;;  %v18387_v57 = vld [vmem:[#allocation23_spill] sm:$0xff]  ;;  %vm18388_vm2 = vcmp.eq.f32.partialorder %v9477_v10, %v11533_v12  ;;  %v11806_v25 = vsel %vm18390_vm6, -3e+38, %v18389_v43  ;;  %vm2566_vm3 = vcmp.eq.f32.partialorder %v9479_v24, %v2487_v28  ;;  %v18391_v19 = vld [vmem:[#allocation45_spill] sm:$0xff] }
 0x5cd   : > { %2937 = vmax.xlane.f32.xlu1 %v2936_v16  ;;  %vm2568_vm13 = vcmp.eq.f32.partialorder %v9479_v24, %v11766_v18  ;;  %2075 = vmatprep.mubr.bf16.mxu1 %v11777_v58  ;;  %v11800_v16 = vsel %vm18388_vm2, -3e+38, %v18387_v57  ;;  %v2951_v12 = vmax.f32 %v11784_v55, %v11790_v59  ;;  %v18393_v23 = vld [vmem:[#allocation46_spill] sm:$0xff]  ;;  %18414 = vst [vmem:[#allocation26_spill] sm:$0xff] %v11947_v46 }
 0x5ce   : > { %vm7732_vm2 = vmpackc.low %vm2568_vm13, %vm2566_vm3  ;;  %v2948_v43 = vmax.f32 %v11800_v16, %v11806_v25 }
 0x5cf   : > { %2946 = vmax.xlane.f32.xlu0 %v2945_v33  ;;  %v11828_v33 = vsel %vm2553_vm5, -3e+38, %v18391_v19  ;;  %vm18398_vm5 = vcmp.eq.f32.partialorder %v9479_v24, %v11567_v49 }
 0x5d0   : > { %18392 = vst [vmem:[#allocation50_spill] sm:$0xff] %v11828_v33  ;;  %v2496_v57 = vpop.xlane.xlu1 %2495  ;;  %v11848_v19 = vsel %vm18398_vm5, -3e+38, %v18397_v4 }
 0x5d1   : > { %7731 = vmatpush1.bf16.xpose.msk.msra.mxu0 %vm7730_vm10, %v18318_v47  ;;  %2943 = vmax.xlane.f32.xlu1 %v2942_v35  ;;  %v11834_v35 = vsel %vm2554_vm14, -3e+38, %v18393_v23  ;;  %vm18396_vm10 = vcmp.eq.f32.partialorder %v9477_v10, %v11567_v49  ;;  %18399 = vst [vmem:[#allocation54_spill] sm:$0xff] %v11848_v19  ;;  %vm2567_vm14 = vcmp.eq.f32.partialorder %v9477_v10, %v11766_v18  ;;  %v11853_v23 = vld [vmem:[%s9231_s2] ss:$8 sps:$4 sm:$0xff]  }
 0x5d2   : > { %7733 = vmatprep.subr.msk.bf16.mxu0 %vm7732_vm2, %v18318_v47  ;;  %18394 = vst [vmem:[#allocation51_spill] sm:$0xff] %v11834_v35  ;;  %v11842_v62 = vsel %vm18396_vm10, -3e+38, %v18395_v9  ;;  %vm2572_vm6 = vcmp.eq.f32.partialorder %v9479_v24, %v2496_v57  ;;  %v2957_v9 = vmax.f32 %v11828_v33, %v11834_v35  ;;  %v18401_v49 = vld [vmem:[#allocation52_spill] sm:$0xff]  ;;  %vm2565_vm2 = vcmp.eq.f32.partialorder %v9477_v10, %v2487_v28  ;;  %v18404_v35 = vld [vmem:[#allocation43_spill] sm:$0xff] }
 0x5d3   : > { %2952 = vmax.xlane.f32.xlu0 %v2951_v12  ;;  %v11864_v4 = vsel %vm2557_vm4, -3e+38, %v18401_v49  ;;  %v18402_v12 = vld [vmem:[#allocation53_spill] sm:$0xff]  ;;  %v2954_v5 = vmax.f32 %v11842_v62, %v11848_v19  ;;  %v18406_v33 = vld [vmem:[#allocation44_spill] sm:$0xff]  ;;  %vm2570_vm4 = vcmp.eq.f32.partialorder %v9479_v24, %v2493_v20 }
 0x5d4   : > { %2076 = vmatmul.mubr.bf16.vlgmr.msra.gmra.mrb[16].mxu1 %v11853_v23  ;;  %v11885_v49 = vsel %vm2556_vm7, -3e+38, %v18406_v33  ;;  %v11905_v33 = vsel %vm2561_vm0, -3e+38, %v18408_v36  ;;  %v11925_v36 = vsel %vm2560_vm11, -3e+38, %v18364_v17  ;;  %vm2571_vm7 = vcmp.eq.f32.partialorder %v9477_v10, %v2496_v57 }
 0x5d5   : > { %2949 = vmax.xlane.f32.xlu1 %v2948_v43  ;;  %2120 = vmatprep.mubr.bf16.mxu1 %v18400_v32  ;;  %v11870_v43 = vsel %vm2558_vm8, -3e+38, %v18402_v12  ;;  %v11879_v32 = vsel %vm2555_vm1, -3e+38, %v18404_v35  ;;  %18407 = vst [vmem:[#allocation56_spill] sm:$0xff] %v11885_v49  ;;  %vm7734_vm8 = vmpackc.low %vm2567_vm14, %vm2565_vm2  ;;  %v18409_v35 = vld [vmem:[#allocation49_spill] sm:$0xff]  ;;  %vm18416_vm11 = vcmp.eq.f32.partialorder %v9479_v24, %v11722_v42 }
 0x5d6   : > { %18403 = vst [vmem:[#allocation18_spill] sm:$0xff] %v11870_v43  ;;  %18405 = vst [vmem:[#allocation55_spill] sm:$0xff] %v11879_v32  ;;  %v2963_v8 = vmax.f32 %v11864_v4, %v11870_v43  ;;  %v18410_v12 = vld [vmem:[#allocation47_spill] sm:$0xff]  ;;  %v18418_v28 = vld [vmem:[#allocation24_spill] sm:$0xff]  ;;  %v11966_v61 = vsel %vm2570_vm4, -3e+38, %v18370_v34 }
 0x5d7   : > { %2958 = vmax.xlane.f32.xlu0 %v2957_v9  ;;  %vm7736_vm1 = vmpackc.low %vm2572_vm6, %vm2570_vm4  ;;  %v2960_v9 = vmax.f32 %v11879_v32, %v11885_v49  ;;  %v11919_v43 = vsel %vm2559_vm15, -3e+38, %v18410_v12  ;;  %18412 = vst [vmem:[#allocation27_spill] sm:$0xff] %v11925_v36  ;;  %v11938_v12 = vsel %vm2566_vm3, -3e+38, %v18366_v45  ;;  %vm2569_vm15 = vcmp.eq.f32.partialorder %v9477_v10, %v2493_v20 }
 0x5d8   : > { %18411 = vst [vmem:[#allocation57_spill] sm:$0xff] %v11919_v43  ;;  %v2966_v17 = vmax.f32 %v11919_v43, %v11925_v36  ;;  %18420 = vst [vmem:[#allocation20_spill] sm:$0xff] %v11966_v61 }
 0x5d9   : > { %7735 = vmatpush1.bf16.xpose.msk.msra.mxu0 %vm7734_vm8, %v18318_v47  ;;  %2955 = vmax.xlane.f32.xlu1 %v2954_v5  ;;  %v11911_v5 = vsel %vm2562_vm12, -3e+38, %v18409_v35  ;;  %v11933_v35 = vsel %vm2565_vm2, -3e+38, %v18365_v44  ;;  %vm7738_vm12 = vmpackc.low %vm2571_vm7, %vm2569_vm15 }
 0x5da   : > { %7737 = vmatprep.subr.msk.bf16.mxu0 %vm7736_vm1, %v18318_v47  ;;  %v2969_v7 = vmax.f32 %v11905_v33, %v11911_v5  ;;  %18413 = vst [vmem:[#allocation23_spill] sm:$0xff] %v11933_v35  ;;  %v2975_v45 = vmax.f32 %v11933_v35, %v11938_v12 }
 0x5db   : > { %2964 = vmax.xlane.f32.xlu0 %v2963_v8  ;;  %v18415_v8 = vld [vmem:[#allocation19_spill] sm:$0xff] }
 0x5dc   : > { %v11953_v44 = vsel %vm18416_vm11, -3e+38, %v18415_v8  ;;  %v11989_v8 = vsel %vm2571_vm7, -3e+38, %v10946_v11 }
 0x5dd   : > { %2961 = vmax.xlane.f32.xlu1 %v2960_v9  ;;  %18417 = vst [vmem:[#allocation45_spill] sm:$0xff] %v11953_v44  ;;  %v11961_v9 = vsel %vm2569_vm15, -3e+38, %v18418_v28  ;;  %v2972_v42 = vmax.f32 %v11947_v46, %v11953_v44  ;;  %18423 = vst [vmem:[#allocation53_spill] sm:$0xff] %v11989_v8 }
 0x5de   : > { %18419 = vst [vmem:[#allocation46_spill] sm:$0xff] %v11961_v9  ;;  %v2981_v34 = vmax.f32 %v11961_v9, %v11966_v61 }
 0x5df   : > { %2970 = vmax.xlane.f32.xlu0 %v2969_v7  ;;  %v11974_v7 = vsel %vm2567_vm14, -3e+38, %v18371_v26  ;;  %v11994_v26 = vsel %vm2572_vm6, -3e+38, %v10949_v60 }
 0x5e0   : > { %18421 = vst [vmem:[#allocation42_spill] sm:$0xff] %v11974_v7  ;;  %18424 = vst [vmem:[#allocation43_spill] sm:$0xff] %v11994_v26 }
 0x5e1   : > { %7739 = vmatpush1.bf16.xpose.msk.msra.mxu0 %vm7738_vm12, %v18318_v47  ;;  %2967 = vmax.xlane.f32.xlu1 %v2966_v17  ;;  %v11980_v17 = vsel %vm2568_vm13, -3e+38, %v18372_v21  ;;  %v2984_v21 = vmax.f32 %v11989_v8, %v11994_v26 }
 0x5e2   : > { %18422 = vst [vmem:[#allocation52_spill] sm:$0xff] %v11980_v17  ;;  %v2978_v20 = vmax.f32 %v11974_v7, %v11980_v17 }
 0x5e3   : > { %2976 = vmax.xlane.f32.xlu0 %v2975_v45 }
 0x5e5   : > { %2973 = vmax.xlane.f32.xlu1 %v2972_v42 }
 0x5e7   : > { %2982 = vmax.xlane.f32.xlu0 %v2981_v34 }
 0x5e9   : > { %2979 = vmax.xlane.f32.xlu1 %v2978_v20 }
 0x5ed   : > { %2985 = vmax.xlane.f32.xlu1 %v2984_v21 }
 0x624   : > { %v11998_v18 = vpop.xlane.xlu0 %2498 }
 0x625   : > { %vm2573_vm9 = vcmp.eq.f32.partialorder %v9477_v10, %v11998_v18  ;;  %vm2574_vm3 = vcmp.eq.f32.partialorder %v9479_v24, %v11998_v18 }
 0x629   : > { %v12000_v45 = vpop.xlane.xlu1 %2501 }
 0x62a   : > { %vm2575_vm13 = vcmp.eq.f32.partialorder %v9477_v10, %v12000_v45  ;;  %vm2576_vm0 = vcmp.eq.f32.partialorder %v9479_v24, %v12000_v45 }
 0x62b   : > { %vm7742_vm10 = vmpackc.low %vm2575_vm13, %vm2573_vm9 }
 0x62c   : > { %vm7740_vm5 = vmpackc.low %vm2576_vm0, %vm2574_vm3  ;;  %v12024_v11 = vpop.xlane.xlu0 %2504 }
 0x62d   : > { %7741 = vmatprep.subr.msk.bf16.mxu0 %vm7740_vm5, %v18318_v47  ;;  %vm2577_vm14 = vcmp.eq.f32.partialorder %v9477_v10, %v12024_v11  ;;  %vm2578_vm4 = vcmp.eq.f32.partialorder %v9479_v24, %v12024_v11 }
 0x62e   : > { %7743 = vmatpush1.bf16.xpose.msk.msra.mxu0 %vm7742_vm10, %v18318_v47 }
 0x631   : > { %v12026_v60 = vpop.xlane.xlu1 %2507 }
 0x632   : > { %vm2579_vm6 = vcmp.eq.f32.partialorder %v9477_v10, %v12026_v60  ;;  %vm2580_vm2 = vcmp.eq.f32.partialorder %v9479_v24, %v12026_v60 }
 0x633   : > { %vm7746_vm8 = vmpackc.low %vm2579_vm6, %vm2577_vm14 }
 0x634   : > { %vm7744_vm1 = vmpackc.low %vm2580_vm2, %vm2578_vm4  ;;  %v12050_v57 = vpop.xlane.xlu0 %2510 }
 0x635   : > { %7745 = vmatprep.subr.msk.bf16.mxu0 %vm7744_vm1, %v18318_v47  ;;  %vm17664_vm7 = vcmp.eq.f32.partialorder %v9477_v10, %v12050_v57  ;;  %vm17655_vm12 = vcmp.eq.f32.partialorder %v9479_v24, %v12050_v57 }
 0x636   : > { %7747 = vmatpush1.bf16.xpose.msk.msra.mxu0 %vm7746_vm8, %v18318_v47 }
 0x639   : > { %v12052_v28 = vpop.xlane.xlu1 %2513 }
 0x63a   : > { %vm17653_vm15 = vcmp.eq.f32.partialorder %v9477_v10, %v12052_v28  ;;  %vm17654_vm11 = vcmp.eq.f32.partialorder %v9479_v24, %v12052_v28 }
 0x63b   : > { %vm7750_vm10 = vmpackc.low %vm17653_vm15, %vm17664_vm7 }
 0x63c   : > { %vm7748_vm5 = vmpackc.low %vm17654_vm11, %vm17655_vm12  ;;  %v12076_v42 = vpop.xlane.xlu0 %2516 }
 0x63d   : > { %7749 = vmatprep.subr.msk.bf16.mxu0 %vm7748_vm5, %v18318_v47  ;;  %vm17657_vm8 = vcmp.eq.f32.partialorder %v9477_v10, %v12076_v42  ;;  %vm17663_vm11 = vcmp.eq.f32.partialorder %v9479_v24, %v12076_v42 }
 0x63e   : > { %7751 = vmatpush1.bf16.xpose.msk.msra.mxu0 %vm7750_vm10, %v18318_v47 }
 0x641   : > { %v12078_v34 = vpop.xlane.xlu1 %2519 }
 0x642   : > { %vm17656_vm1 = vcmp.eq.f32.partialorder %v9477_v10, %v12078_v34  ;;  %vm17658_vm15 = vcmp.eq.f32.partialorder %v9479_v24, %v12078_v34 }
 0x643   : > { %vm7754_vm10 = vmpackc.low %vm17656_vm1, %vm17657_vm8 }
 0x644   : > { %vm7752_vm5 = vmpackc.low %vm17658_vm15, %vm17663_vm11  ;;  %v12102_v20 = vpop.xlane.xlu0 %2522 }
 0x645   : > { %7753 = vmatprep.subr.msk.bf16.mxu0 %vm7752_vm5, %v18318_v47  ;;  %vm2589_vm12 = vcmp.eq.f32.partialorder %v9477_v10, %v12102_v20  ;;  %vm17673_vm15 = vcmp.eq.f32.partialorder %v9479_v24, %v12102_v20 }
 0x646   : > { %7755 = vmatpush1.bf16.xpose.msk.msra.mxu0 %vm7754_vm10, %v18318_v47 }
 0x649   : > { %v12104_v21 = vpop.xlane.xlu1 %2525 }
 0x64a   : > { %vm17665_vm1 = vcmp.eq.f32.partialorder %v9477_v10, %v12104_v21  ;;  %vm17672_vm8 = vcmp.eq.f32.partialorder %v9479_v24, %v12104_v21 }
 0x64b   : > { %vm7758_vm10 = vmpackc.low %vm17665_vm1, %vm2589_vm12 }
 0x64c   : > { %vm7756_vm5 = vmpackc.low %vm17672_vm8, %vm17673_vm15  ;;  %v12126_v26 = vpop.xlane.xlu0 %2528 }
 0x64d   : > { %7757 = vmatprep.subr.msk.bf16.mxu0 %vm7756_vm5, %v18318_v47  ;;  %vm2593_vm11 = vcmp.eq.f32.partialorder %v9477_v10, %v12126_v26  ;;  %vm2594_vm5 = vcmp.eq.f32.partialorder %v9479_v24, %v12126_v26 }
 0x64e   : > { %7759 = vmatpush1.bf16.xpose.msk.msra.mxu0 %vm7758_vm10, %v18318_v47 }
 0x650   : > { %v2929_v8 = vpop.xlane.xlu0 %2928 }
 0x651   : > { %vm3023_vm7 = vcmp.ge.f32.partialorder %v11621_v29, %v2929_v8  ;;  %vm3024_vm1 = vcmp.ge.f32.partialorder %v11627_v53, %v2929_v8  ;;  %v12154_v53 = vsel %vm2573_vm9, -3e+38, %v11026_v27  ;;  %v12160_v29 = vsel %vm2574_vm3, -3e+38, %v11032_v38 }
 0x652   : > { %v12134_v17 = vpop.xlane.xlu1 %2531  ;;  %v3087_v7 = vsel %vm3023_vm7, %v9477_v10, 256.0  ;;  %v3088_v61 = vsel %vm3024_vm1, %v9479_v24, 256.0  ;;  %v2987_v18 = vmax.f32 %v12154_v53, %v12160_v29 }
 0x653   : > { %vm17676_vm8 = vcmp.eq.f32.partialorder %v9477_v10, %v12134_v17  ;;  %vm2596_vm10 = vcmp.eq.f32.partialorder %v9479_v24, %v12134_v17  ;;  %v3151_v8 = vmin.f32 %v3087_v7, %v3088_v61 }
 0x654   : > { %vm7762_vm15 = vmpackc.low %vm17676_vm8, %vm2593_vm11  ;;  %v2935_v61 = vpop.xlane.xlu0 %2934 }
 0x655   : > { %vm7760_vm7 = vmpackc.low %vm2596_vm10, %vm2594_vm5  ;;  %vm3027_vm1 = vcmp.ge.f32.partialorder %v11649_v1, %v2935_v61  ;;  %vm3028_vm9 = vcmp.ge.f32.partialorder %v11655_v52, %v2935_v61  ;;  %3152 = vmin.xlane.f32.xlu0 %v3151_v8  ;;  %v12184_v8 = vsel %vm2575_vm13, -3e+38, %v11054_v63  ;;  %v12198_v63 = vsel %vm2577_vm14, -3e+38, %v11080_v0 }
 0x656   : > { %7761 = vmatprep.subr.msk.bf16.mxu0 %vm7760_vm7, %v18318_v47  ;;  %v2932_v27 = vpop.xlane.xlu1 %2931  ;;  %v3091_v9 = vsel %vm3027_vm1, %v9477_v10, 256.0  ;;  %v3092_v1 = vsel %vm3028_vm9, %v9479_v24, 256.0  ;;  %18425 = vst [vmem:[#allocation44_spill] sm:$0xff] %v12184_v8  ;;  %vm18428_vm7 = vcmp.eq.f32.partialorder %v9477_v10, %v12050_v57  ;;  %vm18432_vm9 = vcmp.eq.f32.partialorder %v9477_v10, %v12052_v28 }
 0x657   : > { %vm3025_vm8 = vcmp.ge.f32.partialorder %v11661_v51, %v2932_v27  ;;  %vm3026_vm3 = vcmp.ge.f32.partialorder %v11667_v22, %v2932_v27  ;;  %7763 = vmatpush1.bf16.xpose.msk.msra.mxu0 %vm7762_vm15, %v18318_v47  ;;  %v12190_v27 = vsel %vm2576_vm0, -3e+38, %v11060_v2  ;;  %v12204_v2 = vsel %vm2578_vm4, -3e+38, %v11086_v30 }
 0x658   : > { %v3089_v38 = vsel %vm3025_vm8, %v9477_v10, 256.0  ;;  %v3090_v7 = vsel %vm3026_vm3, %v9479_v24, 256.0  ;;  %v2941_v52 = vpop.xlane.xlu0 %2940  ;;  %18426 = vst [vmem:[#allocation48_spill] sm:$0xff] %v12204_v2  ;;  %v2990_v45 = vmax.f32 %v12184_v8, %v12190_v27  ;;  %v2993_v30 = vmax.f32 %v12198_v63, %v12204_v2 }
 0x659   : > { %v3154_v61 = vmin.f32 %v3089_v38, %v3090_v7  ;;  %2988 = vmax.xlane.f32.xlu0 %v2987_v18  ;;  %v3157_v38 = vmin.f32 %v3091_v9, %v3092_v1  ;;  %vm3031_vm13 = vcmp.ge.f32.partialorder %v11691_v15, %v2941_v52  ;;  %vm3032_vm0 = vcmp.ge.f32.partialorder %v11697_v39, %v2941_v52 }
 0x65a   : > { %v2938_v47 = vpop.xlane.xlu1 %2937  ;;  %v3095_v9 = vsel %vm3031_vm13, %v9477_v10, 256.0  ;;  %v3096_v11 = vsel %vm3032_vm0, %v9479_v24, 256.0  ;;  %v12222_v52 = vsel %vm2579_vm6, -3e+38, %v11108_v41  ;;  %v12236_v41 = vsel %vm18428_vm7, -3e+38, %v11138_v14 }
 0x65b   : > { %vm3029_vm15 = vcmp.ge.f32.partialorder %v11713_v31, %v2938_v47  ;;  %vm3030_vm8 = vcmp.ge.f32.partialorder %v11719_v13, %v2938_v47  ;;  %3155 = vmin.xlane.f32.xlu1 %v3154_v61  ;;  %18427 = vst [vmem:[#allocation49_spill] sm:$0xff] %v12222_v52  ;;  %v3163_v18 = vmin.f32 %v3095_v9, %v3096_v11 }
 0x65c   : > { %v3093_v47 = vsel %vm3029_vm15, %v9477_v10, 256.0  ;;  %v3094_v1 = vsel %vm3030_vm8, %v9479_v24, 256.0  ;;  %vm18429_vm6 = vcmp.eq.f32.partialorder %v9479_v24, %v12050_v57  ;;  %vm18434_vm3 = vcmp.eq.f32.partialorder %v9479_v24, %v12052_v28 }
 0x65d   : > { %3158 = vmin.xlane.f32.xlu0 %v3157_v38  ;;  %v3160_v7 = vmin.f32 %v3093_v47, %v3094_v1  ;;  %v12264_v9 = vsel %vm18434_vm3, -3e+38, %v11178_v48  ;;  %vm18435_vm13 = vcmp.eq.f32.partialorder %v9477_v10, %v12076_v42  ;;  %vm18437_vm0 = vcmp.eq.f32.partialorder %v9479_v24, %v12076_v42 }
 0x65e   : > { %2790 = vmatmul.mubr.bf16.vlgmr.msra.gmra.mrb[68].mxu0 %v11853_v23  ;;  %v2944_v0 = vpop.xlane.xlu1 %2943  ;;  %v2947_v23 = vpop.xlane.xlu0 %2946  ;;  %vm18440_vm7 = vcmp.eq.f32.partialorder %v9477_v10, %v12078_v34 }
 0x65f   : > { %2991 = vmax.xlane.f32.xlu1 %v2990_v45  ;;  %4217 = vmatprep.mubr.bf16.mxu0 %v11777_v58  ;;  %v12228_v58 = vsel %vm2580_vm2, -3e+38, %v11114_v50  ;;  %vm3033_vm14 = vcmp.ge.f32.partialorder %v11757_v37, %v2944_v0  ;;  %vm3034_vm4 = vcmp.ge.f32.partialorder %v11763_v3, %v2944_v0  ;;  %v12242_v50 = vsel %vm18429_vm6, -3e+38, %v11144_v56  ;;  %v18431_v0 = vld [vmem:[#allocation21_spill] sm:$0xff] }
 0x660   : > { %18430 = vst [vmem:[#allocation47_spill] sm:$0xff] %v12242_v50  ;;  %v2996_v60 = vmax.f32 %v12222_v52, %v12228_v58  ;;  %vm3035_vm2 = vcmp.ge.f32.partialorder %v11737_v54, %v2947_v23  ;;  %vm3036_vm1 = vcmp.ge.f32.partialorder %v11743_v40, %v2947_v23  ;;  %v3097_v61 = vsel %vm3033_vm14, %v9477_v10, 256.0  ;;  %v18436_v23 = vld [vmem:[#allocation28_spill] sm:$0xff] }
 0x661   : > { %2994 = vmax.xlane.f32.xlu0 %v2993_v30  ;;  %v3098_v38 = vsel %vm3034_vm4, %v9479_v24, 256.0  ;;  %v2999_v45 = vmax.f32 %v12236_v41, %v12242_v50  ;;  %v3099_v56 = vsel %vm3035_vm2, %v9477_v10, 256.0  ;;  %v3100_v57 = vsel %vm3036_vm1, %v9479_v24, 256.0 }
 0x662   : > { %v2950_v14 = vpop.xlane.xlu1 %2949  ;;  %v2953_v47 = vpop.xlane.xlu0 %2952  ;;  %v3166_v1 = vmin.f32 %v3097_v61, %v3098_v38  ;;  %v12258_v30 = vsel %vm18432_vm9, -3e+38, %v18431_v0  ;;  %v3169_v11 = vmin.f32 %v3099_v56, %v3100_v57  ;;  %v12278_v28 = vsel %vm18437_vm0, -3e+38, %v18436_v23  ;;  %v18439_v56 = vld [vmem:[#allocation29_spill] sm:$0xff]  ;;  %v18444_v23 = vld [vmem:[#allocation22_spill] sm:$0xff] }
 0x663   : > { %3161 = vmin.xlane.f32.xlu1 %v3160_v7  ;;  %18433 = vst [vmem:[#allocation19_spill] sm:$0xff] %v12258_v30  ;;  %vm3037_vm15 = vcmp.ge.f32.partialorder %v11800_v16, %v2950_v14  ;;  %vm3038_vm8 = vcmp.ge.f32.partialorder %v11806_v25, %v2950_v14  ;;  %v12272_v7 = vsel %vm18435_vm13, -3e+38, %v11200_v6  ;;  %18438 = vst [vmem:[#allocation24_spill] sm:$0xff] %v12278_v28  ;;  %v12294_v57 = vsel %vm18440_vm7, -3e+38, %v18439_v56 }
 0x664   : > { %v3002_v48 = vmax.f32 %v12258_v30, %v12264_v9  ;;  %vm3039_vm14 = vcmp.ge.f32.partialorder %v11784_v55, %v2953_v47  ;;  %vm3040_vm4 = vcmp.ge.f32.partialorder %v11790_v59, %v2953_v47  ;;  %v3005_v42 = vmax.f32 %v12272_v7, %v12278_v28  ;;  %18441 = vst [vmem:[#allocation21_spill] sm:$0xff] %v12294_v57  ;;  %v18442_v47 = vld [vmem:[#allocation25_spill] sm:$0xff] }
 0x665   : > { %3164 = vmin.xlane.f32.xlu0 %v3163_v18  ;;  %v3101_v18 = vsel %vm3037_vm15, %v9477_v10, 256.0  ;;  %v3103_v38 = vsel %vm3039_vm14, %v9477_v10, 256.0  ;;  %v3104_v14 = vsel %vm3040_vm4, %v9479_v24, 256.0  ;;  %vm18443_vm6 = vcmp.eq.f32.partialorder %v9479_v24, %v12078_v34 }
 0x666   : > { %v2956_v61 = vpop.xlane.xlu1 %2955  ;;  %v2959_v6 = vpop.xlane.xlu0 %2958  ;;  %vm18447_vm9 = vcmp.eq.f32.partialorder %v9479_v24, %v12102_v20 }
 0x667   : > { %2997 = vmax.xlane.f32.xlu1 %v2996_v60  ;;  %v3102_v60 = vsel %vm3038_vm8, %v9479_v24, 256.0  ;;  %vm3041_vm2 = vcmp.ge.f32.partialorder %v11842_v62, %v2956_v61  ;;  %vm3042_vm1 = vcmp.ge.f32.partialorder %v11848_v19, %v2956_v61  ;;  %v18449_v61 = vld [vmem:[#allocation50_spill] sm:$0xff]  ;;  %vm18455_vm8 = vcmp.eq.f32.partialorder %v9479_v24, %v12104_v21 }
 0x668   : > { %vm3043_vm3 = vcmp.ge.f32.partialorder %v18449_v61, %v2959_v6  ;;  %v18459_v19 = vld [vmem:[#allocation34_spill] sm:$0xff] }
 0x669   : > { %3000 = vmax.xlane.f32.xlu0 %v2999_v45  ;;  %v3172_v45 = vmin.f32 %v3101_v18, %v3102_v60  ;;  %v18446_v18 = vld [vmem:[#allocation30_spill] sm:$0xff]  ;;  %v3107_v20 = vsel %vm3043_vm3, %v9477_v10, 256.0 }
 0x66a   : > { %v2962_v0 = vpop.xlane.xlu1 %2961  ;;  %v12314_v34 = vsel %vm18447_vm9, -3e+38, %v18446_v18  ;;  %v2965_v60 = vpop.xlane.xlu0 %2964  ;;  %v18451_v18 = vld [vmem:[#allocation31_spill] sm:$0xff] }
 0x66b   : > { %3167 = vmin.xlane.f32.xlu1 %v3166_v1  ;;  %v12300_v1 = vsel %vm18443_vm6, -3e+38, %v18442_v47  ;;  %18448 = vst [vmem:[#allocation29_spill] sm:$0xff] %v12314_v34  ;;  %vm3045_vm13 = vcmp.ge.f32.partialorder %v11879_v32, %v2962_v0  ;;  %vm3046_vm0 = vcmp.ge.f32.partialorder %v11885_v49, %v2962_v0  ;;  %vm3047_vm14 = vcmp.ge.f32.partialorder %v11864_v4, %v2965_v60  ;;  %v18461_v0 = vld [vmem:[#allocation18_spill] sm:$0xff]  ;;  %v18462_v32 = vld [vmem:[#allocation35_spill] sm:$0xff] }
 0x66c   : > { %vm3048_vm4 = vcmp.ge.f32.partialorder %v18461_v0, %v2965_v60  ;;  %v18465_v0 = vld [vmem:[#allocation36_spill] sm:$0xff] }
 0x66d   : > { %3170 = vmin.xlane.f32.xlu0 %v3169_v11  ;;  %v3175_v11 = vmin.f32 %v3103_v38, %v3104_v14  ;;  %v3105_v38 = vsel %vm3041_vm2, %v9477_v10, 256.0  ;;  %v3106_v14 = vsel %vm3042_vm1, %v9479_v24, 256.0  ;;  %v3112_v26 = vsel %vm3048_vm4, %v9479_v24, 256.0 }
 0x66e   : > { %vm18489_vm4 = vcmask 130048  }
 0x66f   : > { %3003 = vmax.xlane.f32.xlu1 %v3002_v48  ;;  %v12308_v48 = vsel %vm2589_vm12, -3e+38, %v18444_v23  ;;  %v3178_v23 = vmin.f32 %v3105_v38, %v3106_v14  ;;  %vm18452_vm12 = vcmp.eq.f32.partialorder %v9477_v10, %v12104_v21  ;;  %v18457_v14 = vld [vmem:[#allocation33_spill] sm:$0xff]  ;;  %v12350_v21 = vsel %vm2594_vm5, -3e+38, %v18459_v19 }
 0x670   : > { %18445 = vst [vmem:[#allocation28_spill] sm:$0xff] %v12308_v48  ;;  %v3011_v56 = vmax.f32 %v12308_v48, %v12314_v34  ;;  %v12330_v61 = vsel %vm18452_vm12, -3e+38, %v18451_v18  ;;  %v12344_v18 = vsel %vm2593_vm11, -3e+38, %v18457_v14  ;;  %18460 = vst [vmem:[#allocation31_spill] sm:$0xff] %v12350_v21  ;;  %vm18463_vm11 = vcmp.eq.f32.partialorder %v9477_v10, %v12134_v17 }
 0x671   : > { %3006 = vmax.xlane.f32.xlu0 %v3005_v42  ;;  %v3008_v42 = vmax.f32 %v12294_v57, %v12300_v1  ;;  %18453 = vst [vmem:[#allocation25_spill] sm:$0xff] %v12330_v61  ;;  %18458 = vst [vmem:[#allocation30_spill] sm:$0xff] %v12344_v18  ;;  %v3111_v19 = vsel %vm3047_vm14, %v9477_v10, 256.0  ;;  %v12366_v60 = vsel %vm18463_vm11, -3e+38, %v18462_v32 }
 0x672   : > { %vm18492_vm11 = vmmov %vm18489_vm4 }
 0x673   : > { %3173 = vmin.xlane.f32.xlu1 %v3172_v45  ;;  %v18450_v45 = vld [vmem:[#allocation51_spill] sm:$0xff] }
 0x674   : > { %vm3044_vm15 = vcmp.ge.f32.partialorder %v18450_v45, %v2959_v6  ;;  %v18454_v6 = vld [vmem:[#allocation32_spill] sm:$0xff]  ;;  %v2971_v45 = vpop.xlane.xlu0 %2970 }
 0x675   : > { %3176 = vmin.xlane.f32.xlu0 %v3175_v11  ;;  %v3108_v47 = vsel %vm3044_vm15, %v9479_v24, 256.0  ;;  %v12336_v11 = vsel %vm18455_vm8, -3e+38, %v18454_v6  ;;  %v3017_v6 = vmax.f32 %v12344_v18, %v12350_v21  ;;  %18464 = vst [vmem:[#allocation32_spill] sm:$0xff] %v12366_v60  ;;  %vm3051_vm5 = vcmp.ge.f32.partialorder %v11905_v33, %v2971_v45 }
 0x676   : > { %18456 = vst [vmem:[#allocation22_spill] sm:$0xff] %v12336_v11  ;;  %v3181_v38 = vmin.f32 %v3107_v20, %v3108_v47  ;;  %v3109_v20 = vsel %vm3045_vm13, %v9477_v10, 256.0  ;;  %v3110_v47 = vsel %vm3046_vm0, %v9479_v24, 256.0  ;;  %vm3052_vm7 = vcmp.ge.f32.partialorder %v11911_v5, %v2971_v45 }
 0x677   : > { %3009 = vmax.xlane.f32.xlu1 %v3008_v42  ;;  %v2968_v42 = vpop.xlane.xlu1 %2967  ;;  %v3184_v49 = vmin.f32 %v3109_v20, %v3110_v47  ;;  %v3115_v32 = vsel %vm3051_vm5, %v9477_v10, 256.0  ;;  %v3116_v20 = vsel %vm3052_vm7, %v9479_v24, 256.0 }
 0x678   : > { %v2977_v14 = vpop.xlane.xlu0 %2976  ;;  %vm3049_vm6 = vcmp.ge.f32.partialorder %v11919_v43, %v2968_v42  ;;  %vm3050_vm2 = vcmp.ge.f32.partialorder %v11925_v36, %v2968_v42  ;;  %v3193_v42 = vmin.f32 %v3115_v32, %v3116_v20  ;;  %v18467_v43 = vld [vmem:[#allocation46_spill] sm:$0xff] }
 0x679   : > { %3012 = vmax.xlane.f32.xlu0 %v3011_v56  ;;  %v3014_v56 = vmax.f32 %v12330_v61, %v12336_v11  ;;  %v3114_v47 = vsel %vm3050_vm2, %v9479_v24, 256.0  ;;  %vm3056_vm1 = vcmp.ge.f32.partialorder %v11938_v12, %v2977_v14 }
 0x67b   : > { %3179 = vmin.xlane.f32.xlu1 %v3178_v23  ;;  %v2974_v23 = vpop.xlane.xlu1 %2973 }
 0x67c   : > { %vm3053_vm9 = vcmp.ge.f32.partialorder %v11947_v46, %v2974_v23  ;;  %vm3054_vm3 = vcmp.ge.f32.partialorder %v11953_v44, %v2974_v23  ;;  %v18470_v23 = vld [vmem:[#allocation52_spill] sm:$0xff] }
 0x67d   : > { %3182 = vmin.xlane.f32.xlu0 %v3181_v38  ;;  %v12372_v38 = vsel %vm2596_vm10, -3e+38, %v18465_v0  ;;  %v3113_v0 = vsel %vm3049_vm6, %v9477_v10, 256.0  ;;  %vm3055_vm10 = vcmp.ge.f32.partialorder %v11933_v35, %v2977_v14  ;;  %v3117_v36 = vsel %vm3053_vm9, %v9477_v10, 256.0  ;;  %v18468_v14 = vld [vmem:[#allocation20_spill] sm:$0xff] }
 0x67e   : > { %18466 = vst [vmem:[#allocation33_spill] sm:$0xff] %v12372_v38  ;;  %v3020_v17 = vmax.f32 %v12366_v60, %v12372_v38  ;;  %v3118_v35 = vsel %vm3054_vm3, %v9479_v24, 256.0 }
 0x67f   : > { %3015 = vmax.xlane.f32.xlu1 %v3014_v56  ;;  %v3187_v56 = vmin.f32 %v3111_v19, %v3112_v26  ;;  %v2980_v45 = vpop.xlane.xlu1 %2979  ;;  %v3120_v19 = vsel %vm3056_vm1, %v9479_v24, 256.0  ;;  %v3190_v26 = vmin.f32 %v3113_v0, %v3114_v47  ;;  %v3196_v47 = vmin.f32 %v3117_v36, %v3118_v35  ;;  %v12404_v36 = vpop.f32.mrb[0].mxu1 }
 0x680   : > { %vm3058_vm13 = vcmp.ge.f32.partialorder %v18470_v23, %v2980_v45  ;;  %18473 = vst [vmem:[#allocation34_spill] sm:$0xff] %v12404_v36  ;;  %v12406_v35 = vpop.f32.mrb[1].mxu1  ;;  %v12436_v36 = vld [vmem:[#allocation8] sm:$0xff]  }
 0x681   : > { %3018 = vmax.xlane.f32.xlu0 %v3017_v6  ;;  %v3119_v6 = vsel %vm3055_vm10, %v9477_v10, 256.0  ;;  %v3122_v46 = vsel %vm3058_vm13, %v9479_v24, 256.0  ;;  %18474 = vst [vmem:[#allocation35_spill] sm:$0xff] %v12406_v35 }
 0x682   : > { %v3199_v20 = vmin.f32 %v3119_v6, %v3120_v19 }
 0x683   : > { %3185 = vmin.xlane.f32.xlu1 %v3184_v49  ;;  %v2983_v49 = vpop.xlane.xlu0 %2982  ;;  %v2986_v32 = vpop.xlane.xlu1 %2985 }
 0x684   : > { %vm3059_vm15 = vcmp.ge.f32.partialorder %v18467_v43, %v2983_v49  ;;  %vm3060_vm12 = vcmp.ge.f32.partialorder %v18468_v14, %v2983_v49  ;;  %v18471_v43 = vld [vmem:[#allocation53_spill] sm:$0xff]  ;;  %v18472_v49 = vld [vmem:[#allocation43_spill] sm:$0xff] }
 0x685   : > { %3188 = vmin.xlane.f32.xlu0 %v3187_v56  ;;  %v18469_v56 = vld [vmem:[#allocation42_spill] sm:$0xff]  ;;  %v3124_v0 = vsel %vm3060_vm12, %v9479_v24, 256.0  ;;  %vm3061_vm0 = vcmp.ge.f32.partialorder %v18471_v43, %v2986_v32  ;;  %vm3062_vm14 = vcmp.ge.f32.partialorder %v18472_v49, %v2986_v32 }
 0x686   : > { %vm3057_vm8 = vcmp.ge.f32.partialorder %v18469_v56, %v2980_v45  ;;  %v3126_v6 = vsel %vm3062_vm14, %v9479_v24, 256.0 }
 0x687   : > { %3021 = vmax.xlane.f32.xlu1 %v3020_v17  ;;  %v3123_v17 = vsel %vm3059_vm15, %v9477_v10, 256.0  ;;  %v3121_v44 = vsel %vm3057_vm8, %v9477_v10, 256.0 }
 0x688   : > { %v3202_v45 = vmin.f32 %v3121_v44, %v3122_v46 }
 0x689   : > { %3194 = vmin.xlane.f32.xlu0 %v3193_v42  ;;  %v3205_v42 = vmin.f32 %v3123_v17, %v3124_v0 }
 0x68b   : > { %3191 = vmin.xlane.f32.xlu1 %v3190_v26  ;;  %v3125_v26 = vsel %vm3061_vm0, %v9477_v10, 256.0 }
 0x68c   : > { %v3208_v19 = vmin.f32 %v3125_v26, %v3126_v6 }
 0x68d   : > { %3200 = vmin.xlane.f32.xlu0 %v3199_v20  ;;  %v12408_v20 = vpop.f32.mrb[2].mxu1 }
 0x68e   : > { %18475 = vst [vmem:[#allocation36_spill] sm:$0xff] %v12408_v20  ;;  %v12410_v43 = vpop.f32.mrb[3].mxu1 }
 0x68f   : > { %3197 = vmin.xlane.f32.xlu1 %v3196_v47  ;;  %18476 = vst [vmem:[#allocation20_spill] sm:$0xff] %v12410_v43  ;;  %v12412_v32 = vpop.f32.mrb[4].mxu1 }
 0x690   : > { %18477 = vst [vmem:[#allocation42_spill] sm:$0xff] %v12412_v32  ;;  %v12414_v17 = vpop.f32.mrb[5].mxu1 }
 0x691   : > { %3206 = vmin.xlane.f32.xlu0 %v3205_v42  ;;  %18478 = vst [vmem:[#allocation52_spill] sm:$0xff] %v12414_v17  ;;  %v12416_v46 = vpop.f32.mrb[6].mxu1 }
 0x692   : > { %18479 = vst [vmem:[#allocation43_spill] sm:$0xff] %v12416_v46  ;;  %v12418_v44 = vpop.f32.mrb[7].mxu1 }
 0x693   : > { %3203 = vmin.xlane.f32.xlu1 %v3202_v45  ;;  %18480 = vst [vmem:[#allocation58_spill] sm:$0xff] %v12418_v44  ;;  %v12420_v0 = vpop.f32.mrb[8].mxu1 }
 0x694   : > { %18481 = vst [vmem:[#allocation59_spill] sm:$0xff] %v12420_v0  ;;  %v12422_v47 = vpop.f32.mrb[9].mxu1 }
 0x695   : > { %18482 = vst [vmem:[#allocation60_spill] sm:$0xff] %v12422_v47  ;;  %v12424_v42 = vpop.f32.mrb[10].mxu1 }
 0x696   : > { %18483 = vst [vmem:[#allocation61_spill] sm:$0xff] %v12424_v42  ;;  %v12426_v45 = vpop.f32.mrb[11].mxu1 }
 0x697   : > { %3209 = vmin.xlane.f32.xlu1 %v3208_v19  ;;  %18484 = vst [vmem:[#allocation62_spill] sm:$0xff] %v12426_v45 }
 0x69f   : > { %v12428_v26 = vpop.f32.mrb[12].mxu1 }
 0x6a0   : > { %18485 = vst [vmem:[#allocation63_spill] sm:$0xff] %v12428_v26  ;;  %v12430_v6 = vpop.f32.mrb[13].mxu1  ;;  %v18490_v26 = vmov 0  }
 0x6a1   : > { %18486 = vst [vmem:[#allocation64_spill] sm:$0xff] %v12430_v6  ;;  %v12432_v19 = vpop.f32.mrb[14].mxu1  ;;  %v18491_v6 = vld [vmem:[#allocation41_spill] sm:$0xff] }
 0x6a2   : > { %18487 = vst [vmem:[#allocation65_spill] sm:$0xff] %v12432_v19  ;;  %v12434_v32 = vpop.f32.mrb[15].mxu1 }
 0x6a3   : > { %18488 = vst [vmem:[#allocation66_spill] sm:$0xff] %v12434_v32 }
 0x6a7   : > { %v2077_v17 = vpop.f32.mrb[16].mxu1 }
 0x6a8   : > { %v2079_v46 = vpop.f32.mrb[17].mxu1 }
 0x6a9   : > { %v2081_v43 = vpop.f32.mrb[18].mxu1 }
 0x6aa   : > { %v2086_v44 = vpack.c.bf16 %v2081_v43, %v2077_v17  ;;  %v2083_v20 = vpop.f32.mrb[19].mxu1  ;;  %v18493_v43 = vld [vmem:[#allocation37_spill] sm:$0xff] }
 0x6ab   : > { %v2087_v35 = vpack.c.bf16 %v2083_v20, %v2079_v46  ;;  %v18494_v20 = vld [vmem:[#allocation38_spill] sm:$0xff] }
 0x6ad   : > { %2088 = vmatprep.subr.bf16.mxu1 %v2087_v35 }
 0x6ae   : > { %2089 = vmatpush1.bf16.msra.mxu1 %v2086_v44 }
 0x6b1   : > { %7634 = vmatmul.mubr.msk.bf16.vlgmr.msra.gmra.mrb[20].mxu1 %vm18489_vm4, %v12436_v36 }
 0x6b2   : > { %2130 = vmatprep.mubr.bf16.mxu1 %v18490_v26 }
 0x6b9   : > { %7635 = vmatmul.mubr.msk.bf16.gmra.mrb[24].mxu1 %vm18492_vm11, %v18491_v6 }
 0x6ba   : > { %2834 = vmatprep.mubr.bf16.mxu1 %v18490_v26 }
 0x6e2   : > { %v3153_v32 = vpop.xlane.xlu0 %3152 }
 0x6e3   : > { %vm3247_vm5 = vcmp.eq.f32.partialorder %v9477_v10, %v3153_v32  ;;  %vm3248_vm7 = vcmp.eq.f32.partialorder %v9479_v24, %v3153_v32 }
 0x6e4   : > { %v12447_v35 = vsel %vm3247_vm5, -3e+38, %v18493_v43  ;;  %v12452_v17 = vsel %vm3248_vm7, -3e+38, %v18494_v20 }
 0x6e5   : > { %v3641_v46 = vmax.f32 %v12447_v35, %v12452_v17 }
 0x6e6   : > { %v2989_v44 = vpop.xlane.xlu0 %2988 }
 0x6e7   : > { %vm3063_vm6 = vcmp.ge.f32.partialorder %v12154_v53, %v2989_v44  ;;  %vm3064_vm2 = vcmp.ge.f32.partialorder %v12160_v29, %v2989_v44  ;;  %3642 = vmax.xlane.f32.xlu0 %v3641_v46 }
 0x6e8   : > { %v3156_v6 = vpop.xlane.xlu1 %3155  ;;  %v3127_v19 = vsel %vm3063_vm6, %v9477_v10, 256.0  ;;  %v3128_v43 = vsel %vm3064_vm2, %v9479_v24, 256.0 }
 0x6e9   : > { %vm3249_vm10 = vcmp.eq.f32.partialorder %v9477_v10, %v3156_v6  ;;  %vm3250_vm1 = vcmp.eq.f32.partialorder %v9479_v24, %v3156_v6  ;;  %v3211_v44 = vmin.f32 %v3127_v19, %v3128_v43  ;;  %v18501_v6 = vld [vmem:[#allocation39_spill] sm:$0xff]  ;;  %v18502_v19 = vld [vmem:[#allocation40_spill] sm:$0xff] }
 0x6ea   : > { %vm12462_vm9 = vmpackc.low %vm3249_vm10, %vm3247_vm5  ;;  %v12467_v45 = vsel %vm3249_vm10, -3e+38, %v11661_v51  ;;  %v12470_v42 = vsel %vm3250_vm1, -3e+38, %v11667_v22  ;;  %v3159_v46 = vpop.xlane.xlu0 %3158 }
 0x6eb   : > { %18497 = vst [vmem:[#allocation41_spill] sm:$0xff] %v12467_v45  ;;  %18498 = vst [vmem:[#allocation37_spill] sm:$0xff] %v12470_v42  ;;  %v3644_v47 = vmax.f32 %v12467_v45, %v12470_v42  ;;  %vm3251_vm15 = vcmp.eq.f32.partialorder %v9477_v10, %v3159_v46  ;;  %vm3252_vm12 = vcmp.eq.f32.partialorder %v9479_v24, %v3159_v46  ;;  %3212 = vmin.xlane.f32.xlu0 %v3211_v44 }
 0x6ec   : > { %vm12476_vm3 = vmpackc.low %vm3250_vm1, %vm3248_vm7  ;;  %v2992_v51 = vpop.xlane.xlu1 %2991  ;;  %v12485_v22 = vsel %vm3251_vm15, -3e+38, %v18501_v6  ;;  %v12490_v43 = vsel %vm3252_vm12, -3e+38, %v18502_v19 }
 0x6ed   : > { %vm3065_vm8 = vcmp.ge.f32.partialorder %v12184_v8, %v2992_v51  ;;  %vm3066_vm13 = vcmp.ge.f32.partialorder %v12190_v27, %v2992_v51  ;;  %3645 = vmax.xlane.f32.xlu1 %v3644_v47  ;;  %v3647_v44 = vmax.f32 %v12485_v22, %v12490_v43 }
 0x6ee   : > { %v3129_v32 = vsel %vm3065_vm8, %v9477_v10, 256.0  ;;  %v3130_v42 = vsel %vm3066_vm13, %v9479_v24, 256.0  ;;  %v2995_v45 = vpop.xlane.xlu0 %2994 }
 0x6ef   : > { %v3214_v6 = vmin.f32 %v3129_v32, %v3130_v42  ;;  %vm3067_vm0 = vcmp.ge.f32.partialorder %v12198_v63, %v2995_v45  ;;  %vm3068_vm14 = vcmp.ge.f32.partialorder %v12204_v2, %v2995_v45  ;;  %3648 = vmax.xlane.f32.xlu0 %v3647_v44 }
 0x6f0   : > { %v3162_v19 = vpop.xlane.xlu1 %3161  ;;  %v3131_v8 = vsel %vm3067_vm0, %v9477_v10, 256.0  ;;  %v3132_v51 = vsel %vm3068_vm14, %v9479_v24, 256.0 }
 0x6f1   : > { %vm3253_vm4 = vcmp.eq.f32.partialorder %v9477_v10, %v3162_v19  ;;  %vm3254_vm11 = vcmp.eq.f32.partialorder %v9479_v24, %v3162_v19  ;;  %3215 = vmin.xlane.f32.xlu1 %v3214_v6  ;;  %v3217_v32 = vmin.f32 %v3131_v8, %v3132_v51 }
 0x6f2   : > { %vm12506_vm5 = vmpackc.low %vm3253_vm4, %vm3251_vm15  ;;  %v12511_v42 = vsel %vm3253_vm4, -3e+38, %v11713_v31  ;;  %v12514_v45 = vsel %vm3254_vm11, -3e+38, %v11719_v13  ;;  %v3165_v44 = vpop.xlane.xlu0 %3164 }
 0x6f3   : > { %v3650_v2 = vmax.f32 %v12511_v42, %v12514_v45  ;;  %vm12520_vm7 = vmpackc.low %vm3254_vm11, %vm3252_vm12  ;;  %vm3255_vm6 = vcmp.eq.f32.partialorder %v9477_v10, %v3165_v44  ;;  %vm3256_vm2 = vcmp.eq.f32.partialorder %v9479_v24, %v3165_v44  ;;  %3218 = vmin.xlane.f32.xlu0 %v3217_v32 }
 0x6f4   : > { %v2998_v31 = vpop.xlane.xlu1 %2997  ;;  %v12529_v13 = vsel %vm3255_vm6, -3e+38, %v11691_v15  ;;  %v12534_v8 = vsel %vm3256_vm2, -3e+38, %v11697_v39 }
 0x6f5   : > { %vm3069_vm10 = vcmp.ge.f32.partialorder %v12222_v52, %v2998_v31  ;;  %vm3070_vm1 = vcmp.ge.f32.partialorder %v12228_v58, %v2998_v31  ;;  %3651 = vmax.xlane.f32.xlu1 %v3650_v2  ;;  %v3653_v51 = vmax.f32 %v12529_v13, %v12534_v8 }
 0x6f6   : > { %v3133_v46 = vsel %vm3069_vm10, %v9477_v10, 256.0  ;;  %v3134_v19 = vsel %vm3070_vm1, %v9479_v24, 256.0  ;;  %v3001_v32 = vpop.xlane.xlu0 %3000 }
 0x6f7   : > { %v3220_v15 = vmin.f32 %v3133_v46, %v3134_v19  ;;  %vm3071_vm15 = vcmp.ge.f32.partialorder %v12236_v41, %v3001_v32  ;;  %vm3072_vm12 = vcmp.ge.f32.partialorder %v12242_v50, %v3001_v32  ;;  %3654 = vmax.xlane.f32.xlu0 %v3653_v51 }
 0x6f8   : > { %v3168_v39 = vpop.xlane.xlu1 %3167  ;;  %v3135_v52 = vsel %vm3071_vm15, %v9477_v10, 256.0  ;;  %v3136_v31 = vsel %vm3072_vm12, %v9479_v24, 256.0 }
 0x6f9   : > { %vm3257_vm8 = vcmp.eq.f32.partialorder %v9477_v10, %v3168_v39  ;;  %vm3258_vm13 = vcmp.eq.f32.partialorder %v9479_v24, %v3168_v39  ;;  %3221 = vmin.xlane.f32.xlu1 %v3220_v15  ;;  %v3223_v51 = vmin.f32 %v3135_v52, %v3136_v31 }
 0x6fa   : > { %vm12550_vm0 = vmpackc.low %vm3257_vm8, %vm3255_vm6  ;;  %v12555_v46 = vsel %vm3257_vm8, -3e+38, %v11757_v37  ;;  %v12558_v19 = vsel %vm3258_vm13, -3e+38, %v11763_v3  ;;  %v3171_v32 = vpop.xlane.xlu0 %3170 }
 0x6fb   : > { %v3656_v50 = vmax.f32 %v12555_v46, %v12558_v19  ;;  %vm12564_vm14 = vmpackc.low %vm3258_vm13, %vm3256_vm2  ;;  %vm3259_vm4 = vcmp.eq.f32.partialorder %v9477_v10, %v3171_v32  ;;  %vm3260_vm11 = vcmp.eq.f32.partialorder %v9479_v24, %v3171_v32  ;;  %3224 = vmin.xlane.f32.xlu0 %v3223_v51 }
 0x6fc   : > { %v3004_v37 = vpop.xlane.xlu1 %3003  ;;  %v12573_v3 = vsel %vm3259_vm4, -3e+38, %v11737_v54  ;;  %v12578_v52 = vsel %vm3260_vm11, -3e+38, %v11743_v40 }
 0x6fd   : > { %vm3073_vm6 = vcmp.ge.f32.partialorder %v12258_v30, %v3004_v37  ;;  %vm3074_vm2 = vcmp.ge.f32.partialorder %v12264_v9, %v3004_v37  ;;  %3657 = vmax.xlane.f32.xlu1 %v3656_v50  ;;  %v3659_v31 = vmax.f32 %v12573_v3, %v12578_v52 }
 0x6fe   : > { %v3137_v44 = vsel %vm3073_vm6, %v9477_v10, 256.0  ;;  %v3138_v39 = vsel %vm3074_vm2, %v9479_v24, 256.0  ;;  %v3007_v51 = vpop.xlane.xlu0 %3006 }
 0x6ff   : > { %v3226_v54 = vmin.f32 %v3137_v44, %v3138_v39  ;;  %vm3075_vm10 = vcmp.ge.f32.partialorder %v12272_v7, %v3007_v51  ;;  %vm3076_vm1 = vcmp.ge.f32.partialorder %v12278_v28, %v3007_v51  ;;  %3660 = vmax.xlane.f32.xlu0 %v3659_v31 }
 0x700   : > { %v3174_v40 = vpop.xlane.xlu1 %3173  ;;  %v3139_v30 = vsel %vm3075_vm10, %v9477_v10, 256.0  ;;  %v3140_v37 = vsel %vm3076_vm1, %v9479_v24, 256.0 }
 0x701   : > { %vm3261_vm15 = vcmp.eq.f32.partialorder %v9477_v10, %v3174_v40  ;;  %vm3262_vm12 = vcmp.eq.f32.partialorder %v9479_v24, %v3174_v40  ;;  %3227 = vmin.xlane.f32.xlu1 %v3226_v54  ;;  %v3229_v31 = vmin.f32 %v3139_v30, %v3140_v37  ;;  %v18595_v54 = vld [vmem:[#allocation41_spill] sm:$0xff] }
 0x702   : > { %vm12594_vm8 = vmpackc.low %vm3261_vm15, %vm3259_vm4  ;;  %v12599_v44 = vsel %vm3261_vm15, -3e+38, %v11800_v16  ;;  %v12602_v39 = vsel %vm3262_vm12, -3e+38, %v11806_v25  ;;  %v3177_v51 = vpop.xlane.xlu0 %3176 }
 0x703   : > { %18513 = vst [vmem:[#allocation38_spill] sm:$0xff] %v12599_v44  ;;  %18514 = vst [vmem:[#allocation39_spill] sm:$0xff] %v12602_v39  ;;  %v3662_v28 = vmax.f32 %v12599_v44, %v12602_v39  ;;  %vm3263_vm4 = vcmp.eq.f32.partialorder %v9477_v10, %v3177_v51  ;;  %vm3264_vm6 = vcmp.eq.f32.partialorder %v9479_v24, %v3177_v51  ;;  %3230 = vmin.xlane.f32.xlu0 %v3229_v31 }
 0x704   : > { %vm12608_vm13 = vmpackc.low %vm3262_vm12, %vm3260_vm11  ;;  %v3010_v16 = vpop.xlane.xlu1 %3009  ;;  %v12617_v25 = vsel %vm3263_vm4, -3e+38, %v11784_v55  ;;  %v12622_v30 = vsel %vm3264_vm6, -3e+38, %v11790_v59 }
 0x705   : > { %18517 = vst [vmem:[#allocation40_spill] sm:$0xff] %v12617_v25  ;;  %18518 = vst [vmem:[#allocation67_spill] sm:$0xff] %v12622_v30  ;;  %vm3077_vm11 = vcmp.ge.f32.partialorder %v12294_v57, %v3010_v16  ;;  %vm3078_vm2 = vcmp.ge.f32.partialorder %v12300_v1, %v3010_v16  ;;  %3663 = vmax.xlane.f32.xlu1 %v3662_v28  ;;  %v3665_v37 = vmax.f32 %v12617_v25, %v12622_v30  ;;  %v18519_v28 = vmov 0 }
 0x706   : > { %v3141_v32 = vsel %vm3077_vm11, %v9477_v10, 256.0  ;;  %v3142_v40 = vsel %vm3078_vm2, %v9479_v24, 256.0  ;;  %v3013_v31 = vpop.xlane.xlu0 %3012 }
 0x707   : > { %v3232_v55 = vmin.f32 %v3141_v32, %v3142_v40  ;;  %vm3079_vm10 = vcmp.ge.f32.partialorder %v12308_v48, %v3013_v31  ;;  %vm3080_vm1 = vcmp.ge.f32.partialorder %v12314_v34, %v3013_v31  ;;  %3666 = vmax.xlane.f32.xlu0 %v3665_v37  ;;  %v18522_v40 = vld [vmem:[#allocation54_spill] sm:$0xff] }
 0x708   : > { %v3180_v59 = vpop.xlane.xlu1 %3179  ;;  %v3143_v57 = vsel %vm3079_vm10, %v9477_v10, 256.0  ;;  %v3144_v16 = vsel %vm3080_vm1, %v9479_v24, 256.0 }
 0x709   : > { %vm3265_vm15 = vcmp.eq.f32.partialorder %v9477_v10, %v3180_v59  ;;  %vm3266_vm12 = vcmp.eq.f32.partialorder %v9479_v24, %v3180_v59  ;;  %3233 = vmin.xlane.f32.xlu1 %v3232_v55  ;;  %v3235_v31 = vmin.f32 %v3143_v57, %v3144_v16  ;;  %v18526_v59 = vld [vmem:[#allocation50_spill] sm:$0xff]  ;;  %v18528_v16 = vld [vmem:[#allocation51_spill] sm:$0xff] }
 0x70a   : > { %vm12638_vm11 = vmpackc.low %vm3265_vm15, %vm3263_vm4  ;;  %v12643_v32 = vsel %vm3265_vm15, -3e+38, %v11842_v62  ;;  %v12646_v37 = vsel %vm3266_vm12, -3e+38, %v18522_v40  ;;  %v3183_v34 = vpop.xlane.xlu0 %3182 }
 0x70b   : > { %v18520_v28 = vsel %vm12638_vm11, 4294967295, %v18519_v28  ;;  %18521 = vst [vmem:[#allocation68_spill] sm:$0xff] %v12643_v32  ;;  %18523 = vst [vmem:[#allocation54_spill] sm:$0xff] %v12646_v37  ;;  %v3668_v48 = vmax.f32 %v12643_v32, %v12646_v37  ;;  %vm3267_vm4 = vcmp.eq.f32.partialorder %v9477_v10, %v3183_v34  ;;  %vm17708_vm10 = vcmp.eq.f32.partialorder %v9479_v24, %v3183_v34 }
 0x70c   : > { %vm12652_vm2 = vmpackc.low %vm3266_vm12, %vm3264_vm6  ;;  %v3016_v62 = vpop.xlane.xlu1 %3015  ;;  %3236 = vmin.xlane.f32.xlu0 %v3235_v31  ;;  %v12661_v57 = vsel %vm3267_vm4, -3e+38, %v18526_v59  ;;  %v12666_v40 = vsel %vm17708_vm10, -3e+38, %v18528_v16 }
 0x70d   : > { %18527 = vst [vmem:[#allocation50_spill] sm:$0xff] %v12661_v57  ;;  %18529 = vst [vmem:[#allocation51_spill] sm:$0xff] %v12666_v40  ;;  %vm3081_vm6 = vcmp.ge.f32.partialorder %v12330_v61, %v3016_v62  ;;  %vm3082_vm1 = vcmp.ge.f32.partialorder %v12336_v11, %v3016_v62  ;;  %3669 = vmax.xlane.f32.xlu1 %v3668_v48  ;;  %v3671_v31 = vmax.f32 %v12661_v57, %v12666_v40  ;;  %v18530_v48 = vmov 0 }
 0x70e   : > { %v3145_v51 = vsel %vm3081_vm6, %v9477_v10, 256.0  ;;  %v3146_v37 = vsel %vm3082_vm1, %v9479_v24, 256.0  ;;  %v3019_v32 = vpop.xlane.xlu0 %3018 }
 0x70f   : > { %v3238_v59 = vmin.f32 %v3145_v51, %v3146_v37  ;;  %vm3083_vm15 = vcmp.ge.f32.partialorder %v12344_v18, %v3019_v32  ;;  %vm3084_vm12 = vcmp.ge.f32.partialorder %v12350_v21, %v3019_v32  ;;  %v18532_v37 = vld [vmem:[#allocation55_spill] sm:$0xff]  ;;  %v18534_v32 = vld [vmem:[#allocation56_spill] sm:$0xff] }
 0x710   : > { %v3186_v16 = vpop.xlane.xlu1 %3185  ;;  %3672 = vmax.xlane.f32.xlu0 %v3671_v31  ;;  %v3147_v61 = vsel %vm3083_vm15, %v9477_v10, 256.0  ;;  %v3148_v62 = vsel %vm3084_vm12, %v9479_v24, 256.0  ;;  %vm18536_vm15 = vcmp.eq.f32.partialorder %v9479_v24, %v3183_v34 }
 0x711   : > { %vm3269_vm10 = vcmp.eq.f32.partialorder %v9477_v10, %v3186_v16  ;;  %vm3270_vm6 = vcmp.eq.f32.partialorder %v9479_v24, %v3186_v16  ;;  %3239 = vmin.xlane.f32.xlu1 %v3238_v59  ;;  %v3241_v21 = vmin.f32 %v3147_v61, %v3148_v62  ;;  %v18537_v59 = vmov 0  ;;  %v18540_v62 = vld [vmem:[#allocation18_spill] sm:$0xff] }
 0x712   : > { %vm12682_vm1 = vmpackc.low %vm3269_vm10, %vm3267_vm4  ;;  %v12687_v51 = vsel %vm3269_vm10, -3e+38, %v18532_v37  ;;  %v12690_v31 = vsel %vm3270_vm6, -3e+38, %v18534_v32  ;;  %v3189_v18 = vpop.xlane.xlu0 %3188 }
 0x713   : > { %v18531_v48 = vsel %vm12682_vm1, 4294967295, %v18530_v48  ;;  %18533 = vst [vmem:[#allocation55_spill] sm:$0xff] %v12687_v51  ;;  %18535 = vst [vmem:[#allocation56_spill] sm:$0xff] %v12690_v31  ;;  %v3674_v11 = vmax.f32 %v12687_v51, %v12690_v31  ;;  %vm17714_vm4 = vcmp.eq.f32.partialorder %v9477_v10, %v3189_v18  ;;  %vm17715_vm1 = vcmp.eq.f32.partialorder %v9479_v24, %v3189_v18 }
 0x714   : > { %vm12696_vm12 = vmpackc.low %vm3270_vm6, %vm18536_vm15  ;;  %v3022_v16 = vpop.xlane.xlu1 %3021  ;;  %3242 = vmin.xlane.f32.xlu0 %v3241_v21  ;;  %v12705_v61 = vsel %vm17714_vm4, -3e+38, %v11864_v4  ;;  %v12710_v37 = vsel %vm17715_vm1, -3e+38, %v18540_v62  ;;  %vm18544_vm1 = vcmp.eq.f32.partialorder %v9477_v10, %v3189_v18 }
 0x715   : > { %v18538_v59 = vsel %vm12696_vm12, 4294967295, %v18537_v59  ;;  %18539 = vst [vmem:[#allocation69_spill] sm:$0xff] %v12705_v61  ;;  %18541 = vst [vmem:[#allocation18_spill] sm:$0xff] %v12710_v37  ;;  %vm3085_vm10 = vcmp.ge.f32.partialorder %v12366_v60, %v3022_v16  ;;  %vm3086_vm6 = vcmp.ge.f32.partialorder %v12372_v38, %v3022_v16  ;;  %3675 = vmax.xlane.f32.xlu1 %v3674_v11 }
 0x716   : > { %v3149_v34 = vsel %vm3085_vm10, %v9477_v10, 256.0  ;;  %v3150_v32 = vsel %vm3086_vm6, %v9479_v24, 256.0  ;;  %v3677_v21 = vmax.f32 %v12705_v61, %v12710_v37  ;;  %v3195_v31 = vpop.xlane.xlu0 %3194 }
 0x717   : > { %v3244_v4 = vmin.f32 %v3149_v34, %v3150_v32  ;;  %vm17719_vm15 = vcmp.eq.f32.partialorder %v9477_v10, %v3195_v31  ;;  %vm17718_vm4 = vcmp.eq.f32.partialorder %v9479_v24, %v3195_v31  ;;  %v18545_v34 = vmov 0  ;;  %v18547_v32 = vld [vmem:[#allocation57_spill] sm:$0xff] }
 0x718   : > { %v3192_v62 = vpop.xlane.xlu1 %3191  ;;  %3678 = vmax.xlane.f32.xlu0 %v3677_v21  ;;  %v12723_v16 = vsel %vm17719_vm15, -3e+38, %v11905_v33  ;;  %v12728_v11 = vsel %vm17718_vm4, -3e+38, %v11911_v5  ;;  %v18549_v33 = vld [vmem:[#allocation27_spill] sm:$0xff]  ;;  %vm18551_vm4 = vcmp.eq.f32.partialorder %v9479_v24, %v3189_v18  ;;  %v18558_v18 = vmov 0 }
 0x719   : > { %18542 = vst [vmem:[#allocation70_spill] sm:$0xff] %v12723_v16  ;;  %18543 = vst [vmem:[#allocation71_spill] sm:$0xff] %v12728_v11  ;;  %vm3273_vm10 = vcmp.eq.f32.partialorder %v9477_v10, %v3192_v62  ;;  %vm3274_vm6 = vcmp.eq.f32.partialorder %v9479_v24, %v3192_v62  ;;  %3245 = vmin.xlane.f32.xlu1 %v3244_v4  ;;  %v3683_v5 = vmax.f32 %v12723_v16, %v12728_v11  ;;  %v18552_v4 = vmov 0 }
 0x71a   : > { %vm12734_vm12 = vmpackc.low %vm3273_vm10, %vm18544_vm1  ;;  %v12739_v21 = vsel %vm3273_vm10, -3e+38, %v18547_v32  ;;  %v12742_v38 = vsel %vm3274_vm6, -3e+38, %v18549_v33  ;;  %v3201_v60 = vpop.xlane.xlu0 %3200  ;;  %v18554_v33 = vld [vmem:[#allocation23_spill] sm:$0xff] }
 0x71b   : > { %v18546_v34 = vsel %vm12734_vm12, 4294967295, %v18545_v34  ;;  %18548 = vst [vmem:[#allocation57_spill] sm:$0xff] %v12739_v21  ;;  %18550 = vst [vmem:[#allocation27_spill] sm:$0xff] %v12742_v38  ;;  %v3680_v62 = vmax.f32 %v12739_v21, %v12742_v38  ;;  %vm17731_vm1 = vcmp.eq.f32.partialorder %v9477_v10, %v3201_v60  ;;  %vm17730_vm10 = vcmp.eq.f32.partialorder %v9479_v24, %v3201_v60 }
 0x71c   : > { %vm12750_vm15 = vmpackc.low %vm3274_vm6, %vm18551_vm4  ;;  %v3198_v32 = vpop.xlane.xlu1 %3197  ;;  %3684 = vmax.xlane.f32.xlu0 %v3683_v5  ;;  %v12759_v11 = vsel %vm17731_vm1, -3e+38, %v18554_v33  ;;  %v12764_v38 = vsel %vm17730_vm10, -3e+38, %v11938_v12  ;;  %vm18557_vm12 = vcmp.eq.f32.partialorder %v9477_v10, %v3195_v31  ;;  %v18560_v5 = vld [vmem:[#allocation26_spill] sm:$0xff]  ;;  %v18562_v33 = vld [vmem:[#allocation45_spill] sm:$0xff]  ;;  %vm18564_vm10 = vcmp.eq.f32.partialorder %v9479_v24, %v3195_v31 }
 0x71d   : > { %v18553_v4 = vsel %vm12750_vm15, 4294967295, %v18552_v4  ;;  %18555 = vst [vmem:[#allocation23_spill] sm:$0xff] %v12759_v11  ;;  %18556 = vst [vmem:[#allocation72_spill] sm:$0xff] %v12764_v38  ;;  %vm3277_vm4 = vcmp.eq.f32.partialorder %v9477_v10, %v3198_v32  ;;  %vm3278_vm6 = vcmp.eq.f32.partialorder %v9479_v24, %v3198_v32  ;;  %3681 = vmax.xlane.f32.xlu1 %v3680_v62  ;;  %v18565_v62 = vmov 0 }
 0x71e   : > { %vm12770_vm15 = vmpackc.low %vm3277_vm4, %vm18557_vm12  ;;  %v12775_v21 = vsel %vm3277_vm4, -3e+38, %v18560_v5  ;;  %v12778_v16 = vsel %vm3278_vm6, -3e+38, %v18562_v33  ;;  %v3689_v12 = vmax.f32 %v12759_v11, %v12764_v38  ;;  %v3207_v37 = vpop.xlane.xlu0 %3206  ;;  %v18567_v33 = vld [vmem:[#allocation46_spill] sm:$0xff]  ;;  %v18571_v31 = vmov 0 }
 0x71f   : > { %v18559_v18 = vsel %vm12770_vm15, 4294967295, %v18558_v18  ;;  %18561 = vst [vmem:[#allocation26_spill] sm:$0xff] %v12775_v21  ;;  %18563 = vst [vmem:[#allocation45_spill] sm:$0xff] %v12778_v16  ;;  %v3686_v32 = vmax.f32 %v12775_v21, %v12778_v16  ;;  %vm17739_vm12 = vcmp.eq.f32.partialorder %v9477_v10, %v3207_v37  ;;  %vm17738_vm4 = vcmp.eq.f32.partialorder %v9479_v24, %v3207_v37 }
 0x720   : > { %vm12786_vm1 = vmpackc.low %vm3278_vm6, %vm18564_vm10  ;;  %v3204_v5 = vpop.xlane.xlu1 %3203  ;;  %3690 = vmax.xlane.f32.xlu0 %v3689_v12  ;;  %v12795_v38 = vsel %vm17739_vm12, -3e+38, %v18567_v33  ;;  %v12800_v16 = vsel %vm17738_vm4, -3e+38, %v18468_v14  ;;  %vm18570_vm15 = vcmp.eq.f32.partialorder %v9477_v10, %v3201_v60  ;;  %vm18575_vm4 = vcmp.eq.f32.partialorder %v9479_v24, %v3201_v60 }
 0x721   : > { %v18566_v62 = vsel %vm12786_vm1, 4294967295, %v18565_v62  ;;  %18568 = vst [vmem:[#allocation46_spill] sm:$0xff] %v12795_v38  ;;  %18569 = vst [vmem:[#allocation73_spill] sm:$0xff] %v12800_v16  ;;  %vm3281_vm10 = vcmp.eq.f32.partialorder %v9477_v10, %v3204_v5  ;;  %vm3282_vm6 = vcmp.eq.f32.partialorder %v9479_v24, %v3204_v5  ;;  %3687 = vmax.xlane.f32.xlu1 %v3686_v32 }
 0x722   : > { %vm12806_vm1 = vmpackc.low %vm3281_vm10, %vm18570_vm15  ;;  %v12811_v12 = vsel %vm3281_vm10, -3e+38, %v18469_v56  ;;  %v12814_v33 = vsel %vm3282_vm6, -3e+38, %v18470_v23  ;;  %v3695_v14 = vmax.f32 %v12795_v38, %v12800_v16  ;;  %v18581_v23 = vld [vmem:[#allocation53_spill] sm:$0xff] }
 0x723   : > { %v18572_v31 = vsel %vm12806_vm1, 4294967295, %v18571_v31  ;;  %18573 = vst [vmem:[#allocation74_spill] sm:$0xff] %v12811_v12  ;;  %18574 = vst [vmem:[#allocation75_spill] sm:$0xff] %v12814_v33  ;;  %v3692_v21 = vmax.f32 %v12811_v12, %v12814_v33  ;;  %vm18578_vm1 = vcmp.eq.f32.partialorder %v9477_v10, %v3207_v37 }
 0x724   : > { %vm12822_vm12 = vmpackc.low %vm3282_vm6, %vm18575_vm4  ;;  %v3210_v5 = vpop.xlane.xlu1 %3209  ;;  %3696 = vmax.xlane.f32.xlu0 %v3695_v14  ;;  %vm18582_vm4 = vcmp.eq.f32.partialorder %v9479_v24, %v3207_v37  ;;  %v8675_v37 = vld [vmem:[#allocation8 + $0x8] sm:$0xff]  }
 0x725   : > { %vm3285_vm15 = vcmp.eq.f32.partialorder %v9477_v10, %v3210_v5  ;;  %vm3286_vm10 = vcmp.eq.f32.partialorder %v9479_v24, %v3210_v5  ;;  %3693 = vmax.xlane.f32.xlu1 %v3692_v21 }
 0x726   : > { %vm12830_vm11 = vmpackc.low %vm3285_vm15, %vm18578_vm1  ;;  %v12835_v33 = vsel %vm3285_vm15, -3e+38, %v18581_v23  ;;  %v12838_v60 = vsel %vm3286_vm10, -3e+38, %v18472_v49  ;;  %v18585_v49 = vmov 1.0|1.0  }
 0x727   : > { %v3698_v14 = vmax.f32 %v12835_v33, %v12838_v60  ;;  %vm12844_vm6 = vmpackc.low %vm3286_vm10, %vm18582_vm4  ;;  %vm18586_vm1 = vcmask 130048  }
 0x728   : > { %vm18587_vm15 = vmmov %vm18586_vm1 }
 0x729   : > { %3699 = vmax.xlane.f32.xlu1 %v3698_v14 }
 0x731   : > { %v2791_v21 = vpop.f32.mrb[68].mxu0 }
 0x732   : > { %v2793_v12 = vpop.f32.mrb[69].mxu0 }
 0x733   : > { %v2795_v16 = vpop.f32.mrb[70].mxu0 }
 0x734   : > { %v2800_v38 = vpack.c.bf16 %v2795_v16, %v2791_v21  ;;  %v2797_v23 = vpop.f32.mrb[71].mxu0  ;;  %v18599_v21 = vld [vmem:[#allocation48_spill] sm:$0xff] }
 0x735   : > { %v2801_v11 = vpack.c.bf16 %v2797_v23, %v2793_v12 }
 0x737   : > { %2802 = vmatprep.subr.bf16.mxu1 %v2801_v11 }
 0x738   : > { %2803 = vmatpush1.bf16.msra.mxu1 %v2800_v38  ;;  %v8676_v38 = vld [vmem:[%s9231_s2 + $0x4] ss:$8 sps:$4 sm:$0xff]  }
 0x739   : > { %7831 = vmatprep.subr.msk.bf16.mxu1 %vm12476_vm3, %v18585_v49  ;;  %vm18589_vm3 = vnez %v18538_v59 }
 0x73b   : > { %7764 = vmatmul.mubr.msk.bf16.vlgmr.msra.gmra.mrb[28].mxu1 %vm18586_vm1, %v12436_v36 }
 0x73c   : > { %2844 = vmatprep.mubr.bf16.mxu1 %v18490_v26 }
 0x741   : > { %7833 = vmatpush1.bf16.xpose.msk.msra.mxu1 %vm12462_vm9, %v18585_v49  ;;  %vm18588_vm9 = vnez %v18520_v28  ;;  %v18596_v28 = vld [vmem:[#allocation37_spill] sm:$0xff] }
 0x742   : > { %7835 = vmatprep.subr.msk.bf16.mxu1 %vm12520_vm7, %v18585_v49  ;;  %vm18591_vm7 = vnez %v18553_v4  ;;  %v18597_v4 = vld [vmem:[#allocation44_spill] sm:$0xff] }
 0x743   : > { %7765 = vmatmul.mubr.msk.bf16.gmra.mrb[32].mxu1 %vm18587_vm15, %v8675_v37 }
 0x744   : > { %3503 = vmatprep.mubr.bf16.mxu1 %v8676_v38 }
 0x749   : > { %7837 = vmatpush1.bf16.xpose.msk.msra.mxu1 %vm12506_vm5, %v18585_v49  ;;  %vm18590_vm5 = vnez %v18531_v48 }
 0x74a   : > { %7839 = vmatprep.subr.msk.bf16.mxu1 %vm12564_vm14, %v18585_v49  ;;  %vm18593_vm14 = vnez %v18566_v62 }
 0x751   : > { %7841 = vmatpush1.bf16.xpose.msk.msra.mxu1 %vm12550_vm0, %v18585_v49  ;;  %vm18592_vm0 = vnez %v18546_v34 }
 0x752   : > { %7843 = vmatprep.subr.msk.bf16.mxu1 %vm12608_vm13, %v18585_v49 }
 0x759   : > { %7845 = vmatpush1.bf16.xpose.msk.msra.mxu1 %vm12594_vm8, %v18585_v49 }
 0x75a   : > { %7847 = vmatprep.subr.msk.bf16.mxu1 %vm12652_vm2, %v18585_v49  ;;  %vm18594_vm2 = vnez %v18559_v18 }
 0x761   : > { %7849 = vmatpush1.bf16.xpose.msk.msra.mxu1 %vm18588_vm9, %v18585_v49 }
 0x762   : > { %7851 = vmatprep.subr.msk.bf16.mxu1 %vm18589_vm3, %v18585_v49 }
 0x769   : > { %7853 = vmatpush1.bf16.xpose.msk.msra.mxu1 %vm18590_vm5, %v18585_v49 }
 0x76a   : > { %7855 = vmatprep.subr.msk.bf16.mxu1 %vm18591_vm7, %v18585_v49  ;;  %vm18598_vm7 = vnez %v18572_v31 }
 0x771   : > { %7857 = vmatpush1.bf16.xpose.msk.msra.mxu1 %vm18592_vm0, %v18585_v49 }
 0x772   : > { %7859 = vmatprep.subr.msk.bf16.mxu1 %vm18593_vm14, %v18585_v49 }
 0x774   : > { %v3643_v36 = vpop.xlane.xlu0 %3642 }
 0x775   : > { %vm3737_vm8 = vcmp.ge.f32.partialorder %v12447_v35, %v3643_v36  ;;  %vm3738_vm13 = vcmp.ge.f32.partialorder %v12452_v17, %v3643_v36 }
 0x776   : > { %v3801_v0 = vsel %vm3737_vm8, %v9477_v10, 256.0  ;;  %v3802_v20 = vsel %vm3738_vm13, %v9479_v24, 256.0 }
 0x777   : > { %v3865_v47 = vmin.f32 %v3801_v0, %v3802_v20 }
 0x778   : > { %v12905_v6 = vpop.xlane.xlu0 %3212 }
 0x779   : > { %7861 = vmatpush1.bf16.xpose.msk.msra.mxu1 %vm18594_vm2, %v18585_v49  ;;  %vm3287_vm10 = vcmp.eq.f32.partialorder %v9477_v10, %v12905_v6  ;;  %vm3288_vm4 = vcmp.eq.f32.partialorder %v9479_v24, %v12905_v6  ;;  %3866 = vmin.xlane.f32.xlu0 %v3865_v47 }
 0x77a   : > { %7863 = vmatprep.subr.msk.bf16.mxu1 %vm12822_vm12, %v18585_v49  ;;  %v3646_v2 = vpop.xlane.xlu1 %3645  ;;  %v12918_v15 = vsel %vm3287_vm10, -3e+38, %v12154_v53  ;;  %v12924_v50 = vsel %vm3288_vm4, -3e+38, %v12160_v29 }
 0x77b   : > { %vm3739_vm12 = vcmp.ge.f32.partialorder %v18595_v54, %v3646_v2  ;;  %vm3740_vm1 = vcmp.ge.f32.partialorder %v18596_v28, %v3646_v2  ;;  %v3701_v59 = vmax.f32 %v12918_v15, %v12924_v50  ;;  %v18600_v2 = vld [vmem:[#allocation49_spill] sm:$0xff] }
 0x77c   : > { %v3803_v55 = vsel %vm3739_vm12, %v9477_v10, 256.0  ;;  %v3804_v48 = vsel %vm3740_vm1, %v9479_v24, 256.0  ;;  %v3649_v16 = vpop.xlane.xlu0 %3648 }
 0x77d   : > { %v3868_v53 = vmin.f32 %v3803_v55, %v3804_v48  ;;  %vm3741_vm15 = vcmp.ge.f32.partialorder %v12485_v22, %v3649_v16  ;;  %vm3742_vm9 = vcmp.ge.f32.partialorder %v12490_v43, %v3649_v16  ;;  %3702 = vmax.xlane.f32.xlu0 %v3701_v59 }
 0x77e   : > { %v12934_v11 = vpop.xlane.xlu1 %3215  ;;  %v3805_v29 = vsel %vm3741_vm15, %v9477_v10, 256.0  ;;  %v3806_v34 = vsel %vm3742_vm9, %v9479_v24, 256.0 }
 0x77f   : > { %vm3289_vm3 = vcmp.eq.f32.partialorder %v9477_v10, %v12934_v11  ;;  %vm3290_vm5 = vcmp.eq.f32.partialorder %v9479_v24, %v12934_v11  ;;  %3869 = vmin.xlane.f32.xlu1 %v3868_v53  ;;  %v3871_v12 = vmin.f32 %v3805_v29, %v3806_v34  ;;  %v18601_v29 = vld [vmem:[#allocation47_spill] sm:$0xff] }
 0x780   : > { %v12946_v18 = vsel %vm3289_vm3, -3e+38, %v18597_v4  ;;  %v12952_v62 = vsel %vm3290_vm5, -3e+38, %v12190_v27  ;;  %v12957_v32 = vpop.xlane.xlu0 %3218  ;;  %vm7870_vm15 = vmpackc.low %vm3290_vm5, %vm3288_vm4 }
 0x781   : > { %7865 = vmatpush1.bf16.xpose.msk.msra.mxu1 %vm18598_vm7, %v18585_v49  ;;  %v3704_v14 = vmax.f32 %v12946_v18, %v12952_v62  ;;  %vm3291_vm0 = vcmp.eq.f32.partialorder %v9477_v10, %v12957_v32  ;;  %vm3292_vm14 = vcmp.eq.f32.partialorder %v9479_v24, %v12957_v32  ;;  %3872 = vmin.xlane.f32.xlu0 %v3871_v12 }
 0x782   : > { %7867 = vmatprep.subr.msk.bf16.mxu1 %vm12844_vm6, %v18585_v49  ;;  %v3652_v27 = vpop.xlane.xlu1 %3651  ;;  %v12972_v31 = vsel %vm3291_vm0, -3e+38, %v12198_v63  ;;  %v12978_v5 = vsel %vm3292_vm14, -3e+38, %v18599_v21 }
 0x783   : > { %vm3743_vm6 = vcmp.ge.f32.partialorder %v12511_v42, %v3652_v27  ;;  %vm3744_vm8 = vcmp.ge.f32.partialorder %v12514_v45, %v3652_v27  ;;  %3705 = vmax.xlane.f32.xlu1 %v3704_v14  ;;  %v3707_v38 = vmax.f32 %v12972_v31, %v12978_v5 }
 0x784   : > { %v3807_v23 = vsel %vm3743_vm6, %v9477_v10, 256.0  ;;  %v3808_v37 = vsel %vm3744_vm8, %v9479_v24, 256.0  ;;  %v3655_v63 = vpop.xlane.xlu0 %3654 }
 0x785   : > { %v3874_v36 = vmin.f32 %v3807_v23, %v3808_v37  ;;  %vm3745_vm13 = vcmp.ge.f32.partialorder %v12529_v13, %v3655_v63  ;;  %vm3746_vm2 = vcmp.ge.f32.partialorder %v12534_v8, %v3655_v63  ;;  %3708 = vmax.xlane.f32.xlu0 %v3707_v38  ;;  %v18603_v38 = vld [vmem:[#allocation19_spill] sm:$0xff] }
 0x786   : > { %v12988_v0 = vpop.xlane.xlu1 %3221  ;;  %v3809_v20 = vsel %vm3745_vm13, %v9477_v10, 256.0  ;;  %v3810_v47 = vsel %vm3746_vm2, %v9479_v24, 256.0  ;;  %vm7872_vm2 = vmpackc.low %vm3289_vm3, %vm3287_vm10 }
 0x787   : > { %vm3293_vm12 = vcmp.eq.f32.partialorder %v9477_v10, %v12988_v0  ;;  %vm3294_vm1 = vcmp.eq.f32.partialorder %v9479_v24, %v12988_v0  ;;  %3875 = vmin.xlane.f32.xlu1 %v3874_v36  ;;  %v3877_v59 = vmin.f32 %v3809_v20, %v3810_v47 }
 0x788   : > { %v13000_v55 = vsel %vm3293_vm12, -3e+38, %v18600_v2  ;;  %v13006_v48 = vsel %vm3294_vm1, -3e+38, %v12228_v58  ;;  %v13017_v16 = vpop.xlane.xlu0 %3224  ;;  %vm7874_vm10 = vmpackc.low %vm3294_vm1, %vm3292_vm14  ;;  %v18605_v2 = vld [vmem:[#allocation24_spill] sm:$0xff] }
 0x789   : > { %7869 = vmatpush1.bf16.xpose.msk.msra.mxu1 %vm12830_vm11, %v18585_v49  ;;  %v3710_v53 = vmax.f32 %v13000_v55, %v13006_v48  ;;  %vm3295_vm9 = vcmp.eq.f32.partialorder %v9477_v10, %v13017_v16  ;;  %vm3296_vm11 = vcmp.eq.f32.partialorder %v9479_v24, %v13017_v16  ;;  %3878 = vmin.xlane.f32.xlu0 %v3877_v59 }
 0x78a   : > { %7871 = vmatprep.subr.msk.bf16.mxu1 %vm7870_vm15, %v18585_v49  ;;  %v3658_v58 = vpop.xlane.xlu1 %3657  ;;  %v13030_v56 = vsel %vm3295_vm9, -3e+38, %v12236_v41  ;;  %v13036_v34 = vsel %vm3296_vm11, -3e+38, %v18601_v29 }
 0x78b   : > { %18602 = vst [vmem:[#allocation53_spill] sm:$0xff] %v13036_v34  ;;  %vm3747_vm4 = vcmp.ge.f32.partialorder %v12555_v46, %v3658_v58  ;;  %vm3748_vm5 = vcmp.ge.f32.partialorder %v12558_v19, %v3658_v58  ;;  %3711 = vmax.xlane.f32.xlu1 %v3710_v53  ;;  %v3713_v14 = vmax.f32 %v13030_v56, %v13036_v34 }
 0x78c   : > { %v3811_v4 = vsel %vm3747_vm4, %v9477_v10, 256.0  ;;  %v3812_v12 = vsel %vm3748_vm5, %v9479_v24, 256.0  ;;  %v3661_v41 = vpop.xlane.xlu0 %3660 }
 0x78d   : > { %v3880_v27 = vmin.f32 %v3811_v4, %v3812_v12  ;;  %vm3749_vm7 = vcmp.ge.f32.partialorder %v12573_v3, %v3661_v41  ;;  %vm3750_vm6 = vcmp.ge.f32.partialorder %v12578_v52, %v3661_v41  ;;  %3714 = vmax.xlane.f32.xlu0 %v3713_v14 }
 0x78e   : > { %v13046_v21 = vpop.xlane.xlu1 %3227  ;;  %v3813_v23 = vsel %vm3749_vm7, %v9477_v10, 256.0  ;;  %v3814_v37 = vsel %vm3750_vm6, %v9479_v24, 256.0 }
 0x78f   : > { %vm3297_vm8 = vcmp.eq.f32.partialorder %v9477_v10, %v13046_v21  ;;  %vm3298_vm13 = vcmp.eq.f32.partialorder %v9479_v24, %v13046_v21  ;;  %3881 = vmin.xlane.f32.xlu1 %v3880_v27  ;;  %v3883_v20 = vmin.f32 %v3813_v23, %v3814_v37  ;;  %v18607_v27 = vld [vmem:[#allocation21_spill] sm:$0xff] }
 0x790   : > { %v13064_v63 = vsel %vm3297_vm8, -3e+38, %v18603_v38  ;;  %v13070_v36 = vsel %vm3298_vm13, -3e+38, %v12264_v9  ;;  %v13079_v6 = vpop.xlane.xlu0 %3230 }
 0x791   : > { %18604 = vst [vmem:[#allocation41_spill] sm:$0xff] %v13064_v63  ;;  %7873 = vmatpush1.bf16.xpose.msk.msra.mxu1 %vm7872_vm2, %v18585_v49  ;;  %v3716_v11 = vmax.f32 %v13064_v63, %v13070_v36  ;;  %vm3299_vm3 = vcmp.eq.f32.partialorder %v9477_v10, %v13079_v6  ;;  %vm3300_vm15 = vcmp.eq.f32.partialorder %v9479_v24, %v13079_v6  ;;  %vm7876_vm2 = vmpackc.low %vm3293_vm12, %vm3291_vm0 }
 0x792   : > { %7875 = vmatprep.subr.msk.bf16.mxu1 %vm7874_vm10, %v18585_v49  ;;  %v3664_v9 = vpop.xlane.xlu1 %3663  ;;  %3884 = vmin.xlane.f32.xlu0 %v3883_v20  ;;  %v13092_v47 = vsel %vm3299_vm3, -3e+38, %v12272_v7  ;;  %v13098_v59 = vsel %vm3300_vm15, -3e+38, %v18605_v2  ;;  %vm7878_vm0 = vmpackc.low %vm3298_vm13, %vm3296_vm11  ;;  %v18610_v20 = vld [vmem:[#allocation28_spill] sm:$0xff] }
 0x793   : > { %18606 = vst [vmem:[#allocation37_spill] sm:$0xff] %v13098_v59  ;;  %vm3751_vm14 = vcmp.ge.f32.partialorder %v12599_v44, %v3664_v9  ;;  %vm3752_vm1 = vcmp.ge.f32.partialorder %v12602_v39, %v3664_v9  ;;  %3717 = vmax.xlane.f32.xlu1 %v3716_v11  ;;  %v3719_v29 = vmax.f32 %v13092_v47, %v13098_v59  ;;  %v18612_v9 = vld [vmem:[#allocation29_spill] sm:$0xff] }
 0x794   : > { %v3815_v53 = vsel %vm3751_vm14, %v9477_v10, 256.0  ;;  %v3816_v58 = vsel %vm3752_vm1, %v9479_v24, 256.0  ;;  %v3667_v7 = vpop.xlane.xlu0 %3666 }
 0x795   : > { %v3886_v4 = vmin.f32 %v3815_v53, %v3816_v58  ;;  %vm3753_vm4 = vcmp.ge.f32.partialorder %v12617_v25, %v3667_v7  ;;  %vm3754_vm5 = vcmp.ge.f32.partialorder %v12622_v30, %v3667_v7  ;;  %v18614_v53 = vld [vmem:[#allocation68_spill] sm:$0xff]  ;;  %v18615_v58 = vld [vmem:[#allocation54_spill] sm:$0xff]  ;;  %v18634_v30 = vld [vmem:[#allocation23_spill] sm:$0xff] }
 0x796   : > { %v13108_v12 = vpop.xlane.xlu1 %3233  ;;  %3720 = vmax.xlane.f32.xlu0 %v3719_v29  ;;  %v3817_v14 = vsel %vm3753_vm4, %v9477_v10, 256.0  ;;  %v3818_v41 = vsel %vm3754_vm5, %v9479_v24, 256.0  ;;  %v18636_v25 = vld [vmem:[#allocation26_spill] sm:$0xff] }
 0x797   : > { %vm3301_vm7 = vcmp.eq.f32.partialorder %v9477_v10, %v13108_v12  ;;  %vm3302_vm6 = vcmp.eq.f32.partialorder %v9479_v24, %v13108_v12  ;;  %3887 = vmin.xlane.f32.xlu1 %v3886_v4  ;;  %v3889_v38 = vmin.f32 %v3817_v14, %v3818_v41 }
 0x798   : > { %v13126_v23 = vsel %vm3301_vm7, -3e+38, %v18607_v27  ;;  %v13132_v37 = vsel %vm3302_vm6, -3e+38, %v12300_v1 }
 0x799   : > { %18608 = vst [vmem:[#allocation44_spill] sm:$0xff] %v13126_v23  ;;  %18609 = vst [vmem:[#allocation48_spill] sm:$0xff] %v13132_v37  ;;  %7877 = vmatpush1.bf16.xpose.msk.msra.mxu1 %vm7876_vm2, %v18585_v49  ;;  %v13141_v32 = vpop.xlane.xlu0 %3236  ;;  %v3722_v0 = vmax.f32 %v13126_v23, %v13132_v37 }
 0x79a   : > { %7879 = vmatprep.subr.msk.bf16.mxu1 %vm7878_vm0, %v18585_v49  ;;  %vm3303_vm12 = vcmp.eq.f32.partialorder %v9477_v10, %v13141_v32  ;;  %vm3304_vm10 = vcmp.eq.f32.partialorder %v9479_v24, %v13141_v32  ;;  %v3670_v1 = vpop.xlane.xlu1 %3669  ;;  %3890 = vmin.xlane.f32.xlu0 %v3889_v38  ;;  %vm7880_vm2 = vmpackc.low %vm3297_vm8, %vm3295_vm9 }
 0x79b   : > { %v13154_v11 = vsel %vm3303_vm12, -3e+38, %v18610_v20  ;;  %v13160_v2 = vsel %vm3304_vm10, -3e+38, %v18612_v9  ;;  %vm3755_vm11 = vcmp.ge.f32.partialorder %v18614_v53, %v3670_v1  ;;  %vm3756_vm13 = vcmp.ge.f32.partialorder %v18615_v58, %v3670_v1  ;;  %3723 = vmax.xlane.f32.xlu1 %v3722_v0  ;;  %v18616_v1 = vld [vmem:[#allocation25_spill] sm:$0xff]  ;;  %v18618_v9 = vld [vmem:[#allocation22_spill] sm:$0xff]  ;;  %vm7882_vm9 = vmpackc.low %vm3302_vm6, %vm3300_vm15 }
 0x79c   : > { %18611 = vst [vmem:[#allocation49_spill] sm:$0xff] %v13154_v11  ;;  %18613 = vst [vmem:[#allocation47_spill] sm:$0xff] %v13160_v2  ;;  %v3819_v29 = vsel %vm3755_vm11, %v9477_v10, 256.0  ;;  %v3820_v7 = vsel %vm3756_vm13, %v9479_v24, 256.0  ;;  %v3725_v4 = vmax.f32 %v13154_v11, %v13160_v2 }
 0x79d   : > { %v3673_v14 = vpop.xlane.xlu0 %3672  ;;  %v3892_v41 = vmin.f32 %v3819_v29, %v3820_v7 }
 0x79e   : > { %vm3757_vm14 = vcmp.ge.f32.partialorder %v12661_v57, %v3673_v14  ;;  %vm3758_vm1 = vcmp.ge.f32.partialorder %v12666_v40, %v3673_v14  ;;  %v13170_v27 = vpop.xlane.xlu1 %3239  ;;  %3726 = vmax.xlane.f32.xlu0 %v3725_v4  ;;  %v18620_v14 = vld [vmem:[#allocation30_spill] sm:$0xff] }
 0x79f   : > { %v3821_v38 = vsel %vm3757_vm14, %v9477_v10, 256.0  ;;  %v3822_v0 = vsel %vm3758_vm1, %v9479_v24, 256.0  ;;  %vm3305_vm4 = vcmp.eq.f32.partialorder %v9477_v10, %v13170_v27  ;;  %vm3306_vm5 = vcmp.eq.f32.partialorder %v9479_v24, %v13170_v27  ;;  %3893 = vmin.xlane.f32.xlu1 %v3892_v41  ;;  %v18625_v40 = vld [vmem:[#allocation18_spill] sm:$0xff] }
 0x7a0   : > { %v13188_v20 = vsel %vm3305_vm4, -3e+38, %v18616_v1  ;;  %v13194_v29 = vsel %vm3306_vm5, -3e+38, %v18618_v9  ;;  %v3895_v7 = vmin.f32 %v3821_v38, %v3822_v0  ;;  %v18622_v38 = vld [vmem:[#allocation31_spill] sm:$0xff]  ;;  %v18624_v1 = vld [vmem:[#allocation56_spill] sm:$0xff] }
 0x7a1   : > { %18617 = vst [vmem:[#allocation19_spill] sm:$0xff] %v13188_v20  ;;  %18619 = vst [vmem:[#allocation24_spill] sm:$0xff] %v13194_v29  ;;  %7881 = vmatpush1.bf16.xpose.msk.msra.mxu1 %vm7880_vm2, %v18585_v49  ;;  %v13203_v16 = vpop.xlane.xlu0 %3242  ;;  %v3728_v21 = vmax.f32 %v13188_v20, %v13194_v29  ;;  %v18638_v27 = vld [vmem:[#allocation46_spill] sm:$0xff] }
 0x7a2   : > { %7883 = vmatprep.subr.msk.bf16.mxu1 %vm7882_vm9, %v18585_v49  ;;  %vm3307_vm8 = vcmp.eq.f32.partialorder %v9477_v10, %v13203_v16  ;;  %vm3308_vm0 = vcmp.eq.f32.partialorder %v9479_v24, %v13203_v16  ;;  %v3676_v4 = vpop.xlane.xlu1 %3675  ;;  %3896 = vmin.xlane.f32.xlu0 %v3895_v7  ;;  %vm7884_vm2 = vmpackc.low %vm3301_vm7, %vm3299_vm3 }
 0x7a3   : > { %v13216_v41 = vsel %vm3307_vm8, -3e+38, %v18620_v14  ;;  %v13222_v0 = vsel %vm3308_vm0, -3e+38, %v18622_v38  ;;  %vm3759_vm15 = vcmp.ge.f32.partialorder %v12687_v51, %v3676_v4  ;;  %vm3760_vm6 = vcmp.ge.f32.partialorder %v18624_v1, %v3676_v4  ;;  %3729 = vmax.xlane.f32.xlu1 %v3728_v21  ;;  %v18626_v4 = vld [vmem:[#allocation32_spill] sm:$0xff]  ;;  %vm7886_vm3 = vmpackc.low %vm3306_vm5, %vm3304_vm10  ;;  %v18632_v1 = vld [vmem:[#allocation57_spill] sm:$0xff] }
 0x7a4   : > { %18621 = vst [vmem:[#allocation21_spill] sm:$0xff] %v13216_v41  ;;  %18623 = vst [vmem:[#allocation28_spill] sm:$0xff] %v13222_v0  ;;  %v3823_v9 = vsel %vm3759_vm15, %v9477_v10, 256.0  ;;  %v3824_v7 = vsel %vm3760_vm6, %v9479_v24, 256.0  ;;  %v3731_v58 = vmax.f32 %v13216_v41, %v13222_v0 }
 0x7a5   : > { %v3679_v14 = vpop.xlane.xlu0 %3678  ;;  %v3898_v53 = vmin.f32 %v3823_v9, %v3824_v7  ;;  %v18628_v9 = vld [vmem:[#allocation33_spill] sm:$0xff] }
 0x7a6   : > { %vm3761_vm11 = vcmp.ge.f32.partialorder %v12705_v61, %v3679_v14  ;;  %vm3762_vm13 = vcmp.ge.f32.partialorder %v18625_v40, %v3679_v14  ;;  %v13232_v38 = vpop.xlane.xlu1 %3245  ;;  %3732 = vmax.xlane.f32.xlu0 %v3731_v58  ;;  %v18630_v14 = vld [vmem:[#allocation70_spill] sm:$0xff]  ;;  %v18633_v40 = vld [vmem:[#allocation27_spill] sm:$0xff] }
 0x7a7   : > { %v3825_v51 = vsel %vm3761_vm11, %v9477_v10, 256.0  ;;  %v3826_v21 = vsel %vm3762_vm13, %v9479_v24, 256.0  ;;  %vm3309_vm14 = vcmp.eq.f32.partialorder %v9477_v10, %v13232_v38  ;;  %vm3310_vm1 = vcmp.eq.f32.partialorder %v9479_v24, %v13232_v38  ;;  %3899 = vmin.xlane.f32.xlu1 %v3898_v53 }
 0x7a8   : > { %v13250_v58 = vsel %vm3309_vm14, -3e+38, %v18626_v4  ;;  %v13256_v7 = vsel %vm3310_vm1, -3e+38, %v18628_v9  ;;  %v3901_v53 = vmin.f32 %v3825_v51, %v3826_v21  ;;  %v18631_v4 = vld [vmem:[#allocation71_spill] sm:$0xff] }
 0x7a9   : > { %18627 = vst [vmem:[#allocation29_spill] sm:$0xff] %v13250_v58  ;;  %18629 = vst [vmem:[#allocation25_spill] sm:$0xff] %v13256_v7  ;;  %7885 = vmatpush1.bf16.xpose.msk.msra.mxu1 %vm7884_vm2, %v18585_v49  ;;  %v3685_v6 = vpop.xlane.xlu0 %3684  ;;  %v3734_v12 = vmax.f32 %v13250_v58, %v13256_v7 }
 0x7aa   : > { %7887 = vmatprep.subr.msk.bf16.mxu1 %vm7886_vm3, %v18585_v49  ;;  %vm3765_vm7 = vcmp.ge.f32.partialorder %v18630_v14, %v3685_v6  ;;  %vm3766_vm9 = vcmp.ge.f32.partialorder %v18631_v4, %v3685_v6  ;;  %v3682_v51 = vpop.xlane.xlu1 %3681  ;;  %3902 = vmin.xlane.f32.xlu0 %v3901_v53  ;;  %v18635_v6 = vld [vmem:[#allocation72_spill] sm:$0xff]  ;;  %vm7888_vm2 = vmpackc.low %vm3305_vm4, %vm3303_vm12 }
 0x7ab   : > { %v3829_v21 = vsel %vm3765_vm7, %v9477_v10, 256.0  ;;  %v3830_v9 = vsel %vm3766_vm9, %v9479_v24, 256.0  ;;  %vm3763_vm15 = vcmp.ge.f32.partialorder %v18632_v1, %v3682_v51  ;;  %vm3764_vm10 = vcmp.ge.f32.partialorder %v18633_v40, %v3682_v51  ;;  %3735 = vmax.xlane.f32.xlu1 %v3734_v12  ;;  %v18637_v12 = vld [vmem:[#allocation45_spill] sm:$0xff]  ;;  %vm7890_vm3 = vmpackc.low %vm3310_vm1, %vm3308_vm0 }
 0x7ac   : > { %v3827_v61 = vsel %vm3763_vm15, %v9477_v10, 256.0  ;;  %v3828_v57 = vsel %vm3764_vm10, %v9479_v24, 256.0  ;;  %v3907_v39 = vmin.f32 %v3829_v21, %v3830_v9  ;;  %v18640_v21 = vld [vmem:[#allocation74_spill] sm:$0xff]  ;;  %v18641_v9 = vld [vmem:[#allocation75_spill] sm:$0xff]  ;;  %vm7892_vm15 = vmpackc.low %vm3309_vm14, %vm3307_vm8 }
 0x7ad   : > { %v3691_v44 = vpop.xlane.xlu0 %3690  ;;  %v3904_v14 = vmin.f32 %v3827_v61, %v3828_v57 }
 0x7ae   : > { %vm3769_vm5 = vcmp.ge.f32.partialorder %v18634_v30, %v3691_v44  ;;  %vm3770_vm6 = vcmp.ge.f32.partialorder %v18635_v6, %v3691_v44  ;;  %v3688_v53 = vpop.xlane.xlu1 %3687  ;;  %3908 = vmin.xlane.f32.xlu0 %v3907_v39 }
 0x7af   : > { %v3833_v4 = vsel %vm3769_vm5, %v9477_v10, 256.0  ;;  %v3834_v1 = vsel %vm3770_vm6, %v9479_v24, 256.0  ;;  %vm3767_vm11 = vcmp.ge.f32.partialorder %v18636_v25, %v3688_v53  ;;  %vm3768_vm13 = vcmp.ge.f32.partialorder %v18637_v12, %v3688_v53  ;;  %3905 = vmin.xlane.f32.xlu1 %v3904_v14  ;;  %v18639_v14 = vld [vmem:[#allocation73_spill] sm:$0xff] }
 0x7b0   : > { %v3831_v44 = vsel %vm3767_vm11, %v9477_v10, 256.0  ;;  %v3832_v39 = vsel %vm3768_vm13, %v9479_v24, 256.0  ;;  %v3913_v57 = vmin.f32 %v3833_v4, %v3834_v1 }
 0x7b1   : > { %7889 = vmatpush1.bf16.xpose.msk.msra.mxu1 %vm7888_vm2, %v18585_v49  ;;  %v3697_v61 = vpop.xlane.xlu0 %3696  ;;  %v3910_v32 = vmin.f32 %v3831_v44, %v3832_v39 }
 0x7b2   : > { %7891 = vmatprep.subr.msk.bf16.mxu1 %vm7890_vm3, %v18585_v49  ;;  %vm3773_vm12 = vcmp.ge.f32.partialorder %v18638_v27, %v3697_v61  ;;  %vm3774_vm4 = vcmp.ge.f32.partialorder %v18639_v14, %v3697_v61  ;;  %v3694_v51 = vpop.xlane.xlu1 %3693  ;;  %3914 = vmin.xlane.f32.xlu0 %v3913_v57 }
 0x7b3   : > { %v3837_v1 = vsel %vm3773_vm12, %v9477_v10, 256.0  ;;  %v3838_v4 = vsel %vm3774_vm4, %v9479_v24, 256.0  ;;  %vm3771_vm7 = vcmp.ge.f32.partialorder %v18640_v21, %v3694_v51  ;;  %vm3772_vm9 = vcmp.ge.f32.partialorder %v18641_v9, %v3694_v51  ;;  %3911 = vmin.xlane.f32.xlu1 %v3910_v32  ;;  %v13318_v51 = vld [vmem:[%s9231_s2] ss:$8 sps:$4 sm:$0xff]  }
 0x7b4   : > { %v3835_v53 = vsel %vm3771_vm7, %v9477_v10, 256.0  ;;  %v3836_v44 = vsel %vm3772_vm9, %v9479_v24, 256.0  ;;  %v3919_v39 = vmin.f32 %v3837_v1, %v3838_v4 }
 0x7b5   : > { %v3916_v27 = vmin.f32 %v3835_v53, %v3836_v44 }
 0x7b6   : > { %v3700_v12 = vpop.xlane.xlu1 %3699  ;;  %3920 = vmin.xlane.f32.xlu0 %v3919_v39 }
 0x7b7   : > { %vm3775_vm0 = vcmp.ge.f32.partialorder %v12835_v33, %v3700_v12  ;;  %vm3776_vm1 = vcmp.ge.f32.partialorder %v12838_v60, %v3700_v12  ;;  %3917 = vmin.xlane.f32.xlu1 %v3916_v27 }
 0x7b8   : > { %v3839_v57 = vsel %vm3775_vm0, %v9477_v10, 256.0  ;;  %v3840_v61 = vsel %vm3776_vm1, %v9479_v24, 256.0 }
 0x7b9   : > { %7893 = vmatpush1.bf16.xpose.msk.msra.mxu1 %vm7892_vm15, %v18585_v49  ;;  %v3922_v32 = vmin.f32 %v3839_v57, %v3840_v61 }
 0x7bb   : > { %3923 = vmin.xlane.f32.xlu1 %v3922_v32 }
 0x7c0   : > { %3504 = vmatmul.mubr.bf16.vlgmr.msra.gmra.mrb[36].mxu1 %v13318_v51 }
 0x7c1   : > { %3548 = vmatprep.mubr.bf16.mxu1 %v18490_v26 }
 0x806   : > { %v13322_v12 = vpop.xlane.xlu0 %3866 }
 0x807   : > { %vm3961_vm8 = vcmp.eq.f32.partialorder %v9477_v10, %v13322_v12  ;;  %vm3962_vm11 = vcmp.eq.f32.partialorder %v9479_v24, %v13322_v12 }
 0x80a   : > { %v3703_v16 = vpop.xlane.xlu0 %3702 }
 0x80b   : > { %vm3777_vm14 = vcmp.ge.f32.partialorder %v12918_v15, %v3703_v16  ;;  %vm3778_vm10 = vcmp.ge.f32.partialorder %v12924_v50, %v3703_v16 }
 0x80c   : > { %v13328_v38 = vpop.xlane.xlu1 %3869  ;;  %v3841_v27 = vsel %vm3777_vm14, %v9477_v10, 256.0  ;;  %v3842_v1 = vsel %vm3778_vm10, %v9479_v24, 256.0 }
 0x80d   : > { %vm3963_vm5 = vcmp.eq.f32.partialorder %v9477_v10, %v13328_v38  ;;  %vm3964_vm6 = vcmp.eq.f32.partialorder %v9479_v24, %v13328_v38  ;;  %v3925_v4 = vmin.f32 %v3841_v27, %v3842_v1 }
 0x80e   : > { %vm7962_vm13 = vmpackc.low %vm3963_vm5, %vm3961_vm8  ;;  %v13350_v53 = vpop.xlane.xlu0 %3872 }
 0x80f   : > { %vm7960_vm2 = vmpackc.low %vm3964_vm6, %vm3962_vm11  ;;  %3926 = vmin.xlane.f32.xlu0 %v3925_v4  ;;  %vm3965_vm4 = vcmp.eq.f32.partialorder %v9477_v10, %v13350_v53  ;;  %vm3966_vm15 = vcmp.eq.f32.partialorder %v9479_v24, %v13350_v53 }
 0x810   : > { %7961 = vmatprep.subr.msk.bf16.mxu0 %vm7960_vm2, %v18585_v49  ;;  %v3706_v44 = vpop.xlane.xlu1 %3705 }
 0x811   : > { %vm3779_vm3 = vcmp.ge.f32.partialorder %v12946_v18, %v3706_v44  ;;  %vm3780_vm12 = vcmp.ge.f32.partialorder %v12952_v62, %v3706_v44  ;;  %7963 = vmatpush1.bf16.xpose.msk.msra.mxu0 %vm7962_vm13, %v18585_v49 }
 0x812   : > { %v3843_v39 = vsel %vm3779_vm3, %v9477_v10, 256.0  ;;  %v3844_v57 = vsel %vm3780_vm12, %v9479_v24, 256.0  ;;  %v3709_v61 = vpop.xlane.xlu0 %3708 }
 0x813   : > { %v3928_v32 = vmin.f32 %v3843_v39, %v3844_v57  ;;  %vm3781_vm7 = vcmp.ge.f32.partialorder %v12972_v31, %v3709_v61  ;;  %vm3782_vm9 = vcmp.ge.f32.partialorder %v12978_v5, %v3709_v61 }
 0x814   : > { %v13362_v16 = vpop.xlane.xlu1 %3875  ;;  %v3845_v27 = vsel %vm3781_vm7, %v9477_v10, 256.0  ;;  %v3846_v1 = vsel %vm3782_vm9, %v9479_v24, 256.0 }
 0x815   : > { %vm17763_vm0 = vcmp.eq.f32.partialorder %v9477_v10, %v13362_v16  ;;  %vm17762_vm1 = vcmp.eq.f32.partialorder %v9479_v24, %v13362_v16  ;;  %3929 = vmin.xlane.f32.xlu1 %v3928_v32  ;;  %v3931_v4 = vmin.f32 %v3845_v27, %v3846_v1 }
 0x816   : > { %vm7966_vm14 = vmpackc.low %vm17763_vm0, %vm3965_vm4  ;;  %v13384_v44 = vpop.xlane.xlu0 %3878 }
 0x817   : > { %vm7964_vm10 = vmpackc.low %vm17762_vm1, %vm3966_vm15  ;;  %3932 = vmin.xlane.f32.xlu0 %v3931_v4  ;;  %vm3969_vm3 = vcmp.eq.f32.partialorder %v9477_v10, %v13384_v44 }
 0x818   : > { %7965 = vmatprep.subr.msk.bf16.mxu0 %vm7964_vm10, %v18585_v49  ;;  %v3712_v39 = vpop.xlane.xlu1 %3711  ;;  %vm3970_vm10 = vcmp.eq.f32.partialorder %v9479_v24, %v13384_v44 }
 0x819   : > { %vm3783_vm13 = vcmp.ge.f32.partialorder %v13000_v55, %v3712_v39  ;;  %vm3784_vm2 = vcmp.ge.f32.partialorder %v13006_v48, %v3712_v39  ;;  %7967 = vmatpush1.bf16.xpose.msk.msra.mxu0 %vm7966_vm14, %v18585_v49 }
 0x81a   : > { %v3847_v57 = vsel %vm3783_vm13, %v9477_v10, 256.0  ;;  %v3848_v61 = vsel %vm3784_vm2, %v9479_v24, 256.0  ;;  %v3715_v32 = vpop.xlane.xlu0 %3714 }
 0x81b   : > { %v3934_v27 = vmin.f32 %v3847_v57, %v3848_v61  ;;  %vm3785_vm12 = vcmp.ge.f32.partialorder %v13030_v56, %v3715_v32  ;;  %vm3786_vm7 = vcmp.ge.f32.partialorder %v13036_v34, %v3715_v32 }
 0x81c   : > { %v13396_v1 = vpop.xlane.xlu1 %3881  ;;  %v3849_v4 = vsel %vm3785_vm12, %v9477_v10, 256.0  ;;  %v3850_v39 = vsel %vm3786_vm7, %v9479_v24, 256.0 }
 0x81d   : > { %vm17760_vm9 = vcmp.eq.f32.partialorder %v9477_v10, %v13396_v1  ;;  %vm17759_vm14 = vcmp.eq.f32.partialorder %v9479_v24, %v13396_v1  ;;  %3935 = vmin.xlane.f32.xlu1 %v3934_v27  ;;  %v3937_v57 = vmin.f32 %v3849_v4, %v3850_v39 }
 0x81e   : > { %vm7970_vm13 = vmpackc.low %vm17760_vm9, %vm3969_vm3 }
 0x81f   : > { %vm7968_vm2 = vmpackc.low %vm17759_vm14, %vm3970_vm10  ;;  %v13418_v61 = vpop.xlane.xlu0 %3884  ;;  %3938 = vmin.xlane.f32.xlu0 %v3937_v57 }
 0x820   : > { %7969 = vmatprep.subr.msk.bf16.mxu0 %vm7968_vm2, %v18585_v49  ;;  %v3718_v32 = vpop.xlane.xlu1 %3717  ;;  %vm17769_vm14 = vcmp.eq.f32.partialorder %v9477_v10, %v13418_v61 }
 0x821   : > { %vm3787_vm12 = vcmp.ge.f32.partialorder %v13064_v63, %v3718_v32  ;;  %vm3788_vm7 = vcmp.ge.f32.partialorder %v13070_v36, %v3718_v32  ;;  %7971 = vmatpush1.bf16.xpose.msk.msra.mxu0 %vm7970_vm13, %v18585_v49 }
 0x822   : > { %v3851_v27 = vsel %vm3787_vm12, %v9477_v10, 256.0  ;;  %v3852_v4 = vsel %vm3788_vm7, %v9479_v24, 256.0  ;;  %vm17768_vm7 = vcmp.eq.f32.partialorder %v9479_v24, %v13418_v61 }
 0x823   : > { %v3721_v39 = vpop.xlane.xlu0 %3720  ;;  %v3940_v34 = vmin.f32 %v3851_v27, %v3852_v4 }
 0x824   : > { %vm3789_vm9 = vcmp.ge.f32.partialorder %v13092_v47, %v3721_v39  ;;  %vm3790_vm2 = vcmp.ge.f32.partialorder %v13098_v59, %v3721_v39  ;;  %v13430_v57 = vpop.xlane.xlu1 %3887 }
 0x825   : > { %v3853_v63 = vsel %vm3789_vm9, %v9477_v10, 256.0  ;;  %v3854_v32 = vsel %vm3790_vm2, %v9479_v24, 256.0  ;;  %vm17766_vm13 = vcmp.eq.f32.partialorder %v9477_v10, %v13430_v57  ;;  %vm17765_vm12 = vcmp.eq.f32.partialorder %v9479_v24, %v13430_v57  ;;  %3941 = vmin.xlane.f32.xlu1 %v3940_v34 }
 0x826   : > { %vm7974_vm1 = vmpackc.low %vm17766_vm13, %vm17769_vm14  ;;  %v3943_v27 = vmin.f32 %v3853_v63, %v3854_v32 }
 0x827   : > { %vm7972_vm9 = vmpackc.low %vm17765_vm12, %vm17768_vm7  ;;  %v13452_v4 = vpop.xlane.xlu0 %3890 }
 0x828   : > { %7973 = vmatprep.subr.msk.bf16.mxu0 %vm7972_vm9, %v18585_v49  ;;  %v3724_v34 = vpop.xlane.xlu1 %3723  ;;  %3944 = vmin.xlane.f32.xlu0 %v3943_v27  ;;  %vm3977_vm12 = vcmp.eq.f32.partialorder %v9477_v10, %v13452_v4 }
 0x829   : > { %vm3791_vm2 = vcmp.ge.f32.partialorder %v13126_v23, %v3724_v34  ;;  %vm3792_vm0 = vcmp.ge.f32.partialorder %v13132_v37, %v3724_v34  ;;  %7975 = vmatpush1.bf16.xpose.msk.msra.mxu0 %vm7974_vm1, %v18585_v49  ;;  %v18700_v37 = vld [vmem:[#allocation66_spill] sm:$0xff] }
 0x82a   : > { %v3855_v63 = vsel %vm3791_vm2, %v9477_v10, 256.0  ;;  %v3856_v39 = vsel %vm3792_vm0, %v9479_v24, 256.0  ;;  %vm17774_vm2 = vcmp.eq.f32.partialorder %v9479_v24, %v13452_v4 }
 0x82b   : > { %v3727_v32 = vpop.xlane.xlu0 %3726  ;;  %v3946_v59 = vmin.f32 %v3855_v63, %v3856_v39 }
 0x82c   : > { %vm3793_vm13 = vcmp.ge.f32.partialorder %v13154_v11, %v3727_v32  ;;  %vm3794_vm9 = vcmp.ge.f32.partialorder %v13160_v2, %v3727_v32  ;;  %v13464_v27 = vpop.xlane.xlu1 %3893  ;;  %v18665_v11 = vld [vmem:[#allocation69_spill] sm:$0xff] }
 0x82d   : > { %v3857_v23 = vsel %vm3793_vm13, %v9477_v10, 256.0  ;;  %v3858_v34 = vsel %vm3794_vm9, %v9479_v24, 256.0  ;;  %vm17772_vm1 = vcmp.eq.f32.partialorder %v9477_v10, %v13464_v27  ;;  %vm17771_vm0 = vcmp.eq.f32.partialorder %v9479_v24, %v13464_v27  ;;  %3947 = vmin.xlane.f32.xlu1 %v3946_v59 }
 0x82e   : > { %vm7978_vm7 = vmpackc.low %vm17772_vm1, %vm3977_vm12  ;;  %v3949_v63 = vmin.f32 %v3857_v23, %v3858_v34 }
 0x82f   : > { %vm7976_vm13 = vmpackc.low %vm17771_vm0, %vm17774_vm2  ;;  %v13486_v39 = vpop.xlane.xlu0 %3896 }
 0x830   : > { %7977 = vmatprep.subr.msk.bf16.mxu0 %vm7976_vm13, %v18585_v49  ;;  %v3730_v59 = vpop.xlane.xlu1 %3729  ;;  %3950 = vmin.xlane.f32.xlu0 %v3949_v63  ;;  %vm3981_vm0 = vcmp.eq.f32.partialorder %v9477_v10, %v13486_v39 }
 0x831   : > { %vm3795_vm9 = vcmp.ge.f32.partialorder %v13188_v20, %v3730_v59  ;;  %vm3796_vm14 = vcmp.ge.f32.partialorder %v13194_v29, %v3730_v59  ;;  %7979 = vmatpush1.bf16.xpose.msk.msra.mxu0 %vm7978_vm7, %v18585_v49  ;;  %v18662_v29 = vld [vmem:[#allocation54_spill] sm:$0xff] }
 0x832   : > { %v3859_v23 = vsel %vm3795_vm9, %v9477_v10, 256.0  ;;  %v3860_v32 = vsel %vm3796_vm14, %v9479_v24, 256.0  ;;  %vm3982_vm9 = vcmp.eq.f32.partialorder %v9479_v24, %v13486_v39 }
 0x833   : > { %v3733_v34 = vpop.xlane.xlu0 %3732  ;;  %v3952_v2 = vmin.f32 %v3859_v23, %v3860_v32  ;;  %v13518_v32 = vsel %vm3961_vm8, -3e+38, %v12447_v35 }
 0x834   : > { %vm3797_vm1 = vcmp.ge.f32.partialorder %v13216_v41, %v3733_v34  ;;  %vm3798_vm13 = vcmp.ge.f32.partialorder %v13222_v0, %v3733_v34  ;;  %v13498_v63 = vpop.xlane.xlu1 %3899  ;;  %v18659_v0 = vld [vmem:[#allocation68_spill] sm:$0xff] }
 0x835   : > { %v3861_v20 = vsel %vm3797_vm1, %v9477_v10, 256.0  ;;  %v3862_v59 = vsel %vm3798_vm13, %v9479_v24, 256.0  ;;  %vm3983_vm7 = vcmp.eq.f32.partialorder %v9477_v10, %v13498_v63  ;;  %vm3984_vm14 = vcmp.eq.f32.partialorder %v9479_v24, %v13498_v63  ;;  %3953 = vmin.xlane.f32.xlu1 %v3952_v2 }
 0x836   : > { %vm7982_vm2 = vmpackc.low %vm3983_vm7, %vm3981_vm0  ;;  %v3955_v23 = vmin.f32 %v3861_v20, %v3862_v59  ;;  %v13524_v2 = vsel %vm3962_vm11, -3e+38, %v12452_v17  ;;  %v13546_v59 = vsel %vm3965_vm4, -3e+38, %v12485_v22 }
 0x837   : > { %vm7980_vm1 = vmpackc.low %vm3984_vm14, %vm3982_vm9  ;;  %v13533_v34 = vpop.xlane.xlu0 %3902  ;;  %v4355_v12 = vmax.f32 %v13518_v32, %v13524_v2 }
 0x838   : > { %7981 = vmatprep.subr.msk.bf16.mxu0 %vm7980_vm1, %v18585_v49  ;;  %v3736_v20 = vpop.xlane.xlu1 %3735  ;;  %3956 = vmin.xlane.f32.xlu0 %v3955_v23  ;;  %v13552_v23 = vsel %vm3966_vm15, -3e+38, %v12490_v43  ;;  %vm3985_vm11 = vcmp.eq.f32.partialorder %v9477_v10, %v13533_v34 }
 0x839   : > { %vm3799_vm8 = vcmp.ge.f32.partialorder %v13250_v58, %v3736_v20  ;;  %vm3800_vm13 = vcmp.ge.f32.partialorder %v13256_v7, %v3736_v20  ;;  %7983 = vmatpush1.bf16.xpose.msk.msra.mxu0 %vm7982_vm2, %v18585_v49  ;;  %v13558_v7 = vsel %vm3963_vm5, -3e+38, %v18595_v54  ;;  %v13564_v58 = vsel %vm3964_vm6, -3e+38, %v18596_v28 }
 0x83a   : > { %v3863_v35 = vsel %vm3799_vm8, %v9477_v10, 256.0  ;;  %v3864_v17 = vsel %vm3800_vm13, %v9479_v24, 256.0  ;;  %vm3986_vm5 = vcmp.eq.f32.partialorder %v9479_v24, %v13533_v34  ;;  %v4361_v43 = vmax.f32 %v13546_v59, %v13552_v23  ;;  %v18673_v34 = vld [vmem:[#allocation70_spill] sm:$0xff] }
 0x83b   : > { %v3958_v20 = vmin.f32 %v3863_v35, %v3864_v17  ;;  %v13588_v54 = vsel %vm3969_vm3, -3e+38, %v12529_v13  ;;  %v13594_v28 = vsel %vm3970_vm10, -3e+38, %v12534_v8  ;;  %v13596_v38 = vpop.xlane.xlu0 %3908  ;;  %v4358_v53 = vmax.f32 %v13558_v7, %v13564_v58 }
 0x83c   : > { %v13566_v22 = vpop.xlane.xlu1 %3905  ;;  %4356 = vmax.xlane.f32.xlu0 %v4355_v12  ;;  %vm18642_vm3 = vcmp.eq.f32.partialorder %v9477_v10, %v13362_v16  ;;  %vm18643_vm10 = vcmp.eq.f32.partialorder %v9479_v24, %v13362_v16  ;;  %vm3990_vm8 = vcmp.eq.f32.partialorder %v9479_v24, %v13596_v38  ;;  %vm18644_vm13 = vcmp.eq.f32.partialorder %v9477_v10, %v13418_v61  ;;  %v18648_v12 = vld [vmem:[#allocation40_spill] sm:$0xff] }
 0x83d   : > { %vm3987_vm4 = vcmp.eq.f32.partialorder %v9477_v10, %v13566_v22  ;;  %vm3988_vm15 = vcmp.eq.f32.partialorder %v9479_v24, %v13566_v22  ;;  %3959 = vmin.xlane.f32.xlu1 %v3958_v20  ;;  %v13610_v13 = vsel %vm18642_vm3, -3e+38, %v12511_v42  ;;  %v13616_v8 = vsel %vm18643_vm10, -3e+38, %v12514_v45 }
 0x83e   : > { %vm7986_vm6 = vmpackc.low %vm3987_vm4, %vm3985_vm11  ;;  %v4367_v42 = vmax.f32 %v13588_v54, %v13594_v28  ;;  %v13632_v45 = vsel %vm18644_vm13, -3e+38, %v12573_v3  ;;  %v4364_v35 = vmax.f32 %v13610_v13, %v13616_v8  ;;  %vm18646_vm3 = vcmp.eq.f32.partialorder %v9477_v10, %v13396_v1 }
 0x83f   : > { %vm7984_vm2 = vmpackc.low %vm3988_vm15, %vm3986_vm5  ;;  %v13652_v3 = vsel %vm18646_vm3, -3e+38, %v12555_v46  ;;  %vm18647_vm10 = vcmp.eq.f32.partialorder %v9479_v24, %v13396_v1  ;;  %v3915_v17 = vpop.xlane.xlu0 %3914  ;;  %v18649_v1 = vld [vmem:[#allocation67_spill] sm:$0xff]  ;;  %vm3989_vm3 = vcmp.eq.f32.partialorder %v9477_v10, %v13596_v38 }
 0x840   : > { %7985 = vmatprep.subr.msk.bf16.mxu0 %vm7984_vm2, %v18585_v49  ;;  %v13619_v44 = vpop.xlane.xlu1 %3911  ;;  %4362 = vmax.xlane.f32.xlu0 %v4361_v43  ;;  %vm18645_vm2 = vcmp.eq.f32.partialorder %v9479_v24, %v13418_v61 }
 0x841   : > { %vm17777_vm1 = vcmp.eq.f32.partialorder %v9479_v24, %v13619_v44  ;;  %7987 = vmatpush1.bf16.xpose.msk.msra.mxu0 %vm7986_vm6, %v18585_v49  ;;  %4359 = vmax.xlane.f32.xlu1 %v4358_v53  ;;  %v13638_v16 = vsel %vm18645_vm2, -3e+38, %v12578_v52  ;;  %v13658_v52 = vsel %vm18647_vm10, -3e+38, %v12558_v19  ;;  %vm3991_vm13 = vcmp.eq.f32.partialorder %v9477_v10, %v13619_v44  ;;  %v18651_v53 = vld [vmem:[#allocation38_spill] sm:$0xff] }
 0x842   : > { %vm7988_vm6 = vmpackc.low %vm17777_vm1, %vm3990_vm8  ;;  %v4373_v46 = vmax.f32 %v13632_v45, %v13638_v16  ;;  %v13673_v19 = vsel %vm3977_vm12, -3e+38, %v18648_v12  ;;  %v4370_v43 = vmax.f32 %v13652_v3, %v13658_v52  ;;  %vm18652_vm10 = vcmp.eq.f32.partialorder %v9477_v10, %v13430_v57 }
 0x843   : > { %7989 = vmatprep.subr.msk.bf16.mxu0 %vm7988_vm6, %v18585_v49  ;;  %vm18650_vm6 = vcmp.eq.f32.partialorder %v9479_v24, %v13452_v4  ;;  %vm18654_vm12 = vcmp.eq.f32.partialorder %v9479_v24, %v13430_v57  ;;  %vm7990_vm1 = vmpackc.low %vm3991_vm13, %vm3989_vm3  ;;  %v18655_v4 = vld [vmem:[#allocation50_spill] sm:$0xff]  ;;  %v3921_v39 = vpop.xlane.xlu0 %3920  ;;  %v13831_v22 = vsel %vm3991_vm13, -3e+38, %v18636_v25  ;;  %vm18709_vm13 = vcmask 130048  }
 0x844   : > { %v13661_v61 = vpop.xlane.xlu1 %3917  ;;  %4368 = vmax.xlane.f32.xlu0 %v4367_v42  ;;  %v13679_v20 = vsel %vm18650_vm6, -3e+38, %v18649_v1  ;;  %v13689_v42 = vsel %vm18652_vm10, -3e+38, %v18651_v53  ;;  %vm3994_vm6 = vcmp.eq.f32.partialorder %v9479_v24, %v3915_v17  ;;  %v13717_v1 = vsel %vm3981_vm0, -3e+38, %v18655_v4 }
 0x845   : > { %4365 = vmax.xlane.f32.xlu1 %v4364_v35  ;;  %vm3996_vm2 = vcmp.eq.f32.partialorder %v9479_v24, %v13661_v61  ;;  %v18653_v35 = vld [vmem:[#allocation39_spill] sm:$0xff]  ;;  %v4379_v57 = vmax.f32 %v13673_v19, %v13679_v20  ;;  %18656 = vst [vmem:[#allocation22_spill] sm:$0xff] %v13717_v1  ;;  %vm18663_vm0 = vcmp.eq.f32.partialorder %v9479_v24, %v13464_v27  ;;  %18682 = vst [vmem:[#allocation38_spill] sm:$0xff] %v13831_v22 }
 0x846   : > { %v13695_v12 = vsel %vm18654_vm12, -3e+38, %v18653_v35  ;;  %vm7992_vm10 = vmpackc.low %vm3996_vm2, %vm3994_vm6  ;;  %v13737_v4 = vsel %vm18663_vm0, -3e+38, %v18662_v29 }
 0x847   : > { %v4376_v35 = vmax.f32 %v13689_v42, %v13695_v12  ;;  %18664 = vst [vmem:[#allocation32_spill] sm:$0xff] %v13737_v4 }
 0x848   : > { %4374 = vmax.xlane.f32.xlu0 %v4373_v46  ;;  %v18657_v46 = vld [vmem:[#allocation51_spill] sm:$0xff]  ;;  %v3924_v53 = vpop.xlane.xlu1 %3923 }
 0x849   : > { %7991 = vmatpush1.bf16.xpose.msk.msra.mxu0 %vm7990_vm1, %v18585_v49  ;;  %4371 = vmax.xlane.f32.xlu1 %v4370_v43  ;;  %v13723_v43 = vsel %vm3982_vm9, -3e+38, %v18657_v46  ;;  %vm18660_vm1 = vcmp.eq.f32.partialorder %v9477_v10, %v13464_v27  ;;  %vm3995_vm9 = vcmp.eq.f32.partialorder %v9477_v10, %v13661_v61  ;;  %vm4000_vm12 = vcmp.eq.f32.partialorder %v9479_v24, %v3924_v53  ;;  %v18667_v27 = vld [vmem:[#allocation18_spill] sm:$0xff]  ;;  %v18693_v61 = vld [vmem:[#allocation59_spill] sm:$0xff] }
 0x84a   : > { %7993 = vmatprep.subr.msk.bf16.mxu0 %vm7992_vm10, %v18585_v49  ;;  %18658 = vst [vmem:[#allocation30_spill] sm:$0xff] %v13723_v43  ;;  %v13731_v41 = vsel %vm18660_vm1, -3e+38, %v18659_v0  ;;  %v4385_v46 = vmax.f32 %v13717_v1, %v13723_v43  ;;  %v13748_v0 = vsel %vm3985_vm11, -3e+38, %v18665_v11  ;;  %vm3993_vm10 = vcmp.eq.f32.partialorder %v9477_v10, %v3915_v17  ;;  %v18671_v1 = vld [vmem:[#allocation56_spill] sm:$0xff] }
 0x84b   : > { %18661 = vst [vmem:[#allocation31_spill] sm:$0xff] %v13731_v41  ;;  %18666 = vst [vmem:[#allocation33_spill] sm:$0xff] %v13748_v0  ;;  %v13754_v29 = vsel %vm3986_vm5, -3e+38, %v18667_v27  ;;  %v13769_v11 = vsel %vm3984_vm14, -3e+38, %v18671_v1  ;;  %vm3998_vm11 = vcmp.eq.f32.partialorder %v9479_v24, %v3921_v39  ;;  %vm3999_vm14 = vcmp.eq.f32.partialorder %v9477_v10, %v3924_v53 }
 0x84c   : > { %4380 = vmax.xlane.f32.xlu0 %v4379_v57  ;;  %18668 = vst [vmem:[#allocation27_spill] sm:$0xff] %v13754_v29  ;;  %v4382_v57 = vmax.f32 %v13731_v41, %v13737_v4  ;;  %18672 = vst [vmem:[#allocation72_spill] sm:$0xff] %v13769_v11  ;;  %v4391_v63 = vmax.f32 %v13748_v0, %v13754_v29  ;;  %v13789_v1 = vsel %vm3989_vm3, -3e+38, %v18673_v34  ;;  %v13809_v34 = vsel %vm3988_vm15, -3e+38, %v18633_v40 }
 0x84d   : > { %4377 = vmax.xlane.f32.xlu1 %v4376_v35  ;;  %v18669_v35 = vld [vmem:[#allocation55_spill] sm:$0xff]  ;;  %vm7994_vm5 = vmpackc.low %vm3995_vm9, %vm3993_vm10  ;;  %18674 = vst [vmem:[#allocation26_spill] sm:$0xff] %v13789_v1  ;;  %vm18684_vm15 = vcmp.eq.f32.partialorder %v9479_v24, %v13619_v44  ;;  %v2122_v17 = vpop.f32.mrb[20].mxu1  ;;  %v13850_v44 = vsel %vm3998_vm11, -3e+38, %v18639_v14  ;;  %v18699_v4 = vld [vmem:[#allocation65_spill] sm:$0xff] }
 0x84e   : > { %v13763_v43 = vsel %vm3983_vm7, -3e+38, %v18669_v35  ;;  %vm7996_vm7 = vmpackc.low %vm4000_vm12, %vm3998_vm11  ;;  %v18677_v35 = vld [vmem:[#allocation57_spill] sm:$0xff]  ;;  %18679 = vst [vmem:[#allocation75_spill] sm:$0xff] %v13809_v34  ;;  %v18697_v53 = vld [vmem:[#allocation63_spill] sm:$0xff] }
 0x84f   : > { %18670 = vst [vmem:[#allocation23_spill] sm:$0xff] %v13763_v43  ;;  %v13803_v29 = vsel %vm3987_vm4, -3e+38, %v18677_v35  ;;  %v13822_v35 = vsel %vm3994_vm6, -3e+38, %v18635_v6  ;;  %vm3997_vm4 = vcmp.eq.f32.partialorder %v9477_v10, %v3921_v39  ;;  %18688 = vst [vmem:[#allocation51_spill] sm:$0xff] %v13850_v44 }
 0x850   : > { %4386 = vmax.xlane.f32.xlu0 %v4385_v46  ;;  %v18675_v46 = vld [vmem:[#allocation71_spill] sm:$0xff]  ;;  %18678 = vst [vmem:[#allocation74_spill] sm:$0xff] %v13803_v29  ;;  %18681 = vst [vmem:[#allocation67_spill] sm:$0xff] %v13822_v35  ;;  %v4394_v40 = vmax.f32 %v13803_v29, %v13809_v34  ;;  %v2124_v34 = vpop.f32.mrb[21].mxu1 }
 0x851   : > { %7995 = vmatpush1.bf16.xpose.msk.msra.mxu0 %vm7994_vm5, %v18585_v49  ;;  %4383 = vmax.xlane.f32.xlu1 %v4382_v57  ;;  %v13795_v27 = vsel %vm3990_vm8, -3e+38, %v18675_v46  ;;  %v4388_v57 = vmax.f32 %v13763_v43, %v13769_v11  ;;  %v13817_v46 = vsel %vm3993_vm10, -3e+38, %v18634_v30  ;;  %vm7998_vm8 = vmpackc.low %vm3999_vm14, %vm3997_vm4  ;;  %v2126_v39 = vpop.f32.mrb[22].mxu1 }
 0x852   : > { %7997 = vmatprep.subr.msk.bf16.mxu0 %vm7996_vm7, %v18585_v49  ;;  %18676 = vst [vmem:[#allocation73_spill] sm:$0xff] %v13795_v27  ;;  %v4397_v38 = vmax.f32 %v13789_v1, %v13795_v27  ;;  %18680 = vst [vmem:[#allocation40_spill] sm:$0xff] %v13817_v46  ;;  %v4403_v6 = vmax.f32 %v13817_v46, %v13822_v35  ;;  %v2128_v14 = vpop.f32.mrb[23].mxu1  ;;  %v18694_v46 = vld [vmem:[#allocation60_spill] sm:$0xff]  ;;  %v18696_v1 = vld [vmem:[#allocation62_spill] sm:$0xff] }
 0x853   : > { %v2142_v29 = vmax.f32 %v18694_v46, %v2124_v34  ;;  %v2144_v0 = vmax.f32 %v18696_v1, %v2128_v14 }
 0x854   : > { %4392 = vmax.xlane.f32.xlu0 %v4391_v63  ;;  %v18683_v63 = vld [vmem:[#allocation45_spill] sm:$0xff] }
 0x855   : > { %4389 = vmax.xlane.f32.xlu1 %v4388_v57  ;;  %v13837_v30 = vsel %vm18684_vm15, -3e+38, %v18683_v63  ;;  %v18686_v57 = vld [vmem:[#allocation46_spill] sm:$0xff] }
 0x856   : > { %18685 = vst [vmem:[#allocation39_spill] sm:$0xff] %v13837_v30  ;;  %v13845_v25 = vsel %vm3997_vm4, -3e+38, %v18686_v57  ;;  %v4400_v63 = vmax.f32 %v13831_v22, %v13837_v30  ;;  %v2132_v30 = vpop.f32.mrb[24].mxu1 }
 0x857   : > { %18687 = vst [vmem:[#allocation50_spill] sm:$0xff] %v13845_v25  ;;  %v4409_v57 = vmax.f32 %v13845_v25, %v13850_v44  ;;  %v2134_v35 = vpop.f32.mrb[25].mxu1 }
 0x858   : > { %4398 = vmax.xlane.f32.xlu0 %v4397_v38  ;;  %v13858_v38 = vsel %vm3995_vm9, -3e+38, %v18640_v21  ;;  %v13873_v21 = vsel %vm3999_vm14, -3e+38, %v12835_v33  ;;  %v18695_v33 = vld [vmem:[#allocation61_spill] sm:$0xff] }
 0x859   : > { %7999 = vmatpush1.bf16.xpose.msk.msra.mxu0 %vm7998_vm8, %v18585_v49  ;;  %4395 = vmax.xlane.f32.xlu1 %v4394_v40  ;;  %18689 = vst [vmem:[#allocation68_spill] sm:$0xff] %v13858_v38  ;;  %v13864_v40 = vsel %vm3996_vm2, -3e+38, %v18641_v9  ;;  %18691 = vst [vmem:[#allocation69_spill] sm:$0xff] %v13873_v21  ;;  %v13878_v9 = vsel %vm4000_vm12, -3e+38, %v12838_v60  ;;  %v2143_v27 = vmax.f32 %v18695_v33, %v2126_v39 }
 0x85a   : > { %18690 = vst [vmem:[#allocation54_spill] sm:$0xff] %v13864_v40  ;;  %v4406_v22 = vmax.f32 %v13858_v38, %v13864_v40  ;;  %18692 = vst [vmem:[#allocation18_spill] sm:$0xff] %v13878_v9  ;;  %v4412_v40 = vmax.f32 %v13873_v21, %v13878_v9  ;;  %v2145_v60 = vmax.f32 %v18697_v53, %v2132_v30 }
 0x85b   : > { %vm18710_vm12 = vmmov %vm18709_vm13 }
 0x85c   : > { %4404 = vmax.xlane.f32.xlu0 %v4403_v6  ;;  %v2141_v6 = vmax.f32 %v18693_v61, %v2122_v17 }
 0x85d   : > { %4401 = vmax.xlane.f32.xlu1 %v4400_v63  ;;  %v2136_v63 = vpop.f32.mrb[26].mxu1 }
 0x85e   : > { %v2138_v44 = vpop.f32.mrb[27].mxu1  ;;  %v2147_v41 = vmax.f32 %v18699_v4, %v2136_v63 }
 0x85f   : > { %v2836_v25 = vpop.f32.mrb[28].mxu1  ;;  %v2148_v9 = vmax.f32 %v18700_v37, %v2138_v44 }
 0x860   : > { %4410 = vmax.xlane.f32.xlu0 %v4409_v57  ;;  %v2838_v38 = vpop.f32.mrb[29].mxu1  ;;  %v13890_v21 = vmax.f32 %v2141_v6, %v2836_v25 }
 0x861   : > { %4407 = vmax.xlane.f32.xlu1 %v4406_v22  ;;  %v2840_v11 = vpop.f32.mrb[30].mxu1  ;;  %v18698_v22 = vld [vmem:[#allocation64_spill] sm:$0xff]  ;;  %v13892_v39 = vmax.f32 %v2142_v29, %v2838_v38 }
 0x862   : > { %v2842_v57 = vpop.f32.mrb[31].mxu1  ;;  %v2146_v43 = vmax.f32 %v18698_v22, %v2134_v35  ;;  %18701 = vst [vmem:[#allocation55_spill] sm:$0xff] %v13890_v21  ;;  %v13894_v1 = vmax.f32 %v2143_v27, %v2840_v11  ;;  %v8678_v29 = vld [vmem:[#allocation8] sm:$0xff]  }
 0x863   : > { %v2846_v17 = vpop.f32.mrb[32].mxu1  ;;  %18702 = vst [vmem:[#allocation56_spill] sm:$0xff] %v13892_v39  ;;  %v13896_v30 = vmax.f32 %v2144_v0, %v2842_v57 }
 0x864   : > { %v2848_v61 = vpop.f32.mrb[33].mxu1  ;;  %18703 = vst [vmem:[#allocation70_spill] sm:$0xff] %v13894_v1 }
 0x865   : > { %4413 = vmax.xlane.f32.xlu1 %v4412_v40  ;;  %v2850_v34 = vpop.f32.mrb[34].mxu1  ;;  %18704 = vst [vmem:[#allocation71_spill] sm:$0xff] %v13896_v30  ;;  %v13898_v40 = vmax.f32 %v2145_v60, %v2846_v17  ;;  %v13900_v14 = vmax.f32 %v2146_v43, %v2848_v61 }
 0x866   : > { %v2852_v46 = vpop.f32.mrb[35].mxu1  ;;  %v13902_v33 = vmax.f32 %v2147_v41, %v2850_v34  ;;  %v8679_v41 = vld [vmem:[#allocation8 + $0x8] sm:$0xff]  }
 0x867   : > { %18705 = vst [vmem:[#allocation57_spill] sm:$0xff] %v13898_v40  ;;  %18706 = vst [vmem:[#allocation45_spill] sm:$0xff] %v13900_v14  ;;  %v13904_v35 = vmax.f32 %v2148_v9, %v2852_v46  ;;  %v18738_v14 = vld [vmem:[#allocation19_spill] sm:$0xff] }
 0x868   : > { %18707 = vst [vmem:[#allocation46_spill] sm:$0xff] %v13902_v33 }
 0x869   : > { %18708 = vst [vmem:[#allocation59_spill] sm:$0xff] %v13904_v35 }
 0x893   : > { %v3505_v4 = vpop.f32.mrb[36].mxu1 }
 0x894   : > { %v3507_v37 = vpop.f32.mrb[37].mxu1 }
 0x895   : > { %v3509_v25 = vpop.f32.mrb[38].mxu1 }
 0x896   : > { %v3514_v44 = vpack.c.bf16 %v3509_v25, %v3505_v4  ;;  %v3511_v6 = vpop.f32.mrb[39].mxu1 }
 0x897   : > { %v3515_v63 = vpack.c.bf16 %v3511_v6, %v3507_v37 }
 0x899   : > { %3516 = vmatprep.subr.bf16.mxu1 %v3515_v63 }
 0x89a   : > { %3517 = vmatpush1.bf16.msra.mxu1 %v3514_v44 }
 0x89c   : > { %v13908_v0 = vpop.xlane.xlu0 %3926 }
 0x89d   : > { %7894 = vmatmul.mubr.msk.bf16.vlgmr.msra.gmra.mrb[40].mxu1 %vm18709_vm13, %v8678_v29  ;;  %vm4001_vm2 = vcmp.eq.f32.partialorder %v9477_v10, %v13908_v0  ;;  %vm4002_vm1 = vcmp.eq.f32.partialorder %v9479_v24, %v13908_v0 }
 0x89e   : > { %3558 = vmatprep.mubr.bf16.mxu1 %v18490_v26  ;;  %v14066_v25 = vsel %vm4001_vm2, -3e+38, %v12918_v15  ;;  %v14072_v44 = vsel %vm4002_vm1, -3e+38, %v12924_v50 }
 0x89f   : > { %v4415_v29 = vmax.f32 %v14066_v25, %v14072_v44 }
 0x8a2   : > { %v13910_v43 = vpop.xlane.xlu1 %3929 }
 0x8a3   : > { %vm4003_vm3 = vcmp.eq.f32.partialorder %v9477_v10, %v13910_v43  ;;  %vm4004_vm6 = vcmp.eq.f32.partialorder %v9479_v24, %v13910_v43 }
 0x8a4   : > { %vm8002_vm0 = vmpackc.low %vm4003_vm3, %vm4001_vm2  ;;  %v13936_v11 = vpop.xlane.xlu0 %3932 }
 0x8a5   : > { %vm8000_vm9 = vmpackc.low %vm4004_vm6, %vm4002_vm1  ;;  %7895 = vmatmul.mubr.msk.bf16.gmra.mrb[44].mxu1 %vm18710_vm12, %v8679_v41  ;;  %vm4005_vm10 = vcmp.eq.f32.partialorder %v9477_v10, %v13936_v11  ;;  %vm4006_vm7 = vcmp.eq.f32.partialorder %v9479_v24, %v13936_v11 }
 0x8a6   : > { %8001 = vmatprep.subr.msk.bf16.mxu0 %vm8000_vm9, %v18585_v49  ;;  %4262 = vmatprep.mubr.bf16.mxu1 %v18490_v26  ;;  %v18744_v26 = vld [vmem:[#allocation23_spill] sm:$0xff] }
 0x8a7   : > { %8003 = vmatpush1.bf16.xpose.msk.msra.mxu0 %vm8002_vm0, %v18585_v49 }
 0x8aa   : > { %v13938_v27 = vpop.xlane.xlu1 %3935 }
 0x8ab   : > { %vm4007_vm11 = vcmp.eq.f32.partialorder %v9477_v10, %v13938_v27  ;;  %vm4008_vm5 = vcmp.eq.f32.partialorder %v9479_v24, %v13938_v27 }
 0x8ac   : > { %vm8006_vm14 = vmpackc.low %vm4007_vm11, %vm4005_vm10  ;;  %v13962_v38 = vpop.xlane.xlu0 %3938 }
 0x8ad   : > { %vm8004_vm4 = vmpackc.low %vm4008_vm5, %vm4006_vm7  ;;  %vm17834_vm15 = vcmp.eq.f32.partialorder %v9477_v10, %v13962_v38  ;;  %vm17829_vm0 = vcmp.eq.f32.partialorder %v9479_v24, %v13962_v38 }
 0x8ae   : > { %8005 = vmatprep.subr.msk.bf16.mxu0 %vm8004_vm4, %v18585_v49 }
 0x8af   : > { %8007 = vmatpush1.bf16.xpose.msk.msra.mxu0 %vm8006_vm14, %v18585_v49 }
 0x8b2   : > { %v13964_v9 = vpop.xlane.xlu1 %3941 }
 0x8b3   : > { %vm17827_vm8 = vcmp.eq.f32.partialorder %v9477_v10, %v13964_v9  ;;  %vm17828_vm13 = vcmp.eq.f32.partialorder %v9479_v24, %v13964_v9 }
 0x8b4   : > { %vm8010_vm9 = vmpackc.low %vm17827_vm8, %vm17834_vm15 }
 0x8b5   : > { %vm8008_vm12 = vmpackc.low %vm17828_vm13, %vm17829_vm0  ;;  %v13988_v53 = vpop.xlane.xlu0 %3944 }
 0x8b6   : > { %8009 = vmatprep.subr.msk.bf16.mxu0 %vm8008_vm12, %v18585_v49  ;;  %vm17831_vm14 = vcmp.eq.f32.partialorder %v9477_v10, %v13988_v53  ;;  %vm17833_vm13 = vcmp.eq.f32.partialorder %v9479_v24, %v13988_v53 }
 0x8b7   : > { %8011 = vmatpush1.bf16.xpose.msk.msra.mxu0 %vm8010_vm9, %v18585_v49 }
 0x8ba   : > { %v13990_v60 = vpop.xlane.xlu1 %3947 }
 0x8bb   : > { %vm17830_vm4 = vcmp.eq.f32.partialorder %v9477_v10, %v13990_v60  ;;  %vm17832_vm8 = vcmp.eq.f32.partialorder %v9479_v24, %v13990_v60 }
 0x8bc   : > { %vm8014_vm9 = vmpackc.low %vm17830_vm4, %vm17831_vm14 }
 0x8bd   : > { %vm8012_vm12 = vmpackc.low %vm17832_vm8, %vm17833_vm13  ;;  %v14014_v57 = vpop.xlane.xlu0 %3950 }
 0x8be   : > { %8013 = vmatprep.subr.msk.bf16.mxu0 %vm8012_vm12, %v18585_v49  ;;  %vm4017_vm0 = vcmp.eq.f32.partialorder %v9477_v10, %v14014_v57  ;;  %vm17837_vm8 = vcmp.eq.f32.partialorder %v9479_v24, %v14014_v57 }
 0x8bf   : > { %8015 = vmatpush1.bf16.xpose.msk.msra.mxu0 %vm8014_vm9, %v18585_v49 }
 0x8c2   : > { %v14016_v17 = vpop.xlane.xlu1 %3953 }
 0x8c3   : > { %vm17835_vm4 = vcmp.eq.f32.partialorder %v9477_v10, %v14016_v17  ;;  %vm17836_vm14 = vcmp.eq.f32.partialorder %v9479_v24, %v14016_v17 }
 0x8c4   : > { %vm8018_vm9 = vmpackc.low %vm17835_vm4, %vm4017_vm0 }
 0x8c5   : > { %vm8016_vm12 = vmpackc.low %vm17836_vm14, %vm17837_vm8  ;;  %v14038_v61 = vpop.xlane.xlu0 %3956 }
 0x8c6   : > { %8017 = vmatprep.subr.msk.bf16.mxu0 %vm8016_vm12, %v18585_v49  ;;  %vm4021_vm13 = vcmp.eq.f32.partialorder %v9477_v10, %v14038_v61  ;;  %vm4022_vm12 = vcmp.eq.f32.partialorder %v9479_v24, %v14038_v61 }
 0x8c7   : > { %8019 = vmatpush1.bf16.xpose.msk.msra.mxu0 %vm8018_vm9, %v18585_v49 }
 0x8c9   : > { %v4357_v22 = vpop.xlane.xlu0 %4356 }
 0x8ca   : > { %vm4451_vm15 = vcmp.ge.f32.partialorder %v13518_v32, %v4357_v22  ;;  %vm4452_vm4 = vcmp.ge.f32.partialorder %v13524_v2, %v4357_v22  ;;  %v14046_v34 = vpop.xlane.xlu1 %3959 }
 0x8cb   : > { %v4515_v46 = vsel %vm4451_vm15, %v9477_v10, 256.0  ;;  %v4516_v4 = vsel %vm4452_vm4, %v9479_v24, 256.0  ;;  %vm17838_vm14 = vcmp.eq.f32.partialorder %v9477_v10, %v14046_v34  ;;  %vm4024_vm9 = vcmp.eq.f32.partialorder %v9479_v24, %v14046_v34 }
 0x8cc   : > { %vm8022_vm8 = vmpackc.low %vm17838_vm14, %vm4021_vm13  ;;  %v4579_v37 = vmin.f32 %v4515_v46, %v4516_v4  ;;  %v14096_v46 = vsel %vm4003_vm3, -3e+38, %v12946_v18  ;;  %v14102_v4 = vsel %vm4004_vm6, -3e+38, %v12952_v62  ;;  %v14110_v18 = vsel %vm4005_vm10, -3e+38, %v12972_v31 }
 0x8cd   : > { %vm8020_vm15 = vmpackc.low %vm4024_vm9, %vm4022_vm12  ;;  %v4363_v6 = vpop.xlane.xlu0 %4362  ;;  %v14116_v62 = vsel %vm4006_vm7, -3e+38, %v12978_v5  ;;  %v4418_v43 = vmax.f32 %v14096_v46, %v14102_v4  ;;  %v14126_v31 = vld [vmem:[%s9231_s2 + $0x4] ss:$8 sps:$4 sm:$0xff]  }
 0x8ce   : > { %8021 = vmatprep.subr.msk.bf16.mxu0 %vm8020_vm15, %v18585_v49  ;;  %vm4455_vm4 = vcmp.ge.f32.partialorder %v13546_v59, %v4363_v6  ;;  %vm4456_vm2 = vcmp.ge.f32.partialorder %v13552_v23, %v4363_v6  ;;  %v4360_v15 = vpop.xlane.xlu1 %4359  ;;  %4580 = vmin.xlane.f32.xlu0 %v4579_v37  ;;  %18711 = vst [vmem:[#allocation60_spill] sm:$0xff] %v14126_v31 }
 0x8cf   : > { %vm4453_vm14 = vcmp.ge.f32.partialorder %v13558_v7, %v4360_v15  ;;  %vm4454_vm1 = vcmp.ge.f32.partialorder %v13564_v58, %v4360_v15  ;;  %8023 = vmatpush1.bf16.xpose.msk.msra.mxu0 %vm8022_vm8, %v18585_v49  ;;  %v4519_v0 = vsel %vm4455_vm4, %v9477_v10, 256.0  ;;  %v4520_v41 = vsel %vm4456_vm2, %v9479_v24, 256.0  ;;  %v18745_v49 = vld [vmem:[#allocation72_spill] sm:$0xff] }
 0x8d0   : > { %v4517_v50 = vsel %vm4453_vm14, %v9477_v10, 256.0  ;;  %v4518_v63 = vsel %vm4454_vm1, %v9479_v24, 256.0  ;;  %v4585_v15 = vmin.f32 %v4519_v0, %v4520_v41  ;;  %v4421_v11 = vmax.f32 %v14110_v18, %v14116_v62 }
 0x8d1   : > { %v4582_v22 = vmin.f32 %v4517_v50, %v4518_v63  ;;  %v4369_v6 = vpop.xlane.xlu0 %4368  ;;  %vm18714_vm15 = vcmp.eq.f32.partialorder %v9477_v10, %v13962_v38  ;;  %vm18720_vm2 = vcmp.eq.f32.partialorder %v9477_v10, %v13964_v9  ;;  %vm18721_vm1 = vcmp.eq.f32.partialorder %v9479_v24, %v13964_v9 }
 0x8d2   : > { %v4366_v37 = vpop.xlane.xlu1 %4365  ;;  %4416 = vmax.xlane.f32.xlu0 %v4415_v29  ;;  %vm4459_vm3 = vcmp.ge.f32.partialorder %v13588_v54, %v4369_v6  ;;  %vm4460_vm6 = vcmp.ge.f32.partialorder %v13594_v28, %v4369_v6 }
 0x8d3   : > { %vm4457_vm8 = vcmp.ge.f32.partialorder %v13610_v13, %v4366_v37  ;;  %vm4458_vm14 = vcmp.ge.f32.partialorder %v13616_v8, %v4366_v37  ;;  %4583 = vmin.xlane.f32.xlu1 %v4582_v22  ;;  %v4523_v29 = vsel %vm4459_vm3, %v9477_v10, 256.0  ;;  %v4524_v0 = vsel %vm4460_vm6, %v9479_v24, 256.0 }
 0x8d4   : > { %v4521_v50 = vsel %vm4457_vm8, %v9477_v10, 256.0  ;;  %v4522_v63 = vsel %vm4458_vm14, %v9479_v24, 256.0  ;;  %v14143_v22 = vsel %vm4008_vm5, -3e+38, %v13006_v48  ;;  %v4591_v6 = vmin.f32 %v4523_v29, %v4524_v0  ;;  %v18719_v0 = vld [vmem:[#allocation41_spill] sm:$0xff] }
 0x8d5   : > { %v4588_v41 = vmin.f32 %v4521_v50, %v4522_v63  ;;  %18713 = vst [vmem:[#allocation62_spill] sm:$0xff] %v14143_v22  ;;  %v4375_v37 = vpop.xlane.xlu0 %4374  ;;  %vm18722_vm3 = vcmp.eq.f32.partialorder %v9477_v10, %v13988_v53  ;;  %vm18724_vm6 = vcmp.eq.f32.partialorder %v9479_v24, %v13988_v53 }
 0x8d6   : > { %4218 = vmatmul.mubr.bf16.vlgmr.msra.gmra.mrb[72].mxu0 %v13318_v51  ;;  %4586 = vmin.xlane.f32.xlu0 %v4585_v15  ;;  %v4372_v5 = vpop.xlane.xlu1 %4371  ;;  %v14137_v51 = vsel %vm4007_vm11, -3e+38, %v13000_v55  ;;  %v14151_v55 = vsel %vm18714_vm15, -3e+38, %v13030_v56  ;;  %v18716_v15 = vld [vmem:[#allocation53_spill] sm:$0xff]  ;;  %vm18717_vm11 = vcmp.eq.f32.partialorder %v9479_v24, %v13962_v38  ;;  %vm4463_vm5 = vcmp.ge.f32.partialorder %v13632_v45, %v4375_v37 }
 0x8d7   : > { %4419 = vmax.xlane.f32.xlu1 %v4418_v43  ;;  %5645 = vmatprep.mubr.bf16.mxu0 %v14126_v31  ;;  %18712 = vst [vmem:[#allocation61_spill] sm:$0xff] %v14137_v51  ;;  %vm4461_vm10 = vcmp.ge.f32.partialorder %v13652_v3, %v4372_v5  ;;  %vm4462_vm7 = vcmp.ge.f32.partialorder %v13658_v52, %v4372_v5  ;;  %18715 = vst [vmem:[#allocation63_spill] sm:$0xff] %v14151_v55  ;;  %v14157_v48 = vsel %vm18717_vm11, -3e+38, %v18716_v15  ;;  %v18733_v31 = vld [vmem:[#allocation47_spill] sm:$0xff] }
 0x8d8   : > { %18718 = vst [vmem:[#allocation64_spill] sm:$0xff] %v14157_v48  ;;  %v4424_v27 = vmax.f32 %v14137_v51, %v14143_v22  ;;  %vm4464_vm4 = vcmp.ge.f32.partialorder %v13638_v16, %v4375_v37  ;;  %v4525_v43 = vsel %vm4461_vm10, %v9477_v10, 256.0  ;;  %v4526_v50 = vsel %vm4462_vm7, %v9479_v24, 256.0 }
 0x8d9   : > { %v4427_v63 = vmax.f32 %v14151_v55, %v14157_v48  ;;  %v4527_v38 = vsel %vm4463_vm5, %v9477_v10, 256.0  ;;  %v4528_v5 = vsel %vm4464_vm4, %v9479_v24, 256.0  ;;  %v4594_v29 = vmin.f32 %v4525_v43, %v4526_v50 }
 0x8da   : > { %4422 = vmax.xlane.f32.xlu0 %v4421_v11  ;;  %v4378_v56 = vpop.xlane.xlu1 %4377  ;;  %v4381_v11 = vpop.xlane.xlu0 %4380  ;;  %v14179_v37 = vsel %vm18721_vm1, -3e+38, %v13070_v36  ;;  %v14187_v15 = vsel %vm18722_vm3, -3e+38, %v13092_v47  ;;  %vm18726_vm15 = vcmp.eq.f32.partialorder %v9477_v10, %v13990_v60  ;;  %vm18728_vm11 = vcmp.eq.f32.partialorder %v9479_v24, %v13990_v60 }
 0x8db   : > { %4589 = vmin.xlane.f32.xlu1 %v4588_v41  ;;  %v14173_v41 = vsel %vm18720_vm2, -3e+38, %v18719_v0  ;;  %vm4465_vm8 = vcmp.ge.f32.partialorder %v13689_v42, %v4378_v56  ;;  %vm4466_vm14 = vcmp.ge.f32.partialorder %v13695_v12, %v4378_v56  ;;  %vm4467_vm10 = vcmp.ge.f32.partialorder %v13673_v19, %v4381_v11  ;;  %v18727_v0 = vld [vmem:[#allocation48_spill] sm:$0xff] }
 0x8dc   : > { %v4430_v36 = vmax.f32 %v14173_v41, %v14179_v37  ;;  %vm4468_vm7 = vcmp.ge.f32.partialorder %v13679_v20, %v4381_v11  ;;  %v4529_v43 = vsel %vm4465_vm8, %v9477_v10, 256.0  ;;  %v4530_v50 = vsel %vm4466_vm14, %v9479_v24, 256.0 }
 0x8dd   : > { %vm18734_vm2 = vcmp.eq.f32.partialorder %v9479_v24, %v14014_v57  ;;  %vm18742_vm14 = vcmp.eq.f32.partialorder %v9479_v24, %v14016_v17 }
 0x8de   : > { %4592 = vmin.xlane.f32.xlu0 %v4591_v6  ;;  %v4597_v6 = vmin.f32 %v4527_v38, %v4528_v5  ;;  %v4384_v56 = vpop.xlane.xlu1 %4383  ;;  %v4387_v47 = vpop.xlane.xlu0 %4386  ;;  %v4532_v38 = vsel %vm4468_vm7, %v9479_v24, 256.0  ;;  %v4600_v5 = vmin.f32 %v4529_v43, %v4530_v50  ;;  %v18731_v50 = vld [vmem:[#allocation49_spill] sm:$0xff]  ;;  %v14229_v60 = vsel %vm18734_vm2, -3e+38, %v18733_v31 }
 0x8df   : > { %4425 = vmax.xlane.f32.xlu1 %v4424_v27  ;;  %v18723_v27 = vld [vmem:[#allocation37_spill] sm:$0xff]  ;;  %18735 = vst [vmem:[#allocation66_spill] sm:$0xff] %v14229_v60 }
 0x8e0   : > { %v14193_v9 = vsel %vm18724_vm6, -3e+38, %v18723_v27  ;;  %v18729_v27 = vld [vmem:[#allocation31_spill] sm:$0xff] }
 0x8e1   : > { %v4433_v53 = vmax.f32 %v14187_v15, %v14193_v9  ;;  %vm4469_vm5 = vcmp.ge.f32.partialorder %v18729_v27, %v4384_v56 }
 0x8e2   : > { %4428 = vmax.xlane.f32.xlu0 %v4427_v63  ;;  %v4531_v63 = vsel %vm4467_vm10, %v9477_v10, 256.0  ;;  %v4390_v35 = vpop.xlane.xlu1 %4389 }
 0x8e3   : > { %4595 = vmin.xlane.f32.xlu1 %v4594_v29  ;;  %v18725_v29 = vld [vmem:[#allocation44_spill] sm:$0xff]  ;;  %v4603_v43 = vmin.f32 %v4531_v63, %v4532_v38  ;;  %v4533_v63 = vsel %vm4469_vm5, %v9477_v10, 256.0  ;;  %vm4473_vm3 = vcmp.ge.f32.partialorder %v18744_v26, %v4390_v35  ;;  %vm4474_vm6 = vcmp.ge.f32.partialorder %v18745_v49, %v4390_v35  ;;  %v18751_v35 = vld [vmem:[#allocation27_spill] sm:$0xff] }
 0x8e4   : > { %v14209_v11 = vsel %vm18726_vm15, -3e+38, %v18725_v29  ;;  %v14223_v29 = vsel %vm4017_vm0, -3e+38, %v18731_v50  ;;  %vm18739_vm0 = vcmp.eq.f32.partialorder %v9477_v10, %v14016_v17 }
 0x8e5   : > { %18732 = vst [vmem:[#allocation65_spill] sm:$0xff] %v14223_v29  ;;  %v4439_v50 = vmax.f32 %v14223_v29, %v14229_v60  ;;  %v14245_v40 = vsel %vm18739_vm0, -3e+38, %v18738_v14 }
 0x8e6   : > { %4598 = vmin.xlane.f32.xlu0 %v4597_v6  ;;  %v14215_v6 = vsel %vm18728_vm11, -3e+38, %v18727_v0  ;;  %18740 = vst [vmem:[#allocation53_spill] sm:$0xff] %v14245_v40 }
 0x8e7   : > { %4431 = vmax.xlane.f32.xlu1 %v4430_v36  ;;  %v18730_v36 = vld [vmem:[#allocation32_spill] sm:$0xff]  ;;  %v4436_v0 = vmax.f32 %v14209_v11, %v14215_v6 }
 0x8e8   : > { %vm4470_vm4 = vcmp.ge.f32.partialorder %v18730_v36, %v4384_v56  ;;  %v18736_v56 = vld [vmem:[#allocation22_spill] sm:$0xff] }
 0x8e9   : > { %vm4471_vm1 = vcmp.ge.f32.partialorder %v18736_v56, %v4387_v47  ;;  %v4534_v38 = vsel %vm4470_vm4, %v9479_v24, 256.0  ;;  %v18748_v56 = vld [vmem:[#allocation28_spill] sm:$0xff] }
 0x8ea   : > { %4434 = vmax.xlane.f32.xlu0 %v4433_v53  ;;  %v4393_v53 = vpop.xlane.xlu0 %4392  ;;  %v4535_v57 = vsel %vm4471_vm1, %v9477_v10, 256.0  ;;  %v4606_v33 = vmin.f32 %v4533_v63, %v4534_v38  ;;  %v18746_v38 = vld [vmem:[#allocation21_spill] sm:$0xff]  ;;  %v14265_v17 = vsel %vm4022_vm12, -3e+38, %v18748_v56 }
 0x8eb   : > { %4601 = vmin.xlane.f32.xlu1 %v4600_v5  ;;  %v18737_v5 = vld [vmem:[#allocation30_spill] sm:$0xff]  ;;  %v14259_v14 = vsel %vm4021_vm13, -3e+38, %v18746_v38  ;;  %18749 = vst [vmem:[#allocation44_spill] sm:$0xff] %v14265_v17  ;;  %vm4476_vm7 = vcmp.ge.f32.partialorder %v18751_v35, %v4393_v53  ;;  %vm18753_vm13 = vcmp.eq.f32.partialorder %v9477_v10, %v14046_v34  ;;  %v18755_v35 = vld [vmem:[#allocation25_spill] sm:$0xff] }
 0x8ec   : > { %vm4472_vm8 = vcmp.ge.f32.partialorder %v18737_v5, %v4387_v47  ;;  %v18741_v47 = vld [vmem:[#allocation24_spill] sm:$0xff]  ;;  %18747 = vst [vmem:[#allocation37_spill] sm:$0xff] %v14259_v14  ;;  %v4445_v38 = vmax.f32 %v14259_v14, %v14265_v17  ;;  %v4540_v56 = vsel %vm4476_vm7, %v9479_v24, 256.0  ;;  %v18759_v17 = vld [vmem:[#allocation74_spill] sm:$0xff] }
 0x8ed   : > { %v4536_v31 = vsel %vm4472_vm8, %v9479_v24, 256.0 }
 0x8ee   : > { %4604 = vmin.xlane.f32.xlu0 %v4603_v43  ;;  %v14251_v43 = vsel %vm18742_vm14, -3e+38, %v18741_v47  ;;  %v4399_v5 = vpop.xlane.xlu0 %4398  ;;  %v4609_v63 = vmin.f32 %v4535_v57, %v4536_v31  ;;  %v18750_v47 = vld [vmem:[#allocation33_spill] sm:$0xff]  ;;  %v4538_v57 = vsel %vm4474_vm6, %v9479_v24, 256.0 }
 0x8ef   : > { %4437 = vmax.xlane.f32.xlu1 %v4436_v0  ;;  %18743 = vst [vmem:[#allocation41_spill] sm:$0xff] %v14251_v43  ;;  %v4396_v0 = vpop.xlane.xlu1 %4395  ;;  %vm4475_vm10 = vcmp.ge.f32.partialorder %v18750_v47, %v4393_v53  ;;  %v18758_v47 = vld [vmem:[#allocation73_spill] sm:$0xff] }
 0x8f0   : > { %v4539_v61 = vsel %vm4475_vm10, %v9477_v10, 256.0  ;;  %vm4480_vm15 = vcmp.ge.f32.partialorder %v18758_v47, %v4399_v5  ;;  %vm4477_vm11 = vcmp.ge.f32.partialorder %v18759_v17, %v4396_v0 }
 0x8f1   : > { %v4544_v14 = vsel %vm4480_vm15, %v9479_v24, 256.0 }
 0x8f2   : > { %4440 = vmax.xlane.f32.xlu0 %v4439_v50  ;;  %v4442_v50 = vmax.f32 %v14245_v40, %v14251_v43  ;;  %v4405_v49 = vpop.xlane.xlu0 %4404  ;;  %v18752_v43 = vld [vmem:[#allocation29_spill] sm:$0xff]  ;;  %v18761_v40 = vld [vmem:[#allocation40_spill] sm:$0xff] }
 0x8f3   : > { %4607 = vmin.xlane.f32.xlu1 %v4606_v33  ;;  %v4537_v33 = vsel %vm4473_vm3, %v9477_v10, 256.0  ;;  %v4402_v31 = vpop.xlane.xlu1 %4401  ;;  %v14281_v53 = vsel %vm18753_vm13, -3e+38, %v18752_v43 }
 0x8f4   : > { %v4612_v26 = vmin.f32 %v4537_v33, %v4538_v57  ;;  %18754 = vst [vmem:[#allocation48_spill] sm:$0xff] %v14281_v53  ;;  %v18760_v33 = vld [vmem:[#allocation75_spill] sm:$0xff]  ;;  %v4615_v57 = vmin.f32 %v4539_v61, %v4540_v56 }
 0x8f5   : > { %vm4478_vm5 = vcmp.ge.f32.partialorder %v18760_v33, %v4396_v0  ;;  %v18763_v0 = vld [vmem:[#allocation38_spill] sm:$0xff] }
 0x8f6   : > { %4610 = vmin.xlane.f32.xlu0 %v4609_v63  ;;  %v14287_v63 = vsel %vm4024_vm9, -3e+38, %v18755_v35  ;;  %v4541_v35 = vsel %vm4477_vm11, %v9477_v10, 256.0  ;;  %vm4483_vm9 = vcmp.ge.f32.partialorder %v18761_v40, %v4405_v49  ;;  %vm4481_vm2 = vcmp.ge.f32.partialorder %v18763_v0, %v4402_v31  ;;  %v4411_v61 = vpop.xlane.xlu0 %4410  ;;  %v18810_v39 = vld [vmem:[#allocation41_spill] sm:$0xff] }
 0x8f7   : > { %4443 = vmax.xlane.f32.xlu1 %v4442_v50  ;;  %18756 = vst [vmem:[#allocation31_spill] sm:$0xff] %v14287_v63  ;;  %v18757_v50 = vld [vmem:[#allocation26_spill] sm:$0xff]  ;;  %v4448_v34 = vmax.f32 %v14281_v53, %v14287_v63  ;;  %v4547_v33 = vsel %vm4483_vm9, %v9477_v10, 256.0  ;;  %v4545_v63 = vsel %vm4481_vm2, %v9477_v10, 256.0 }
 0x8f8   : > { %vm4479_vm12 = vcmp.ge.f32.partialorder %v18757_v50, %v4399_v5  ;;  %v4542_v50 = vsel %vm4478_vm5, %v9479_v24, 256.0  ;;  %v18762_v5 = vld [vmem:[#allocation67_spill] sm:$0xff]  ;;  %v18765_v53 = vld [vmem:[#allocation50_spill] sm:$0xff] }
 0x8f9   : > { %v4543_v43 = vsel %vm4479_vm12, %v9477_v10, 256.0  ;;  %vm4484_vm4 = vcmp.ge.f32.partialorder %v18762_v5, %v4405_v49  ;;  %v4618_v47 = vmin.f32 %v4541_v35, %v4542_v50  ;;  %vm4487_vm8 = vcmp.ge.f32.partialorder %v18765_v53, %v4411_v61  ;;  %v18766_v49 = vld [vmem:[#allocation51_spill] sm:$0xff]  ;;  %v18769_v53 = vld [vmem:[#allocation69_spill] sm:$0xff] }
 0x8fa   : > { %4446 = vmax.xlane.f32.xlu0 %v4445_v38  ;;  %v4408_v38 = vpop.xlane.xlu1 %4407  ;;  %v4621_v56 = vmin.f32 %v4543_v43, %v4544_v14  ;;  %v4548_v17 = vsel %vm4484_vm4, %v9479_v24, 256.0  ;;  %vm4488_vm0 = vcmp.ge.f32.partialorder %v18766_v49, %v4411_v61  ;;  %v18770_v61 = vld [vmem:[#allocation18_spill] sm:$0xff] }
 0x8fb   : > { %4613 = vmin.xlane.f32.xlu1 %v4612_v26  ;;  %v18764_v26 = vld [vmem:[#allocation39_spill] sm:$0xff]  ;;  %v4627_v43 = vmin.f32 %v4547_v33, %v4548_v17  ;;  %v4552_v50 = vsel %vm4488_vm0, %v9479_v24, 256.0 }
 0x8fc   : > { %vm4482_vm1 = vcmp.ge.f32.partialorder %v18764_v26, %v4402_v31  ;;  %v18768_v31 = vld [vmem:[#allocation54_spill] sm:$0xff] }
 0x8fd   : > { %v4546_v40 = vsel %vm4482_vm1, %v9479_v24, 256.0  ;;  %vm4486_vm3 = vcmp.ge.f32.partialorder %v18768_v31, %v4408_v38 }
 0x8fe   : > { %4616 = vmin.xlane.f32.xlu0 %v4615_v57  ;;  %v18767_v57 = vld [vmem:[#allocation68_spill] sm:$0xff]  ;;  %v4414_v14 = vpop.xlane.xlu1 %4413  ;;  %v4624_v35 = vmin.f32 %v4545_v63, %v4546_v40  ;;  %v4550_v0 = vsel %vm4486_vm3, %v9479_v24, 256.0 }
 0x8ff   : > { %4449 = vmax.xlane.f32.xlu1 %v4448_v34  ;;  %vm4485_vm14 = vcmp.ge.f32.partialorder %v18767_v57, %v4408_v38  ;;  %v4551_v34 = vsel %vm4487_vm8, %v9477_v10, 256.0  ;;  %vm4489_vm6 = vcmp.ge.f32.partialorder %v18769_v53, %v4414_v14  ;;  %vm4490_vm10 = vcmp.ge.f32.partialorder %v18770_v61, %v4414_v14 }
 0x900   : > { %v4549_v26 = vsel %vm4485_vm14, %v9477_v10, 256.0  ;;  %v4554_v17 = vsel %vm4490_vm10, %v9479_v24, 256.0 }
 0x901   : > { %v4630_v38 = vmin.f32 %v4549_v26, %v4550_v0 }
 0x902   : > { %4622 = vmin.xlane.f32.xlu0 %v4621_v56  ;;  %v4633_v56 = vmin.f32 %v4551_v34, %v4552_v50 }
 0x903   : > { %4619 = vmin.xlane.f32.xlu1 %v4618_v47  ;;  %v4553_v47 = vsel %vm4489_vm6, %v9477_v10, 256.0 }
 0x904   : > { %v4636_v33 = vmin.f32 %v4553_v47, %v4554_v17  ;;  %v18878_v17 = vld [vmem:[#allocation45_spill] sm:$0xff] }
 0x906   : > { %4628 = vmin.xlane.f32.xlu0 %v4627_v43 }
 0x907   : > { %4625 = vmin.xlane.f32.xlu1 %v4624_v35 }
 0x90a   : > { %4634 = vmin.xlane.f32.xlu0 %v4633_v56 }
 0x90b   : > { %4631 = vmin.xlane.f32.xlu1 %v4630_v38 }
 0x90f   : > { %4637 = vmin.xlane.f32.xlu1 %v4636_v33 }
 0x95b   : > { %v4581_v40 = vpop.xlane.xlu0 %4580 }
 0x95c   : > { %vm4675_vm7 = vcmp.eq.f32.partialorder %v9477_v10, %v4581_v40  ;;  %vm4676_vm13 = vcmp.eq.f32.partialorder %v9479_v24, %v4581_v40 }
 0x95d   : > { %v14322_v63 = vsel %vm4675_vm7, -3e+38, %v13518_v32  ;;  %v14327_v0 = vsel %vm4676_vm13, -3e+38, %v13524_v2  ;;  %v18880_v2 = vld [vmem:[#allocation46_spill] sm:$0xff] }
 0x95e   : > { %v5069_v26 = vmax.f32 %v14322_v63, %v14327_v0 }
 0x95f   : > { %v4417_v14 = vpop.xlane.xlu0 %4416 }
 0x960   : > { %vm4491_vm12 = vcmp.ge.f32.partialorder %v14066_v25, %v4417_v14  ;;  %vm4492_vm15 = vcmp.ge.f32.partialorder %v14072_v44, %v4417_v14  ;;  %v4584_v43 = vpop.xlane.xlu1 %4583  ;;  %5070 = vmax.xlane.f32.xlu0 %v5069_v26 }
 0x961   : > { %v4555_v34 = vsel %vm4491_vm12, %v9477_v10, 256.0  ;;  %v4556_v32 = vsel %vm4492_vm15, %v9479_v24, 256.0  ;;  %vm4677_vm11 = vcmp.eq.f32.partialorder %v9477_v10, %v4584_v43  ;;  %vm4678_vm5 = vcmp.eq.f32.partialorder %v9479_v24, %v4584_v43 }
 0x962   : > { %vm14337_vm9 = vmpackc.low %vm4677_vm11, %vm4675_vm7  ;;  %v14342_v50 = vsel %vm4677_vm11, -3e+38, %v13558_v7  ;;  %v14345_v35 = vsel %vm4678_vm5, -3e+38, %v13564_v58  ;;  %v4639_v56 = vmin.f32 %v4555_v34, %v4556_v32 }
 0x963   : > { %v4587_v38 = vpop.xlane.xlu0 %4586  ;;  %v5072_v47 = vmax.f32 %v14342_v50, %v14345_v35  ;;  %vm14351_vm4 = vmpackc.low %vm4678_vm5, %vm4676_vm13 }
 0x964   : > { %vm4679_vm2 = vcmp.eq.f32.partialorder %v9477_v10, %v4587_v38  ;;  %vm4680_vm1 = vcmp.eq.f32.partialorder %v9479_v24, %v4587_v38  ;;  %v4420_v7 = vpop.xlane.xlu1 %4419  ;;  %4640 = vmin.xlane.f32.xlu0 %v4639_v56 }
 0x965   : > { %v14360_v58 = vsel %vm4679_vm2, -3e+38, %v13546_v59  ;;  %v14365_v33 = vsel %vm4680_vm1, -3e+38, %v13552_v23  ;;  %vm4493_vm8 = vcmp.ge.f32.partialorder %v14096_v46, %v4420_v7  ;;  %vm4494_vm0 = vcmp.ge.f32.partialorder %v14102_v4, %v4420_v7  ;;  %5073 = vmax.xlane.f32.xlu1 %v5072_v47 }
 0x966   : > { %v4557_v40 = vsel %vm4493_vm8, %v9477_v10, 256.0  ;;  %v4558_v26 = vsel %vm4494_vm0, %v9479_v24, 256.0  ;;  %v5075_v14 = vmax.f32 %v14360_v58, %v14365_v33 }
 0x967   : > { %v4423_v43 = vpop.xlane.xlu0 %4422  ;;  %v4642_v59 = vmin.f32 %v4557_v40, %v4558_v26 }
 0x968   : > { %vm4495_vm14 = vcmp.ge.f32.partialorder %v14110_v18, %v4423_v43  ;;  %vm4496_vm3 = vcmp.ge.f32.partialorder %v14116_v62, %v4423_v43  ;;  %v4590_v23 = vpop.xlane.xlu1 %4589  ;;  %5076 = vmax.xlane.f32.xlu0 %v5075_v14 }
 0x969   : > { %v4559_v34 = vsel %vm4495_vm14, %v9477_v10, 256.0  ;;  %v4560_v32 = vsel %vm4496_vm3, %v9479_v24, 256.0  ;;  %vm4681_vm6 = vcmp.eq.f32.partialorder %v9477_v10, %v4590_v23  ;;  %vm4682_vm10 = vcmp.eq.f32.partialorder %v9479_v24, %v4590_v23  ;;  %4643 = vmin.xlane.f32.xlu1 %v4642_v59 }
 0x96a   : > { %vm14381_vm7 = vmpackc.low %vm4681_vm6, %vm4679_vm2  ;;  %v14386_v47 = vsel %vm4681_vm6, -3e+38, %v13610_v13  ;;  %v14389_v7 = vsel %vm4682_vm10, -3e+38, %v13616_v8  ;;  %v4645_v40 = vmin.f32 %v4559_v34, %v4560_v32 }
 0x96b   : > { %v4593_v26 = vpop.xlane.xlu0 %4592  ;;  %v5078_v14 = vmax.f32 %v14386_v47, %v14389_v7  ;;  %vm14395_vm13 = vmpackc.low %vm4682_vm10, %vm4680_vm1 }
 0x96c   : > { %vm4683_vm12 = vcmp.eq.f32.partialorder %v9477_v10, %v4593_v26  ;;  %vm4684_vm15 = vcmp.eq.f32.partialorder %v9479_v24, %v4593_v26  ;;  %v4426_v13 = vpop.xlane.xlu1 %4425  ;;  %4646 = vmin.xlane.f32.xlu0 %v4645_v40 }
 0x96d   : > { %v14404_v8 = vsel %vm4683_vm12, -3e+38, %v13588_v54  ;;  %v14409_v59 = vsel %vm4684_vm15, -3e+38, %v13594_v28  ;;  %vm4497_vm11 = vcmp.ge.f32.partialorder %v14137_v51, %v4426_v13  ;;  %vm4498_vm5 = vcmp.ge.f32.partialorder %v14143_v22, %v4426_v13  ;;  %5079 = vmax.xlane.f32.xlu1 %v5078_v14 }
 0x96e   : > { %v4561_v38 = vsel %vm4497_vm11, %v9477_v10, 256.0  ;;  %v4562_v23 = vsel %vm4498_vm5, %v9479_v24, 256.0  ;;  %v5081_v34 = vmax.f32 %v14404_v8, %v14409_v59 }
 0x96f   : > { %v4429_v32 = vpop.xlane.xlu0 %4428  ;;  %v4648_v54 = vmin.f32 %v4561_v38, %v4562_v23 }
 0x970   : > { %vm4499_vm2 = vcmp.ge.f32.partialorder %v14151_v55, %v4429_v32  ;;  %vm4500_vm1 = vcmp.ge.f32.partialorder %v14157_v48, %v4429_v32  ;;  %v4596_v28 = vpop.xlane.xlu1 %4595  ;;  %5082 = vmax.xlane.f32.xlu0 %v5081_v34  ;;  %v14419_v40 = vpop.f32.mrb[40].mxu1 }
 0x971   : > { %18779 = vst [vmem:[#allocation32_spill] sm:$0xff] %v14419_v40  ;;  %v4563_v13 = vsel %vm4499_vm2, %v9477_v10, 256.0  ;;  %v4564_v14 = vsel %vm4500_vm1, %v9479_v24, 256.0  ;;  %vm4685_vm8 = vcmp.eq.f32.partialorder %v9477_v10, %v4596_v28  ;;  %vm4686_vm0 = vcmp.eq.f32.partialorder %v9479_v24, %v4596_v28  ;;  %4649 = vmin.xlane.f32.xlu1 %v4648_v54  ;;  %v14425_v22 = vpop.f32.mrb[41].mxu1 }
 0x972   : > { %18780 = vst [vmem:[#allocation49_spill] sm:$0xff] %v14425_v22  ;;  %vm14429_vm14 = vmpackc.low %vm4685_vm8, %vm4683_vm12  ;;  %v14434_v23 = vsel %vm4685_vm8, -3e+38, %v13652_v3  ;;  %v14437_v34 = vsel %vm4686_vm0, -3e+38, %v13658_v52  ;;  %v4651_v32 = vmin.f32 %v4563_v13, %v4564_v14  ;;  %v14441_v28 = vpop.f32.mrb[42].mxu1 }
 0x973   : > { %18783 = vst [vmem:[#allocation47_spill] sm:$0xff] %v14434_v23  ;;  %18784 = vst [vmem:[#allocation19_spill] sm:$0xff] %v14437_v34  ;;  %v4599_v54 = vpop.xlane.xlu0 %4598  ;;  %v5084_v55 = vmax.f32 %v14434_v23, %v14437_v34  ;;  %v14455_v13 = vpop.f32.mrb[43].mxu1 }
 0x974   : > { %18785 = vst [vmem:[#allocation24_spill] sm:$0xff] %v14441_v28  ;;  %vm14447_vm3 = vmpackc.low %vm4686_vm0, %vm4684_vm15  ;;  %vm4687_vm6 = vcmp.eq.f32.partialorder %v9477_v10, %v4599_v54  ;;  %vm4688_vm10 = vcmp.eq.f32.partialorder %v9479_v24, %v4599_v54  ;;  %v4432_v14 = vpop.xlane.xlu1 %4431  ;;  %4652 = vmin.xlane.f32.xlu0 %v4651_v32 }
 0x975   : > { %18788 = vst [vmem:[#allocation21_spill] sm:$0xff] %v14455_v13  ;;  %v14464_v48 = vsel %vm4687_vm6, -3e+38, %v13632_v45  ;;  %v14469_v52 = vsel %vm4688_vm10, -3e+38, %v13638_v16  ;;  %vm4501_vm12 = vcmp.ge.f32.partialorder %v14173_v41, %v4432_v14  ;;  %vm4502_vm15 = vcmp.ge.f32.partialorder %v14179_v37, %v4432_v14  ;;  %5085 = vmax.xlane.f32.xlu1 %v5084_v55 }
 0x976   : > { %18789 = vst [vmem:[#allocation28_spill] sm:$0xff] %v14464_v48  ;;  %18790 = vst [vmem:[#allocation29_spill] sm:$0xff] %v14469_v52  ;;  %v4565_v32 = vsel %vm4501_vm12, %v9477_v10, 256.0  ;;  %v4566_v3 = vsel %vm4502_vm15, %v9479_v24, 256.0  ;;  %v5087_v26 = vmax.f32 %v14464_v48, %v14469_v52 }
 0x977   : > { %v4435_v13 = vpop.xlane.xlu0 %4434  ;;  %v4654_v45 = vmin.f32 %v4565_v32, %v4566_v3 }
 0x978   : > { %vm4503_vm11 = vcmp.ge.f32.partialorder %v14187_v15, %v4435_v13  ;;  %vm4504_vm5 = vcmp.ge.f32.partialorder %v14193_v9, %v4435_v13  ;;  %v4602_v16 = vpop.xlane.xlu1 %4601  ;;  %5088 = vmax.xlane.f32.xlu0 %v5087_v26 }
 0x979   : > { %v4567_v30 = vsel %vm4503_vm11, %v9477_v10, 256.0  ;;  %v4568_v14 = vsel %vm4504_vm5, %v9479_v24, 256.0  ;;  %vm4689_vm2 = vcmp.eq.f32.partialorder %v9477_v10, %v4602_v16  ;;  %vm4690_vm1 = vcmp.eq.f32.partialorder %v9479_v24, %v4602_v16  ;;  %4655 = vmin.xlane.f32.xlu1 %v4654_v45 }
 0x97a   : > { %vm14485_vm8 = vmpackc.low %vm4689_vm2, %vm4687_vm6  ;;  %v14490_v3 = vsel %vm4689_vm2, -3e+38, %v13689_v42  ;;  %v14493_v13 = vsel %vm4690_vm1, -3e+38, %v13695_v12  ;;  %v4657_v26 = vmin.f32 %v4567_v30, %v4568_v14 }
 0x97b   : > { %18793 = vst [vmem:[#allocation25_spill] sm:$0xff] %v14490_v3  ;;  %18794 = vst [vmem:[#allocation67_spill] sm:$0xff] %v14493_v13  ;;  %v4605_v32 = vpop.xlane.xlu0 %4604  ;;  %v5090_v28 = vmax.f32 %v14490_v3, %v14493_v13 }
 0x97c   : > { %vm14499_vm0 = vmpackc.low %vm4690_vm1, %vm4688_vm10  ;;  %vm4691_vm6 = vcmp.eq.f32.partialorder %v9477_v10, %v4605_v32  ;;  %vm4692_vm12 = vcmp.eq.f32.partialorder %v9479_v24, %v4605_v32  ;;  %v4438_v42 = vpop.xlane.xlu1 %4437  ;;  %4658 = vmin.xlane.f32.xlu0 %v4657_v26  ;;  %v18809_v32 = vld [vmem:[#allocation53_spill] sm:$0xff] }
 0x97d   : > { %v14508_v12 = vsel %vm4691_vm6, -3e+38, %v13673_v19  ;;  %v14513_v30 = vsel %vm4692_vm12, -3e+38, %v13679_v20  ;;  %vm4505_vm10 = vcmp.ge.f32.partialorder %v14209_v11, %v4438_v42  ;;  %vm4506_vm15 = vcmp.ge.f32.partialorder %v14215_v6, %v4438_v42  ;;  %5091 = vmax.xlane.f32.xlu1 %v5090_v28 }
 0x97e   : > { %18797 = vst [vmem:[#allocation51_spill] sm:$0xff] %v14508_v12  ;;  %18798 = vst [vmem:[#allocation68_spill] sm:$0xff] %v14513_v30  ;;  %v4569_v54 = vsel %vm4505_vm10, %v9477_v10, 256.0  ;;  %v4570_v16 = vsel %vm4506_vm15, %v9479_v24, 256.0  ;;  %v5093_v14 = vmax.f32 %v14508_v12, %v14513_v30  ;;  %v18799_v28 = vmov 0 }
 0x97f   : > { %v4441_v26 = vpop.xlane.xlu0 %4440  ;;  %v4660_v19 = vmin.f32 %v4569_v54, %v4570_v16 }
 0x980   : > { %vm4507_vm11 = vcmp.ge.f32.partialorder %v14223_v29, %v4441_v26  ;;  %vm4508_vm5 = vcmp.ge.f32.partialorder %v14229_v60, %v4441_v26  ;;  %v4608_v20 = vpop.xlane.xlu1 %4607  ;;  %5094 = vmax.xlane.f32.xlu0 %v5093_v14  ;;  %v18812_v60 = vld [vmem:[#allocation44_spill] sm:$0xff]  ;;  %v18828_v29 = vld [vmem:[#allocation26_spill] sm:$0xff] }
 0x981   : > { %v4571_v1 = vsel %vm4507_vm11, %v9477_v10, 256.0  ;;  %v4572_v42 = vsel %vm4508_vm5, %v9479_v24, 256.0  ;;  %vm4693_vm2 = vcmp.eq.f32.partialorder %v9477_v10, %v4608_v20  ;;  %vm4694_vm1 = vcmp.eq.f32.partialorder %v9479_v24, %v4608_v20  ;;  %4661 = vmin.xlane.f32.xlu1 %v4660_v19  ;;  %v18805_v20 = vld [vmem:[#allocation22_spill] sm:$0xff] }
 0x982   : > { %vm14529_vm10 = vmpackc.low %vm4693_vm2, %vm4691_vm6  ;;  %v14534_v54 = vsel %vm4693_vm2, -3e+38, %v18729_v27  ;;  %v14537_v16 = vsel %vm4694_vm1, -3e+38, %v18730_v36  ;;  %v4663_v14 = vmin.f32 %v4571_v1, %v4572_v42  ;;  %v18807_v36 = vld [vmem:[#allocation30_spill] sm:$0xff] }
 0x983   : > { %v18800_v28 = vsel %vm14529_vm10, 4294967295, %v18799_v28  ;;  %18801 = vst [vmem:[#allocation54_spill] sm:$0xff] %v14534_v54  ;;  %18802 = vst [vmem:[#allocation69_spill] sm:$0xff] %v14537_v16  ;;  %v4611_v26 = vpop.xlane.xlu0 %4610  ;;  %v5096_v22 = vmax.f32 %v14534_v54, %v14537_v16  ;;  %v18811_v54 = vld [vmem:[#allocation37_spill] sm:$0xff] }
 0x984   : > { %vm14543_vm15 = vmpackc.low %vm4694_vm1, %vm4692_vm12  ;;  %vm4695_vm6 = vcmp.eq.f32.partialorder %v9477_v10, %v4611_v26  ;;  %vm17875_vm11 = vcmp.eq.f32.partialorder %v9479_v24, %v4611_v26  ;;  %v4444_v27 = vpop.xlane.xlu1 %4443  ;;  %4664 = vmin.xlane.f32.xlu0 %v4663_v14 }
 0x985   : > { %v14552_v1 = vsel %vm4695_vm6, -3e+38, %v18805_v20  ;;  %v14557_v42 = vsel %vm17875_vm11, -3e+38, %v18807_v36  ;;  %vm4509_vm12 = vcmp.ge.f32.partialorder %v18809_v32, %v4444_v27  ;;  %vm4510_vm5 = vcmp.ge.f32.partialorder %v18810_v39, %v4444_v27  ;;  %5097 = vmax.xlane.f32.xlu1 %v5096_v22 }
 0x986   : > { %18806 = vst [vmem:[#allocation18_spill] sm:$0xff] %v14552_v1  ;;  %18808 = vst [vmem:[#allocation22_spill] sm:$0xff] %v14557_v42  ;;  %v4573_v40 = vsel %vm4509_vm12, %v9477_v10, 256.0  ;;  %v4574_v21 = vsel %vm4510_vm5, %v9479_v24, 256.0  ;;  %v5099_v14 = vmax.f32 %v14552_v1, %v14557_v42  ;;  %v18813_v22 = vmov 0 }
 0x987   : > { %v4447_v16 = vpop.xlane.xlu0 %4446  ;;  %v4666_v20 = vmin.f32 %v4573_v40, %v4574_v21  ;;  %v18815_v21 = vld [vmem:[#allocation23_spill] sm:$0xff] }
 0x988   : > { %vm4511_vm2 = vcmp.ge.f32.partialorder %v18811_v54, %v4447_v16  ;;  %vm4512_vm1 = vcmp.ge.f32.partialorder %v18812_v60, %v4447_v16  ;;  %v4614_v36 = vpop.xlane.xlu1 %4613  ;;  %5100 = vmax.xlane.f32.xlu0 %v5099_v14  ;;  %v18817_v16 = vld [vmem:[#allocation72_spill] sm:$0xff] }
 0x989   : > { %v4575_v32 = vsel %vm4511_vm2, %v9477_v10, 256.0  ;;  %v4576_v27 = vsel %vm4512_vm1, %v9479_v24, 256.0  ;;  %vm4697_vm11 = vcmp.eq.f32.partialorder %v9477_v10, %v4614_v36  ;;  %vm4698_vm12 = vcmp.eq.f32.partialorder %v9479_v24, %v4614_v36  ;;  %4667 = vmin.xlane.f32.xlu1 %v4666_v20 }
 0x98a   : > { %vm14573_vm5 = vmpackc.low %vm4697_vm11, %vm4695_vm6  ;;  %v14578_v40 = vsel %vm4697_vm11, -3e+38, %v18815_v21  ;;  %v14581_v14 = vsel %vm4698_vm12, -3e+38, %v18817_v16  ;;  %v4669_v60 = vmin.f32 %v4575_v32, %v4576_v27  ;;  %vm18819_vm2 = vcmp.eq.f32.partialorder %v9479_v24, %v4611_v26  ;;  %v18822_v21 = vld [vmem:[#allocation33_spill] sm:$0xff]  ;;  %v18824_v27 = vld [vmem:[#allocation27_spill] sm:$0xff] }
 0x98b   : > { %v18814_v22 = vsel %vm14573_vm5, 4294967295, %v18813_v22  ;;  %18816 = vst [vmem:[#allocation30_spill] sm:$0xff] %v14578_v40  ;;  %18818 = vst [vmem:[#allocation23_spill] sm:$0xff] %v14581_v14  ;;  %v4617_v54 = vpop.xlane.xlu0 %4616  ;;  %v5102_v39 = vmax.f32 %v14578_v40, %v14581_v14  ;;  %v18820_v20 = vmov 0  ;;  %v18826_v26 = vld [vmem:[#allocation48_spill] sm:$0xff]  ;;  %v18827_v14 = vld [vmem:[#allocation31_spill] sm:$0xff] }
 0x98c   : > { %vm14587_vm1 = vmpackc.low %vm4698_vm12, %vm18819_vm2  ;;  %vm17884_vm6 = vcmp.eq.f32.partialorder %v9477_v10, %v4617_v54  ;;  %vm17886_vm5 = vcmp.eq.f32.partialorder %v9479_v24, %v4617_v54  ;;  %v4450_v36 = vpop.xlane.xlu1 %4449  ;;  %4670 = vmin.xlane.f32.xlu0 %v4669_v60 }
 0x98d   : > { %v18821_v20 = vsel %vm14587_vm1, 4294967295, %v18820_v20  ;;  %v14596_v32 = vsel %vm17884_vm6, -3e+38, %v18822_v21  ;;  %v14601_v16 = vsel %vm17886_vm5, -3e+38, %v18824_v27  ;;  %vm4513_vm11 = vcmp.ge.f32.partialorder %v18826_v26, %v4450_v36  ;;  %5103 = vmax.xlane.f32.xlu1 %v5102_v39  ;;  %v18830_v39 = vld [vmem:[#allocation73_spill] sm:$0xff] }
 0x98e   : > { %18823 = vst [vmem:[#allocation72_spill] sm:$0xff] %v14596_v32  ;;  %18825 = vst [vmem:[#allocation33_spill] sm:$0xff] %v14601_v16  ;;  %vm4514_vm12 = vcmp.ge.f32.partialorder %v18827_v14, %v4450_v36  ;;  %v4577_v40 = vsel %vm4513_vm11, %v9477_v10, 256.0  ;;  %v5105_v60 = vmax.f32 %v14596_v32, %v14601_v16  ;;  %vm18832_vm5 = vcmp.eq.f32.partialorder %v9477_v10, %v4617_v54 }
 0x98f   : > { %v4578_v42 = vsel %vm4514_vm12, %v9479_v24, 256.0  ;;  %v4623_v1 = vpop.xlane.xlu0 %4622 }
 0x990   : > { %v4672_v21 = vmin.f32 %v4577_v40, %v4578_v42  ;;  %vm17890_vm2 = vcmp.eq.f32.partialorder %v9477_v10, %v4623_v1  ;;  %vm17889_vm6 = vcmp.eq.f32.partialorder %v9479_v24, %v4623_v1  ;;  %v4620_v27 = vpop.xlane.xlu1 %4619  ;;  %5106 = vmax.xlane.f32.xlu0 %v5105_v60  ;;  %v18833_v42 = vmov 0  ;;  %v18835_v40 = vld [vmem:[#allocation74_spill] sm:$0xff] }
 0x991   : > { %v14614_v36 = vsel %vm17890_vm2, -3e+38, %v18828_v29  ;;  %v14619_v14 = vsel %vm17889_vm6, -3e+38, %v18830_v39  ;;  %vm4701_vm11 = vcmp.eq.f32.partialorder %v9477_v10, %v4620_v27  ;;  %vm4702_vm12 = vcmp.eq.f32.partialorder %v9479_v24, %v4620_v27  ;;  %v18837_v29 = vld [vmem:[#allocation75_spill] sm:$0xff] }
 0x992   : > { %18829 = vst [vmem:[#allocation27_spill] sm:$0xff] %v14614_v36  ;;  %18831 = vst [vmem:[#allocation26_spill] sm:$0xff] %v14619_v14  ;;  %4673 = vmin.xlane.f32.xlu1 %v4672_v21  ;;  %v14630_v60 = vsel %vm4701_vm11, -3e+38, %v18835_v40  ;;  %v14633_v26 = vsel %vm4702_vm12, -3e+38, %v18837_v29  ;;  %v5111_v39 = vmax.f32 %v14614_v36, %v14619_v14  ;;  %vm18839_vm6 = vcmp.eq.f32.partialorder %v9479_v24, %v4617_v54 }
 0x993   : > { %vm14625_vm1 = vmpackc.low %vm4701_vm11, %vm18832_vm5  ;;  %18836 = vst [vmem:[#allocation73_spill] sm:$0xff] %v14630_v60  ;;  %v4629_v16 = vpop.xlane.xlu0 %4628  ;;  %v5108_v27 = vmax.f32 %v14630_v60, %v14633_v26  ;;  %v18840_v21 = vmov 0  ;;  %v18842_v29 = vld [vmem:[#allocation40_spill] sm:$0xff]  ;;  %v18845_v54 = vmov 0 }
 0x994   : > { %v18834_v42 = vsel %vm14625_vm1, 4294967295, %v18833_v42  ;;  %18838 = vst [vmem:[#allocation74_spill] sm:$0xff] %v14633_v26  ;;  %vm14641_vm2 = vmpackc.low %vm4702_vm12, %vm18839_vm6  ;;  %vm17902_vm5 = vcmp.eq.f32.partialorder %v9477_v10, %v4629_v16  ;;  %vm17901_vm11 = vcmp.eq.f32.partialorder %v9479_v24, %v4629_v16  ;;  %v4626_v40 = vpop.xlane.xlu1 %4625  ;;  %5112 = vmax.xlane.f32.xlu0 %v5111_v39  ;;  %vm18844_vm1 = vcmp.eq.f32.partialorder %v9477_v10, %v4623_v1  ;;  %v18847_v39 = vld [vmem:[#allocation38_spill] sm:$0xff] }
 0x995   : > { %v18841_v21 = vsel %vm14641_vm2, 4294967295, %v18840_v21  ;;  %v14650_v14 = vsel %vm17902_vm5, -3e+38, %v18842_v29  ;;  %v14655_v26 = vsel %vm17901_vm11, -3e+38, %v18762_v5  ;;  %vm4705_vm6 = vcmp.eq.f32.partialorder %v9477_v10, %v4626_v40  ;;  %v18849_v29 = vld [vmem:[#allocation39_spill] sm:$0xff] }
 0x996   : > { %18843 = vst [vmem:[#allocation75_spill] sm:$0xff] %v14655_v26  ;;  %vm4706_vm12 = vcmp.eq.f32.partialorder %v9479_v24, %v4626_v40  ;;  %5109 = vmax.xlane.f32.xlu1 %v5108_v27  ;;  %vm14661_vm2 = vmpackc.low %vm4705_vm6, %vm18844_vm1  ;;  %v14666_v60 = vsel %vm4705_vm6, -3e+38, %v18847_v39  ;;  %v5117_v5 = vmax.f32 %v14650_v14, %v14655_v26  ;;  %vm18851_vm11 = vcmp.eq.f32.partialorder %v9479_v24, %v4623_v1 }
 0x997   : > { %v18846_v54 = vsel %vm14661_vm2, 4294967295, %v18845_v54  ;;  %18848 = vst [vmem:[#allocation40_spill] sm:$0xff] %v14666_v60  ;;  %v14669_v36 = vsel %vm4706_vm12, -3e+38, %v18849_v29  ;;  %v4635_v32 = vpop.xlane.xlu0 %4634  ;;  %vm14677_vm5 = vmpackc.low %vm4706_vm12, %vm18851_vm11  ;;  %v18852_v27 = vmov 0  ;;  %v18854_v29 = vld [vmem:[#allocation50_spill] sm:$0xff]  ;;  %vm18857_vm2 = vcmp.eq.f32.partialorder %v9477_v10, %v4629_v16 }
 0x998   : > { %18850 = vst [vmem:[#allocation38_spill] sm:$0xff] %v14669_v36  ;;  %v5114_v40 = vmax.f32 %v14666_v60, %v14669_v36  ;;  %v18853_v27 = vsel %vm14677_vm5, 4294967295, %v18852_v27  ;;  %vm17910_vm1 = vcmp.eq.f32.partialorder %v9477_v10, %v4635_v32  ;;  %vm17909_vm6 = vcmp.eq.f32.partialorder %v9479_v24, %v4635_v32  ;;  %v4632_v39 = vpop.xlane.xlu1 %4631  ;;  %5118 = vmax.xlane.f32.xlu0 %v5117_v5 }
 0x999   : > { %v14686_v26 = vsel %vm17910_vm1, -3e+38, %v18854_v29  ;;  %v14691_v36 = vsel %vm17909_vm6, -3e+38, %v18766_v49  ;;  %vm4709_vm11 = vcmp.eq.f32.partialorder %v9477_v10, %v4632_v39  ;;  %vm4710_vm12 = vcmp.eq.f32.partialorder %v9479_v24, %v4632_v39 }
 0x99a   : > { %18855 = vst [vmem:[#allocation39_spill] sm:$0xff] %v14686_v26  ;;  %18856 = vst [vmem:[#allocation50_spill] sm:$0xff] %v14691_v36  ;;  %5115 = vmax.xlane.f32.xlu1 %v5114_v40  ;;  %v18858_v1 = vmov 0  ;;  %v14702_v5 = vsel %vm4709_vm11, -3e+38, %v18767_v57  ;;  %v5123_v49 = vmax.f32 %v14686_v26, %v14691_v36  ;;  %vm18862_vm6 = vcmp.eq.f32.partialorder %v9479_v24, %v4629_v16 }
 0x99b   : > { %vm14697_vm5 = vmpackc.low %vm4709_vm11, %vm18857_vm2  ;;  %18860 = vst [vmem:[#allocation76_spill] sm:$0xff] %v14702_v5  ;;  %v14705_v29 = vsel %vm4710_vm12, -3e+38, %v18768_v31 }
 0x99c   : > { %v18859_v1 = vsel %vm14697_vm5, 4294967295, %v18858_v1  ;;  %18861 = vst [vmem:[#allocation77_spill] sm:$0xff] %v14705_v29  ;;  %v5120_v60 = vmax.f32 %v14702_v5, %v14705_v29  ;;  %vm14713_vm1 = vmpackc.low %vm4710_vm12, %vm18862_vm6  ;;  %v4638_v39 = vpop.xlane.xlu1 %4637  ;;  %5124 = vmax.xlane.f32.xlu0 %v5123_v49  ;;  %vm18865_vm5 = vcmp.eq.f32.partialorder %v9477_v10, %v4635_v32  ;;  %vm18870_vm6 = vcmp.eq.f32.partialorder %v9479_v24, %v4635_v32 }
 0x99d   : > { %vm4713_vm2 = vcmp.eq.f32.partialorder %v9477_v10, %v4638_v39  ;;  %vm4714_vm11 = vcmp.eq.f32.partialorder %v9479_v24, %v4638_v39  ;;  %v18875_v32 = vmov 0  }
 0x99e   : > { %5121 = vmax.xlane.f32.xlu1 %v5120_v60  ;;  %vm14721_vm10 = vmpackc.low %vm4713_vm2, %vm18865_vm5  ;;  %v14726_v31 = vsel %vm4713_vm2, -3e+38, %v18769_v53  ;;  %v14729_v16 = vsel %vm4714_vm11, -3e+38, %v18770_v61  ;;  %v18873_v61 = vmov 1.0|1.0   ;;  %vm18889_vm2 = vnez %v18846_v54 }
 0x99f   : > { %18868 = vst [vmem:[#allocation78_spill] sm:$0xff] %v14726_v31  ;;  %18869 = vst [vmem:[#allocation79_spill] sm:$0xff] %v14729_v16  ;;  %v5126_v49 = vmax.f32 %v14726_v31, %v14729_v16  ;;  %v8681_v16 = vld [vmem:[#allocation8] sm:$0xff]   ;;  %vm18874_vm5 = vcmask 130048   ;;  %v14744_v31 = vpop.f32.mrb[44].mxu1 }
 0x9a0   : > { %vm14735_vm12 = vmpackc.low %vm4714_vm11, %vm18870_vm6  ;;  %18876 = vst [vmem:[#allocation80_spill] sm:$0xff] %v14744_v31  ;;  %v18882_v31 = vld [vmem:[#allocation59_spill] sm:$0xff] }
 0x9a2   : > { %5127 = vmax.xlane.f32.xlu1 %v5126_v49  ;;  %v8682_v49 = vld [vmem:[#allocation8 + $0x8] sm:$0xff]  }
 0x9a9   : > { %v4219_v60 = vpop.f32.mrb[72].mxu0 }
 0x9aa   : > { %v4221_v29 = vpop.f32.mrb[73].mxu0 }
 0x9ab   : > { %v4223_v5 = vpop.f32.mrb[74].mxu0 }
 0x9ac   : > { %v4228_v36 = vpack.c.bf16 %v4223_v5, %v4219_v60  ;;  %v4225_v26 = vpop.f32.mrb[75].mxu0  ;;  %v18901_v60 = vld [vmem:[#allocation18_spill] sm:$0xff] }
 0x9ad   : > { %v4229_v53 = vpack.c.bf16 %v4225_v26, %v4221_v29  ;;  %v14751_v29 = vpop.f32.mrb[45].mxu1  ;;  %v18881_v26 = vld [vmem:[#allocation60_spill] sm:$0xff] }
 0x9af   : > { %4230 = vmatprep.subr.bf16.mxu1 %v4229_v53 }
 0x9b0   : > { %4231 = vmatpush1.bf16.msra.mxu1 %v4228_v36  ;;  %v18902_v36 = vld [vmem:[#allocation22_spill] sm:$0xff] }
 0x9b1   : > { %8091 = vmatprep.subr.msk.bf16.mxu1 %vm14351_vm4, %v18873_v61  ;;  %vm18879_vm4 = vmmov %vm18874_vm5 }
 0x9b3   : > { %8024 = vmatmul.mubr.msk.bf16.vlgmr.msra.gmra.mrb[48].mxu1 %vm18874_vm5, %v8681_v16  ;;  %v14758_v16 = vpop.f32.mrb[46].mxu1 }
 0x9b4   : > { %4272 = vmatprep.mubr.bf16.mxu1 %v18875_v32  ;;  %v14763_v53 = vpop.f32.mrb[47].mxu1 }
 0x9b9   : > { %8093 = vmatpush1.bf16.xpose.msk.msra.mxu1 %vm14337_vm9, %v18873_v61  ;;  %vm18883_vm9 = vnez %v18800_v28 }
 0x9ba   : > { %8095 = vmatprep.subr.msk.bf16.mxu1 %vm14395_vm13, %v18873_v61  ;;  %vm18885_vm13 = vnez %v18814_v22 }
 0x9bb   : > { %8025 = vmatmul.mubr.msk.bf16.gmra.mrb[52].mxu1 %vm18879_vm4, %v8682_v49 }
 0x9bc   : > { %4931 = vmatprep.mubr.bf16.mxu1 %v18881_v26 }
 0x9c1   : > { %8097 = vmatpush1.bf16.xpose.msk.msra.mxu1 %vm14381_vm7, %v18873_v61  ;;  %vm18884_vm7 = vnez %v18821_v20 }
 0x9c2   : > { %8099 = vmatprep.subr.msk.bf16.mxu1 %vm14447_vm3, %v18873_v61  ;;  %vm18887_vm3 = vnez %v18834_v42 }
 0x9c9   : > { %8101 = vmatpush1.bf16.xpose.msk.msra.mxu1 %vm14429_vm14, %v18873_v61  ;;  %vm18886_vm14 = vnez %v18841_v21 }
 0x9ca   : > { %8103 = vmatprep.subr.msk.bf16.mxu1 %vm14499_vm0, %v18873_v61 }
 0x9d1   : > { %8105 = vmatpush1.bf16.xpose.msk.msra.mxu1 %vm14485_vm8, %v18873_v61  ;;  %vm18888_vm8 = vnez %v18853_v27 }
 0x9d2   : > { %8107 = vmatprep.subr.msk.bf16.mxu1 %vm14543_vm15, %v18873_v61 }
 0x9d9   : > { %8109 = vmatpush1.bf16.xpose.msk.msra.mxu1 %vm18883_vm9, %v18873_v61 }
 0x9da   : > { %8111 = vmatprep.subr.msk.bf16.mxu1 %vm18884_vm7, %v18873_v61 }
 0x9e1   : > { %8113 = vmatpush1.bf16.xpose.msk.msra.mxu1 %vm18885_vm13, %v18873_v61 }
 0x9e2   : > { %8115 = vmatprep.subr.msk.bf16.mxu1 %vm18886_vm14, %v18873_v61  ;;  %vm18892_vm14 = vnez %v18859_v1 }
 0x9e9   : > { %8117 = vmatpush1.bf16.xpose.msk.msra.mxu1 %vm18887_vm3, %v18873_v61 }
 0x9ea   : > { %8119 = vmatprep.subr.msk.bf16.mxu1 %vm18888_vm8, %v18873_v61 }
 0x9ed   : > { %v5071_v51 = vpop.xlane.xlu0 %5070 }
 0x9ee   : > { %vm5165_vm0 = vcmp.ge.f32.partialorder %v14322_v63, %v5071_v51  ;;  %vm5166_vm15 = vcmp.ge.f32.partialorder %v14327_v0, %v5071_v51 }
 0x9ef   : > { %v5229_v56 = vsel %vm5165_vm0, %v9477_v10, 256.0  ;;  %v5230_v43 = vsel %vm5166_vm15, %v9479_v24, 256.0 }
 0x9f0   : > { %v5293_v38 = vmin.f32 %v5229_v56, %v5230_v43 }
 0x9f1   : > { %8121 = vmatpush1.bf16.xpose.msk.msra.mxu1 %vm18889_vm2, %v18873_v61  ;;  %v14811_v55 = vpop.xlane.xlu0 %4640 }
 0x9f2   : > { %8123 = vmatprep.subr.msk.bf16.mxu1 %vm14713_vm1, %v18873_v61  ;;  %vm4715_vm11 = vcmp.eq.f32.partialorder %v9477_v10, %v14811_v55  ;;  %vm4716_vm6 = vcmp.eq.f32.partialorder %v9479_v24, %v14811_v55  ;;  %v5074_v45 = vpop.xlane.xlu1 %5073  ;;  %5294 = vmin.xlane.f32.xlu0 %v5293_v38 }
 0x9f3   : > { %v14824_v28 = vsel %vm4715_vm11, -3e+38, %v14066_v25  ;;  %v14830_v19 = vsel %vm4716_vm6, -3e+38, %v14072_v44  ;;  %vm5167_vm1 = vcmp.ge.f32.partialorder %v14342_v50, %v5074_v45  ;;  %vm5168_vm5 = vcmp.ge.f32.partialorder %v14345_v35, %v5074_v45 }
 0x9f4   : > { %18890 = vst [vmem:[#allocation45_spill] sm:$0xff] %v14824_v28  ;;  %18891 = vst [vmem:[#allocation46_spill] sm:$0xff] %v14830_v19  ;;  %v5231_v22 = vsel %vm5167_vm1, %v9477_v10, 256.0  ;;  %v5232_v20 = vsel %vm5168_vm5, %v9479_v24, 256.0  ;;  %v5129_v42 = vmax.f32 %v14824_v28, %v14830_v19 }
 0x9f5   : > { %v5077_v21 = vpop.xlane.xlu0 %5076  ;;  %v5296_v25 = vmin.f32 %v5231_v22, %v5232_v20 }
 0x9f6   : > { %vm5169_vm4 = vcmp.ge.f32.partialorder %v14360_v58, %v5077_v21  ;;  %vm5170_vm9 = vcmp.ge.f32.partialorder %v14365_v33, %v5077_v21  ;;  %v14840_v54 = vpop.xlane.xlu1 %4643  ;;  %5130 = vmax.xlane.f32.xlu0 %v5129_v42  ;;  %v18893_v42 = vld [vmem:[#allocation61_spill] sm:$0xff] }
 0x9f7   : > { %v5233_v44 = vsel %vm5169_vm4, %v9477_v10, 256.0  ;;  %v5234_v27 = vsel %vm5170_vm9, %v9479_v24, 256.0  ;;  %vm4717_vm7 = vcmp.eq.f32.partialorder %v9477_v10, %v14840_v54  ;;  %vm4718_vm13 = vcmp.eq.f32.partialorder %v9479_v24, %v14840_v54  ;;  %5297 = vmin.xlane.f32.xlu1 %v5296_v25  ;;  %v18894_v25 = vld [vmem:[#allocation62_spill] sm:$0xff] }
 0x9f8   : > { %v14852_v40 = vsel %vm4717_vm7, -3e+38, %v14096_v46  ;;  %v14858_v26 = vsel %vm4718_vm13, -3e+38, %v14102_v4  ;;  %v5299_v49 = vmin.f32 %v5233_v44, %v5234_v27  ;;  %vm8130_vm4 = vmpackc.low %vm4718_vm13, %vm4716_vm6 }
 0x9f9   : > { %8125 = vmatpush1.bf16.xpose.msk.msra.mxu1 %vm18892_vm14, %v18873_v61  ;;  %v14863_v51 = vpop.xlane.xlu0 %4646  ;;  %v5132_v56 = vmax.f32 %v14852_v40, %v14858_v26 }
 0x9fa   : > { %8127 = vmatprep.subr.msk.bf16.mxu1 %vm14735_vm12, %v18873_v61  ;;  %vm4719_vm3 = vcmp.eq.f32.partialorder %v9477_v10, %v14863_v51  ;;  %vm4720_vm8 = vcmp.eq.f32.partialorder %v9479_v24, %v14863_v51  ;;  %v5080_v46 = vpop.xlane.xlu1 %5079  ;;  %5300 = vmin.xlane.f32.xlu0 %v5299_v49 }
 0x9fb   : > { %v14878_v4 = vsel %vm4719_vm3, -3e+38, %v14110_v18  ;;  %v14884_v1 = vsel %vm4720_vm8, -3e+38, %v14116_v62  ;;  %vm5171_vm12 = vcmp.ge.f32.partialorder %v14386_v47, %v5080_v46  ;;  %vm5172_vm0 = vcmp.ge.f32.partialorder %v14389_v7, %v5080_v46  ;;  %5133 = vmax.xlane.f32.xlu1 %v5132_v56  ;;  %v18895_v46 = vld [vmem:[#allocation63_spill] sm:$0xff] }
 0x9fc   : > { %v5235_v39 = vsel %vm5171_vm12, %v9477_v10, 256.0  ;;  %v5236_v43 = vsel %vm5172_vm0, %v9479_v24, 256.0  ;;  %v5135_v38 = vmax.f32 %v14878_v4, %v14884_v1 }
 0x9fd   : > { %v5083_v18 = vpop.xlane.xlu0 %5082  ;;  %v5302_v45 = vmin.f32 %v5235_v39, %v5236_v43  ;;  %v18896_v43 = vld [vmem:[#allocation64_spill] sm:$0xff] }
 0x9fe   : > { %vm5173_vm15 = vcmp.ge.f32.partialorder %v14404_v8, %v5083_v18  ;;  %vm5174_vm2 = vcmp.ge.f32.partialorder %v14409_v59, %v5083_v18  ;;  %v14894_v62 = vpop.xlane.xlu1 %4649  ;;  %5136 = vmax.xlane.f32.xlu0 %v5135_v38 }
 0x9ff   : > { %v5237_v22 = vsel %vm5173_vm15, %v9477_v10, 256.0  ;;  %v5238_v20 = vsel %vm5174_vm2, %v9479_v24, 256.0  ;;  %vm4721_vm1 = vcmp.eq.f32.partialorder %v9477_v10, %v14894_v62  ;;  %vm4722_vm5 = vcmp.eq.f32.partialorder %v9479_v24, %v14894_v62  ;;  %5303 = vmin.xlane.f32.xlu1 %v5302_v45  ;;  %vm8132_vm2 = vmpackc.low %vm4717_vm7, %vm4715_vm11  ;;  %v18897_v62 = vld [vmem:[#allocation65_spill] sm:$0xff] }
 0xa00   : > { %v14906_v21 = vsel %vm4721_vm1, -3e+38, %v18893_v42  ;;  %v14912_v44 = vsel %vm4722_vm5, -3e+38, %v18894_v25  ;;  %v5305_v27 = vmin.f32 %v5237_v22, %v5238_v20  ;;  %vm8134_vm11 = vmpackc.low %vm4722_vm5, %vm4720_vm8 }
 0xa01   : > { %8129 = vmatpush1.bf16.xpose.msk.msra.mxu1 %vm14721_vm10, %v18873_v61  ;;  %v14923_v49 = vpop.xlane.xlu0 %4652  ;;  %v5138_v56 = vmax.f32 %v14906_v21, %v14912_v44 }
 0xa02   : > { %8131 = vmatprep.subr.msk.bf16.mxu1 %vm8130_vm4, %v18873_v61  ;;  %vm4723_vm9 = vcmp.eq.f32.partialorder %v9477_v10, %v14923_v49  ;;  %vm4724_vm10 = vcmp.eq.f32.partialorder %v9479_v24, %v14923_v49  ;;  %v5086_v57 = vpop.xlane.xlu1 %5085  ;;  %5306 = vmin.xlane.f32.xlu0 %v5305_v27 }
 0xa03   : > { %v14936_v39 = vsel %vm4723_vm9, -3e+38, %v18895_v46  ;;  %v14942_v38 = vsel %vm4724_vm10, -3e+38, %v18896_v43  ;;  %vm5175_vm6 = vcmp.ge.f32.partialorder %v14434_v23, %v5086_v57  ;;  %vm5176_vm13 = vcmp.ge.f32.partialorder %v14437_v34, %v5086_v57  ;;  %5139 = vmax.xlane.f32.xlu1 %v5138_v56 }
 0xa04   : > { %v5239_v18 = vsel %vm5175_vm6, %v9477_v10, 256.0  ;;  %v5240_v45 = vsel %vm5176_vm13, %v9479_v24, 256.0  ;;  %v5141_v22 = vmax.f32 %v14936_v39, %v14942_v38 }
 0xa05   : > { %v5089_v20 = vpop.xlane.xlu0 %5088  ;;  %v5308_v42 = vmin.f32 %v5239_v18, %v5240_v45 }
 0xa06   : > { %vm5177_vm14 = vcmp.ge.f32.partialorder %v14464_v48, %v5089_v20  ;;  %vm5178_vm12 = vcmp.ge.f32.partialorder %v14469_v52, %v5089_v20  ;;  %v14952_v25 = vpop.xlane.xlu1 %4655  ;;  %5142 = vmax.xlane.f32.xlu0 %v5141_v22  ;;  %v18924_v48 = vld [vmem:[#allocation40_spill] sm:$0xff] }
 0xa07   : > { %v5241_v27 = vsel %vm5177_vm14, %v9477_v10, 256.0  ;;  %v5242_v56 = vsel %vm5178_vm12, %v9479_v24, 256.0  ;;  %vm4725_vm0 = vcmp.eq.f32.partialorder %v9477_v10, %v14952_v25  ;;  %vm4726_vm15 = vcmp.eq.f32.partialorder %v9479_v24, %v14952_v25  ;;  %5309 = vmin.xlane.f32.xlu1 %v5308_v42 }
 0xa08   : > { %v14970_v57 = vsel %vm4725_vm0, -3e+38, %v14173_v41  ;;  %v14976_v46 = vsel %vm4726_vm15, -3e+38, %v14179_v37  ;;  %v5311_v43 = vmin.f32 %v5241_v27, %v5242_v56 }
 0xa09   : > { %8133 = vmatpush1.bf16.xpose.msk.msra.mxu1 %vm8132_vm2, %v18873_v61  ;;  %v14985_v55 = vpop.xlane.xlu0 %4658  ;;  %v5144_v41 = vmax.f32 %v14970_v57, %v14976_v46  ;;  %vm8136_vm2 = vmpackc.low %vm4721_vm1, %vm4719_vm3 }
 0xa0a   : > { %8135 = vmatprep.subr.msk.bf16.mxu1 %vm8134_vm11, %v18873_v61  ;;  %vm4727_vm7 = vcmp.eq.f32.partialorder %v9477_v10, %v14985_v55  ;;  %vm4728_vm4 = vcmp.eq.f32.partialorder %v9479_v24, %v14985_v55  ;;  %v5092_v37 = vpop.xlane.xlu1 %5091  ;;  %5312 = vmin.xlane.f32.xlu0 %v5311_v43  ;;  %vm8138_vm3 = vmpackc.low %vm4726_vm15, %vm4724_vm10 }
 0xa0b   : > { %v14998_v54 = vsel %vm4727_vm7, -3e+38, %v14187_v15  ;;  %v15004_v18 = vsel %vm4728_vm4, -3e+38, %v14193_v9  ;;  %vm5179_vm8 = vcmp.ge.f32.partialorder %v14490_v3, %v5092_v37  ;;  %vm5180_vm5 = vcmp.ge.f32.partialorder %v14493_v13, %v5092_v37  ;;  %5145 = vmax.xlane.f32.xlu1 %v5144_v41 }
 0xa0c   : > { %v5243_v45 = vsel %vm5179_vm8, %v9477_v10, 256.0  ;;  %v5244_v22 = vsel %vm5180_vm5, %v9479_v24, 256.0  ;;  %v5147_v20 = vmax.f32 %v14998_v54, %v15004_v18 }
 0xa0d   : > { %v5095_v15 = vpop.xlane.xlu0 %5094  ;;  %v5314_v42 = vmin.f32 %v5243_v45, %v5244_v22  ;;  %v18898_v22 = vld [vmem:[#allocation66_spill] sm:$0xff] }
 0xa0e   : > { %vm5181_vm6 = vcmp.ge.f32.partialorder %v14508_v12, %v5095_v15  ;;  %vm5182_vm13 = vcmp.ge.f32.partialorder %v14513_v30, %v5095_v15  ;;  %v15014_v9 = vpop.xlane.xlu1 %4661  ;;  %5148 = vmax.xlane.f32.xlu0 %v5147_v20  ;;  %v18899_v15 = vld [vmem:[#allocation54_spill] sm:$0xff]  ;;  %v18913_v30 = vld [vmem:[#allocation72_spill] sm:$0xff]  ;;  %v18914_v12 = vld [vmem:[#allocation33_spill] sm:$0xff] }
 0xa0f   : > { %v5245_v27 = vsel %vm5181_vm6, %v9477_v10, 256.0  ;;  %v5246_v56 = vsel %vm5182_vm13, %v9479_v24, 256.0  ;;  %vm4729_vm14 = vcmp.eq.f32.partialorder %v9477_v10, %v15014_v9  ;;  %vm4730_vm12 = vcmp.eq.f32.partialorder %v9479_v24, %v15014_v9  ;;  %5315 = vmin.xlane.f32.xlu1 %v5314_v42  ;;  %v18900_v42 = vld [vmem:[#allocation69_spill] sm:$0xff] }
 0xa10   : > { %v15032_v43 = vsel %vm4729_vm14, -3e+38, %v14209_v11  ;;  %v15038_v41 = vsel %vm4730_vm12, -3e+38, %v14215_v6  ;;  %v5317_v37 = vmin.f32 %v5245_v27, %v5246_v56 }
 0xa11   : > { %8137 = vmatpush1.bf16.xpose.msk.msra.mxu1 %vm8136_vm2, %v18873_v61  ;;  %v15047_v51 = vpop.xlane.xlu0 %4664  ;;  %v5150_v11 = vmax.f32 %v15032_v43, %v15038_v41  ;;  %vm8140_vm2 = vmpackc.low %vm4725_vm0, %vm4723_vm9 }
 0xa12   : > { %8139 = vmatprep.subr.msk.bf16.mxu1 %vm8138_vm3, %v18873_v61  ;;  %vm4731_vm1 = vcmp.eq.f32.partialorder %v9477_v10, %v15047_v51  ;;  %vm4732_vm11 = vcmp.eq.f32.partialorder %v9479_v24, %v15047_v51  ;;  %v5098_v6 = vpop.xlane.xlu1 %5097  ;;  %5318 = vmin.xlane.f32.xlu0 %v5317_v37  ;;  %vm8142_vm9 = vmpackc.low %vm4730_vm12, %vm4728_vm4 }
 0xa13   : > { %v15060_v45 = vsel %vm4731_vm1, -3e+38, %v18897_v62  ;;  %v15066_v20 = vsel %vm4732_vm11, -3e+38, %v18898_v22  ;;  %vm5183_vm10 = vcmp.ge.f32.partialorder %v18899_v15, %v5098_v6  ;;  %vm5184_vm15 = vcmp.ge.f32.partialorder %v18900_v42, %v5098_v6  ;;  %5151 = vmax.xlane.f32.xlu1 %v5150_v11  ;;  %v18903_v6 = vld [vmem:[#allocation53_spill] sm:$0xff]  ;;  %v18911_v42 = vld [vmem:[#allocation30_spill] sm:$0xff] }
 0xa14   : > { %v5247_v27 = vsel %vm5183_vm10, %v9477_v10, 256.0  ;;  %v5248_v56 = vsel %vm5184_vm15, %v9479_v24, 256.0  ;;  %v5153_v37 = vmax.f32 %v15060_v45, %v15066_v20 }
 0xa15   : > { %v5101_v62 = vpop.xlane.xlu0 %5100  ;;  %v5320_v5 = vmin.f32 %v5247_v27, %v5248_v56  ;;  %v18905_v56 = vld [vmem:[#allocation41_spill] sm:$0xff] }
 0xa16   : > { %vm5185_vm8 = vcmp.ge.f32.partialorder %v18901_v60, %v5101_v62  ;;  %vm5186_vm5 = vcmp.ge.f32.partialorder %v18902_v36, %v5101_v62  ;;  %v15076_v22 = vpop.xlane.xlu1 %4667  ;;  %5154 = vmax.xlane.f32.xlu0 %v5153_v37  ;;  %v18907_v62 = vld [vmem:[#allocation37_spill] sm:$0xff]  ;;  %v18912_v36 = vld [vmem:[#allocation23_spill] sm:$0xff] }
 0xa17   : > { %v5249_v15 = vsel %vm5185_vm8, %v9477_v10, 256.0  ;;  %v5250_v11 = vsel %vm5186_vm5, %v9479_v24, 256.0  ;;  %vm4733_vm6 = vcmp.eq.f32.partialorder %v9477_v10, %v15076_v22  ;;  %vm4734_vm13 = vcmp.eq.f32.partialorder %v9479_v24, %v15076_v22  ;;  %5321 = vmin.xlane.f32.xlu1 %v5320_v5  ;;  %v18926_v22 = vld [vmem:[#allocation39_spill] sm:$0xff] }
 0xa18   : > { %v15094_v27 = vsel %vm4733_vm6, -3e+38, %v18903_v6  ;;  %v15100_v37 = vsel %vm4734_vm13, -3e+38, %v18905_v56  ;;  %v5323_v5 = vmin.f32 %v5249_v15, %v5250_v11  ;;  %v18909_v6 = vld [vmem:[#allocation44_spill] sm:$0xff] }
 0xa19   : > { %18904 = vst [vmem:[#allocation60_spill] sm:$0xff] %v15094_v27  ;;  %18906 = vst [vmem:[#allocation59_spill] sm:$0xff] %v15100_v37  ;;  %8141 = vmatpush1.bf16.xpose.msk.msra.mxu1 %vm8140_vm2, %v18873_v61  ;;  %v15109_v49 = vpop.xlane.xlu0 %4670  ;;  %v5156_v25 = vmax.f32 %v15094_v27, %v15100_v37 }
 0xa1a   : > { %8143 = vmatprep.subr.msk.bf16.mxu1 %vm8142_vm9, %v18873_v61  ;;  %vm4735_vm0 = vcmp.eq.f32.partialorder %v9477_v10, %v15109_v49  ;;  %vm4736_vm3 = vcmp.eq.f32.partialorder %v9479_v24, %v15109_v49  ;;  %v5104_v15 = vpop.xlane.xlu1 %5103  ;;  %5324 = vmin.xlane.f32.xlu0 %v5323_v5  ;;  %vm8144_vm2 = vmpackc.low %vm4729_vm14, %vm4727_vm7 }
 0xa1b   : > { %v15122_v11 = vsel %vm4735_vm0, -3e+38, %v18907_v62  ;;  %v15128_v56 = vsel %vm4736_vm3, -3e+38, %v18909_v6  ;;  %vm5187_vm4 = vcmp.ge.f32.partialorder %v18911_v42, %v5104_v15  ;;  %vm5188_vm12 = vcmp.ge.f32.partialorder %v18912_v36, %v5104_v15  ;;  %5157 = vmax.xlane.f32.xlu1 %v5156_v25  ;;  %v18917_v15 = vld [vmem:[#allocation31_spill] sm:$0xff]  ;;  %vm8146_vm7 = vmpackc.low %vm4734_vm13, %vm4732_vm11  ;;  %v18921_v36 = vld [vmem:[#allocation73_spill] sm:$0xff] }
 0xa1c   : > { %18908 = vst [vmem:[#allocation61_spill] sm:$0xff] %v15122_v11  ;;  %18910 = vst [vmem:[#allocation62_spill] sm:$0xff] %v15128_v56  ;;  %v5251_v60 = vsel %vm5187_vm4, %v9477_v10, 256.0  ;;  %v5252_v5 = vsel %vm5188_vm12, %v9479_v24, 256.0  ;;  %v5159_v13 = vmax.f32 %v15122_v11, %v15128_v56 }
 0xa1d   : > { %v5107_v62 = vpop.xlane.xlu0 %5106  ;;  %v5326_v3 = vmin.f32 %v5251_v60, %v5252_v5  ;;  %v18915_v60 = vld [vmem:[#allocation48_spill] sm:$0xff] }
 0xa1e   : > { %vm5189_vm10 = vcmp.ge.f32.partialorder %v18913_v30, %v5107_v62  ;;  %vm5190_vm15 = vcmp.ge.f32.partialorder %v18914_v12, %v5107_v62  ;;  %5160 = vmax.xlane.f32.xlu0 %v5159_v13  ;;  %v18919_v62 = vld [vmem:[#allocation27_spill] sm:$0xff]  ;;  %v18922_v12 = vld [vmem:[#allocation74_spill] sm:$0xff] }
 0xa1f   : > { %v15138_v6 = vpop.xlane.xlu1 %4673  ;;  %v5253_v42 = vsel %vm5189_vm10, %v9477_v10, 256.0  ;;  %v5254_v25 = vsel %vm5190_vm15, %v9479_v24, 256.0  ;;  %5327 = vmin.xlane.f32.xlu1 %v5326_v3 }
 0xa20   : > { %vm4737_vm8 = vcmp.eq.f32.partialorder %v9477_v10, %v15138_v6  ;;  %vm4738_vm5 = vcmp.eq.f32.partialorder %v9479_v24, %v15138_v6  ;;  %v5329_v3 = vmin.f32 %v5253_v42, %v5254_v25 }
 0xa21   : > { %v15156_v13 = vsel %vm4737_vm8, -3e+38, %v18915_v60  ;;  %v15162_v5 = vsel %vm4738_vm5, -3e+38, %v18917_v15  ;;  %8145 = vmatpush1.bf16.xpose.msk.msra.mxu1 %vm8144_vm2, %v18873_v61  ;;  %v5113_v55 = vpop.xlane.xlu0 %5112  ;;  %v18920_v60 = vld [vmem:[#allocation26_spill] sm:$0xff]  ;;  %vm8148_vm2 = vmpackc.low %vm4733_vm6, %vm4731_vm1 }
 0xa22   : > { %18916 = vst [vmem:[#allocation63_spill] sm:$0xff] %v15156_v13  ;;  %18918 = vst [vmem:[#allocation64_spill] sm:$0xff] %v15162_v5  ;;  %v5162_v9 = vmax.f32 %v15156_v13, %v15162_v5  ;;  %8147 = vmatprep.subr.msk.bf16.mxu1 %vm8146_vm7, %v18873_v61  ;;  %vm5193_vm14 = vcmp.ge.f32.partialorder %v18919_v62, %v5113_v55  ;;  %vm5194_vm9 = vcmp.ge.f32.partialorder %v18920_v60, %v5113_v55  ;;  %v18923_v55 = vld [vmem:[#allocation75_spill] sm:$0xff] }
 0xa23   : > { %v5110_v42 = vpop.xlane.xlu1 %5109  ;;  %5330 = vmin.xlane.f32.xlu0 %v5329_v3  ;;  %v5257_v25 = vsel %vm5193_vm14, %v9477_v10, 256.0  ;;  %v5258_v15 = vsel %vm5194_vm9, %v9479_v24, 256.0  ;;  %vm8150_vm7 = vmpackc.low %vm4738_vm5, %vm4736_vm3 }
 0xa24   : > { %vm5191_vm4 = vcmp.ge.f32.partialorder %v18921_v36, %v5110_v42  ;;  %vm5192_vm11 = vcmp.ge.f32.partialorder %v18922_v12, %v5110_v42  ;;  %5163 = vmax.xlane.f32.xlu1 %v5162_v9  ;;  %v5335_v23 = vmin.f32 %v5257_v25, %v5258_v15  ;;  %v18925_v9 = vld [vmem:[#allocation38_spill] sm:$0xff]  ;;  %v18928_v25 = vld [vmem:[#allocation76_spill] sm:$0xff]  ;;  %v18929_v15 = vld [vmem:[#allocation77_spill] sm:$0xff] }
 0xa25   : > { %v5255_v30 = vsel %vm5191_vm4, %v9477_v10, 256.0  ;;  %v5256_v34 = vsel %vm5192_vm11, %v9479_v24, 256.0  ;;  %v5119_v52 = vpop.xlane.xlu0 %5118  ;;  %vm8152_vm4 = vmpackc.low %vm4737_vm8, %vm4735_vm0 }
 0xa26   : > { %v5332_v62 = vmin.f32 %v5255_v30, %v5256_v34  ;;  %vm5197_vm13 = vcmp.ge.f32.partialorder %v14650_v14, %v5119_v52  ;;  %vm5198_vm12 = vcmp.ge.f32.partialorder %v18923_v55, %v5119_v52 }
 0xa27   : > { %v5116_v3 = vpop.xlane.xlu1 %5115  ;;  %5336 = vmin.xlane.f32.xlu0 %v5335_v23  ;;  %v5261_v60 = vsel %vm5197_vm13, %v9477_v10, 256.0  ;;  %v5262_v36 = vsel %vm5198_vm12, %v9479_v24, 256.0 }
 0xa28   : > { %vm5195_vm10 = vcmp.ge.f32.partialorder %v18924_v48, %v5116_v3  ;;  %vm5196_vm15 = vcmp.ge.f32.partialorder %v18925_v9, %v5116_v3  ;;  %5333 = vmin.xlane.f32.xlu1 %v5332_v62  ;;  %v5341_v52 = vmin.f32 %v5261_v60, %v5262_v36  ;;  %v18927_v62 = vld [vmem:[#allocation50_spill] sm:$0xff] }
 0xa29   : > { %v5259_v34 = vsel %vm5195_vm10, %v9477_v10, 256.0  ;;  %v5260_v23 = vsel %vm5196_vm15, %v9479_v24, 256.0  ;;  %8149 = vmatpush1.bf16.xpose.msk.msra.mxu1 %vm8148_vm2, %v18873_v61  ;;  %v5125_v30 = vpop.xlane.xlu0 %5124 }
 0xa2a   : > { %v5338_v51 = vmin.f32 %v5259_v34, %v5260_v23  ;;  %8151 = vmatprep.subr.msk.bf16.mxu1 %vm8150_vm7, %v18873_v61  ;;  %vm5201_vm1 = vcmp.ge.f32.partialorder %v18926_v22, %v5125_v30  ;;  %vm5202_vm6 = vcmp.ge.f32.partialorder %v18927_v62, %v5125_v30  ;;  %v18930_v30 = vld [vmem:[#allocation78_spill] sm:$0xff] }
 0xa2b   : > { %v5122_v42 = vpop.xlane.xlu1 %5121  ;;  %5342 = vmin.xlane.f32.xlu0 %v5341_v52  ;;  %v5265_v36 = vsel %vm5201_vm1, %v9477_v10, 256.0  ;;  %v5266_v60 = vsel %vm5202_vm6, %v9479_v24, 256.0  ;;  %v18931_v52 = vld [vmem:[#allocation79_spill] sm:$0xff] }
 0xa2c   : > { %vm5199_vm14 = vcmp.ge.f32.partialorder %v18928_v25, %v5122_v42  ;;  %vm5200_vm9 = vcmp.ge.f32.partialorder %v18929_v15, %v5122_v42  ;;  %5339 = vmin.xlane.f32.xlu1 %v5338_v51  ;;  %v5347_v23 = vmin.f32 %v5265_v36, %v5266_v60  ;;  %v15224_v60 = vld [vmem:[%s9231_s2] ss:$8 sps:$4 sm:$0xff]  }
 0xa2d   : > { %v5263_v3 = vsel %vm5199_vm14, %v9477_v10, 256.0  ;;  %v5264_v34 = vsel %vm5200_vm9, %v9479_v24, 256.0  ;;  %18932 = vst [vmem:[#allocation65_spill] sm:$0xff] %v15224_v60 }
 0xa2e   : > { %v5344_v22 = vmin.f32 %v5263_v3, %v5264_v34 }
 0xa2f   : > { %v5128_v9 = vpop.xlane.xlu1 %5127  ;;  %5348 = vmin.xlane.f32.xlu0 %v5347_v23 }
 0xa30   : > { %vm5203_vm3 = vcmp.ge.f32.partialorder %v18930_v30, %v5128_v9  ;;  %vm5204_vm5 = vcmp.ge.f32.partialorder %v18931_v52, %v5128_v9  ;;  %5345 = vmin.xlane.f32.xlu1 %v5344_v22 }
 0xa31   : > { %v5267_v51 = vsel %vm5203_vm3, %v9477_v10, 256.0  ;;  %v5268_v42 = vsel %vm5204_vm5, %v9479_v24, 256.0  ;;  %8153 = vmatpush1.bf16.xpose.msk.msra.mxu1 %vm8152_vm4, %v18873_v61 }
 0xa32   : > { %v5350_v36 = vmin.f32 %v5267_v51, %v5268_v42  ;;  %v18933_v51 = vld [vmem:[#allocation55_spill] sm:$0xff]  ;;  %v18934_v42 = vld [vmem:[#allocation32_spill] sm:$0xff] }
 0xa34   : > { %5351 = vmin.xlane.f32.xlu1 %v5350_v36  ;;  %v18935_v36 = vmax.f32 %v18933_v51, %v18934_v42  ;;  %v18942_v51 = vld [vmem:[#allocation24_spill] sm:$0xff] }
 0xa38   : > { %4932 = vmatmul.mubr.bf16.vlgmr.msra.gmra.mrb[56].mxu1 %v15224_v60 }
 0xa39   : > { %4976 = vmatprep.mubr.bf16.mxu1 %v18875_v32  ;;  %v18938_v32 = vld [vmem:[#allocation49_spill] sm:$0xff] }
 0xa7f   : > { %v15228_v9 = vpop.xlane.xlu0 %5294 }
 0xa80   : > { %vm5389_vm0 = vcmp.eq.f32.partialorder %v9477_v10, %v15228_v9  ;;  %vm5390_vm10 = vcmp.eq.f32.partialorder %v9479_v24, %v15228_v9 }
 0xa83   : > { %v5131_v49 = vpop.xlane.xlu0 %5130 }
 0xa84   : > { %vm5205_vm8 = vcmp.ge.f32.partialorder %v14824_v28, %v5131_v49  ;;  %vm5206_vm11 = vcmp.ge.f32.partialorder %v14830_v19, %v5131_v49  ;;  %v15234_v6 = vpop.xlane.xlu1 %5297  ;;  %v18937_v28 = vld [vmem:[#allocation56_spill] sm:$0xff] }
 0xa85   : > { %v5269_v22 = vsel %vm5205_vm8, %v9477_v10, 256.0  ;;  %v5270_v3 = vsel %vm5206_vm11, %v9479_v24, 256.0  ;;  %vm5391_vm13 = vcmp.eq.f32.partialorder %v9477_v10, %v15234_v6  ;;  %vm5392_vm12 = vcmp.eq.f32.partialorder %v9479_v24, %v15234_v6 }
 0xa86   : > { %vm8222_vm15 = vmpackc.low %vm5391_vm13, %vm5389_vm0  ;;  %v4264_v34 = vpop.f32.mrb[48].mxu1  ;;  %v5353_v23 = vmin.f32 %v5269_v22, %v5270_v3  ;;  %v18939_v52 = vmax.f32 %v18937_v28, %v18938_v32  ;;  %v18945_v28 = vld [vmem:[#allocation71_spill] sm:$0xff] }
 0xa87   : > { %v15253_v49 = vmax.f32 %v18935_v36, %v4264_v34  ;;  %v4266_v60 = vpop.f32.mrb[49].mxu1  ;;  %vm8220_vm2 = vmpackc.low %vm5392_vm12, %vm5390_vm10  ;;  %v15261_v19 = vpop.xlane.xlu0 %5300  ;;  %v18941_v34 = vld [vmem:[#allocation70_spill] sm:$0xff] }
 0xa88   : > { %v15266_v30 = vmax.f32 %v18939_v52, %v4266_v60  ;;  %v4268_v22 = vpop.f32.mrb[50].mxu1  ;;  %8221 = vmatprep.subr.msk.bf16.mxu0 %vm8220_vm2, %v18873_v61  ;;  %v5134_v3 = vpop.xlane.xlu1 %5133  ;;  %5354 = vmin.xlane.f32.xlu0 %v5353_v23  ;;  %v18943_v42 = vmax.f32 %v18941_v34, %v18942_v51  ;;  %v18946_v52 = vld [vmem:[#allocation21_spill] sm:$0xff]  ;;  %vm5393_vm6 = vcmp.eq.f32.partialorder %v9477_v10, %v15261_v19 }
 0xa89   : > { %18936 = vst [vmem:[#allocation66_spill] sm:$0xff] %v15253_v49  ;;  %vm5207_vm7 = vcmp.ge.f32.partialorder %v14852_v40, %v5134_v3  ;;  %v4270_v49 = vpop.f32.mrb[51].mxu1  ;;  %8223 = vmatpush1.bf16.xpose.msk.msra.mxu0 %vm8222_vm15, %v18873_v61  ;;  %vm5208_vm1 = vcmp.ge.f32.partialorder %v14858_v26, %v5134_v3  ;;  %v18947_v60 = vmax.f32 %v18945_v28, %v18946_v52  ;;  %v18952_v28 = vld [vmem:[#allocation80_spill] sm:$0xff] }
 0xa8a   : > { %18940 = vst [vmem:[#allocation53_spill] sm:$0xff] %v15266_v30  ;;  %v15272_v36 = vmax.f32 %v18943_v42, %v4268_v22  ;;  %v5271_v32 = vsel %vm5207_vm7, %v9477_v10, 256.0  ;;  %v5272_v23 = vsel %vm5208_vm1, %v9479_v24, 256.0  ;;  %vm5394_vm4 = vcmp.eq.f32.partialorder %v9479_v24, %v15261_v19 }
 0xa8b   : > { %v15281_v30 = vmax.f32 %v18947_v60, %v4270_v49  ;;  %v5137_v15 = vpop.xlane.xlu0 %5136  ;;  %v5356_v3 = vmin.f32 %v5271_v32, %v5272_v23  ;;  %v18951_v32 = vld [vmem:[#allocation57_spill] sm:$0xff] }
 0xa8c   : > { %18944 = vst [vmem:[#allocation41_spill] sm:$0xff] %v15272_v36  ;;  %vm5209_vm14 = vcmp.ge.f32.partialorder %v14878_v4, %v5137_v15  ;;  %vm5210_vm9 = vcmp.ge.f32.partialorder %v14884_v1, %v5137_v15  ;;  %v15288_v22 = vpop.xlane.xlu1 %5303  ;;  %v18953_v52 = vmax.f32 %v18951_v32, %v18952_v28 }
 0xa8d   : > { %18948 = vst [vmem:[#allocation37_spill] sm:$0xff] %v15281_v30  ;;  %v5273_v34 = vsel %vm5209_vm14, %v9477_v10, 256.0  ;;  %v5274_v51 = vsel %vm5210_vm9, %v9479_v24, 256.0  ;;  %vm17943_vm3 = vcmp.eq.f32.partialorder %v9477_v10, %v15288_v22  ;;  %vm17942_vm5 = vcmp.eq.f32.partialorder %v9479_v24, %v15288_v22  ;;  %5357 = vmin.xlane.f32.xlu1 %v5356_v3 }
 0xa8e   : > { %vm15304_vm8 = vmpackc.low %vm17943_vm3, %vm5393_vm6  ;;  %v4274_v49 = vpop.f32.mrb[52].mxu1  ;;  %v5359_v42 = vmin.f32 %v5273_v34, %v5274_v51  ;;  %v18955_v3 = vmax.f32 %v18878_v17, %v14751_v29  ;;  %v18959_v17 = vmax.f32 %v18882_v31, %v14763_v53 }
 0xa8f   : > { %v15311_v60 = vmax.f32 %v18953_v52, %v4274_v49  ;;  %v4276_v23 = vpop.f32.mrb[53].mxu1  ;;  %vm8224_vm11 = vmpackc.low %vm17942_vm5, %vm5394_vm4  ;;  %v15319_v30 = vpop.xlane.xlu0 %5306  ;;  %v18957_v49 = vmax.f32 %v18880_v2, %v14758_v16 }
 0xa90   : > { %v15324_v36 = vmax.f32 %v18955_v3, %v4276_v23  ;;  %v4278_v34 = vpop.f32.mrb[54].mxu1  ;;  %8225 = vmatprep.subr.msk.bf16.mxu0 %vm8224_vm11, %v18873_v61  ;;  %v5140_v51 = vpop.xlane.xlu1 %5139  ;;  %5360 = vmin.xlane.f32.xlu0 %v5359_v42  ;;  %vm5397_vm7 = vcmp.eq.f32.partialorder %v9477_v10, %v15319_v30  ;;  %vm5398_vm11 = vcmp.eq.f32.partialorder %v9479_v24, %v15319_v30 }
 0xa91   : > { %18954 = vst [vmem:[#allocation44_spill] sm:$0xff] %v15311_v60  ;;  %v15330_v32 = vmax.f32 %v18957_v49, %v4278_v34  ;;  %vm5211_vm15 = vcmp.ge.f32.partialorder %v14906_v21, %v5140_v51  ;;  %v4280_v28 = vpop.f32.mrb[55].mxu1  ;;  %8227 = vmatpush1.bf16.xpose.msk.msra.mxu0 %vm15304_vm8, %v18873_v61  ;;  %vm5212_vm2 = vcmp.ge.f32.partialorder %v14912_v44, %v5140_v51 }
 0xa92   : > { %18956 = vst [vmem:[#allocation48_spill] sm:$0xff] %v15324_v36  ;;  %v5275_v29 = vsel %vm5211_vm15, %v9477_v10, 256.0  ;;  %v15341_v42 = vmax.f32 %v18959_v17, %v4280_v28  ;;  %v5276_v16 = vsel %vm5212_vm2, %v9479_v24, 256.0  ;;  %v18978_v36 = vld [vmem:[#allocation25_spill] sm:$0xff] }
 0xa93   : > { %18958 = vst [vmem:[#allocation31_spill] sm:$0xff] %v15330_v32  ;;  %v5143_v2 = vpop.xlane.xlu0 %5142  ;;  %v5362_v52 = vmin.f32 %v5275_v29, %v5276_v16  ;;  %v18975_v32 = vld [vmem:[#allocation51_spill] sm:$0xff] }
 0xa94   : > { %18960 = vst [vmem:[#allocation74_spill] sm:$0xff] %v15341_v42  ;;  %vm5213_vm1 = vcmp.ge.f32.partialorder %v14936_v39, %v5143_v2  ;;  %vm5214_vm14 = vcmp.ge.f32.partialorder %v14942_v38, %v5143_v2  ;;  %v15348_v15 = vpop.xlane.xlu1 %5309  ;;  %v15516_v42 = vsel %vm5392_vm12, -3e+38, %v14345_v35  ;;  %v15540_v35 = vsel %vm5397_vm7, -3e+38, %v14404_v8 }
 0xa95   : > { %v5277_v23 = vsel %vm5213_vm1, %v9477_v10, 256.0  ;;  %v5278_v3 = vsel %vm5214_vm14, %v9479_v24, 256.0  ;;  %vm17941_vm9 = vcmp.eq.f32.partialorder %v9477_v10, %v15348_v15  ;;  %vm17940_vm8 = vcmp.eq.f32.partialorder %v9479_v24, %v15348_v15  ;;  %5363 = vmin.xlane.f32.xlu1 %v5362_v52 }
 0xa96   : > { %vm8230_vm15 = vmpackc.low %vm17941_vm9, %vm5397_vm7  ;;  %v5365_v31 = vmin.f32 %v5277_v23, %v5278_v3  ;;  %vm18965_vm7 = vcmp.eq.f32.partialorder %v9477_v10, %v15288_v22 }
 0xa97   : > { %vm8228_vm2 = vmpackc.low %vm17940_vm8, %vm5398_vm11  ;;  %v15370_v53 = vpop.xlane.xlu0 %5312  ;;  %v15562_v8 = vsel %vm18965_vm7, -3e+38, %v14386_v47  ;;  %vm18972_vm7 = vcmp.eq.f32.partialorder %v9477_v10, %v15348_v15 }
 0xa98   : > { %8229 = vmatprep.subr.msk.bf16.mxu0 %vm8228_vm2, %v18873_v61  ;;  %v5146_v34 = vpop.xlane.xlu1 %5145  ;;  %5366 = vmin.xlane.f32.xlu0 %v5365_v31  ;;  %vm17947_vm8 = vcmp.eq.f32.partialorder %v9477_v10, %v15370_v53 }
 0xa99   : > { %vm5215_vm1 = vcmp.ge.f32.partialorder %v14970_v57, %v5146_v34  ;;  %vm5216_vm14 = vcmp.ge.f32.partialorder %v14976_v46, %v5146_v34  ;;  %8231 = vmatpush1.bf16.xpose.msk.msra.mxu0 %vm8230_vm15, %v18873_v61 }
 0xa9a   : > { %v5279_v51 = vsel %vm5215_vm1, %v9477_v10, 256.0  ;;  %v5280_v49 = vsel %vm5216_vm14, %v9479_v24, 256.0  ;;  %vm17946_vm14 = vcmp.eq.f32.partialorder %v9479_v24, %v15370_v53 }
 0xa9b   : > { %v5149_v28 = vpop.xlane.xlu0 %5148  ;;  %v5368_v29 = vmin.f32 %v5279_v51, %v5280_v49 }
 0xa9c   : > { %vm5217_vm9 = vcmp.ge.f32.partialorder %v14998_v54, %v5149_v28  ;;  %vm5218_vm2 = vcmp.ge.f32.partialorder %v15004_v18, %v5149_v28  ;;  %v15382_v17 = vpop.xlane.xlu1 %5315 }
 0xa9d   : > { %v5281_v16 = vsel %vm5217_vm9, %v9477_v10, 256.0  ;;  %v5282_v2 = vsel %vm5218_vm2, %v9479_v24, 256.0  ;;  %vm17945_vm15 = vcmp.eq.f32.partialorder %v9477_v10, %v15382_v17  ;;  %vm17944_vm1 = vcmp.eq.f32.partialorder %v9479_v24, %v15382_v17  ;;  %5369 = vmin.xlane.f32.xlu1 %v5368_v29 }
 0xa9e   : > { %vm8234_vm5 = vmpackc.low %vm17945_vm15, %vm17947_vm8  ;;  %v5371_v52 = vmin.f32 %v5281_v16, %v5282_v2 }
 0xa9f   : > { %vm8232_vm9 = vmpackc.low %vm17944_vm1, %vm17946_vm14  ;;  %v15404_v23 = vpop.xlane.xlu0 %5318 }
 0xaa0   : > { %8233 = vmatprep.subr.msk.bf16.mxu0 %vm8232_vm9, %v18873_v61  ;;  %v5152_v3 = vpop.xlane.xlu1 %5151  ;;  %5372 = vmin.xlane.f32.xlu0 %v5371_v52  ;;  %vm5405_vm1 = vcmp.eq.f32.partialorder %v9477_v10, %v15404_v23 }
 0xaa1   : > { %vm5219_vm2 = vcmp.ge.f32.partialorder %v15032_v43, %v5152_v3  ;;  %vm5220_vm3 = vcmp.ge.f32.partialorder %v15038_v41, %v5152_v3  ;;  %8235 = vmatpush1.bf16.xpose.msk.msra.mxu0 %vm8234_vm5, %v18873_v61 }
 0xaa2   : > { %v5283_v31 = vsel %vm5219_vm2, %v9477_v10, 256.0  ;;  %v5284_v34 = vsel %vm5220_vm3, %v9479_v24, 256.0  ;;  %vm17950_vm2 = vcmp.eq.f32.partialorder %v9479_v24, %v15404_v23 }
 0xaa3   : > { %v5155_v51 = vpop.xlane.xlu0 %5154  ;;  %v5374_v49 = vmin.f32 %v5283_v31, %v5284_v34 }
 0xaa4   : > { %vm5221_vm15 = vcmp.ge.f32.partialorder %v15060_v45, %v5155_v51  ;;  %vm5222_vm9 = vcmp.ge.f32.partialorder %v15066_v20, %v5155_v51  ;;  %v15416_v28 = vpop.xlane.xlu1 %5321 }
 0xaa5   : > { %v5285_v29 = vsel %vm5221_vm15, %v9477_v10, 256.0  ;;  %v5286_v16 = vsel %vm5222_vm9, %v9479_v24, 256.0  ;;  %vm17949_vm5 = vcmp.eq.f32.partialorder %v9477_v10, %v15416_v28  ;;  %vm17948_vm3 = vcmp.eq.f32.partialorder %v9479_v24, %v15416_v28  ;;  %5375 = vmin.xlane.f32.xlu1 %v5374_v49 }
 0xaa6   : > { %vm8238_vm14 = vmpackc.low %vm17949_vm5, %vm5405_vm1  ;;  %v5377_v2 = vmin.f32 %v5285_v29, %v5286_v16 }
 0xaa7   : > { %vm8236_vm15 = vmpackc.low %vm17948_vm3, %vm17950_vm2  ;;  %v15438_v52 = vpop.xlane.xlu0 %5324 }
 0xaa8   : > { %8237 = vmatprep.subr.msk.bf16.mxu0 %vm8236_vm15, %v18873_v61  ;;  %v5158_v3 = vpop.xlane.xlu1 %5157  ;;  %5378 = vmin.xlane.f32.xlu0 %v5377_v2  ;;  %vm5409_vm3 = vcmp.eq.f32.partialorder %v9477_v10, %v15438_v52 }
 0xaa9   : > { %vm5223_vm9 = vcmp.ge.f32.partialorder %v15094_v27, %v5158_v3  ;;  %vm5224_vm8 = vcmp.ge.f32.partialorder %v15100_v37, %v5158_v3  ;;  %8239 = vmatpush1.bf16.xpose.msk.msra.mxu0 %vm8238_vm14, %v18873_v61  ;;  %v18989_v37 = vld [vmem:[#allocation72_spill] sm:$0xff] }
 0xaaa   : > { %v5287_v31 = vsel %vm5223_vm9, %v9477_v10, 256.0  ;;  %v5288_v34 = vsel %vm5224_vm8, %v9479_v24, 256.0  ;;  %vm5410_vm9 = vcmp.eq.f32.partialorder %v9479_v24, %v15438_v52 }
 0xaab   : > { %v5161_v51 = vpop.xlane.xlu0 %5160  ;;  %v5380_v49 = vmin.f32 %v5287_v31, %v5288_v34  ;;  %v15470_v31 = vsel %vm5389_vm0, -3e+38, %v14322_v63  ;;  %v15476_v34 = vsel %vm5390_vm10, -3e+38, %v14327_v0 }
 0xaac   : > { %vm5225_vm5 = vcmp.ge.f32.partialorder %v15122_v11, %v5161_v51  ;;  %vm5226_vm15 = vcmp.ge.f32.partialorder %v15128_v56, %v5161_v51  ;;  %v15450_v29 = vpop.xlane.xlu1 %5327  ;;  %18961 = vst [vmem:[#allocation75_spill] sm:$0xff] %v15470_v31  ;;  %18962 = vst [vmem:[#allocation40_spill] sm:$0xff] %v15476_v34  ;;  %v5783_v9 = vmax.f32 %v15470_v31, %v15476_v34  ;;  %v18987_v11 = vld [vmem:[#allocation69_spill] sm:$0xff] }
 0xaad   : > { %v5289_v16 = vsel %vm5225_vm5, %v9477_v10, 256.0  ;;  %v5290_v2 = vsel %vm5226_vm15, %v9479_v24, 256.0  ;;  %vm5411_vm14 = vcmp.eq.f32.partialorder %v9477_v10, %v15450_v29  ;;  %vm5412_vm8 = vcmp.eq.f32.partialorder %v9479_v24, %v15450_v29  ;;  %5381 = vmin.xlane.f32.xlu1 %v5380_v49 }
 0xaae   : > { %vm8242_vm2 = vmpackc.low %vm5411_vm14, %vm5409_vm3  ;;  %v5383_v3 = vmin.f32 %v5289_v16, %v5290_v2  ;;  %v15498_v16 = vsel %vm5393_vm6, -3e+38, %v14360_v58  ;;  %v15504_v2 = vsel %vm5394_vm4, -3e+38, %v14365_v33  ;;  %v15546_v33 = vsel %vm5398_vm11, -3e+38, %v14409_v59 }
 0xaaf   : > { %vm8240_vm5 = vmpackc.low %vm5412_vm8, %vm5410_vm9  ;;  %18963 = vst [vmem:[#allocation50_spill] sm:$0xff] %v15498_v16  ;;  %vm18966_vm11 = vcmp.eq.f32.partialorder %v9479_v24, %v15288_v22  ;;  %v5795_v47 = vmax.f32 %v15540_v35, %v15546_v33  ;;  %v18967_v22 = vld [vmem:[#allocation28_spill] sm:$0xff] }
 0xab0   : > { %8241 = vmatprep.subr.msk.bf16.mxu0 %vm8240_vm5, %v18873_v61  ;;  %5384 = vmin.xlane.f32.xlu0 %v5383_v3  ;;  %v15485_v49 = vpop.xlane.xlu0 %5330  ;;  %18964 = vst [vmem:[#allocation76_spill] sm:$0xff] %v15504_v2  ;;  %v15568_v59 = vsel %vm18966_vm11, -3e+38, %v14389_v7  ;;  %vm18974_vm11 = vcmp.eq.f32.partialorder %v9479_v24, %v15348_v15  ;;  %v15625_v15 = vsel %vm5405_vm1, -3e+38, %v18975_v32  ;;  %v18980_v32 = vld [vmem:[#allocation67_spill] sm:$0xff]  ;;  %vm18981_vm1 = vcmp.eq.f32.partialorder %v9479_v24, %v15382_v17 }
 0xab1   : > { %v5164_v51 = vpop.xlane.xlu1 %5163  ;;  %8243 = vmatpush1.bf16.xpose.msk.msra.mxu0 %vm8242_vm2, %v18873_v61  ;;  %vm5413_vm10 = vcmp.eq.f32.partialorder %v9477_v10, %v15485_v49 }
 0xab2   : > { %vm5227_vm0 = vcmp.ge.f32.partialorder %v15156_v13, %v5164_v51  ;;  %vm5228_vm15 = vcmp.ge.f32.partialorder %v15162_v5, %v5164_v51  ;;  %v15510_v51 = vsel %vm5391_vm13, -3e+38, %v14342_v50  ;;  %vm5414_vm13 = vcmp.eq.f32.partialorder %v9479_v24, %v15485_v49  ;;  %v18985_v13 = vld [vmem:[#allocation54_spill] sm:$0xff]  ;;  %v18995_v49 = vld [vmem:[#allocation27_spill] sm:$0xff] }
 0xab3   : > { %v5291_v63 = vsel %vm5227_vm0, %v9477_v10, 256.0  ;;  %v5292_v0 = vsel %vm5228_vm15, %v9479_v24, 256.0  ;;  %v5789_v50 = vmax.f32 %v15498_v16, %v15504_v2  ;;  %v5786_v6 = vmax.f32 %v15510_v51, %v15516_v42 }
 0xab4   : > { %v5386_v3 = vmin.f32 %v5291_v63, %v5292_v0  ;;  %5784 = vmax.xlane.f32.xlu0 %v5783_v9  ;;  %v15548_v19 = vpop.xlane.xlu0 %5336  ;;  %vm18968_vm15 = vcmp.eq.f32.partialorder %v9477_v10, %v15370_v53  ;;  %v18969_v63 = vld [vmem:[#allocation29_spill] sm:$0xff]  ;;  %v5792_v9 = vmax.f32 %v15562_v8, %v15568_v59  ;;  %v15647_v5 = vsel %vm18981_vm1, -3e+38, %v18980_v32 }
 0xab5   : > { %v15518_v58 = vpop.xlane.xlu1 %5333  ;;  %vm5418_vm0 = vcmp.eq.f32.partialorder %v9479_v24, %v15548_v19  ;;  %v15584_v7 = vsel %vm18968_vm15, -3e+38, %v18967_v22 }
 0xab6   : > { %vm5415_vm6 = vcmp.eq.f32.partialorder %v9477_v10, %v15518_v58  ;;  %vm5416_vm4 = vcmp.eq.f32.partialorder %v9479_v24, %v15518_v58  ;;  %5387 = vmin.xlane.f32.xlu1 %v5386_v3  ;;  %v18971_v3 = vld [vmem:[#allocation47_spill] sm:$0xff] }
 0xab7   : > { %vm8246_vm12 = vmpackc.low %vm5415_vm6, %vm5413_vm10 }
 0xab8   : > { %vm8244_vm2 = vmpackc.low %vm5416_vm4, %vm5414_vm13  ;;  %5790 = vmax.xlane.f32.xlu0 %v5789_v50  ;;  %v15604_v50 = vsel %vm18972_vm7, -3e+38, %v18971_v3  ;;  %vm5417_vm7 = vcmp.eq.f32.partialorder %v9477_v10, %v15548_v19 }
 0xab9   : > { %8245 = vmatprep.subr.msk.bf16.mxu0 %vm8244_vm2, %v18873_v61  ;;  %v15571_v30 = vpop.xlane.xlu1 %5339  ;;  %vm18970_vm2 = vcmp.eq.f32.partialorder %v9479_v24, %v15370_v53 }
 0xaba   : > { %vm17956_vm5 = vcmp.eq.f32.partialorder %v9479_v24, %v15571_v30  ;;  %8247 = vmatpush1.bf16.xpose.msk.msra.mxu0 %vm8246_vm12, %v18873_v61  ;;  %5787 = vmax.xlane.f32.xlu1 %v5786_v6  ;;  %v15590_v0 = vsel %vm18970_vm2, -3e+38, %v18969_v63  ;;  %v18973_v6 = vld [vmem:[#allocation19_spill] sm:$0xff]  ;;  %v5343_v63 = vpop.xlane.xlu0 %5342  ;;  %vm5419_vm15 = vcmp.eq.f32.partialorder %v9477_v10, %v15571_v30 }
 0xabb   : > { %vm8248_vm12 = vmpackc.low %vm17956_vm5, %vm5418_vm0  ;;  %v15610_v53 = vsel %vm18974_vm11, -3e+38, %v18973_v6  ;;  %v5801_v3 = vmax.f32 %v15584_v7, %v15590_v0  ;;  %v18976_v6 = vld [vmem:[#allocation68_spill] sm:$0xff]  ;;  %vm18979_vm11 = vcmp.eq.f32.partialorder %v9477_v10, %v15382_v17  ;;  %v18982_v17 = vld [vmem:[#allocation18_spill] sm:$0xff]  ;;  %v15783_v58 = vsel %vm5419_vm15, -3e+38, %v18924_v48 }
 0xabc   : > { %8249 = vmatprep.subr.msk.bf16.mxu0 %vm8248_vm12, %v18873_v61  ;;  %5796 = vmax.xlane.f32.xlu0 %v5795_v47  ;;  %vm18977_vm12 = vcmp.eq.f32.partialorder %v9479_v24, %v15404_v23  ;;  %v15641_v60 = vsel %vm18979_vm11, -3e+38, %v18978_v36  ;;  %vm8250_vm5 = vmpackc.low %vm5419_vm15, %vm5417_vm7  ;;  %v15669_v23 = vsel %vm5409_vm3, -3e+38, %v18982_v17  ;;  %vm18988_vm3 = vcmp.eq.f32.partialorder %v9479_v24, %v15416_v28  ;;  %19004 = vst [vmem:[#allocation80_spill] sm:$0xff] %v15783_v58 }
 0xabd   : > { %v15613_v22 = vpop.xlane.xlu1 %5345  ;;  %v15631_v47 = vsel %vm18977_vm12, -3e+38, %v18976_v6  ;;  %vm5422_vm12 = vcmp.eq.f32.partialorder %v9479_v24, %v5343_v63  ;;  %v5804_v32 = vmax.f32 %v15641_v60, %v15647_v5  ;;  %v15689_v17 = vsel %vm18988_vm3, -3e+38, %v18987_v11 }
 0xabe   : > { %5793 = vmax.xlane.f32.xlu1 %v5792_v9  ;;  %vm5424_vm2 = vcmp.eq.f32.partialorder %v9479_v24, %v15613_v22  ;;  %v5798_v9 = vmax.f32 %v15604_v50, %v15610_v53  ;;  %v5807_v36 = vmax.f32 %v15625_v15, %v15631_v47  ;;  %v5349_v52 = vpop.xlane.xlu0 %5348  ;;  %vm19018_vm15 = vcmask 130048  }
 0xabf   : > { %vm8252_vm11 = vmpackc.low %vm5424_vm2, %vm5422_vm12 }
 0xac0   : > { %5802 = vmax.xlane.f32.xlu0 %v5801_v3  ;;  %v18983_v3 = vld [vmem:[#allocation22_spill] sm:$0xff] }
 0xac1   : > { %v15675_v6 = vsel %vm5410_vm9, -3e+38, %v18983_v3  ;;  %vm5423_vm9 = vcmp.eq.f32.partialorder %v9477_v10, %v15613_v22 }
 0xac2   : > { %8251 = vmatpush1.bf16.xpose.msk.msra.mxu0 %vm8250_vm5, %v18873_v61  ;;  %5799 = vmax.xlane.f32.xlu1 %v5798_v9  ;;  %18984 = vst [vmem:[#allocation55_spill] sm:$0xff] %v15675_v6  ;;  %v5352_v9 = vpop.xlane.xlu1 %5351  ;;  %vm18986_vm5 = vcmp.eq.f32.partialorder %v9477_v10, %v15416_v28  ;;  %v5813_v3 = vmax.f32 %v15669_v23, %v15675_v6  ;;  %v18991_v28 = vld [vmem:[#allocation33_spill] sm:$0xff]  ;;  %v18994_v6 = vld [vmem:[#allocation23_spill] sm:$0xff] }
 0xac3   : > { %8253 = vmatprep.subr.msk.bf16.mxu0 %vm8252_vm11, %v18873_v61  ;;  %v15683_v56 = vsel %vm18986_vm5, -3e+38, %v18985_v13  ;;  %vm5428_vm1 = vcmp.eq.f32.partialorder %v9479_v24, %v5352_v9  ;;  %v15700_v13 = vsel %vm5413_vm10, -3e+38, %v18989_v37  ;;  %v15706_v11 = vsel %vm5414_vm13, -3e+38, %v18991_v28 }
 0xac4   : > { %5808 = vmax.xlane.f32.xlu0 %v5807_v36  ;;  %18990 = vst [vmem:[#allocation32_spill] sm:$0xff] %v15700_v13  ;;  %18992 = vst [vmem:[#allocation56_spill] sm:$0xff] %v15706_v11  ;;  %vm5421_vm11 = vcmp.eq.f32.partialorder %v9477_v10, %v5343_v63  ;;  %v5810_v36 = vmax.f32 %v15683_v56, %v15689_v17  ;;  %v15721_v37 = vsel %vm5412_vm8, -3e+38, %v18994_v6  ;;  %v15741_v6 = vsel %vm5417_vm7, -3e+38, %v18995_v49 }
 0xac5   : > { %vm5426_vm10 = vcmp.eq.f32.partialorder %v9479_v24, %v5349_v52  ;;  %vm8254_vm13 = vmpackc.low %vm5423_vm9, %vm5421_vm11  ;;  %v5819_v29 = vmax.f32 %v15700_v13, %v15706_v11  ;;  %18996 = vst [vmem:[#allocation49_spill] sm:$0xff] %v15741_v6  ;;  %v15761_v49 = vsel %vm5416_vm4, -3e+38, %v18922_v12  ;;  %vm5427_vm8 = vcmp.eq.f32.partialorder %v9477_v10, %v5352_v9  ;;  %v19008_v63 = vld [vmem:[#allocation39_spill] sm:$0xff] }
 0xac6   : > { %5805 = vmax.xlane.f32.xlu1 %v5804_v32  ;;  %v18993_v32 = vld [vmem:[#allocation30_spill] sm:$0xff]  ;;  %19001 = vst [vmem:[#allocation71_spill] sm:$0xff] %v15761_v49  ;;  %vm19006_vm4 = vcmp.eq.f32.partialorder %v9479_v24, %v15571_v30  ;;  %v15802_v48 = vsel %vm5426_vm10, -3e+38, %v18927_v62  ;;  %v19019_v9 = vmov 0  }
 0xac7   : > { %v15715_v27 = vsel %vm5411_vm14, -3e+38, %v18993_v32  ;;  %vm8256_vm14 = vmpackc.low %vm5428_vm1, %vm5426_vm10  ;;  %v18999_v32 = vld [vmem:[#allocation73_spill] sm:$0xff]  ;;  %19010 = vst [vmem:[#allocation47_spill] sm:$0xff] %v15802_v48 }
 0xac8   : > { %5814 = vmax.xlane.f32.xlu0 %v5813_v3  ;;  %v18997_v3 = vld [vmem:[#allocation26_spill] sm:$0xff]  ;;  %v15755_v11 = vsel %vm5415_vm6, -3e+38, %v18999_v32  ;;  %v15774_v32 = vsel %vm5422_vm12, -3e+38, %v18923_v55  ;;  %vm5425_vm6 = vcmp.eq.f32.partialorder %v9477_v10, %v5349_v52 }
 0xac9   : > { %v15747_v28 = vsel %vm5418_vm0, -3e+38, %v18997_v3  ;;  %19000 = vst [vmem:[#allocation24_spill] sm:$0xff] %v15755_v11  ;;  %v15769_v3 = vsel %vm5421_vm11, -3e+38, %v14650_v14  ;;  %19003 = vst [vmem:[#allocation57_spill] sm:$0xff] %v15774_v32  ;;  %v5822_v12 = vmax.f32 %v15755_v11, %v15761_v49 }
 0xaca   : > { %8255 = vmatpush1.bf16.xpose.msk.msra.mxu0 %vm8254_vm13, %v18873_v61  ;;  %5811 = vmax.xlane.f32.xlu1 %v5810_v36  ;;  %18998 = vst [vmem:[#allocation70_spill] sm:$0xff] %v15747_v28  ;;  %v5816_v36 = vmax.f32 %v15715_v27, %v15721_v37  ;;  %v5825_v19 = vmax.f32 %v15741_v6, %v15747_v28  ;;  %19002 = vst [vmem:[#allocation21_spill] sm:$0xff] %v15769_v3 }
 0xacb   : > { %8257 = vmatprep.subr.msk.bf16.mxu0 %vm8256_vm14, %v18873_v61  ;;  %vm8258_vm0 = vmpackc.low %vm5427_vm8, %vm5425_vm6  ;;  %v5831_v55 = vmax.f32 %v15769_v3, %v15774_v32  ;;  %v19022_v32 = vld [vmem:[#allocation46_spill] sm:$0xff] }
 0xacc   : > { %5820 = vmax.xlane.f32.xlu0 %v5819_v29  ;;  %v19005_v29 = vld [vmem:[#allocation38_spill] sm:$0xff] }
 0xacd   : > { %v15789_v14 = vsel %vm19006_vm4, -3e+38, %v19005_v29 }
 0xace   : > { %5817 = vmax.xlane.f32.xlu1 %v5816_v36  ;;  %19007 = vst [vmem:[#allocation28_spill] sm:$0xff] %v15789_v14  ;;  %v15797_v36 = vsel %vm5425_vm6, -3e+38, %v19008_v63  ;;  %v5828_v30 = vmax.f32 %v15783_v58, %v15789_v14  ;;  %v19014_v63 = vld [vmem:[#allocation78_spill] sm:$0xff] }
 0xacf   : > { %19009 = vst [vmem:[#allocation29_spill] sm:$0xff] %v15797_v36  ;;  %v5837_v62 = vmax.f32 %v15797_v36, %v15802_v48  ;;  %v15825_v14 = vsel %vm5427_vm8, -3e+38, %v19014_v63  ;;  %v8684_v63 = vld [vmem:[#allocation8] sm:$0xff]  }
 0xad0   : > { %5826 = vmax.xlane.f32.xlu0 %v5825_v19  ;;  %v15810_v19 = vsel %vm5423_vm9, -3e+38, %v18928_v25  ;;  %19015 = vst [vmem:[#allocation68_spill] sm:$0xff] %v15825_v14  ;;  %v19016_v25 = vld [vmem:[#allocation79_spill] sm:$0xff]  ;;  %vm19020_vm9 = vmmov %vm19018_vm15 }
 0xad1   : > { %19011 = vst [vmem:[#allocation19_spill] sm:$0xff] %v15810_v19  ;;  %v15830_v58 = vsel %vm5428_vm1, -3e+38, %v19016_v25 }
 0xad2   : > { %8259 = vmatpush1.bf16.xpose.msk.msra.mxu0 %vm8258_vm0, %v18873_v61  ;;  %5823 = vmax.xlane.f32.xlu1 %v5822_v12  ;;  %v19012_v12 = vld [vmem:[#allocation77_spill] sm:$0xff]  ;;  %19017 = vst [vmem:[#allocation25_spill] sm:$0xff] %v15830_v58  ;;  %v5840_v22 = vmax.f32 %v15825_v14, %v15830_v58 }
 0xad3   : > { %v15816_v29 = vsel %vm5424_vm2, -3e+38, %v19012_v12 }
 0xad4   : > { %19013 = vst [vmem:[#allocation51_spill] sm:$0xff] %v15816_v29  ;;  %5832 = vmax.xlane.f32.xlu0 %v5831_v55  ;;  %v5834_v52 = vmax.f32 %v15810_v19, %v15816_v29 }
 0xad6   : > { %5829 = vmax.xlane.f32.xlu1 %v5828_v30 }
 0xad8   : > { %5838 = vmax.xlane.f32.xlu0 %v5837_v62 }
 0xada   : > { %5835 = vmax.xlane.f32.xlu1 %v5834_v52 }
 0xade   : > { %5841 = vmax.xlane.f32.xlu1 %v5840_v22 }
 0xb0b   : > { %v4933_v55 = vpop.f32.mrb[56].mxu1 }
 0xb0c   : > { %v4935_v30 = vpop.f32.mrb[57].mxu1 }
 0xb0d   : > { %v4937_v12 = vpop.f32.mrb[58].mxu1 }
 0xb0e   : > { %v4942_v29 = vpack.c.bf16 %v4937_v12, %v4933_v55  ;;  %v4939_v19 = vpop.f32.mrb[59].mxu1 }
 0xb0f   : > { %v4943_v48 = vpack.c.bf16 %v4939_v19, %v4935_v30 }
 0xb11   : > { %4944 = vmatprep.subr.bf16.mxu1 %v4943_v48  ;;  %v8685_v48 = vld [vmem:[#allocation8 + $0x8] sm:$0xff]  }
 0xb12   : > { %4945 = vmatpush1.bf16.msra.mxu1 %v4942_v29 }
 0xb15   : > { %8154 = vmatmul.mubr.msk.bf16.vlgmr.msra.gmra.mrb[60].mxu1 %vm19018_vm15, %v8684_v63  ;;  %v15836_v25 = vpop.xlane.xlu0 %5354 }
 0xb16   : > { %4986 = vmatprep.mubr.bf16.mxu1 %v19019_v9  ;;  %vm5429_vm2 = vcmp.eq.f32.partialorder %v9477_v10, %v15836_v25  ;;  %vm5430_vm5 = vcmp.eq.f32.partialorder %v9479_v24, %v15836_v25 }
 0xb17   : > { %v16000_v3 = vsel %vm5430_vm5, -3e+38, %v19022_v32 }
 0xb1a   : > { %v15838_v62 = vpop.xlane.xlu1 %5357 }
 0xb1b   : > { %vm5431_vm7 = vcmp.eq.f32.partialorder %v9477_v10, %v15838_v62  ;;  %vm5432_vm12 = vcmp.eq.f32.partialorder %v9479_v24, %v15838_v62 }
 0xb1c   : > { %vm8262_vm3 = vmpackc.low %vm5431_vm7, %vm5429_vm2 }
 0xb1d   : > { %8155 = vmatmul.mubr.msk.bf16.gmra.mrb[64].mxu1 %vm19020_vm9, %v8685_v48  ;;  %vm8260_vm1 = vmpackc.low %vm5432_vm12, %vm5430_vm5  ;;  %v15864_v19 = vpop.xlane.xlu0 %5360 }
 0xb1e   : > { %5690 = vmatprep.mubr.bf16.mxu1 %v19019_v9  ;;  %8261 = vmatprep.subr.msk.bf16.mxu0 %vm8260_vm1, %v18873_v61  ;;  %vm5433_vm11 = vcmp.eq.f32.partialorder %v9477_v10, %v15864_v19  ;;  %vm5434_vm14 = vcmp.eq.f32.partialorder %v9479_v24, %v15864_v19  ;;  %v16056_v19 = vld [vmem:[%s9231_s2 + $0x4] ss:$8 sps:$4 sm:$0xff]  }
 0xb1f   : > { %8263 = vmatpush1.bf16.xpose.msk.msra.mxu0 %vm8262_vm3, %v18873_v61  ;;  %19026 = vst [vmem:[#allocation22_spill] sm:$0xff] %v16056_v19 }
 0xb22   : > { %v15866_v29 = vpop.xlane.xlu1 %5363 }
 0xb23   : > { %vm5435_vm10 = vcmp.eq.f32.partialorder %v9477_v10, %v15866_v29  ;;  %vm5436_vm13 = vcmp.eq.f32.partialorder %v9479_v24, %v15866_v29 }
 0xb24   : > { %vm8266_vm8 = vmpackc.low %vm5435_vm10, %vm5433_vm11 }
 0xb25   : > { %vm8264_vm6 = vmpackc.low %vm5436_vm13, %vm5434_vm14  ;;  %v15889_v52 = vpop.xlane.xlu0 %5366 }
 0xb26   : > { %8265 = vmatprep.subr.msk.bf16.mxu0 %vm8264_vm6, %v18873_v61  ;;  %vm17984_vm4 = vcmp.eq.f32.partialorder %v9477_v10, %v15889_v52  ;;  %vm17978_vm3 = vcmp.eq.f32.partialorder %v9479_v24, %v15889_v52 }
 0xb27   : > { %8267 = vmatpush1.bf16.xpose.msk.msra.mxu0 %vm8266_vm8, %v18873_v61 }
 0xb2a   : > { %v15892_v22 = vpop.xlane.xlu1 %5369 }
 0xb2b   : > { %vm17976_vm0 = vcmp.eq.f32.partialorder %v9477_v10, %v15892_v22  ;;  %vm17977_vm15 = vcmp.eq.f32.partialorder %v9479_v24, %v15892_v22 }
 0xb2c   : > { %vm8270_vm9 = vmpackc.low %vm17976_vm0, %vm17984_vm4 }
 0xb2d   : > { %vm8268_vm1 = vmpackc.low %vm17977_vm15, %vm17978_vm3  ;;  %v15915_v55 = vpop.xlane.xlu0 %5372 }
 0xb2e   : > { %8269 = vmatprep.subr.msk.bf16.mxu0 %vm8268_vm1, %v18873_v61  ;;  %vm17980_vm8 = vcmp.eq.f32.partialorder %v9477_v10, %v15915_v55  ;;  %vm17983_vm15 = vcmp.eq.f32.partialorder %v9479_v24, %v15915_v55 }
 0xb2f   : > { %8271 = vmatpush1.bf16.xpose.msk.msra.mxu0 %vm8270_vm9, %v18873_v61 }
 0xb32   : > { %v15918_v30 = vpop.xlane.xlu1 %5375 }
 0xb33   : > { %vm17979_vm6 = vcmp.eq.f32.partialorder %v9477_v10, %v15918_v30  ;;  %vm17981_vm0 = vcmp.eq.f32.partialorder %v9479_v24, %v15918_v30 }
 0xb34   : > { %vm8274_vm9 = vmpackc.low %vm17979_vm6, %vm17980_vm8 }
 0xb35   : > { %vm8272_vm1 = vmpackc.low %vm17981_vm0, %vm17983_vm15  ;;  %v15941_v12 = vpop.xlane.xlu0 %5378 }
 0xb36   : > { %8273 = vmatprep.subr.msk.bf16.mxu0 %vm8272_vm1, %v18873_v61  ;;  %vm5445_vm3 = vcmp.eq.f32.partialorder %v9477_v10, %v15941_v12  ;;  %vm17993_vm0 = vcmp.eq.f32.partialorder %v9479_v24, %v15941_v12 }
 0xb37   : > { %8275 = vmatpush1.bf16.xpose.msk.msra.mxu0 %vm8274_vm9, %v18873_v61 }
 0xb3a   : > { %v15944_v63 = vpop.xlane.xlu1 %5381 }
 0xb3b   : > { %vm17985_vm6 = vcmp.eq.f32.partialorder %v9477_v10, %v15944_v63  ;;  %vm17992_vm8 = vcmp.eq.f32.partialorder %v9479_v24, %v15944_v63 }
 0xb3c   : > { %vm8278_vm9 = vmpackc.low %vm17985_vm6, %vm5445_vm3 }
 0xb3d   : > { %vm8276_vm1 = vmpackc.low %vm17992_vm8, %vm17993_vm0  ;;  %v15966_v48 = vpop.xlane.xlu0 %5384 }
 0xb3e   : > { %8277 = vmatprep.subr.msk.bf16.mxu0 %vm8276_vm1, %v18873_v61  ;;  %vm5449_vm15 = vcmp.eq.f32.partialorder %v9477_v10, %v15966_v48  ;;  %vm5450_vm1 = vcmp.eq.f32.partialorder %v9479_v24, %v15966_v48 }
 0xb3f   : > { %8279 = vmatpush1.bf16.xpose.msk.msra.mxu0 %vm8278_vm9, %v18873_v61 }
 0xb41   : > { %v5785_v9 = vpop.xlane.xlu0 %5784 }
 0xb42   : > { %vm5879_vm4 = vcmp.ge.f32.partialorder %v15470_v31, %v5785_v9  ;;  %vm5880_vm6 = vcmp.ge.f32.partialorder %v15476_v34, %v5785_v9  ;;  %v19021_v34 = vld [vmem:[#allocation45_spill] sm:$0xff] }
 0xb43   : > { %v15974_v58 = vpop.xlane.xlu1 %5387  ;;  %v5943_v14 = vsel %vm5879_vm4, %v9477_v10, 256.0  ;;  %v5944_v36 = vsel %vm5880_vm6, %v9479_v24, 256.0  ;;  %v15994_v31 = vsel %vm5429_vm2, -3e+38, %v19021_v34 }
 0xb44   : > { %vm18000_vm8 = vcmp.eq.f32.partialorder %v9477_v10, %v15974_v58  ;;  %vm5452_vm9 = vcmp.eq.f32.partialorder %v9479_v24, %v15974_v58  ;;  %v6007_v9 = vmin.f32 %v5943_v14, %v5944_v36  ;;  %v5843_v25 = vmax.f32 %v15994_v31, %v16000_v3 }
 0xb45   : > { %vm8282_vm0 = vmpackc.low %vm18000_vm8, %vm5449_vm15  ;;  %v5791_v14 = vpop.xlane.xlu0 %5790 }
 0xb46   : > { %vm8280_vm4 = vmpackc.low %vm5452_vm9, %vm5450_vm1  ;;  %vm5883_vm6 = vcmp.ge.f32.partialorder %v15498_v16, %v5791_v14  ;;  %vm5884_vm2 = vcmp.ge.f32.partialorder %v15504_v2, %v5791_v14  ;;  %6008 = vmin.xlane.f32.xlu0 %v6007_v9  ;;  %v16024_v9 = vsel %vm5431_vm7, -3e+38, %v14852_v40  ;;  %v16038_v40 = vsel %vm5433_vm11, -3e+38, %v14878_v4  ;;  %v19025_v4 = vld [vmem:[#allocation65_spill] sm:$0xff] }
 0xb47   : > { %8281 = vmatprep.subr.msk.bf16.mxu0 %vm8280_vm4, %v18873_v61  ;;  %v5788_v34 = vpop.xlane.xlu1 %5787  ;;  %v5947_v49 = vsel %vm5883_vm6, %v9477_v10, 256.0  ;;  %v5948_v16 = vsel %vm5884_vm2, %v9479_v24, 256.0  ;;  %19023 = vst [vmem:[#allocation67_spill] sm:$0xff] %v16024_v9  ;;  %vm19029_vm4 = vcmp.eq.f32.partialorder %v9477_v10, %v15889_v52  ;;  %vm19033_vm2 = vcmp.eq.f32.partialorder %v9477_v10, %v15892_v22 }
 0xb48   : > { %vm5881_vm8 = vcmp.ge.f32.partialorder %v15510_v51, %v5788_v34  ;;  %vm5882_vm5 = vcmp.ge.f32.partialorder %v15516_v42, %v5788_v34  ;;  %8283 = vmatpush1.bf16.xpose.msk.msra.mxu0 %vm8282_vm0, %v18873_v61  ;;  %v16030_v34 = vsel %vm5432_vm12, -3e+38, %v14858_v26  ;;  %v16044_v26 = vsel %vm5434_vm14, -3e+38, %v14884_v1 }
 0xb49   : > { %v5945_v32 = vsel %vm5881_vm8, %v9477_v10, 256.0  ;;  %v5946_v36 = vsel %vm5882_vm5, %v9479_v24, 256.0  ;;  %v5797_v2 = vpop.xlane.xlu0 %5796  ;;  %19024 = vst [vmem:[#allocation18_spill] sm:$0xff] %v16044_v26  ;;  %v5846_v62 = vmax.f32 %v16024_v9, %v16030_v34  ;;  %v5849_v1 = vmax.f32 %v16038_v40, %v16044_v26 }
 0xb4a   : > { %v6010_v14 = vmin.f32 %v5945_v32, %v5946_v36  ;;  %5844 = vmax.xlane.f32.xlu0 %v5843_v25  ;;  %v6013_v32 = vmin.f32 %v5947_v49, %v5948_v16  ;;  %vm5887_vm7 = vcmp.ge.f32.partialorder %v15540_v35, %v5797_v2  ;;  %vm5888_vm12 = vcmp.ge.f32.partialorder %v15546_v33, %v5797_v2 }
 0xb4b   : > { %v5794_v61 = vpop.xlane.xlu1 %5793  ;;  %v5951_v36 = vsel %vm5887_vm7, %v9477_v10, 256.0  ;;  %v5952_v2 = vsel %vm5888_vm12, %v9479_v24, 256.0  ;;  %vm19034_vm5 = vcmp.eq.f32.partialorder %v9479_v24, %v15892_v22  ;;  %vm19035_vm7 = vcmp.eq.f32.partialorder %v9477_v10, %v15915_v55 }
 0xb4c   : > { %vm5885_vm0 = vcmp.ge.f32.partialorder %v15562_v8, %v5794_v61  ;;  %vm5886_vm8 = vcmp.ge.f32.partialorder %v15568_v59, %v5794_v61  ;;  %6011 = vmin.xlane.f32.xlu1 %v6010_v14  ;;  %v16065_v14 = vsel %vm5435_vm10, -3e+38, %v14906_v21  ;;  %v16079_v21 = vsel %vm19029_vm4, -3e+38, %v14936_v39 }
 0xb4d   : > { %v5949_v61 = vsel %vm5885_vm0, %v9477_v10, 256.0  ;;  %v5950_v16 = vsel %vm5886_vm8, %v9479_v24, 256.0  ;;  %19027 = vst [vmem:[#allocation54_spill] sm:$0xff] %v16065_v14  ;;  %19030 = vst [vmem:[#allocation72_spill] sm:$0xff] %v16079_v21  ;;  %vm19031_vm10 = vcmp.eq.f32.partialorder %v9479_v24, %v15889_v52  ;;  %vm19036_vm12 = vcmp.eq.f32.partialorder %v9479_v24, %v15915_v55 }
 0xb4e   : > { %6014 = vmin.xlane.f32.xlu0 %v6013_v32  ;;  %v6016_v25 = vmin.f32 %v5949_v61, %v5950_v16  ;;  %v16071_v32 = vsel %vm5436_vm13, -3e+38, %v14912_v44  ;;  %v6019_v61 = vmin.f32 %v5951_v36, %v5952_v2  ;;  %v16085_v44 = vsel %vm19031_vm10, -3e+38, %v14942_v38 }
 0xb4f   : > { %5646 = vmatmul.mubr.bf16.vlgmr.msra.gmra.mrb[76].mxu0 %v19025_v4  ;;  %v5800_v49 = vpop.xlane.xlu1 %5799  ;;  %19028 = vst [vmem:[#allocation69_spill] sm:$0xff] %v16071_v32  ;;  %19032 = vst [vmem:[#allocation33_spill] sm:$0xff] %v16085_v44  ;;  %v5852_v29 = vmax.f32 %v16065_v14, %v16071_v32  ;;  %v16101_v2 = vsel %vm19033_vm2, -3e+38, %v14970_v57  ;;  %v16121_v57 = vsel %vm19036_vm12, -3e+38, %v15004_v18  ;;  %vm19038_vm4 = vcmp.eq.f32.partialorder %v9477_v10, %v15918_v30 }
 0xb50   : > { %5847 = vmax.xlane.f32.xlu1 %v5846_v62  ;;  %7073 = vmatprep.mubr.bf16.mxu0 %v16056_v19  ;;  %v5803_v62 = vpop.xlane.xlu0 %5802  ;;  %vm5889_vm11 = vcmp.ge.f32.partialorder %v15604_v50, %v5800_v49  ;;  %vm5890_vm14 = vcmp.ge.f32.partialorder %v15610_v53, %v5800_v49  ;;  %v5855_v49 = vmax.f32 %v16079_v21, %v16085_v44  ;;  %v19053_v19 = vld [vmem:[#allocation63_spill] sm:$0xff] }
 0xb51   : > { %vm5891_vm13 = vcmp.ge.f32.partialorder %v15584_v7, %v5803_v62  ;;  %vm5892_vm6 = vcmp.ge.f32.partialorder %v15590_v0, %v5803_v62  ;;  %v5953_v16 = vsel %vm5889_vm11, %v9477_v10, 256.0  ;;  %v5954_v4 = vsel %vm5890_vm14, %v9479_v24, 256.0  ;;  %19037 = vst [vmem:[#allocation30_spill] sm:$0xff] %v16121_v57 }
 0xb52   : > { %5850 = vmax.xlane.f32.xlu0 %v5849_v1  ;;  %v5955_v38 = vsel %vm5891_vm13, %v9477_v10, 256.0  ;;  %v5956_v52 = vsel %vm5892_vm6, %v9479_v24, 256.0  ;;  %v6022_v36 = vmin.f32 %v5953_v16, %v5954_v4  ;;  %vm19039_vm10 = vcmp.eq.f32.partialorder %v9479_v24, %v15918_v30 }
 0xb53   : > { %v5806_v39 = vpop.xlane.xlu1 %5805  ;;  %v6025_v62 = vmin.f32 %v5955_v38, %v5956_v52  ;;  %v16143_v38 = vsel %vm19039_vm10, -3e+38, %v15038_v41  ;;  %vm19040_vm2 = vcmp.eq.f32.partialorder %v9479_v24, %v15941_v12 }
 0xb54   : > { %6017 = vmin.xlane.f32.xlu1 %v6016_v25  ;;  %v5809_v1 = vpop.xlane.xlu0 %5808  ;;  %v16107_v25 = vsel %vm19034_vm5, -3e+38, %v14976_v46  ;;  %vm5893_vm0 = vcmp.ge.f32.partialorder %v15641_v60, %v5806_v39  ;;  %vm5894_vm8 = vcmp.ge.f32.partialorder %v15647_v5, %v5806_v39  ;;  %v16157_v41 = vsel %vm19040_vm2, -3e+38, %v15066_v20 }
 0xb55   : > { %v5858_v46 = vmax.f32 %v16101_v2, %v16107_v25  ;;  %vm5895_vm11 = vcmp.ge.f32.partialorder %v15625_v15, %v5809_v1  ;;  %vm5896_vm14 = vcmp.ge.f32.partialorder %v15631_v47, %v5809_v1  ;;  %v5957_v22 = vsel %vm5893_vm0, %v9477_v10, 256.0 }
 0xb56   : > { %6020 = vmin.xlane.f32.xlu0 %v6019_v61  ;;  %v16115_v61 = vsel %vm19035_vm7, -3e+38, %v14998_v54  ;;  %v5959_v18 = vsel %vm5895_vm11, %v9477_v10, 256.0  ;;  %v5960_v4 = vsel %vm5896_vm14, %v9479_v24, 256.0 }
 0xb57   : > { %v5812_v16 = vpop.xlane.xlu1 %5811  ;;  %v5861_v55 = vmax.f32 %v16115_v61, %v16121_v57  ;;  %v6031_v1 = vmin.f32 %v5959_v18, %v5960_v4 }
 0xb58   : > { %5853 = vmax.xlane.f32.xlu1 %v5852_v29  ;;  %v5958_v29 = vsel %vm5894_vm8, %v9479_v24, 256.0  ;;  %v5815_v54 = vpop.xlane.xlu0 %5814  ;;  %vm5897_vm13 = vcmp.ge.f32.partialorder %v15683_v56, %v5812_v16  ;;  %vm5898_vm6 = vcmp.ge.f32.partialorder %v15689_v17, %v5812_v16  ;;  %v19042_v16 = vld [vmem:[#allocation60_spill] sm:$0xff]  ;;  %vm19046_vm8 = vcmp.eq.f32.partialorder %v9479_v24, %v15944_v63 }
 0xb59   : > { %v6028_v39 = vmin.f32 %v5957_v22, %v5958_v29  ;;  %vm5899_vm5 = vcmp.ge.f32.partialorder %v15669_v23, %v5815_v54  ;;  %v5962_v22 = vsel %vm5898_vm6, %v9479_v24, 256.0 }
 0xb5a   : > { %5856 = vmax.xlane.f32.xlu0 %v5855_v49  ;;  %v16137_v49 = vsel %vm19038_vm4, -3e+38, %v15032_v43  ;;  %v16151_v43 = vsel %vm5445_vm3, -3e+38, %v15060_v45  ;;  %v5963_v20 = vsel %vm5899_vm5, %v9477_v10, 256.0  ;;  %vm19043_vm3 = vcmp.eq.f32.partialorder %v9477_v10, %v15944_v63 }
 0xb5b   : > { %v5818_v52 = vpop.xlane.xlu1 %5817  ;;  %v5867_v45 = vmax.f32 %v16151_v43, %v16157_v41 }
 0xb5c   : > { %6023 = vmin.xlane.f32.xlu1 %v6022_v36  ;;  %v5821_v30 = vpop.xlane.xlu0 %5820  ;;  %v5864_v36 = vmax.f32 %v16137_v49, %v16143_v38  ;;  %vm5901_vm7 = vcmp.ge.f32.partialorder %v15715_v27, %v5818_v52  ;;  %vm5902_vm12 = vcmp.ge.f32.partialorder %v15721_v37, %v5818_v52  ;;  %v19052_v52 = vld [vmem:[#allocation56_spill] sm:$0xff] }
 0xb5d   : > { %vm5903_vm11 = vcmp.ge.f32.partialorder %v15700_v13, %v5821_v30  ;;  %vm5904_vm14 = vcmp.ge.f32.partialorder %v19052_v52, %v5821_v30  ;;  %v19056_v52 = vld [vmem:[#allocation64_spill] sm:$0xff]  ;;  %v19059_v13 = vld [vmem:[#allocation21_spill] sm:$0xff] }
 0xb5e   : > { %6026 = vmin.xlane.f32.xlu0 %v6025_v62  ;;  %v19041_v62 = vld [vmem:[#allocation55_spill] sm:$0xff]  ;;  %v5967_v48 = vsel %vm5903_vm11, %v9477_v10, 256.0 }
 0xb5f   : > { %vm5900_vm0 = vcmp.ge.f32.partialorder %v19041_v62, %v5815_v54  ;;  %v19045_v54 = vld [vmem:[#allocation59_spill] sm:$0xff]  ;;  %v5824_v4 = vpop.xlane.xlu1 %5823 }
 0xb60   : > { %5859 = vmax.xlane.f32.xlu1 %v5858_v46  ;;  %v5961_v46 = vsel %vm5897_vm13, %v9477_v10, 256.0  ;;  %v5964_v12 = vsel %vm5900_vm0, %v9479_v24, 256.0  ;;  %v16179_v18 = vsel %vm19046_vm8, -3e+38, %v19045_v54  ;;  %v5968_v54 = vsel %vm5904_vm14, %v9479_v24, 256.0 }
 0xb61   : > { %v6034_v29 = vmin.f32 %v5961_v46, %v5962_v22  ;;  %19047 = vst [vmem:[#allocation27_spill] sm:$0xff] %v16179_v18  ;;  %v19050_v22 = vld [vmem:[#allocation62_spill] sm:$0xff]  ;;  %vm5905_vm10 = vcmp.ge.f32.partialorder %v15755_v11, %v5824_v4 }
 0xb62   : > { %5862 = vmax.xlane.f32.xlu0 %v5861_v55  ;;  %v16173_v55 = vsel %vm19043_vm3, -3e+38, %v19042_v16  ;;  %v16193_v63 = vsel %vm5450_vm1, -3e+38, %v19050_v22 }
 0xb63   : > { %19044 = vst [vmem:[#allocation23_spill] sm:$0xff] %v16173_v55  ;;  %19051 = vst [vmem:[#allocation73_spill] sm:$0xff] %v16193_v63 }
 0xb64   : > { %6029 = vmin.xlane.f32.xlu1 %v6028_v39  ;;  %v5827_v39 = vpop.xlane.xlu0 %5826 }
 0xb65   : > { %vm5907_vm1 = vcmp.ge.f32.partialorder %v15741_v6, %v5827_v39  ;;  %vm5908_vm4 = vcmp.ge.f32.partialorder %v15747_v28, %v5827_v39  ;;  %v19060_v39 = vld [vmem:[#allocation57_spill] sm:$0xff] }
 0xb66   : > { %6032 = vmin.xlane.f32.xlu0 %v6031_v1  ;;  %v6037_v1 = vmin.f32 %v5963_v20, %v5964_v12  ;;  %v5965_v20 = vsel %vm5901_vm7, %v9477_v10, 256.0  ;;  %v5966_v12 = vsel %vm5902_vm12, %v9479_v24, 256.0 }
 0xb67   : > { %v6040_v22 = vmin.f32 %v5965_v20, %v5966_v12  ;;  %v6043_v20 = vmin.f32 %v5967_v48, %v5968_v54  ;;  %v5972_v12 = vsel %vm5908_vm4, %v9479_v24, 256.0  ;;  %v19062_v48 = vld [vmem:[#allocation28_spill] sm:$0xff] }
 0xb68   : > { %5865 = vmax.xlane.f32.xlu1 %v5864_v36  ;;  %v19048_v36 = vld [vmem:[#allocation61_spill] sm:$0xff] }
 0xb69   : > { %v16187_v46 = vsel %vm5449_vm15, -3e+38, %v19048_v36  ;;  %v5833_v36 = vpop.xlane.xlu0 %5832  ;;  %vm19054_vm15 = vcmp.eq.f32.partialorder %v9477_v10, %v15974_v58 }
 0xb6a   : > { %5868 = vmax.xlane.f32.xlu0 %v5867_v45  ;;  %19049 = vst [vmem:[#allocation26_spill] sm:$0xff] %v16187_v46  ;;  %v5870_v45 = vmax.f32 %v16173_v55, %v16179_v18  ;;  %v5873_v16 = vmax.f32 %v16187_v46, %v16193_v63  ;;  %v16209_v30 = vsel %vm19054_vm15, -3e+38, %v19053_v19  ;;  %v5971_v19 = vsel %vm5907_vm1, %v9477_v10, 256.0 }
 0xb6b   : > { %19055 = vst [vmem:[#allocation38_spill] sm:$0xff] %v16209_v30  ;;  %vm5912_vm6 = vcmp.ge.f32.partialorder %v19060_v39, %v5833_v36 }
 0xb6c   : > { %6035 = vmin.xlane.f32.xlu1 %v6034_v29  ;;  %v5830_v29 = vpop.xlane.xlu1 %5829  ;;  %v5976_v11 = vsel %vm5912_vm6, %v9479_v24, 256.0 }
 0xb6d   : > { %vm5910_vm5 = vcmp.ge.f32.partialorder %v19062_v48, %v5830_v29  ;;  %v5839_v54 = vpop.xlane.xlu0 %5838 }
 0xb6e   : > { %6038 = vmin.xlane.f32.xlu0 %v6037_v1  ;;  %v16215_v1 = vsel %vm5452_vm9, -3e+38, %v19056_v52  ;;  %v5969_v52 = vsel %vm5905_vm10, %v9477_v10, 256.0  ;;  %vm5911_vm9 = vcmp.ge.f32.partialorder %v19059_v13, %v5833_v36  ;;  %v5974_v13 = vsel %vm5910_vm5, %v9479_v24, 256.0  ;;  %v19064_v36 = vld [vmem:[#allocation47_spill] sm:$0xff] }
 0xb6f   : > { %19057 = vst [vmem:[#allocation39_spill] sm:$0xff] %v16215_v1  ;;  %v5876_v58 = vmax.f32 %v16209_v30, %v16215_v1  ;;  %v19063_v30 = vld [vmem:[#allocation29_spill] sm:$0xff]  ;;  %vm5916_vm3 = vcmp.ge.f32.partialorder %v19064_v36, %v5839_v54 }
 0xb70   : > { %5871 = vmax.xlane.f32.xlu1 %v5870_v45  ;;  %v19058_v45 = vld [vmem:[#allocation71_spill] sm:$0xff]  ;;  %vm5915_vm0 = vcmp.ge.f32.partialorder %v19063_v30, %v5839_v54  ;;  %v19067_v30 = vld [vmem:[#allocation68_spill] sm:$0xff]  ;;  %v19068_v54 = vld [vmem:[#allocation25_spill] sm:$0xff] }
 0xb71   : > { %vm5906_vm13 = vcmp.ge.f32.partialorder %v19058_v45, %v5824_v4  ;;  %v19061_v4 = vld [vmem:[#allocation80_spill] sm:$0xff]  ;;  %v5975_v45 = vsel %vm5911_vm9, %v9477_v10, 256.0 }
 0xb72   : > { %5874 = vmax.xlane.f32.xlu0 %v5873_v16  ;;  %v5970_v6 = vsel %vm5906_vm13, %v9479_v24, 256.0  ;;  %v5836_v16 = vpop.xlane.xlu1 %5835  ;;  %vm5909_vm2 = vcmp.ge.f32.partialorder %v19061_v4, %v5830_v29  ;;  %v19066_v29 = vld [vmem:[#allocation51_spill] sm:$0xff] }
 0xb73   : > { %v6046_v28 = vmin.f32 %v5969_v52, %v5970_v6  ;;  %v5973_v1 = vsel %vm5909_vm2, %v9477_v10, 256.0  ;;  %vm5914_vm7 = vcmp.ge.f32.partialorder %v19066_v29, %v5836_v16  ;;  %v5980_v6 = vsel %vm5916_vm3, %v9479_v24, 256.0 }
 0xb74   : > { %6041 = vmin.xlane.f32.xlu1 %v6040_v22  ;;  %v6049_v22 = vmin.f32 %v5971_v19, %v5972_v12  ;;  %v6055_v12 = vmin.f32 %v5975_v45, %v5976_v11  ;;  %v6052_v52 = vmin.f32 %v5973_v1, %v5974_v13  ;;  %v5978_v4 = vsel %vm5914_vm7, %v9479_v24, 256.0  ;;  %v19069_v1 = vld [vmem:[#allocation75_spill] sm:$0xff] }
 0xb76   : > { %6044 = vmin.xlane.f32.xlu0 %v6043_v20  ;;  %v19065_v20 = vld [vmem:[#allocation19_spill] sm:$0xff]  ;;  %v5842_v19 = vpop.xlane.xlu1 %5841 }
 0xb77   : > { %vm5913_vm8 = vcmp.ge.f32.partialorder %v19065_v20, %v5836_v16  ;;  %vm5917_vm12 = vcmp.ge.f32.partialorder %v19067_v30, %v5842_v19  ;;  %vm5918_vm11 = vcmp.ge.f32.partialorder %v19068_v54, %v5842_v19  ;;  %v19070_v19 = vld [vmem:[#allocation40_spill] sm:$0xff] }
 0xb78   : > { %5877 = vmax.xlane.f32.xlu1 %v5876_v58  ;;  %v5979_v58 = vsel %vm5915_vm0, %v9477_v10, 256.0  ;;  %v5977_v48 = vsel %vm5913_vm8, %v9477_v10, 256.0  ;;  %v5982_v11 = vsel %vm5918_vm11, %v9479_v24, 256.0 }
 0xb79   : > { %v6058_v16 = vmin.f32 %v5977_v48, %v5978_v4 }
 0xb7a   : > { %6050 = vmin.xlane.f32.xlu0 %v6049_v22  ;;  %v6061_v22 = vmin.f32 %v5979_v58, %v5980_v6 }
 0xb7c   : > { %6047 = vmin.xlane.f32.xlu1 %v6046_v28  ;;  %v5981_v28 = vsel %vm5917_vm12, %v9477_v10, 256.0 }
 0xb7d   : > { %v6064_v45 = vmin.f32 %v5981_v28, %v5982_v11 }
 0xb7e   : > { %6056 = vmin.xlane.f32.xlu0 %v6055_v12 }
 0xb80   : > { %6053 = vmin.xlane.f32.xlu1 %v6052_v52 }
 0xb82   : > { %6062 = vmin.xlane.f32.xlu0 %v6061_v22 }
 0xb84   : > { %6059 = vmin.xlane.f32.xlu1 %v6058_v16 }
 0xb88   : > { %6065 = vmin.xlane.f32.xlu1 %v6064_v45 }
 0xbd3   : > { %v6009_v13 = vpop.xlane.xlu0 %6008 }
 0xbd4   : > { %vm6103_vm14 = vcmp.eq.f32.partialorder %v9477_v10, %v6009_v13  ;;  %vm6104_vm15 = vcmp.eq.f32.partialorder %v9479_v24, %v6009_v13 }
 0xbd5   : > { %v16250_v12 = vsel %vm6103_vm14, -3e+38, %v19069_v1  ;;  %v16255_v4 = vsel %vm6104_vm15, -3e+38, %v19070_v19 }
 0xbd6   : > { %v6497_v48 = vmax.f32 %v16250_v12, %v16255_v4 }
 0xbd7   : > { %v5845_v58 = vpop.xlane.xlu0 %5844 }
 0xbd8   : > { %vm5919_vm1 = vcmp.ge.f32.partialorder %v15994_v31, %v5845_v58  ;;  %vm5920_vm4 = vcmp.ge.f32.partialorder %v16000_v3, %v5845_v58  ;;  %6498 = vmax.xlane.f32.xlu0 %v6497_v48  ;;  %v19076_v58 = vld [vmem:[#allocation50_spill] sm:$0xff] }
 0xbd9   : > { %v6012_v6 = vpop.xlane.xlu1 %6011  ;;  %v5983_v52 = vsel %vm5919_vm1, %v9477_v10, 256.0  ;;  %v5984_v22 = vsel %vm5920_vm4, %v9479_v24, 256.0  ;;  %v19173_v48 = vld [vmem:[#allocation22_spill] sm:$0xff] }
 0xbda   : > { %vm6105_vm10 = vcmp.eq.f32.partialorder %v9477_v10, %v6012_v6  ;;  %vm6106_vm13 = vcmp.eq.f32.partialorder %v9479_v24, %v6012_v6  ;;  %v6067_v45 = vmin.f32 %v5983_v52, %v5984_v22  ;;  %v19077_v6 = vld [vmem:[#allocation76_spill] sm:$0xff] }
 0xbdb   : > { %vm16265_vm9 = vmpackc.low %vm6105_vm10, %vm6103_vm14  ;;  %v16270_v28 = vsel %vm6105_vm10, -3e+38, %v15510_v51  ;;  %v16273_v11 = vsel %vm6106_vm13, -3e+38, %v15516_v42  ;;  %v6015_v1 = vpop.xlane.xlu0 %6014 }
 0xbdc   : > { %19073 = vst [vmem:[#allocation77_spill] sm:$0xff] %v16273_v11  ;;  %v6500_v19 = vmax.f32 %v16270_v28, %v16273_v11  ;;  %vm16279_vm6 = vmpackc.low %vm6106_vm13, %vm6104_vm15  ;;  %vm6107_vm2 = vcmp.eq.f32.partialorder %v9477_v10, %v6015_v1  ;;  %vm6108_vm5 = vcmp.eq.f32.partialorder %v9479_v24, %v6015_v1  ;;  %6068 = vmin.xlane.f32.xlu0 %v6067_v45 }
 0xbdd   : > { %v5848_v51 = vpop.xlane.xlu1 %5847  ;;  %v16288_v42 = vsel %vm6107_vm2, -3e+38, %v19076_v58  ;;  %v16293_v52 = vsel %vm6108_vm5, -3e+38, %v19077_v6 }
 0xbde   : > { %vm5921_vm0 = vcmp.ge.f32.partialorder %v16024_v9, %v5848_v51  ;;  %vm5922_vm3 = vcmp.ge.f32.partialorder %v16030_v34, %v5848_v51  ;;  %6501 = vmax.xlane.f32.xlu1 %v6500_v19  ;;  %v6503_v45 = vmax.f32 %v16288_v42, %v16293_v52 }
 0xbdf   : > { %v5985_v13 = vsel %vm5921_vm0, %v9477_v10, 256.0  ;;  %v5986_v22 = vsel %vm5922_vm3, %v9479_v24, 256.0  ;;  %v5851_v11 = vpop.xlane.xlu0 %5850 }
 0xbe0   : > { %v6070_v58 = vmin.f32 %v5985_v13, %v5986_v22  ;;  %vm5923_vm8 = vcmp.ge.f32.partialorder %v16038_v40, %v5851_v11  ;;  %vm5924_vm7 = vcmp.ge.f32.partialorder %v16044_v26, %v5851_v11  ;;  %6504 = vmax.xlane.f32.xlu0 %v6503_v45 }
 0xbe1   : > { %v6018_v6 = vpop.xlane.xlu1 %6017  ;;  %v5987_v9 = vsel %vm5923_vm8, %v9477_v10, 256.0  ;;  %v5988_v51 = vsel %vm5924_vm7, %v9479_v24, 256.0 }
 0xbe2   : > { %vm6109_vm12 = vcmp.eq.f32.partialorder %v9477_v10, %v6018_v6  ;;  %vm6110_vm11 = vcmp.eq.f32.partialorder %v9479_v24, %v6018_v6  ;;  %6071 = vmin.xlane.f32.xlu1 %v6070_v58  ;;  %v6073_v22 = vmin.f32 %v5987_v9, %v5988_v51 }
 0xbe3   : > { %vm16309_vm14 = vmpackc.low %vm6109_vm12, %vm6107_vm2  ;;  %v16314_v13 = vsel %vm6109_vm12, -3e+38, %v15562_v8  ;;  %v16317_v11 = vsel %vm6110_vm11, -3e+38, %v15568_v59  ;;  %v6021_v45 = vpop.xlane.xlu0 %6020 }
 0xbe4   : > { %19080 = vst [vmem:[#allocation78_spill] sm:$0xff] %v16317_v11  ;;  %v6506_v26 = vmax.f32 %v16314_v13, %v16317_v11  ;;  %vm16323_vm15 = vmpackc.low %vm6110_vm11, %vm6108_vm5  ;;  %vm6111_vm1 = vcmp.eq.f32.partialorder %v9477_v10, %v6021_v45  ;;  %vm6112_vm4 = vcmp.eq.f32.partialorder %v9479_v24, %v6021_v45  ;;  %6074 = vmin.xlane.f32.xlu0 %v6073_v22 }
 0xbe5   : > { %v5854_v8 = vpop.xlane.xlu1 %5853  ;;  %v16332_v59 = vsel %vm6111_vm1, -3e+38, %v15540_v35  ;;  %v16337_v9 = vsel %vm6112_vm4, -3e+38, %v15546_v33 }
 0xbe6   : > { %19083 = vst [vmem:[#allocation79_spill] sm:$0xff] %v16337_v9  ;;  %vm5925_vm10 = vcmp.ge.f32.partialorder %v16065_v14, %v5854_v8  ;;  %vm5926_vm13 = vcmp.ge.f32.partialorder %v16071_v32, %v5854_v8  ;;  %6507 = vmax.xlane.f32.xlu1 %v6506_v26  ;;  %v6509_v51 = vmax.f32 %v16332_v59, %v16337_v9 }
 0xbe7   : > { %v5989_v1 = vsel %vm5925_vm10, %v9477_v10, 256.0  ;;  %v5990_v6 = vsel %vm5926_vm13, %v9479_v24, 256.0  ;;  %v5857_v22 = vpop.xlane.xlu0 %5856 }
 0xbe8   : > { %v6076_v35 = vmin.f32 %v5989_v1, %v5990_v6  ;;  %v16345_v11 = vpop.f32.mrb[60].mxu1  ;;  %vm5927_vm2 = vcmp.ge.f32.partialorder %v16079_v21, %v5857_v22  ;;  %vm5928_vm5 = vcmp.ge.f32.partialorder %v16085_v44, %v5857_v22  ;;  %6510 = vmax.xlane.f32.xlu0 %v6509_v51 }
 0xbe9   : > { %19084 = vst [vmem:[#allocation45_spill] sm:$0xff] %v16345_v11  ;;  %v6024_v33 = vpop.xlane.xlu1 %6023  ;;  %v5991_v32 = vsel %vm5927_vm2, %v9477_v10, 256.0  ;;  %v5992_v14 = vsel %vm5928_vm5, %v9479_v24, 256.0  ;;  %v16354_v9 = vpop.f32.mrb[61].mxu1 }
 0xbea   : > { %vm6113_vm0 = vcmp.eq.f32.partialorder %v9477_v10, %v6024_v33  ;;  %19086 = vst [vmem:[#allocation46_spill] sm:$0xff] %v16354_v9  ;;  %6077 = vmin.xlane.f32.xlu1 %v6076_v35  ;;  %vm6114_vm3 = vcmp.eq.f32.partialorder %v9479_v24, %v6024_v33  ;;  %v16368_v26 = vpop.f32.mrb[62].mxu1  ;;  %v6079_v11 = vmin.f32 %v5991_v32, %v5992_v14 }
 0xbeb   : > { %vm16359_vm8 = vmpackc.low %vm6113_vm0, %vm6111_vm1  ;;  %v16364_v6 = vsel %vm6113_vm0, -3e+38, %v15604_v50  ;;  %19090 = vst [vmem:[#allocation65_spill] sm:$0xff] %v16368_v26  ;;  %v16371_v8 = vsel %vm6114_vm3, -3e+38, %v15610_v53  ;;  %v16375_v44 = vpop.f32.mrb[63].mxu1  ;;  %v6027_v21 = vpop.xlane.xlu0 %6026 }
 0xbec   : > { %19092 = vst [vmem:[#allocation55_spill] sm:$0xff] %v16375_v44  ;;  %vm16379_vm7 = vmpackc.low %vm6114_vm3, %vm6112_vm4  ;;  %vm6115_vm12 = vcmp.eq.f32.partialorder %v9477_v10, %v6027_v21  ;;  %vm6116_vm11 = vcmp.eq.f32.partialorder %v9479_v24, %v6027_v21  ;;  %6080 = vmin.xlane.f32.xlu0 %v6079_v11  ;;  %v6512_v14 = vmax.f32 %v16364_v6, %v16371_v8 }
 0xbed   : > { %v5860_v53 = vpop.xlane.xlu1 %5859  ;;  %v16392_v32 = vsel %vm6115_vm12, -3e+38, %v15584_v7  ;;  %v16397_v45 = vsel %vm6116_vm11, -3e+38, %v15590_v0 }
 0xbee   : > { %vm5929_vm1 = vcmp.ge.f32.partialorder %v16101_v2, %v5860_v53  ;;  %vm5930_vm4 = vcmp.ge.f32.partialorder %v16107_v25, %v5860_v53  ;;  %v6515_v11 = vmax.f32 %v16392_v32, %v16397_v45  ;;  %6513 = vmax.xlane.f32.xlu1 %v6512_v14 }
 0xbef   : > { %v5993_v9 = vsel %vm5929_vm1, %v9477_v10, 256.0  ;;  %v5994_v33 = vsel %vm5930_vm4, %v9479_v24, 256.0  ;;  %v5863_v44 = vpop.xlane.xlu0 %5862 }
 0xbf0   : > { %v6082_v7 = vmin.f32 %v5993_v9, %v5994_v33  ;;  %v16405_v22 = vpop.f32.mrb[64].mxu1  ;;  %vm5931_vm10 = vcmp.ge.f32.partialorder %v16115_v61, %v5863_v44  ;;  %vm5932_vm13 = vcmp.ge.f32.partialorder %v16121_v57, %v5863_v44  ;;  %6516 = vmax.xlane.f32.xlu0 %v6515_v11 }
 0xbf1   : > { %19096 = vst [vmem:[#allocation60_spill] sm:$0xff] %v16405_v22  ;;  %v6030_v0 = vpop.xlane.xlu1 %6029  ;;  %v5995_v35 = vsel %vm5931_vm10, %v9477_v10, 256.0  ;;  %v5996_v51 = vsel %vm5932_vm13, %v9479_v24, 256.0  ;;  %v16414_v14 = vpop.f32.mrb[65].mxu1 }
 0xbf2   : > { %vm6117_vm2 = vcmp.eq.f32.partialorder %v9477_v10, %v6030_v0  ;;  %19098 = vst [vmem:[#allocation59_spill] sm:$0xff] %v16414_v14  ;;  %v6085_v9 = vmin.f32 %v5995_v35, %v5996_v51  ;;  %vm6118_vm5 = vcmp.eq.f32.partialorder %v9479_v24, %v6030_v0  ;;  %6083 = vmin.xlane.f32.xlu1 %v6082_v7  ;;  %v16428_v22 = vpop.f32.mrb[66].mxu1 }
 0xbf3   : > { %vm16419_vm0 = vmpackc.low %vm6117_vm2, %vm6115_vm12  ;;  %v16424_v33 = vsel %vm6117_vm2, -3e+38, %v15641_v60  ;;  %19102 = vst [vmem:[#allocation61_spill] sm:$0xff] %v16428_v22  ;;  %v16431_v53 = vsel %vm6118_vm5, -3e+38, %v15647_v5  ;;  %v16435_v0 = vpop.f32.mrb[67].mxu1  ;;  %v6033_v57 = vpop.xlane.xlu0 %6032 }
 0xbf4   : > { %19104 = vst [vmem:[#allocation62_spill] sm:$0xff] %v16435_v0  ;;  %vm16439_vm3 = vmpackc.low %vm6118_vm5, %vm6116_vm11  ;;  %vm6119_vm12 = vcmp.eq.f32.partialorder %v9477_v10, %v6033_v57  ;;  %vm6120_vm1 = vcmp.eq.f32.partialorder %v9479_v24, %v6033_v57  ;;  %6086 = vmin.xlane.f32.xlu0 %v6085_v9  ;;  %v6518_v35 = vmax.f32 %v16424_v33, %v16431_v53  ;;  %v19182_v60 = vld [vmem:[#allocation77_spill] sm:$0xff] }
 0xbf5   : > { %v5866_v5 = vpop.xlane.xlu1 %5865  ;;  %v16452_v21 = vsel %vm6119_vm12, -3e+38, %v15625_v15  ;;  %v16457_v22 = vsel %vm6120_vm1, -3e+38, %v15631_v47 }
 0xbf6   : > { %vm5933_vm11 = vcmp.ge.f32.partialorder %v16137_v49, %v5866_v5  ;;  %vm5934_vm4 = vcmp.ge.f32.partialorder %v16143_v38, %v5866_v5  ;;  %v6521_v9 = vmax.f32 %v16452_v21, %v16457_v22  ;;  %6519 = vmax.xlane.f32.xlu1 %v6518_v35 }
 0xbf7   : > { %v5997_v7 = vsel %vm5933_vm11, %v9477_v10, 256.0  ;;  %v5998_v0 = vsel %vm5934_vm4, %v9479_v24, 256.0  ;;  %v5869_v26 = vpop.xlane.xlu0 %5868 }
 0xbf8   : > { %v6088_v15 = vmin.f32 %v5997_v7, %v5998_v0  ;;  %vm5935_vm10 = vcmp.ge.f32.partialorder %v16151_v43, %v5869_v26  ;;  %vm5936_vm13 = vcmp.ge.f32.partialorder %v16157_v41, %v5869_v26  ;;  %6522 = vmax.xlane.f32.xlu0 %v6521_v9  ;;  %v19110_v7 = vmov 0 }
 0xbf9   : > { %v6036_v47 = vpop.xlane.xlu1 %6035  ;;  %v5999_v51 = vsel %vm5935_vm10, %v9477_v10, 256.0  ;;  %v6000_v5 = vsel %vm5936_vm13, %v9479_v24, 256.0 }
 0xbfa   : > { %vm6121_vm2 = vcmp.eq.f32.partialorder %v9477_v10, %v6036_v47  ;;  %vm6122_vm5 = vcmp.eq.f32.partialorder %v9479_v24, %v6036_v47  ;;  %v6091_v14 = vmin.f32 %v5999_v51, %v6000_v5  ;;  %6089 = vmin.xlane.f32.xlu1 %v6088_v15 }
 0xbfb   : > { %vm16473_vm11 = vmpackc.low %vm6122_vm5, %vm6120_vm1  ;;  %v16478_v0 = vsel %vm6121_vm2, -3e+38, %v15683_v56  ;;  %v16481_v26 = vsel %vm6122_vm5, -3e+38, %v15689_v17  ;;  %v6039_v9 = vpop.xlane.xlu0 %6038 }
 0xbfc   : > { %vm16485_vm4 = vmpackc.low %vm6121_vm2, %vm6119_vm12  ;;  %v6524_v51 = vmax.f32 %v16478_v0, %v16481_v26  ;;  %vm18033_vm1 = vcmp.eq.f32.partialorder %v9477_v10, %v6039_v9  ;;  %vm18034_vm10 = vcmp.eq.f32.partialorder %v9479_v24, %v6039_v9  ;;  %6092 = vmin.xlane.f32.xlu0 %v6091_v14 }
 0xbfd   : > { %v19111_v7 = vsel %vm16485_vm4, 4294967295, %v19110_v7  ;;  %v5872_v56 = vpop.xlane.xlu1 %5871  ;;  %v16496_v17 = vsel %vm18033_vm1, -3e+38, %v15669_v23  ;;  %v16501_v57 = vsel %vm18034_vm10, -3e+38, %v19041_v62 }
 0xbfe   : > { %vm5937_vm12 = vcmp.ge.f32.partialorder %v16173_v55, %v5872_v56  ;;  %vm5938_vm13 = vcmp.ge.f32.partialorder %v16179_v18, %v5872_v56  ;;  %v6527_v15 = vmax.f32 %v16496_v17, %v16501_v57  ;;  %6525 = vmax.xlane.f32.xlu1 %v6524_v51  ;;  %v19113_v51 = vmov 0  ;;  %v19126_v55 = vld [vmem:[#allocation49_spill] sm:$0xff] }
 0xbff   : > { %v6001_v47 = vsel %vm5937_vm12, %v9477_v10, 256.0  ;;  %v6002_v14 = vsel %vm5938_vm13, %v9479_v24, 256.0  ;;  %v5875_v23 = vpop.xlane.xlu0 %5874  ;;  %vm19112_vm12 = vcmp.eq.f32.partialorder %v9479_v24, %v6039_v9 }
 0xc00   : > { %v6094_v5 = vmin.f32 %v6001_v47, %v6002_v14  ;;  %vm5939_vm2 = vcmp.ge.f32.partialorder %v16187_v46, %v5875_v23  ;;  %vm5940_vm5 = vcmp.ge.f32.partialorder %v16193_v63, %v5875_v23  ;;  %6528 = vmax.xlane.f32.xlu0 %v6527_v15  ;;  %v19118_v14 = vmov 0 }
 0xc01   : > { %v6042_v62 = vpop.xlane.xlu1 %6041  ;;  %v6003_v11 = vsel %vm5939_vm2, %v9477_v10, 256.0  ;;  %v6004_v56 = vsel %vm5940_vm5, %v9479_v24, 256.0  ;;  %vm19117_vm2 = vcmp.eq.f32.partialorder %v9477_v10, %v6039_v9  ;;  %v19122_v9 = vld [vmem:[#allocation56_spill] sm:$0xff] }
 0xc02   : > { %vm6125_vm1 = vcmp.eq.f32.partialorder %v9477_v10, %v6042_v62  ;;  %vm6126_vm10 = vcmp.eq.f32.partialorder %v9479_v24, %v6042_v62  ;;  %v6097_v18 = vmin.f32 %v6003_v11, %v6004_v56  ;;  %6095 = vmin.xlane.f32.xlu1 %v6094_v5  ;;  %v19120_v62 = vld [vmem:[#allocation32_spill] sm:$0xff]  ;;  %v19124_v56 = vld [vmem:[#allocation38_spill] sm:$0xff] }
 0xc03   : > { %vm16517_vm13 = vmpackc.low %vm6126_vm10, %vm19112_vm12  ;;  %v16522_v47 = vsel %vm6125_vm1, -3e+38, %v15715_v27  ;;  %v16525_v15 = vsel %vm6126_vm10, -3e+38, %v15721_v37  ;;  %v6045_v23 = vpop.xlane.xlu0 %6044 }
 0xc04   : > { %v19114_v51 = vsel %vm16517_vm13, 4294967295, %v19113_v51  ;;  %19115 = vst [vmem:[#allocation63_spill] sm:$0xff] %v16522_v47  ;;  %19116 = vst [vmem:[#allocation64_spill] sm:$0xff] %v16525_v15  ;;  %v6530_v11 = vmax.f32 %v16522_v47, %v16525_v15  ;;  %vm18040_vm12 = vcmp.eq.f32.partialorder %v9477_v10, %v6045_v23  ;;  %vm6128_vm13 = vcmp.eq.f32.partialorder %v9479_v24, %v6045_v23  ;;  %v19125_v15 = vld [vmem:[#allocation39_spill] sm:$0xff] }
 0xc05   : > { %vm16529_vm5 = vmpackc.low %vm6125_vm1, %vm19117_vm2  ;;  %v5878_v27 = vpop.xlane.xlu1 %5877  ;;  %6098 = vmin.xlane.f32.xlu0 %v6097_v18  ;;  %v16540_v37 = vsel %vm18040_vm12, -3e+38, %v19120_v62  ;;  %v16545_v5 = vsel %vm6128_vm13, -3e+38, %v19122_v9 }
 0xc06   : > { %v19119_v14 = vsel %vm16529_vm5, 4294967295, %v19118_v14  ;;  %19121 = vst [vmem:[#allocation57_spill] sm:$0xff] %v16540_v37  ;;  %19123 = vst [vmem:[#allocation47_spill] sm:$0xff] %v16545_v5  ;;  %vm5941_vm1 = vcmp.ge.f32.partialorder %v19124_v56, %v5878_v27  ;;  %vm5942_vm10 = vcmp.ge.f32.partialorder %v19125_v15, %v5878_v27  ;;  %v6533_v47 = vmax.f32 %v16540_v37, %v16545_v5  ;;  %v19128_v15 = vld [vmem:[#allocation70_spill] sm:$0xff] }
 0xc07   : > { %v6005_v63 = vsel %vm5941_vm1, %v9477_v10, 256.0  ;;  %v6006_v18 = vsel %vm5942_vm10, %v9479_v24, 256.0  ;;  %6531 = vmax.xlane.f32.xlu1 %v6530_v11  ;;  %v6051_v62 = vpop.xlane.xlu0 %6050 }
 0xc08   : > { %v6100_v46 = vmin.f32 %v6005_v63, %v6006_v18  ;;  %vm18043_vm2 = vcmp.eq.f32.partialorder %v9477_v10, %v6051_v62  ;;  %vm18044_vm12 = vcmp.eq.f32.partialorder %v9479_v24, %v6051_v62  ;;  %v19134_v18 = vld [vmem:[#allocation71_spill] sm:$0xff] }
 0xc09   : > { %v6048_v9 = vpop.xlane.xlu1 %6047  ;;  %6534 = vmax.xlane.f32.xlu0 %v6533_v47  ;;  %v16558_v27 = vsel %vm18043_vm2, -3e+38, %v19126_v55  ;;  %v16563_v56 = vsel %vm18044_vm12, -3e+38, %v19128_v15  ;;  %v19130_v47 = vmov 0  ;;  %v19132_v55 = vld [vmem:[#allocation24_spill] sm:$0xff]  ;;  %vm19136_vm2 = vcmp.eq.f32.partialorder %v9477_v10, %v6045_v23 }
 0xc0a   : > { %19127 = vst [vmem:[#allocation19_spill] sm:$0xff] %v16558_v27  ;;  %19129 = vst [vmem:[#allocation51_spill] sm:$0xff] %v16563_v56  ;;  %vm6129_vm1 = vcmp.eq.f32.partialorder %v9477_v10, %v6048_v9  ;;  %vm6130_vm10 = vcmp.eq.f32.partialorder %v9479_v24, %v6048_v9  ;;  %v6539_v63 = vmax.f32 %v16558_v27, %v16563_v56  ;;  %v19137_v15 = vmov 0  ;;  %v19139_v27 = vld [vmem:[#allocation21_spill] sm:$0xff] }
 0xc0b   : > { %vm16571_vm5 = vmpackc.low %vm6130_vm10, %vm6128_vm13  ;;  %v16576_v11 = vsel %vm6129_vm1, -3e+38, %v19132_v55  ;;  %v16579_v5 = vsel %vm6130_vm10, -3e+38, %v19134_v18  ;;  %6101 = vmin.xlane.f32.xlu1 %v6100_v46  ;;  %v6057_v56 = vpop.xlane.xlu0 %6056  ;;  %vm19142_vm10 = vcmp.eq.f32.partialorder %v9479_v24, %v6051_v62 }
 0xc0c   : > { %v19131_v47 = vsel %vm16571_vm5, 4294967295, %v19130_v47  ;;  %19133 = vst [vmem:[#allocation68_spill] sm:$0xff] %v16576_v11  ;;  %19135 = vst [vmem:[#allocation25_spill] sm:$0xff] %v16579_v5  ;;  %v6536_v9 = vmax.f32 %v16576_v11, %v16579_v5  ;;  %vm18050_vm13 = vcmp.eq.f32.partialorder %v9477_v10, %v6057_v56  ;;  %vm18051_vm5 = vcmp.eq.f32.partialorder %v9479_v24, %v6057_v56  ;;  %v19147_v11 = vld [vmem:[#allocation28_spill] sm:$0xff] }
 0xc0d   : > { %vm16583_vm12 = vmpackc.low %vm6129_vm1, %vm19136_vm2  ;;  %v6054_v55 = vpop.xlane.xlu1 %6053  ;;  %6540 = vmax.xlane.f32.xlu0 %v6539_v63  ;;  %v16594_v46 = vsel %vm18050_vm13, -3e+38, %v19139_v27  ;;  %v16599_v23 = vsel %vm18051_vm5, -3e+38, %v19060_v39  ;;  %v19143_v63 = vmov 0  ;;  %v19145_v27 = vld [vmem:[#allocation80_spill] sm:$0xff]  ;;  %vm19149_vm13 = vcmp.eq.f32.partialorder %v9477_v10, %v6051_v62 }
 0xc0e   : > { %v19138_v15 = vsel %vm16583_vm12, 4294967295, %v19137_v15  ;;  %19140 = vst [vmem:[#allocation75_spill] sm:$0xff] %v16594_v46  ;;  %19141 = vst [vmem:[#allocation40_spill] sm:$0xff] %v16599_v23  ;;  %vm6133_vm2 = vcmp.eq.f32.partialorder %v9477_v10, %v6054_v55  ;;  %vm6134_vm1 = vcmp.eq.f32.partialorder %v9479_v24, %v6054_v55  ;;  %v6545_v18 = vmax.f32 %v16594_v46, %v16599_v23  ;;  %v19152_v46 = vld [vmem:[#allocation29_spill] sm:$0xff] }
 0xc0f   : > { %vm16607_vm12 = vmpackc.low %vm6134_vm1, %vm19142_vm10  ;;  %v16612_v5 = vsel %vm6133_vm2, -3e+38, %v19145_v27  ;;  %v16615_v37 = vsel %vm6134_vm1, -3e+38, %v19147_v11  ;;  %6537 = vmax.xlane.f32.xlu1 %v6536_v9  ;;  %v19150_v39 = vmov 0  ;;  %v6063_v23 = vpop.xlane.xlu0 %6062  ;;  %vm19155_vm1 = vcmp.eq.f32.partialorder %v9479_v24, %v6057_v56 }
 0xc10   : > { %v19144_v63 = vsel %vm16607_vm12, 4294967295, %v19143_v63  ;;  %19146 = vst [vmem:[#allocation50_spill] sm:$0xff] %v16612_v5  ;;  %19148 = vst [vmem:[#allocation76_spill] sm:$0xff] %v16615_v37  ;;  %v6542_v55 = vmax.f32 %v16612_v5, %v16615_v37  ;;  %vm18055_vm10 = vcmp.eq.f32.partialorder %v9477_v10, %v6063_v23  ;;  %vm18056_vm12 = vcmp.eq.f32.partialorder %v9479_v24, %v6063_v23 }
 0xc11   : > { %vm16619_vm5 = vmpackc.low %vm6133_vm2, %vm19149_vm13  ;;  %v6060_v27 = vpop.xlane.xlu1 %6059  ;;  %6546 = vmax.xlane.f32.xlu0 %v6545_v18  ;;  %v16630_v11 = vsel %vm18055_vm10, -3e+38, %v19152_v46  ;;  %v16635_v62 = vsel %vm18056_vm12, -3e+38, %v19064_v36  ;;  %v19156_v18 = vmov 0  ;;  %vm19160_vm10 = vcmp.eq.f32.partialorder %v9477_v10, %v6057_v56  ;;  %v19185_v36 = vld [vmem:[#allocation78_spill] sm:$0xff] }
 0xc12   : > { %v19151_v39 = vsel %vm16619_vm5, 4294967295, %v19150_v39  ;;  %19153 = vst [vmem:[#allocation32_spill] sm:$0xff] %v16630_v11  ;;  %19154 = vst [vmem:[#allocation56_spill] sm:$0xff] %v16635_v62  ;;  %vm6137_vm13 = vcmp.eq.f32.partialorder %v9477_v10, %v6060_v27  ;;  %vm6138_vm2 = vcmp.eq.f32.partialorder %v9479_v24, %v6060_v27  ;;  %v6551_v9 = vmax.f32 %v16630_v11, %v16635_v62 }
 0xc13   : > { %vm16643_vm5 = vmpackc.low %vm6138_vm2, %vm19155_vm1  ;;  %v16648_v46 = vsel %vm6137_vm13, -3e+38, %v19065_v20  ;;  %v16651_v37 = vsel %vm6138_vm2, -3e+38, %v19066_v29  ;;  %6543 = vmax.xlane.f32.xlu1 %v6542_v55  ;;  %vm19163_vm4 = vcmp.eq.f32.partialorder %v9479_v24, %v6063_v23 }
 0xc14   : > { %v19157_v18 = vsel %vm16643_vm5, 4294967295, %v19156_v18  ;;  %19158 = vst [vmem:[#allocation49_spill] sm:$0xff] %v16648_v46  ;;  %19159 = vst [vmem:[#allocation70_spill] sm:$0xff] %v16651_v37  ;;  %v6548_v27 = vmax.f32 %v16648_v46, %v16651_v37 }
 0xc15   : > { %vm16655_vm12 = vmpackc.low %vm6137_vm13, %vm19160_vm10  ;;  %v6066_v62 = vpop.xlane.xlu1 %6065  ;;  %6552 = vmax.xlane.f32.xlu0 %v6551_v9  ;;  %vm19166_vm10 = vcmp.eq.f32.partialorder %v9477_v10, %v6063_v23  ;;  %v16686_v23 = vld [vmem:[#allocation8] sm:$0xff]  }
 0xc16   : > { %vm6141_vm1 = vcmp.eq.f32.partialorder %v9477_v10, %v6066_v62  ;;  %vm6142_vm5 = vcmp.eq.f32.partialorder %v9479_v24, %v6066_v62 }
 0xc17   : > { %vm16665_vm2 = vmpackc.low %vm6142_vm5, %vm19163_vm4  ;;  %v16670_v29 = vsel %vm6141_vm1, -3e+38, %v19067_v30  ;;  %v16673_v56 = vsel %vm6142_vm5, -3e+38, %v19068_v54  ;;  %6549 = vmax.xlane.f32.xlu1 %v6548_v27  ;;  %v19169_v54 = vmov 1.0|1.0  }
 0xc18   : > { %vm16677_vm13 = vmpackc.low %vm6141_vm1, %vm19166_vm10  ;;  %v6554_v62 = vmax.f32 %v16670_v29, %v16673_v56  ;;  %vm19170_vm4 = vcmask 130048   ;;  %v19171_v27 = vmov 0  }
 0xc19   : > { %vm19172_vm5 = vmmov %vm19170_vm4 }
 0xc1b   : > { %6555 = vmax.xlane.f32.xlu1 %v6554_v62 }
 0xc22   : > { %v5647_v9 = vpop.f32.mrb[76].mxu0 }
 0xc23   : > { %v5649_v37 = vpop.f32.mrb[77].mxu0 }
 0xc24   : > { %v5651_v46 = vpop.f32.mrb[78].mxu0 }
 0xc25   : > { %v5656_v11 = vpack.c.bf16 %v5651_v46, %v5647_v9  ;;  %v5653_v30 = vpop.f32.mrb[79].mxu0 }
 0xc26   : > { %v5657_v5 = vpack.c.bf16 %v5653_v30, %v5649_v37  ;;  %v16697_v37 = vld [vmem:[#allocation8 + $0x8] sm:$0xff]  }
 0xc28   : > { %5658 = vmatprep.subr.bf16.mxu1 %v5657_v5 }
 0xc29   : > { %5659 = vmatpush1.bf16.msra.mxu1 %v5656_v11 }
 0xc2a   : > { %8351 = vmatprep.subr.msk.bf16.mxu1 %vm16279_vm6, %v19169_v54  ;;  %vm19175_vm6 = vnez %v19114_v51 }
 0xc2c   : > { %8284 = vmatmul.mubr.msk.bf16.vlgmr.msra.gmra.mrb[68].mxu1 %vm19170_vm4, %v16686_v23  ;;  %vm19181_vm4 = vnez %v19157_v18  ;;  %v19184_v18 = vld [vmem:[#allocation18_spill] sm:$0xff] }
 0xc2d   : > { %5700 = vmatprep.mubr.bf16.mxu1 %v19171_v27 }
 0xc32   : > { %8353 = vmatpush1.bf16.xpose.msk.msra.mxu1 %vm16265_vm9, %v19169_v54  ;;  %vm19174_vm9 = vnez %v19111_v7 }
 0xc33   : > { %8355 = vmatprep.subr.msk.bf16.mxu1 %vm16323_vm15, %v19169_v54  ;;  %vm19177_vm15 = vnez %v19131_v47 }
 0xc34   : > { %8285 = vmatmul.mubr.msk.bf16.gmra.mrb[72].mxu1 %vm19172_vm5, %v16697_v37 }
 0xc35   : > { %6359 = vmatprep.mubr.bf16.mxu1 %v19173_v48  ;;  %v19186_v48 = vld [vmem:[#allocation79_spill] sm:$0xff] }
 0xc3a   : > { %8357 = vmatpush1.bf16.xpose.msk.msra.mxu1 %vm16309_vm14, %v19169_v54  ;;  %vm19176_vm14 = vnez %v19119_v14 }
 0xc3b   : > { %8359 = vmatprep.subr.msk.bf16.mxu1 %vm16379_vm7, %v19169_v54  ;;  %vm19179_vm7 = vnez %v19144_v63 }
 0xc42   : > { %8361 = vmatpush1.bf16.xpose.msk.msra.mxu1 %vm16359_vm8, %v19169_v54  ;;  %vm19178_vm8 = vnez %v19138_v15  ;;  %v19183_v15 = vld [vmem:[#allocation67_spill] sm:$0xff] }
 0xc43   : > { %8363 = vmatprep.subr.msk.bf16.mxu1 %vm16439_vm3, %v19169_v54 }
 0xc4a   : > { %8365 = vmatpush1.bf16.xpose.msk.msra.mxu1 %vm16419_vm0, %v19169_v54 }
 0xc4b   : > { %8367 = vmatprep.subr.msk.bf16.mxu1 %vm16473_vm11, %v19169_v54  ;;  %vm19180_vm11 = vnez %v19151_v39 }
 0xc52   : > { %8369 = vmatpush1.bf16.xpose.msk.msra.mxu1 %vm19174_vm9, %v19169_v54 }
 0xc53   : > { %8371 = vmatprep.subr.msk.bf16.mxu1 %vm19175_vm6, %v19169_v54 }
 0xc5a   : > { %8373 = vmatpush1.bf16.xpose.msk.msra.mxu1 %vm19176_vm14, %v19169_v54 }
 0xc5b   : > { %8375 = vmatprep.subr.msk.bf16.mxu1 %vm19177_vm15, %v19169_v54 }
 0xc62   : > { %8377 = vmatpush1.bf16.xpose.msk.msra.mxu1 %vm19178_vm8, %v19169_v54 }
 0xc63   : > { %8379 = vmatprep.subr.msk.bf16.mxu1 %vm19179_vm7, %v19169_v54 }
 0xc65   : > { %v6499_v16 = vpop.xlane.xlu0 %6498 }
 0xc66   : > { %vm6593_vm0 = vcmp.ge.f32.partialorder %v16250_v12, %v6499_v16  ;;  %vm6594_vm3 = vcmp.ge.f32.partialorder %v16255_v4, %v6499_v16 }
 0xc67   : > { %v6657_v19 = vsel %vm6593_vm0, %v9477_v10, 256.0  ;;  %v6658_v58 = vsel %vm6594_vm3, %v9479_v24, 256.0 }
 0xc68   : > { %v6721_v1 = vmin.f32 %v6657_v19, %v6658_v58 }
 0xc69   : > { %v16742_v50 = vpop.xlane.xlu0 %6068 }
 0xc6a   : > { %8381 = vmatpush1.bf16.xpose.msk.msra.mxu1 %vm19180_vm11, %v19169_v54  ;;  %vm6143_vm1 = vcmp.eq.f32.partialorder %v9477_v10, %v16742_v50  ;;  %vm6144_vm10 = vcmp.eq.f32.partialorder %v9479_v24, %v16742_v50  ;;  %6722 = vmin.xlane.f32.xlu0 %v6721_v1  ;;  %v19187_v1 = vld [vmem:[#allocation54_spill] sm:$0xff] }
 0xc6b   : > { %v6502_v12 = vpop.xlane.xlu1 %6501  ;;  %8383 = vmatprep.subr.msk.bf16.mxu1 %vm19181_vm4, %v19169_v54  ;;  %v16758_v4 = vsel %vm6143_vm1, -3e+38, %v15994_v31  ;;  %v16764_v44 = vsel %vm6144_vm10, -3e+38, %v16000_v3 }
 0xc6c   : > { %vm6595_vm5 = vcmp.ge.f32.partialorder %v16270_v28, %v6502_v12  ;;  %vm6596_vm9 = vcmp.ge.f32.partialorder %v19182_v60, %v6502_v12  ;;  %v6557_v35 = vmax.f32 %v16758_v4, %v16764_v44  ;;  %v19188_v12 = vld [vmem:[#allocation69_spill] sm:$0xff] }
 0xc6d   : > { %v6659_v7 = vsel %vm6595_vm5, %v9477_v10, 256.0  ;;  %v6660_v51 = vsel %vm6596_vm9, %v9479_v24, 256.0  ;;  %v6505_v31 = vpop.xlane.xlu0 %6504 }
 0xc6e   : > { %v6724_v14 = vmin.f32 %v6659_v7, %v6660_v51  ;;  %vm6597_vm6 = vcmp.ge.f32.partialorder %v16288_v42, %v6505_v31  ;;  %vm6598_vm14 = vcmp.ge.f32.partialorder %v16293_v52, %v6505_v31  ;;  %6558 = vmax.xlane.f32.xlu0 %v6557_v35  ;;  %v19189_v51 = vld [vmem:[#allocation72_spill] sm:$0xff]  ;;  %v19190_v31 = vld [vmem:[#allocation33_spill] sm:$0xff] }
 0xc6f   : > { %v16774_v5 = vpop.xlane.xlu1 %6071  ;;  %v6661_v3 = vsel %vm6597_vm6, %v9477_v10, 256.0  ;;  %v6662_v28 = vsel %vm6598_vm14, %v9479_v24, 256.0 }
 0xc70   : > { %vm6145_vm15 = vcmp.eq.f32.partialorder %v9477_v10, %v16774_v5  ;;  %vm6146_vm8 = vcmp.eq.f32.partialorder %v9479_v24, %v16774_v5  ;;  %6725 = vmin.xlane.f32.xlu1 %v6724_v14  ;;  %v6727_v47 = vmin.f32 %v6661_v3, %v6662_v28 }
 0xc71   : > { %v16786_v42 = vsel %vm6145_vm15, -3e+38, %v19183_v15  ;;  %v16792_v52 = vsel %vm6146_vm8, -3e+38, %v16030_v34  ;;  %v16796_v39 = vpop.xlane.xlu0 %6074  ;;  %vm8390_vm9 = vmpackc.low %vm6146_vm8, %vm6144_vm10 }
 0xc72   : > { %v6560_v63 = vmax.f32 %v16786_v42, %v16792_v52  ;;  %8385 = vmatpush1.bf16.xpose.msk.msra.mxu1 %vm16655_vm12, %v19169_v54  ;;  %vm6147_vm7 = vcmp.eq.f32.partialorder %v9477_v10, %v16796_v39  ;;  %vm6148_vm0 = vcmp.eq.f32.partialorder %v9479_v24, %v16796_v39  ;;  %6728 = vmin.xlane.f32.xlu0 %v6727_v47 }
 0xc73   : > { %v6508_v11 = vpop.xlane.xlu1 %6507  ;;  %8387 = vmatprep.subr.msk.bf16.mxu1 %vm16665_vm2, %v19169_v54  ;;  %v16812_v34 = vsel %vm6147_vm7, -3e+38, %v16038_v40  ;;  %v16818_v46 = vsel %vm6148_vm0, -3e+38, %v19184_v18 }
 0xc74   : > { %vm6599_vm12 = vcmp.ge.f32.partialorder %v16314_v13, %v6508_v11  ;;  %vm6600_vm3 = vcmp.ge.f32.partialorder %v19185_v36, %v6508_v11  ;;  %6561 = vmax.xlane.f32.xlu1 %v6560_v63  ;;  %v6563_v20 = vmax.f32 %v16812_v34, %v16818_v46 }
 0xc75   : > { %v6663_v62 = vsel %vm6599_vm12, %v9477_v10, 256.0  ;;  %v6664_v9 = vsel %vm6600_vm3, %v9479_v24, 256.0  ;;  %v6511_v30 = vpop.xlane.xlu0 %6510 }
 0xc76   : > { %v6730_v40 = vmin.f32 %v6663_v62, %v6664_v9  ;;  %vm6601_vm2 = vcmp.ge.f32.partialorder %v16332_v59, %v6511_v30  ;;  %vm6602_vm11 = vcmp.ge.f32.partialorder %v19186_v48, %v6511_v30  ;;  %6564 = vmax.xlane.f32.xlu0 %v6563_v20 }
 0xc77   : > { %v16828_v16 = vpop.xlane.xlu1 %6077  ;;  %v6665_v13 = vsel %vm6601_vm2, %v9477_v10, 256.0  ;;  %v6666_v19 = vsel %vm6602_vm11, %v9479_v24, 256.0  ;;  %vm8392_vm11 = vmpackc.low %vm6145_vm15, %vm6143_vm1 }
 0xc78   : > { %vm6149_vm4 = vcmp.eq.f32.partialorder %v9477_v10, %v16828_v16  ;;  %vm6150_vm5 = vcmp.eq.f32.partialorder %v9479_v24, %v16828_v16  ;;  %6731 = vmin.xlane.f32.xlu1 %v6730_v40  ;;  %v6733_v58 = vmin.f32 %v6665_v13, %v6666_v19 }
 0xc79   : > { %v16840_v59 = vsel %vm6149_vm4, -3e+38, %v19187_v1  ;;  %v16846_v60 = vsel %vm6150_vm5, -3e+38, %v19188_v12  ;;  %v16850_v7 = vpop.xlane.xlu0 %6080  ;;  %vm8394_vm1 = vmpackc.low %vm6150_vm5, %vm6148_vm0 }
 0xc7a   : > { %v6566_v35 = vmax.f32 %v16840_v59, %v16846_v60  ;;  %8389 = vmatpush1.bf16.xpose.msk.msra.mxu1 %vm16677_vm13, %v19169_v54  ;;  %vm6151_vm6 = vcmp.eq.f32.partialorder %v9477_v10, %v16850_v7  ;;  %vm6152_vm14 = vcmp.eq.f32.partialorder %v9479_v24, %v16850_v7  ;;  %6734 = vmin.xlane.f32.xlu0 %v6733_v58 }
 0xc7b   : > { %8391 = vmatprep.subr.msk.bf16.mxu1 %vm8390_vm9, %v19169_v54  ;;  %v16870_v14 = vsel %vm6151_vm6, -3e+38, %v19189_v51  ;;  %v16876_v55 = vsel %vm6152_vm14, -3e+38, %v19190_v31  ;;  %v6514_v3 = vpop.xlane.xlu1 %6513 }
 0xc7c   : > { %6567 = vmax.xlane.f32.xlu1 %v6566_v35  ;;  %v6569_v28 = vmax.f32 %v16870_v14, %v16876_v55  ;;  %vm6603_vm13 = vcmp.ge.f32.partialorder %v16364_v6, %v6514_v3  ;;  %vm6604_vm10 = vcmp.ge.f32.partialorder %v16371_v8, %v6514_v3 }
 0xc7d   : > { %v6667_v47 = vsel %vm6603_vm13, %v9477_v10, 256.0  ;;  %v6668_v15 = vsel %vm6604_vm10, %v9479_v24, 256.0  ;;  %v6517_v63 = vpop.xlane.xlu0 %6516 }
 0xc7e   : > { %v6736_v11 = vmin.f32 %v6667_v47, %v6668_v15  ;;  %vm6605_vm8 = vcmp.ge.f32.partialorder %v16392_v32, %v6517_v63  ;;  %vm6606_vm12 = vcmp.ge.f32.partialorder %v16397_v45, %v6517_v63  ;;  %6570 = vmax.xlane.f32.xlu0 %v6569_v28  ;;  %v19194_v15 = vld [vmem:[#allocation26_spill] sm:$0xff] }
 0xc7f   : > { %v6669_v18 = vsel %vm6605_vm8, %v9477_v10, 256.0  ;;  %v6670_v36 = vsel %vm6606_vm12, %v9479_v24, 256.0  ;;  %v16888_v20 = vpop.xlane.xlu1 %6083 }
 0xc80   : > { %v6739_v6 = vmin.f32 %v6669_v18, %v6670_v36  ;;  %vm6153_vm3 = vcmp.eq.f32.partialorder %v9477_v10, %v16888_v20  ;;  %vm6154_vm2 = vcmp.eq.f32.partialorder %v9479_v24, %v16888_v20  ;;  %6737 = vmin.xlane.f32.xlu1 %v6736_v11  ;;  %v19195_v11 = vld [vmem:[#allocation73_spill] sm:$0xff] }
 0xc81   : > { %v16904_v8 = vsel %vm6153_vm3, -3e+38, %v16101_v2  ;;  %v16910_v32 = vsel %vm6154_vm2, -3e+38, %v16107_v25  ;;  %v16912_v45 = vpop.xlane.xlu0 %6086  ;;  %v19191_v25 = vld [vmem:[#allocation30_spill] sm:$0xff] }
 0xc82   : > { %v6572_v50 = vmax.f32 %v16904_v8, %v16910_v32  ;;  %8393 = vmatpush1.bf16.xpose.msk.msra.mxu1 %vm8392_vm11, %v19169_v54  ;;  %vm6155_vm15 = vcmp.eq.f32.partialorder %v9477_v10, %v16912_v45  ;;  %vm6156_vm9 = vcmp.eq.f32.partialorder %v9479_v24, %v16912_v45  ;;  %6740 = vmin.xlane.f32.xlu0 %v6739_v6  ;;  %vm8396_vm11 = vmpackc.low %vm6149_vm4, %vm6147_vm7  ;;  %v19196_v6 = vld [vmem:[#allocation63_spill] sm:$0xff] }
 0xc83   : > { %8395 = vmatprep.subr.msk.bf16.mxu1 %vm8394_vm1, %v19169_v54  ;;  %v16932_v2 = vsel %vm6155_vm15, -3e+38, %v16115_v61  ;;  %v16938_v5 = vsel %vm6156_vm9, -3e+38, %v19191_v25  ;;  %v6520_v62 = vpop.xlane.xlu1 %6519  ;;  %vm8398_vm7 = vmpackc.low %vm6154_vm2, %vm6152_vm14 }
 0xc84   : > { %v6575_v9 = vmax.f32 %v16932_v2, %v16938_v5  ;;  %vm6607_vm0 = vcmp.ge.f32.partialorder %v16424_v33, %v6520_v62  ;;  %vm6608_vm5 = vcmp.ge.f32.partialorder %v16431_v53, %v6520_v62  ;;  %6573 = vmax.xlane.f32.xlu1 %v6572_v50  ;;  %v19197_v50 = vld [vmem:[#allocation64_spill] sm:$0xff] }
 0xc85   : > { %v6671_v40 = vsel %vm6607_vm0, %v9477_v10, 256.0  ;;  %v6672_v61 = vsel %vm6608_vm5, %v9479_v24, 256.0  ;;  %v6523_v30 = vpop.xlane.xlu0 %6522 }
 0xc86   : > { %v6742_v48 = vmin.f32 %v6671_v40, %v6672_v61  ;;  %vm6609_vm13 = vcmp.ge.f32.partialorder %v16452_v21, %v6523_v30  ;;  %vm6610_vm10 = vcmp.ge.f32.partialorder %v16457_v22, %v6523_v30  ;;  %6576 = vmax.xlane.f32.xlu0 %v6575_v9  ;;  %v19198_v61 = vld [vmem:[#allocation57_spill] sm:$0xff]  ;;  %v19199_v30 = vld [vmem:[#allocation47_spill] sm:$0xff] }
 0xc87   : > { %v6673_v13 = vsel %vm6609_vm13, %v9477_v10, 256.0  ;;  %v6674_v19 = vsel %vm6610_vm10, %v9479_v24, 256.0  ;;  %v16950_v58 = vpop.xlane.xlu1 %6089 }
 0xc88   : > { %v6745_v33 = vmin.f32 %v6673_v13, %v6674_v19  ;;  %vm6157_vm8 = vcmp.eq.f32.partialorder %v9477_v10, %v16950_v58  ;;  %vm6158_vm12 = vcmp.eq.f32.partialorder %v9479_v24, %v16950_v58  ;;  %6743 = vmin.xlane.f32.xlu1 %v6742_v48  ;;  %v19202_v58 = vld [vmem:[#allocation19_spill] sm:$0xff] }
 0xc89   : > { %v16966_v22 = vsel %vm6157_vm8, -3e+38, %v16137_v49  ;;  %v16972_v53 = vsel %vm6158_vm12, -3e+38, %v16143_v38  ;;  %v16974_v21 = vpop.xlane.xlu0 %6092 }
 0xc8a   : > { %v6578_v39 = vmax.f32 %v16966_v22, %v16972_v53  ;;  %8397 = vmatpush1.bf16.xpose.msk.msra.mxu1 %vm8396_vm11, %v19169_v54  ;;  %vm6159_vm4 = vcmp.eq.f32.partialorder %v9477_v10, %v16974_v21  ;;  %vm6160_vm1 = vcmp.eq.f32.partialorder %v9479_v24, %v16974_v21  ;;  %6746 = vmin.xlane.f32.xlu0 %v6745_v33  ;;  %vm8400_vm11 = vmpackc.low %vm6153_vm3, %vm6151_vm6  ;;  %v19210_v21 = vld [vmem:[#allocation32_spill] sm:$0xff] }
 0xc8b   : > { %8399 = vmatprep.subr.msk.bf16.mxu1 %vm8398_vm7, %v19169_v54  ;;  %v16994_v49 = vsel %vm6159_vm4, -3e+38, %v16151_v43  ;;  %v17000_v38 = vsel %vm6160_vm1, -3e+38, %v16157_v41  ;;  %v6526_v16 = vpop.xlane.xlu1 %6525  ;;  %vm8402_vm6 = vmpackc.low %vm6158_vm12, %vm6156_vm9 }
 0xc8c   : > { %v6581_v1 = vmax.f32 %v16994_v49, %v17000_v38  ;;  %vm6611_vm14 = vcmp.ge.f32.partialorder %v16478_v0, %v6526_v16  ;;  %vm6612_vm2 = vcmp.ge.f32.partialorder %v16481_v26, %v6526_v16  ;;  %6579 = vmax.xlane.f32.xlu1 %v6578_v39  ;;  %v19192_v26 = vld [vmem:[#allocation23_spill] sm:$0xff]  ;;  %v19200_v39 = vld [vmem:[#allocation38_spill] sm:$0xff] }
 0xc8d   : > { %v6675_v12 = vsel %vm6611_vm14, %v9477_v10, 256.0  ;;  %v6676_v43 = vsel %vm6612_vm2, %v9479_v24, 256.0  ;;  %v6529_v35 = vpop.xlane.xlu0 %6528 }
 0xc8e   : > { %v6748_v51 = vmin.f32 %v6675_v12, %v6676_v43  ;;  %vm6613_vm0 = vcmp.ge.f32.partialorder %v16496_v17, %v6529_v35  ;;  %vm6614_vm5 = vcmp.ge.f32.partialorder %v16501_v57, %v6529_v35  ;;  %6582 = vmax.xlane.f32.xlu0 %v6581_v1  ;;  %v19193_v57 = vld [vmem:[#allocation27_spill] sm:$0xff] }
 0xc8f   : > { %v6677_v41 = vsel %vm6613_vm0, %v9477_v10, 256.0  ;;  %v6678_v31 = vsel %vm6614_vm5, %v9479_v24, 256.0  ;;  %v17012_v3 = vpop.xlane.xlu1 %6095  ;;  %v19201_v1 = vld [vmem:[#allocation39_spill] sm:$0xff] }
 0xc90   : > { %v6751_v0 = vmin.f32 %v6677_v41, %v6678_v31  ;;  %vm6161_vm13 = vcmp.eq.f32.partialorder %v9477_v10, %v17012_v3  ;;  %vm6162_vm10 = vcmp.eq.f32.partialorder %v9479_v24, %v17012_v3  ;;  %6749 = vmin.xlane.f32.xlu1 %v6748_v51  ;;  %v19203_v35 = vld [vmem:[#allocation51_spill] sm:$0xff] }
 0xc91   : > { %v17028_v17 = vsel %vm6161_vm13, -3e+38, %v19192_v26  ;;  %v17034_v28 = vsel %vm6162_vm10, -3e+38, %v19193_v57  ;;  %v19204_v26 = vld [vmem:[#allocation68_spill] sm:$0xff]  ;;  %v19205_v57 = vld [vmem:[#allocation25_spill] sm:$0xff] }
 0xc92   : > { %v17036_v47 = vpop.xlane.xlu0 %6098  ;;  %v6584_v7 = vmax.f32 %v17028_v17, %v17034_v28  ;;  %8401 = vmatpush1.bf16.xpose.msk.msra.mxu1 %vm8400_vm11, %v19169_v54  ;;  %6752 = vmin.xlane.f32.xlu0 %v6751_v0  ;;  %vm8404_vm11 = vmpackc.low %vm6157_vm8, %vm6155_vm15 }
 0xc93   : > { %vm6163_vm3 = vcmp.eq.f32.partialorder %v9477_v10, %v17036_v47  ;;  %vm6164_vm7 = vcmp.eq.f32.partialorder %v9479_v24, %v17036_v47  ;;  %8403 = vmatprep.subr.msk.bf16.mxu1 %vm8402_vm6, %v19169_v54  ;;  %vm8406_vm15 = vmpackc.low %vm6162_vm10, %vm6160_vm1 }
 0xc94   : > { %v17056_v63 = vsel %vm6163_vm3, -3e+38, %v19194_v15  ;;  %v17062_v18 = vsel %vm6164_vm7, -3e+38, %v19195_v11  ;;  %v6532_v36 = vpop.xlane.xlu1 %6531  ;;  %6585 = vmax.xlane.f32.xlu1 %v6584_v7 }
 0xc95   : > { %v6587_v20 = vmax.f32 %v17056_v63, %v17062_v18  ;;  %vm6615_vm9 = vcmp.ge.f32.partialorder %v19196_v6, %v6532_v36  ;;  %vm6616_vm12 = vcmp.ge.f32.partialorder %v19197_v50, %v6532_v36  ;;  %v19207_v6 = vld [vmem:[#allocation40_spill] sm:$0xff] }
 0xc96   : > { %v6679_v25 = vsel %vm6615_vm9, %v9477_v10, 256.0  ;;  %v6680_v62 = vsel %vm6616_vm12, %v9479_v24, 256.0  ;;  %v6535_v9 = vpop.xlane.xlu0 %6534 }
 0xc97   : > { %v6754_v40 = vmin.f32 %v6679_v25, %v6680_v62  ;;  %vm6617_vm14 = vcmp.ge.f32.partialorder %v19198_v61, %v6535_v9  ;;  %vm6618_vm2 = vcmp.ge.f32.partialorder %v19199_v30, %v6535_v9  ;;  %6588 = vmax.xlane.f32.xlu0 %v6587_v20  ;;  %v19206_v20 = vld [vmem:[#allocation75_spill] sm:$0xff]  ;;  %v19209_v61 = vld [vmem:[#allocation76_spill] sm:$0xff] }
 0xc98   : > { %v6681_v48 = vsel %vm6617_vm14, %v9477_v10, 256.0  ;;  %v6682_v13 = vsel %vm6618_vm2, %v9479_v24, 256.0  ;;  %v17074_v19 = vpop.xlane.xlu1 %6101 }
 0xc99   : > { %v6757_v33 = vmin.f32 %v6681_v48, %v6682_v13  ;;  %vm6165_vm0 = vcmp.eq.f32.partialorder %v9477_v10, %v17074_v19  ;;  %vm6166_vm5 = vcmp.eq.f32.partialorder %v9479_v24, %v17074_v19  ;;  %6755 = vmin.xlane.f32.xlu1 %v6754_v40  ;;  %v19208_v40 = vld [vmem:[#allocation50_spill] sm:$0xff] }
 0xc9a   : > { %v17090_v16 = vsel %vm6165_vm0, -3e+38, %v19200_v39  ;;  %v17096_v12 = vsel %vm6166_vm5, -3e+38, %v19201_v1  ;;  %v6541_v43 = vpop.xlane.xlu0 %6540  ;;  %8405 = vmatpush1.bf16.xpose.msk.msra.mxu1 %vm8404_vm11, %v19169_v54  ;;  %vm8408_vm11 = vmpackc.low %vm6161_vm13, %vm6159_vm4  ;;  %v19211_v39 = vld [vmem:[#allocation56_spill] sm:$0xff] }
 0xc9b   : > { %v6590_v45 = vmax.f32 %v17090_v16, %v17096_v12  ;;  %vm6621_vm8 = vcmp.ge.f32.partialorder %v19202_v58, %v6541_v43  ;;  %vm6622_vm6 = vcmp.ge.f32.partialorder %v19203_v35, %v6541_v43  ;;  %6758 = vmin.xlane.f32.xlu0 %v6757_v33  ;;  %8407 = vmatprep.subr.msk.bf16.mxu1 %vm8406_vm15, %v19169_v54  ;;  %vm8410_vm15 = vmpackc.low %vm6166_vm5, %vm6164_vm7  ;;  %v19212_v58 = vld [vmem:[#allocation49_spill] sm:$0xff]  ;;  %v19213_v35 = vld [vmem:[#allocation70_spill] sm:$0xff] }
 0xc9c   : > { %v6685_v51 = vsel %vm6621_vm8, %v9477_v10, 256.0  ;;  %v6686_v41 = vsel %vm6622_vm6, %v9479_v24, 256.0  ;;  %v6538_v31 = vpop.xlane.xlu1 %6537 }
 0xc9d   : > { %v6763_v0 = vmin.f32 %v6685_v51, %v6686_v41  ;;  %vm6619_vm1 = vcmp.ge.f32.partialorder %v19204_v26, %v6538_v31  ;;  %vm6620_vm10 = vcmp.ge.f32.partialorder %v19205_v57, %v6538_v31  ;;  %6591 = vmax.xlane.f32.xlu1 %v6590_v45 }
 0xc9e   : > { %v6683_v7 = vsel %vm6619_vm1, %v9477_v10, 256.0  ;;  %v6684_v15 = vsel %vm6620_vm10, %v9479_v24, 256.0  ;;  %v6547_v11 = vpop.xlane.xlu0 %6546  ;;  %vm8412_vm1 = vmpackc.low %vm6165_vm0, %vm6163_vm3 }
 0xc9f   : > { %v6760_v36 = vmin.f32 %v6683_v7, %v6684_v15  ;;  %vm6625_vm9 = vcmp.ge.f32.partialorder %v19206_v20, %v6547_v11  ;;  %vm6626_vm12 = vcmp.ge.f32.partialorder %v19207_v6, %v6547_v11  ;;  %6764 = vmin.xlane.f32.xlu0 %v6763_v0  ;;  %v17158_v15 = vld [vmem:[%s9231_s2] ss:$8 sps:$4 sm:$0xff]  }
 0xca0   : > { %v6689_v50 = vsel %vm6625_vm9, %v9477_v10, 256.0  ;;  %v6690_v25 = vsel %vm6626_vm12, %v9479_v24, 256.0  ;;  %v6544_v62 = vpop.xlane.xlu1 %6543  ;;  %v19214_v6 = vld [vmem:[#allocation66_spill] sm:$0xff] }
 0xca1   : > { %v6769_v9 = vmin.f32 %v6689_v50, %v6690_v25  ;;  %vm6623_vm14 = vcmp.ge.f32.partialorder %v19208_v40, %v6544_v62  ;;  %vm6624_vm2 = vcmp.ge.f32.partialorder %v19209_v61, %v6544_v62  ;;  %6761 = vmin.xlane.f32.xlu1 %v6760_v36  ;;  %v19217_v40 = vld [vmem:[#allocation53_spill] sm:$0xff]  ;;  %v19218_v61 = vld [vmem:[#allocation46_spill] sm:$0xff] }
 0xca2   : > { %v6687_v30 = vsel %vm6623_vm14, %v9477_v10, 256.0  ;;  %v6688_v48 = vsel %vm6624_vm2, %v9479_v24, 256.0  ;;  %v6553_v13 = vpop.xlane.xlu0 %6552  ;;  %8409 = vmatpush1.bf16.xpose.msk.msra.mxu1 %vm8408_vm11, %v19169_v54 }
 0xca3   : > { %v6766_v33 = vmin.f32 %v6687_v30, %v6688_v48  ;;  %vm6629_vm8 = vcmp.ge.f32.partialorder %v19210_v21, %v6553_v13  ;;  %vm6630_vm6 = vcmp.ge.f32.partialorder %v19211_v39, %v6553_v13  ;;  %6770 = vmin.xlane.f32.xlu0 %v6769_v9  ;;  %8411 = vmatprep.subr.msk.bf16.mxu1 %vm8410_vm15, %v19169_v54  ;;  %v19221_v21 = vld [vmem:[#allocation65_spill] sm:$0xff] }
 0xca4   : > { %v6693_v3 = vsel %vm6629_vm8, %v9477_v10, 256.0  ;;  %v6694_v1 = vsel %vm6630_vm6, %v9479_v24, 256.0  ;;  %v6550_v43 = vpop.xlane.xlu1 %6549  ;;  %v19219_v30 = vmax.f32 %v19217_v40, %v19218_v61 }
 0xca5   : > { %v6775_v45 = vmin.f32 %v6693_v3, %v6694_v1  ;;  %vm6627_vm4 = vcmp.ge.f32.partialorder %v19212_v58, %v6550_v43  ;;  %vm6628_vm13 = vcmp.ge.f32.partialorder %v19213_v35, %v6550_v43  ;;  %6767 = vmin.xlane.f32.xlu1 %v6766_v33  ;;  %v19220_v33 = vld [vmem:[#allocation41_spill] sm:$0xff] }
 0xca6   : > { %v6691_v51 = vsel %vm6627_vm4, %v9477_v10, 256.0  ;;  %v6692_v41 = vsel %vm6628_vm13, %v9479_v24, 256.0  ;;  %v19222_v39 = vmax.f32 %v19220_v33, %v19221_v21  ;;  %v19223_v35 = vld [vmem:[#allocation37_spill] sm:$0xff]  ;;  %v19235_v21 = vld [vmem:[#allocation74_spill] sm:$0xff] }
 0xca7   : > { %v6772_v31 = vmin.f32 %v6691_v51, %v6692_v41  ;;  %6776 = vmin.xlane.f32.xlu0 %v6775_v45  ;;  %v19224_v51 = vld [vmem:[#allocation55_spill] sm:$0xff] }
 0xca8   : > { %v6556_v0 = vpop.xlane.xlu1 %6555  ;;  %v19225_v41 = vmax.f32 %v19223_v35, %v19224_v51 }
 0xca9   : > { %vm6631_vm7 = vcmp.ge.f32.partialorder %v16670_v29, %v6556_v0  ;;  %vm6632_vm5 = vcmp.ge.f32.partialorder %v16673_v56, %v6556_v0  ;;  %6773 = vmin.xlane.f32.xlu1 %v6772_v31 }
 0xcaa   : > { %v6695_v26 = vsel %vm6631_vm7, %v9477_v10, 256.0  ;;  %v6696_v57 = vsel %vm6632_vm5, %v9479_v24, 256.0  ;;  %8413 = vmatpush1.bf16.xpose.msk.msra.mxu1 %vm8412_vm1, %v19169_v54 }
 0xcab   : > { %v6778_v7 = vmin.f32 %v6695_v26, %v6696_v57 }
 0xcad   : > { %6779 = vmin.xlane.f32.xlu1 %v6778_v7 }
 0xcb1   : > { %6360 = vmatmul.mubr.bf16.vlgmr.msra.gmra.mrb[76].mxu1 %v17158_v15 }
 0xcb2   : > { %6404 = vmatprep.mubr.bf16.mxu1 %v19171_v27 }
 0xcf7   : > { %v6723_v29 = vpop.xlane.xlu0 %6722 }
 0xcf8   : > { %vm6818_vm10 = vcmp.eq.f32.partialorder %v9479_v24, %v6723_v29  ;;  %vm6817_vm14 = vcmp.eq.f32.partialorder %v9477_v10, %v6723_v29  ;;  %v19227_v29 = vld [vmem:[#allocation60_spill] sm:$0xff] }
 0xcfb   : > { %v6559_v56 = vpop.xlane.xlu0 %6558 }
 0xcfc   : > { %vm6633_vm3 = vcmp.ge.f32.partialorder %v16758_v4, %v6559_v56  ;;  %vm6634_vm0 = vcmp.ge.f32.partialorder %v16764_v44, %v6559_v56  ;;  %v19215_v44 = vld [vmem:[#allocation45_spill] sm:$0xff] }
 0xcfd   : > { %v6726_v47 = vpop.xlane.xlu1 %6725  ;;  %v6697_v19 = vsel %vm6633_vm3, %v9477_v10, 256.0  ;;  %v6698_v11 = vsel %vm6634_vm0, %v9479_v24, 256.0  ;;  %v19216_v50 = vmax.f32 %v19214_v6, %v19215_v44 }
 0xcfe   : > { %vm6819_vm9 = vcmp.eq.f32.partialorder %v9477_v10, %v6726_v47  ;;  %vm6820_vm12 = vcmp.eq.f32.partialorder %v9479_v24, %v6726_v47  ;;  %v6781_v36 = vmin.f32 %v6697_v19, %v6698_v11 }
 0xcff   : > { %vm8480_vm2 = vmpackc.low %vm6820_vm12, %vm6818_vm10  ;;  %v5692_v20 = vpop.f32.mrb[68].mxu1  ;;  %v6729_v4 = vpop.xlane.xlu0 %6728 }
 0xd00   : > { %vm8482_vm11 = vmpackc.low %vm6819_vm9, %vm6817_vm14  ;;  %8481 = vmatprep.subr.msk.bf16.mxu0 %vm8480_vm2, %v19169_v54  ;;  %v17174_v25 = vmax.f32 %v19216_v50, %v5692_v20  ;;  %v5694_v62 = vpop.f32.mrb[69].mxu1  ;;  %6782 = vmin.xlane.f32.xlu0 %v6781_v36  ;;  %vm6822_vm6 = vcmp.eq.f32.partialorder %v9479_v24, %v6729_v4  ;;  %vm6821_vm1 = vcmp.eq.f32.partialorder %v9477_v10, %v6729_v4  ;;  %v19229_v36 = vld [vmem:[#allocation48_spill] sm:$0xff]  ;;  %v19230_v20 = vld [vmem:[#allocation59_spill] sm:$0xff] }
 0xd01   : > { %v6562_v9 = vpop.xlane.xlu1 %6561  ;;  %8483 = vmatpush1.bf16.xpose.msk.msra.mxu0 %vm8482_vm11, %v19169_v54  ;;  %v17180_v48 = vmax.f32 %v19219_v30, %v5694_v62  ;;  %v5696_v13 = vpop.f32.mrb[70].mxu1  ;;  %v19231_v4 = vmax.f32 %v19229_v36, %v19230_v20  ;;  %v19232_v50 = vld [vmem:[#allocation31_spill] sm:$0xff]  ;;  %v19233_v62 = vld [vmem:[#allocation61_spill] sm:$0xff] }
 0xd02   : > { %vm6635_vm15 = vcmp.ge.f32.partialorder %v16786_v42, %v6562_v9  ;;  %vm6636_vm8 = vcmp.ge.f32.partialorder %v16792_v52, %v6562_v9  ;;  %v17187_v3 = vmax.f32 %v19222_v39, %v5696_v13  ;;  %v5698_v45 = vpop.f32.mrb[71].mxu1  ;;  %v19234_v9 = vmax.f32 %v19232_v50, %v19233_v62  ;;  %v19236_v39 = vld [vmem:[#allocation62_spill] sm:$0xff] }
 0xd03   : > { %v6699_v1 = vsel %vm6635_vm15, %v9477_v10, 256.0  ;;  %v6700_v43 = vsel %vm6636_vm8, %v9479_v24, 256.0  ;;  %v17194_v31 = vmax.f32 %v19225_v41, %v5698_v45  ;;  %v6565_v0 = vpop.xlane.xlu0 %6564 }
 0xd04   : > { %v6784_v58 = vmin.f32 %v6699_v1, %v6700_v43  ;;  %vm6637_vm4 = vcmp.ge.f32.partialorder %v16812_v34, %v6565_v0  ;;  %vm6638_vm13 = vcmp.ge.f32.partialorder %v16818_v46, %v6565_v0  ;;  %v19226_v46 = vld [vmem:[#allocation44_spill] sm:$0xff]  ;;  %v19237_v1 = vmax.f32 %v19235_v21, %v19236_v39  ;;  %v658_v21 = vld [vmem:[#allocation10] sm:$0xff]  ;;  %v659_v39 = vld [vmem:[#allocation10 + $0x8] sm:$0xff] }
 0xd05   : > { %v6732_v42 = vpop.xlane.xlu1 %6731  ;;  %v6701_v52 = vsel %vm6637_vm4, %v9477_v10, 256.0  ;;  %v6702_v26 = vsel %vm6638_vm13, %v9479_v24, 256.0  ;;  %v19228_v56 = vmax.f32 %v19226_v46, %v19227_v29 }
 0xd06   : > { %vm6823_vm7 = vcmp.eq.f32.partialorder %v9477_v10, %v6732_v42  ;;  %vm6824_vm5 = vcmp.eq.f32.partialorder %v9479_v24, %v6732_v42  ;;  %6785 = vmin.xlane.f32.xlu1 %v6784_v58  ;;  %v6787_v57 = vmin.f32 %v6701_v52, %v6702_v26 }
 0xd07   : > { %vm8484_vm10 = vmpackc.low %vm6824_vm5, %vm6822_vm6  ;;  %v5702_v7 = vpop.f32.mrb[72].mxu1  ;;  %v6735_v34 = vpop.xlane.xlu0 %6734 }
 0xd08   : > { %vm8486_vm3 = vmpackc.low %vm6823_vm7, %vm6821_vm1  ;;  %8485 = vmatprep.subr.msk.bf16.mxu0 %vm8484_vm10, %v19169_v54  ;;  %v17208_v47 = vmax.f32 %v19228_v56, %v5702_v7  ;;  %v5704_v19 = vpop.f32.mrb[73].mxu1  ;;  %6788 = vmin.xlane.f32.xlu0 %v6787_v57  ;;  %vm6826_vm2 = vcmp.eq.f32.partialorder %v9479_v24, %v6735_v34  ;;  %vm6825_vm8 = vcmp.eq.f32.partialorder %v9477_v10, %v6735_v34 }
 0xd09   : > { %v6568_v11 = vpop.xlane.xlu1 %6567  ;;  %8487 = vmatpush1.bf16.xpose.msk.msra.mxu0 %vm8486_vm3, %v19169_v54  ;;  %v17214_v6 = vmax.f32 %v19231_v4, %v5704_v19  ;;  %v5706_v44 = vpop.f32.mrb[74].mxu1 }
 0xd0a   : > { %vm6639_vm0 = vcmp.ge.f32.partialorder %v16840_v59, %v6568_v11  ;;  %vm6640_vm9 = vcmp.ge.f32.partialorder %v16846_v60, %v6568_v11  ;;  %v17221_v40 = vmax.f32 %v19234_v9, %v5706_v44  ;;  %v5708_v13 = vpop.f32.mrb[75].mxu1 }
 0xd0b   : > { %v6703_v61 = vsel %vm6639_vm0, %v9477_v10, 256.0  ;;  %v6704_v30 = vsel %vm6640_vm9, %v9479_v24, 256.0  ;;  %v17228_v43 = vmax.f32 %v19237_v1, %v5708_v13  ;;  %v6571_v45 = vpop.xlane.xlu0 %6570 }
 0xd0c   : > { %v6790_v33 = vmin.f32 %v6703_v61, %v6704_v30  ;;  %vm6641_vm12 = vcmp.ge.f32.partialorder %v16870_v14, %v6571_v45  ;;  %vm6642_vm14 = vcmp.ge.f32.partialorder %v16876_v55, %v6571_v45  ;;  %v660_v45 = vld [vmem:[#allocation10 + $0x10] sm:$0xff] }
 0xd0d   : > { %v6705_v59 = vsel %vm6641_vm12, %v9477_v10, 256.0  ;;  %v6706_v60 = vsel %vm6642_vm14, %v9479_v24, 256.0  ;;  %v6738_v58 = vpop.xlane.xlu1 %6737 }
 0xd0e   : > { %6791 = vmin.xlane.f32.xlu1 %v6790_v33  ;;  %v6793_v35 = vmin.f32 %v6705_v59, %v6706_v60  ;;  %vm6827_vm11 = vcmp.eq.f32.partialorder %v9477_v10, %v6738_v58  ;;  %vm6828_vm15 = vcmp.eq.f32.partialorder %v9479_v24, %v6738_v58  ;;  %v661_v59 = vld [vmem:[#allocation10 + $0x18] sm:$0xff] }
 0xd0f   : > { %vm8488_vm6 = vmpackc.low %vm6828_vm15, %vm6826_vm2  ;;  %v6741_v51 = vpop.xlane.xlu0 %6740 }
 0xd10   : > { %vm8490_vm4 = vmpackc.low %vm6827_vm11, %vm6825_vm8  ;;  %8489 = vmatprep.subr.msk.bf16.mxu0 %vm8488_vm6, %v19169_v54  ;;  %6794 = vmin.xlane.f32.xlu0 %v6793_v35  ;;  %vm6830_vm10 = vcmp.eq.f32.partialorder %v9479_v24, %v6741_v51  ;;  %vm6829_vm9 = vcmp.eq.f32.partialorder %v9477_v10, %v6741_v51 }
 0xd11   : > { %v6574_v14 = vpop.xlane.xlu1 %6573  ;;  %8491 = vmatpush1.bf16.xpose.msk.msra.mxu0 %vm8490_vm4, %v19169_v54 }
 0xd12   : > { %vm6643_vm13 = vcmp.ge.f32.partialorder %v16904_v8, %v6574_v14  ;;  %vm6644_vm7 = vcmp.ge.f32.partialorder %v16910_v32, %v6574_v14 }
 0xd13   : > { %v6707_v55 = vsel %vm6643_vm13, %v9477_v10, 256.0  ;;  %v6708_v41 = vsel %vm6644_vm7, %v9479_v24, 256.0  ;;  %v6577_v0 = vpop.xlane.xlu0 %6576 }
 0xd14   : > { %v6796_v42 = vmin.f32 %v6707_v55, %v6708_v41  ;;  %vm6645_vm5 = vcmp.ge.f32.partialorder %v16932_v2, %v6577_v0  ;;  %vm6646_vm1 = vcmp.ge.f32.partialorder %v16938_v5, %v6577_v0 }
 0xd15   : > { %v6709_v52 = vsel %vm6645_vm5, %v9477_v10, 256.0  ;;  %v6710_v26 = vsel %vm6646_vm1, %v9479_v24, 256.0  ;;  %v6744_v57 = vpop.xlane.xlu1 %6743 }
 0xd16   : > { %v6799_v8 = vmin.f32 %v6709_v52, %v6710_v26  ;;  %vm6831_vm3 = vcmp.eq.f32.partialorder %v9477_v10, %v6744_v57  ;;  %vm6832_vm0 = vcmp.eq.f32.partialorder %v9479_v24, %v6744_v57  ;;  %6797 = vmin.xlane.f32.xlu1 %v6796_v42 }
 0xd17   : > { %vm8492_vm12 = vmpackc.low %vm6832_vm0, %vm6830_vm10  ;;  %v6747_v32 = vpop.xlane.xlu0 %6746 }
 0xd18   : > { %vm8494_vm14 = vmpackc.low %vm6831_vm3, %vm6829_vm9  ;;  %8493 = vmatprep.subr.msk.bf16.mxu0 %vm8492_vm12, %v19169_v54  ;;  %6800 = vmin.xlane.f32.xlu0 %v6799_v8  ;;  %vm6834_vm6 = vcmp.eq.f32.partialorder %v9479_v24, %v6747_v32  ;;  %vm6833_vm7 = vcmp.eq.f32.partialorder %v9477_v10, %v6747_v32 }
 0xd19   : > { %v6580_v2 = vpop.xlane.xlu1 %6579  ;;  %8495 = vmatpush1.bf16.xpose.msk.msra.mxu0 %vm8494_vm14, %v19169_v54 }
 0xd1a   : > { %vm6647_vm2 = vcmp.ge.f32.partialorder %v16966_v22, %v6580_v2  ;;  %vm6648_vm11 = vcmp.ge.f32.partialorder %v16972_v53, %v6580_v2 }
 0xd1b   : > { %v6711_v5 = vsel %vm6647_vm2, %v9477_v10, 256.0  ;;  %v6712_v7 = vsel %vm6648_vm11, %v9479_v24, 256.0  ;;  %v6583_v34 = vpop.xlane.xlu0 %6582 }
 0xd1c   : > { %v6802_v46 = vmin.f32 %v6711_v5, %v6712_v7  ;;  %vm6649_vm15 = vcmp.ge.f32.partialorder %v16994_v49, %v6583_v34  ;;  %vm6650_vm8 = vcmp.ge.f32.partialorder %v17000_v38, %v6583_v34 }
 0xd1d   : > { %v6713_v29 = vsel %vm6649_vm15, %v9477_v10, 256.0  ;;  %v6714_v56 = vsel %vm6650_vm8, %v9479_v24, 256.0  ;;  %v6750_v19 = vpop.xlane.xlu1 %6749 }
 0xd1e   : > { %v6805_v22 = vmin.f32 %v6713_v29, %v6714_v56  ;;  %vm6835_vm4 = vcmp.eq.f32.partialorder %v9477_v10, %v6750_v19  ;;  %vm6836_vm13 = vcmp.eq.f32.partialorder %v9479_v24, %v6750_v19  ;;  %6803 = vmin.xlane.f32.xlu1 %v6802_v46 }
 0xd1f   : > { %vm8496_vm5 = vmpackc.low %vm6836_vm13, %vm6834_vm6  ;;  %v6753_v53 = vpop.xlane.xlu0 %6752 }
 0xd20   : > { %vm8498_vm1 = vmpackc.low %vm6835_vm4, %vm6833_vm7  ;;  %8497 = vmatprep.subr.msk.bf16.mxu0 %vm8496_vm5, %v19169_v54  ;;  %6806 = vmin.xlane.f32.xlu0 %v6805_v22  ;;  %vm6838_vm12 = vcmp.eq.f32.partialorder %v9479_v24, %v6753_v53  ;;  %vm6837_vm11 = vcmp.eq.f32.partialorder %v9477_v10, %v6753_v53 }
 0xd21   : > { %v6586_v49 = vpop.xlane.xlu1 %6585  ;;  %8499 = vmatpush1.bf16.xpose.msk.msra.mxu0 %vm8498_vm1, %v19169_v54 }
 0xd22   : > { %vm6651_vm10 = vcmp.ge.f32.partialorder %v17028_v17, %v6586_v49  ;;  %vm6652_vm3 = vcmp.ge.f32.partialorder %v17034_v28, %v6586_v49 }
 0xd23   : > { %v6715_v38 = vsel %vm6651_vm10, %v9477_v10, 256.0  ;;  %v6716_v11 = vsel %vm6652_vm3, %v9479_v24, 256.0 }
 0xd24   : > { %v6589_v36 = vpop.xlane.xlu0 %6588  ;;  %v6808_v20 = vmin.f32 %v6715_v38, %v6716_v11 }
 0xd25   : > { %vm6653_vm0 = vcmp.ge.f32.partialorder %v17056_v63, %v6589_v36  ;;  %vm6654_vm9 = vcmp.ge.f32.partialorder %v17062_v18, %v6589_v36 }
 0xd26   : > { %v6717_v4 = vsel %vm6653_vm0, %v9477_v10, 256.0  ;;  %v6718_v44 = vsel %vm6654_vm9, %v9479_v24, 256.0  ;;  %v6756_v50 = vpop.xlane.xlu1 %6755  ;;  %6809 = vmin.xlane.f32.xlu1 %v6808_v20 }
 0xd27   : > { %v6811_v17 = vmin.f32 %v6717_v4, %v6718_v44  ;;  %vm6839_vm14 = vcmp.eq.f32.partialorder %v9477_v10, %v6756_v50  ;;  %vm6840_vm2 = vcmp.eq.f32.partialorder %v9479_v24, %v6756_v50  ;;  %v19242_v50 = vld [vmem:[#allocation34_spill] sm:$0xff] }
 0xd28   : > { %vm8500_vm15 = vmpackc.low %vm6840_vm2, %vm6838_vm12  ;;  %v6759_v28 = vpop.xlane.xlu0 %6758 }
 0xd29   : > { %vm8502_vm8 = vmpackc.low %vm6839_vm14, %vm6837_vm11  ;;  %8501 = vmatprep.subr.msk.bf16.mxu0 %vm8500_vm15, %v19169_v54  ;;  %6812 = vmin.xlane.f32.xlu0 %v6811_v17  ;;  %vm6842_vm13 = vcmp.eq.f32.partialorder %v9479_v24, %v6759_v28  ;;  %vm6841_vm1 = vcmp.eq.f32.partialorder %v9477_v10, %v6759_v28 }
 0xd2a   : > { %v6592_v63 = vpop.xlane.xlu1 %6591  ;;  %8503 = vmatpush1.bf16.xpose.msk.msra.mxu0 %vm8502_vm8, %v19169_v54 }
 0xd2b   : > { %vm6655_vm6 = vcmp.ge.f32.partialorder %v17090_v16, %v6592_v63  ;;  %vm6656_vm4 = vcmp.ge.f32.partialorder %v17096_v12, %v6592_v63 }
 0xd2c   : > { %v6719_v18 = vsel %vm6655_vm6, %v9477_v10, 256.0  ;;  %v6720_v62 = vsel %vm6656_vm4, %v9479_v24, 256.0  ;;  %v6765_v30 = vpop.xlane.xlu0 %6764 }
 0xd2d   : > { %v6814_v9 = vmin.f32 %v6719_v18, %v6720_v62  ;;  %vm6846_vm0 = vcmp.eq.f32.partialorder %v9479_v24, %v6765_v30  ;;  %vm6845_vm11 = vcmp.eq.f32.partialorder %v9477_v10, %v6765_v30  ;;  %v19243_v18 = vld [vmem:[#allocation35_spill] sm:$0xff] }
 0xd2e   : > { %v6762_v61 = vpop.xlane.xlu1 %6761 }
 0xd2f   : > { %vm6843_vm7 = vcmp.eq.f32.partialorder %v9477_v10, %v6762_v61  ;;  %vm6844_vm5 = vcmp.eq.f32.partialorder %v9479_v24, %v6762_v61  ;;  %6815 = vmin.xlane.f32.xlu1 %v6814_v9 }
 0xd30   : > { %vm8504_vm10 = vmpackc.low %vm6844_vm5, %vm6842_vm13  ;;  %v6771_v12 = vpop.xlane.xlu0 %6770 }
 0xd31   : > { %vm8506_vm3 = vmpackc.low %vm6843_vm7, %vm6841_vm1  ;;  %8505 = vmatprep.subr.msk.bf16.mxu0 %vm8504_vm10, %v19169_v54  ;;  %vm6850_vm15 = vcmp.eq.f32.partialorder %v9479_v24, %v6771_v12  ;;  %vm6849_vm7 = vcmp.eq.f32.partialorder %v9477_v10, %v6771_v12 }
 0xd32   : > { %v6768_v16 = vpop.xlane.xlu1 %6767  ;;  %8507 = vmatpush1.bf16.xpose.msk.msra.mxu0 %vm8506_vm3, %v19169_v54 }
 0xd33   : > { %vm6848_vm9 = vcmp.eq.f32.partialorder %v9479_v24, %v6768_v16  ;;  %vm6847_vm14 = vcmp.eq.f32.partialorder %v9477_v10, %v6768_v16  ;;  %v19244_v16 = vld [vmem:[#allocation36_spill] sm:$0xff] }
 0xd34   : > { %vm8508_vm12 = vmpackc.low %vm6848_vm9, %vm6846_vm0  ;;  %v6777_v1 = vpop.xlane.xlu0 %6776 }
 0xd35   : > { %8509 = vmatprep.subr.msk.bf16.mxu0 %vm8508_vm12, %v19169_v54  ;;  %vm8510_vm8 = vmpackc.low %vm6847_vm14, %vm6845_vm11  ;;  %vm6854_vm5 = vcmp.eq.f32.partialorder %v9479_v24, %v6777_v1  ;;  %vm6853_vm0 = vcmp.eq.f32.partialorder %v9477_v10, %v6777_v1  ;;  %vm19238_vm12 = vcmask 130048  }
 0xd36   : > { %v6774_v13 = vpop.xlane.xlu1 %6773 }
 0xd37   : > { %vm6852_vm2 = vcmp.eq.f32.partialorder %v9479_v24, %v6774_v13  ;;  %vm6851_vm4 = vcmp.eq.f32.partialorder %v9477_v10, %v6774_v13 }
 0xd38   : > { %vm8512_vm6 = vmpackc.low %vm6852_vm2, %vm6850_vm15 }
 0xd39   : > { %vm8514_vm1 = vmpackc.low %vm6851_vm4, %vm6849_vm7 }
 0xd3a   : > { %8511 = vmatpush1.bf16.xpose.msk.msra.mxu0 %vm8510_vm8, %v19169_v54  ;;  %v6780_v33 = vpop.xlane.xlu1 %6779  ;;  %vm19239_vm4 = vmmov %vm19238_vm12 }
 0xd3b   : > { %8513 = vmatprep.subr.msk.bf16.mxu0 %vm8512_vm6, %v19169_v54  ;;  %vm6856_vm13 = vcmp.eq.f32.partialorder %v9479_v24, %v6780_v33  ;;  %vm6855_vm3 = vcmp.eq.f32.partialorder %v9477_v10, %v6780_v33 }
 0xd3c   : > { %vm8516_vm10 = vmpackc.low %vm6856_vm13, %vm6854_vm5 }
 0xd3d   : > { %vm8518_vm9 = vmpackc.low %vm6855_vm3, %vm6853_vm0 }
 0xd3f   : > { %664 = vperm.xlu0 %8660, %v658_v21   ;;  %v19245_v21 = vld [vmem:[#allocation20_spill] sm:$0xff] }
 0xd40   : > { %669 = vperm.xlu1 %8661, %v659_v39  }
 0xd42   : > { %8515 = vmatpush1.bf16.xpose.msk.msra.mxu0 %vm8514_vm1, %v19169_v54 }
 0xd43   : > { %8517 = vmatprep.subr.msk.bf16.mxu0 %vm8516_vm10, %v19169_v54 }
 0xd44   : > { %674 = vperm.xlu1 %8661, %v660_v45  }
 0xd48   : > { %679 = vperm.xlu1 %8661, %v661_v59  }
 0xd4a   : > { %8519 = vmatpush1.bf16.xpose.msk.msra.mxu0 %vm8518_vm9, %v19169_v54 }
 0xd84   : > { %v6361_v60 = vpop.f32.mrb[76].mxu1 }
 0xd85   : > { %v6363_v58 = vpop.f32.mrb[77].mxu1 }
 0xd86   : > { %v6365_v35 = vpop.f32.mrb[78].mxu1 }
 0xd87   : > { %v6370_v51 = vpack.c.bf16 %v6365_v35, %v6361_v60  ;;  %v6367_v14 = vpop.f32.mrb[79].mxu1 }
 0xd88   : > { %v6371_v55 = vpack.c.bf16 %v6367_v14, %v6363_v58 }
 0xd8a   : > { %6372 = vmatprep.subr.bf16.mxu1 %v6371_v55 }
 0xd8b   : > { %6373 = vmatpush1.bf16.msra.mxu1 %v6370_v51 }
 0xd8d   : > { %v6783_v41 = vpop.xlane.xlu0 %6782 }
 0xd8e   : > { %8414 = vmatmul.mubr.msk.bf16.vlgmr.msra.gmra.mrb[80].mxu1 %vm19238_vm12, %v16686_v23  ;;  %vm6858_vm14 = vcmp.eq.f32.partialorder %v9479_v24, %v6783_v41  ;;  %vm6857_vm15 = vcmp.eq.f32.partialorder %v9477_v10, %v6783_v41 }
 0xd8f   : > { %6414 = vmatprep.mubr.bf16.mxu1 %v19171_v27 }
 0xd93   : > { %v6786_v0 = vpop.xlane.xlu1 %6785 }
 0xd94   : > { %vm6859_vm2 = vcmp.eq.f32.partialorder %v9477_v10, %v6786_v0  ;;  %vm6860_vm11 = vcmp.eq.f32.partialorder %v9479_v24, %v6786_v0  ;;  %v19246_v0 = vld [vmem:[#allocation42_spill] sm:$0xff] }
 0xd95   : > { %vm8520_vm8 = vmpackc.low %vm6860_vm11, %vm6858_vm14  ;;  %v6789_v23 = vpop.xlane.xlu0 %6788 }
 0xd96   : > { %vm8522_vm6 = vmpackc.low %vm6859_vm2, %vm6857_vm15  ;;  %8521 = vmatprep.subr.msk.bf16.mxu0 %vm8520_vm8, %v19169_v54  ;;  %8415 = vmatmul.mubr.msk.bf16.gmra.mrb[84].mxu1 %vm19239_vm4, %v16697_v37  ;;  %vm6862_vm13 = vcmp.eq.f32.partialorder %v9479_v24, %v6789_v23  ;;  %vm6861_vm1 = vcmp.eq.f32.partialorder %v9477_v10, %v6789_v23 }
 0xd97   : > { %8523 = vmatpush1.bf16.xpose.msk.msra.mxu0 %vm8522_vm6, %v19169_v54  ;;  %7118 = vmatprep.mubr.bf16.mxu1 %v19171_v27 }
 0xd9b   : > { %v6792_v42 = vpop.xlane.xlu1 %6791 }
 0xd9c   : > { %vm6863_vm7 = vcmp.eq.f32.partialorder %v9477_v10, %v6792_v42  ;;  %vm6864_vm5 = vcmp.eq.f32.partialorder %v9479_v24, %v6792_v42 }
 0xd9d   : > { %vm8524_vm10 = vmpackc.low %vm6864_vm5, %vm6862_vm13  ;;  %v6795_v37 = vpop.xlane.xlu0 %6794 }
 0xd9e   : > { %vm8526_vm3 = vmpackc.low %vm6863_vm7, %vm6861_vm1  ;;  %8525 = vmatprep.subr.msk.bf16.mxu0 %vm8524_vm10, %v19169_v54  ;;  %vm6866_vm0 = vcmp.eq.f32.partialorder %v9479_v24, %v6795_v37  ;;  %vm6865_vm14 = vcmp.eq.f32.partialorder %v9477_v10, %v6795_v37 }
 0xd9f   : > { %8527 = vmatpush1.bf16.xpose.msk.msra.mxu0 %vm8526_vm3, %v19169_v54 }
 0xda3   : > { %v6798_v52 = vpop.xlane.xlu1 %6797 }
 0xda4   : > { %vm6867_vm9 = vcmp.eq.f32.partialorder %v9477_v10, %v6798_v52  ;;  %vm6868_vm12 = vcmp.eq.f32.partialorder %v9479_v24, %v6798_v52  ;;  %v19247_v52 = vld [vmem:[#allocation52_spill] sm:$0xff] }
 0xda5   : > { %vm8528_vm2 = vmpackc.low %vm6868_vm12, %vm6866_vm0  ;;  %v6801_v26 = vpop.xlane.xlu0 %6800 }
 0xda6   : > { %vm8530_vm11 = vmpackc.low %vm6867_vm9, %vm6865_vm14  ;;  %8529 = vmatprep.subr.msk.bf16.mxu0 %vm8528_vm2, %v19169_v54  ;;  %vm6870_vm15 = vcmp.eq.f32.partialorder %v9479_v24, %v6801_v26  ;;  %vm6869_vm4 = vcmp.eq.f32.partialorder %v9477_v10, %v6801_v26 }
 0xda7   : > { %8531 = vmatpush1.bf16.xpose.msk.msra.mxu0 %vm8530_vm11, %v19169_v54 }
 0xdab   : > { %v6804_v57 = vpop.xlane.xlu1 %6803 }
 0xdac   : > { %vm6871_vm8 = vcmp.eq.f32.partialorder %v9477_v10, %v6804_v57  ;;  %vm6872_vm6 = vcmp.eq.f32.partialorder %v9479_v24, %v6804_v57 }
 0xdad   : > { %vm8532_vm13 = vmpackc.low %vm6872_vm6, %vm6870_vm15  ;;  %v6807_v8 = vpop.xlane.xlu0 %6806  ;;  %vm19240_vm6 = vcmask 130048  }
 0xdae   : > { %vm8534_vm7 = vmpackc.low %vm6871_vm8, %vm6869_vm4  ;;  %8533 = vmatprep.subr.msk.bf16.mxu0 %vm8532_vm13, %v19169_v54  ;;  %vm6874_vm5 = vcmp.eq.f32.partialorder %v9479_v24, %v6807_v8  ;;  %vm6873_vm3 = vcmp.eq.f32.partialorder %v9477_v10, %v6807_v8 }
 0xdaf   : > { %8535 = vmatpush1.bf16.xpose.msk.msra.mxu0 %vm8534_vm7, %v19169_v54  ;;  %vm19241_vm4 = vmmov %vm19240_vm6 }
 0xdb3   : > { %v6810_v32 = vpop.xlane.xlu1 %6809 }
 0xdb4   : > { %vm6875_vm1 = vcmp.eq.f32.partialorder %v9477_v10, %v6810_v32  ;;  %vm6876_vm10 = vcmp.eq.f32.partialorder %v9479_v24, %v6810_v32  ;;  %v19248_v32 = vld [vmem:[#allocation43_spill] sm:$0xff] }
 0xdb5   : > { %vm8536_vm0 = vmpackc.low %vm6876_vm10, %vm6874_vm5 }
 0xdb6   : > { %vm8538_vm9 = vmpackc.low %vm6875_vm1, %vm6873_vm3  ;;  %8537 = vmatprep.subr.msk.bf16.mxu0 %vm8536_vm0, %v19169_v54  ;;  %v6813_v2 = vpop.xlane.xlu0 %6812 }
 0xdb7   : > { %8539 = vmatpush1.bf16.xpose.msk.msra.mxu0 %vm8538_vm9, %v19169_v54  ;;  %vm6878_vm12 = vcmp.eq.f32.partialorder %v9479_v24, %v6813_v2  ;;  %vm6877_vm11 = vcmp.eq.f32.partialorder %v9477_v10, %v6813_v2 }
 0xdbc   : > { %v6816_v5 = vpop.xlane.xlu1 %6815 }
 0xdbd   : > { %vm6879_vm14 = vcmp.eq.f32.partialorder %v9477_v10, %v6816_v5  ;;  %vm6880_vm2 = vcmp.eq.f32.partialorder %v9479_v24, %v6816_v5 }
 0xdbe   : > { %vm8540_vm15 = vmpackc.low %vm6880_vm2, %vm6878_vm12 }
 0xdbf   : > { %vm8542_vm8 = vmpackc.low %vm6879_vm14, %vm6877_vm11  ;;  %8541 = vmatprep.subr.msk.bf16.mxu0 %vm8540_vm15, %v19169_v54 }
 0xdc0   : > { %8543 = vmatpush1.bf16.xpose.msk.msra.mxu0 %vm8542_vm8, %v19169_v54 }
 0xdc7   : > { %7074 = vmatmul.mubr.bf16.vlgmr.msra.gmra.mrb[80].mxu0 %v17158_v15 }
 0xe61   : > { %v6406_v7 = vpop.f32.mrb[80].mxu1 }
 0xe62   : > { %v6425_v34 = vmax.f32 %v17174_v25, %v6406_v7  ;;  %v6408_v46 = vpop.f32.mrb[81].mxu1 }
 0xe63   : > { %v6426_v29 = vmax.f32 %v17180_v48, %v6408_v46  ;;  %v6410_v56 = vpop.f32.mrb[82].mxu1  ;;  %v19249_v46 = vld [vmem:[#allocation58_spill] sm:$0xff] }
 0xe64   : > { %v6427_v19 = vmax.f32 %v17187_v3, %v6410_v56  ;;  %v6412_v24 = vpop.f32.mrb[83].mxu1 }
 0xe65   : > { %v6428_v10 = vmax.f32 %v17194_v31, %v6412_v24  ;;  %v8690_v31 = vld [vmem:[#allocation8] sm:$0xff]  }
 0xe69   : > { %v6416_v22 = vpop.f32.mrb[84].mxu1 }
 0xe6a   : > { %v6429_v53 = vmax.f32 %v17208_v47, %v6416_v22  ;;  %v6418_v49 = vpop.f32.mrb[85].mxu1  ;;  %v8691_v47 = vld [vmem:[#allocation8 + $0x8] sm:$0xff]  }
 0xe6b   : > { %v6430_v54 = vmax.f32 %v17214_v6, %v6418_v49  ;;  %v6420_v38 = vpop.f32.mrb[86].mxu1  ;;  %v670_v6 = vpop.permute.xlu1 %669 }
 0xe6c   : > { %v6431_v15 = vmax.f32 %v17221_v40, %v6420_v38  ;;  %v6422_v11 = vpop.f32.mrb[87].mxu1  ;;  %v665_v40 = vpop.permute.xlu0 %664  ;;  %v747_v12 = vadd.f32 %v19244_v16, %v670_v6  ;;  %v749_v39 = vadd.f32 %v19245_v21, %v670_v6 }
 0xe6d   : > { %v6432_v25 = vmax.f32 %v17228_v43, %v6422_v11  ;;  %v743_v17 = vadd.f32 %v19242_v50, %v665_v40  ;;  %v745_v62 = vadd.f32 %v19243_v18, %v665_v40 }
 0xe6f   : > { %v675_v9 = vpop.permute.xlu1 %674 }
 0xe70   : > { %v753_v23 = vadd.f32 %v19246_v0, %v675_v9  ;;  %v755_v26 = vadd.f32 %v19247_v52, %v675_v9 }
 0xe73   : > { %v680_v14 = vpop.permute.xlu1 %679 }
 0xe74   : > { %v757_v2 = vadd.f32 %v19248_v32, %v680_v14 }
 0xe9a   : > { %v7075_v36 = vpop.f32.mrb[80].mxu0 }
 0xe9b   : > { %v7077_v48 = vpop.f32.mrb[81].mxu0 }
 0xe9c   : > { %v7079_v20 = vpop.f32.mrb[82].mxu0 }
 0xe9d   : > { %v7084_v3 = vpack.c.bf16 %v7079_v20, %v7075_v36  ;;  %v7081_v4 = vpop.f32.mrb[83].mxu0 }
 0xe9e   : > { %v7085_v44 = vpack.c.bf16 %v7081_v4, %v7077_v48 }
 0xea0   : > { %7086 = vmatprep.subr.bf16.mxu1 %v7085_v44 }
 0xea1   : > { %7087 = vmatpush1.bf16.msra.mxu1 %v7084_v3 }
 0xea4   : > { %8544 = vmatmul.mubr.msk.bf16.vlgmr.msra.gmra.mrb[88].mxu1 %vm19240_vm6, %v8690_v31 }
 0xea5   : > { %7128 = vmatprep.mubr.bf16.mxu1 %v19171_v27 }
 0xeac   : > { %8545 = vmatmul.mubr.msk.bf16.gmra.mrb[92].mxu1 %vm19241_vm4, %v8691_v47 }
 0xf77   : > { %v7120_v43 = vpop.f32.mrb[88].mxu1 }
 0xf78   : > { %v7139_v28 = vmax.f32 %v6425_v34, %v7120_v43  ;;  %v7122_v63 = vpop.f32.mrb[89].mxu1 }
 0xf79   : > { %v7140_v61 = vmax.f32 %v6426_v29, %v7122_v63  ;;  %v7124_v30 = vpop.f32.mrb[90].mxu1  ;;  %v759_v29 = vadd.f32 %v19249_v46, %v680_v14 }
 0xf7a   : > { %v7147_v13 = vadd.f32 %v7139_v28, %v743_v17  ;;  %v7141_v27 = vmax.f32 %v6427_v19, %v7124_v30  ;;  %v7126_v33 = vpop.f32.mrb[91].mxu1 }
 0xf7b   : > { %v7148_v1 = vadd.f32 %v7140_v61, %v745_v62  ;;  %v7142_v45 = vmax.f32 %v6428_v10, %v7126_v33 }
 0xf7c   : > { %v7155_v59 = vmax.f32 %v7147_v13, 0.0  ;;  %v7149_v60 = vadd.f32 %v7141_v27, %v747_v12 }
 0xf7d   : > { %v7156_v58 = vmax.f32 %v7148_v1, 0.0  ;;  %v7150_v35 = vadd.f32 %v7142_v45, %v749_v39 }
 0xf7e   : > { %7163 = vst [vmem:[%s17369_s26] sm:$0xff] %v7155_v59  ;;  %v7157_v51 = vmax.f32 %v7149_v60, 0.0 }
 0xf7f   : > { %7164 = vst [vmem:[%s17369_s26 + $0x8] sm:$0xff] %v7156_v58  ;;  %v7158_v55 = vmax.f32 %v7150_v35, 0.0  ;;  %v7130_v41 = vpop.f32.mrb[92].mxu1 }
 0xf80   : > { %7165 = vst [vmem:[%s17369_s26 + $0x10] sm:$0xff] %v7157_v51  ;;  %v7143_v42 = vmax.f32 %v6429_v53, %v7130_v41  ;;  %v7132_v37 = vpop.f32.mrb[93].mxu1 }
 0xf81   : > { %7166 = vst [vmem:[%s17369_s26 + $0x18] sm:$0xff] %v7158_v55  ;;  %v7144_v57 = vmax.f32 %v6430_v54, %v7132_v37  ;;  %v7134_v8 = vpop.f32.mrb[94].mxu1 }
 0xf82   : > { %v7151_v5 = vadd.f32 %v7143_v42, %v753_v23  ;;  %v7145_v7 = vmax.f32 %v6431_v15, %v7134_v8  ;;  %v7136_v34 = vpop.f32.mrb[95].mxu1 }
 0xf83   : > { %v7152_v56 = vadd.f32 %v7144_v57, %v755_v26  ;;  %v7146_v19 = vmax.f32 %v6432_v25, %v7136_v34 }
 0xf84   : > { %v7159_v24 = vmax.f32 %v7151_v5, 0.0  ;;  %v7153_v10 = vadd.f32 %v7145_v7, %v757_v2 }
 0xf85   : > { %v7160_v22 = vmax.f32 %v7152_v56, 0.0  ;;  %v7154_v53 = vadd.f32 %v7146_v19, %v759_v29 }
 0xf86   : > { %7167 = vst [vmem:[%s17369_s26 + $0x20] sm:$0xff] %v7159_v24  ;;  %v7161_v49 = vmax.f32 %v7153_v10, 0.0 }
 0xf87   : > { %7168 = vst [vmem:[%s17369_s26 + $0x28] sm:$0xff] %v7160_v22  ;;  %v7162_v54 = vmax.f32 %v7154_v53, 0.0 }
 0xf88   : > { %7169 = vst [vmem:[%s17369_s26 + $0x30] sm:$0xff] %v7161_v49 }
 0xf89   : > { %7170 = vst [vmem:[%s17369_s26 + $0x38] sm:$0xff] %v7162_v54 }
 0xf8a   : > { %8849 = shalt.err (!%p8846_p7)
}
 0xf8b   : > { %s8850_s0 = scalar_lea.hbm %s17387_s3, 1024  ;;  %s8854_s2 = scalar_lea.hbm %s17444_s5, 2048 }
 0xf8c   : > { %p8851_p12 = scmp.ne.s32.totalorder %s17387_s3, %s8850_s0  ;;  %p8855_p9 = scmp.lt.u32.totalorder %s17387_s3, %s17444_s5 }
 0xf8d   : > { %p8856_p0 = scmp.lt.u32.totalorder %s8854_s2, %s8850_s0  ;;  %p8858_p4 = scmp.lt.u32.totalorder %s8850_s0, %s17387_s3 }
 0xf8e   : > { %p8852_p6 = pnand %p8851_p12, %p9126_p10 }
 0xf8f   : > { %p8857_p1 = por %p8856_p0, %p8855_p9 }
 0xf90   : > { %p8853_p11 = pneg %p8852_p6 }
 0xf91   : > { %p8859_p8 = por %p8858_p4, %p8857_p1 }
 0xf93   : > { %p8860_p2 = pnand %p8859_p8, %p8853_p11 }
 0xf95   : > { %8863 = shalt.err (!%p8860_p2)
}
 0xf96   : > { %s8944_s9 = smov 256   ;;  %s8945_s24 = smov 16  }
 0xf97   : > { %8570 = dma.vmem_to_hbm [thread:$0]  (%p9126_p10), %s17381_s17, 1024, %s17387_s3, %s7172_s21, %s8944_s9, %s8944_s9, %s8945_s24  }
 0xf98 PF: > { %s19250_s26 = sld [smem:[#allocation17_spill]]  ;;  %s7202_s25 = sand.u32 1, %s8910_s18  }
 0xf99   : > { %p19252_p3 = scmp.ge.s32.totalorder %s8930_s23, 2  ;;  %s7203_s30 = scalar_lea.sflag [#allocation4], %s7202_s25 }
 0xf9e   : > { %p19251_p13 = scmp.ne.s32.totalorder %s19250_s26, 0 }
 0xfa0   : > { %p8590_p5 = pnand %p19252_p3, %p19251_p13 }
 0xfa2   : > { %8905 = dma.done.wait (!%p8590_p5), %s7203_s30, 1024  }
 0xfa3   : > { %8907 = vsyncadd (!%p8590_p5), %s7203_s30, 4294966272  ;;  %s25_s23 = sadd.s32 1, %s8930_s23   ;;  %s19253_s18 = smov %s8914_s19 }
 0xfa4   : > { %p22_p7 = scmp.ge.s32.totalorder %s25_s23, 4   ;;  %s19254_s19 = smov %s8918_s20 }
 0xfa5   : > { %s19255_s20 = smov %s9138_s15  ;;  %s19256_s21 = smov %s8926_s22 }
 0xfa6   : > { %s19257_s22 = smov %s19259_s11  ;;  %24 = sbr.rel (!%p22_p7) target bundleno = 13 (0xd), region = 112 }
 0xfad   :  { %7208 = vsyncpa [#allocation3], 1 }
 0xfae   :  { %7210 = vsyncpa [#allocation3 + $0x1], 1 }
 0xfaf   :  { %7211 = vsyncpa [#allocation6], 1 }
 0xfb0   :  { %7213 = vsyncpa [#allocation6 + $0x1], 1 }
 0xfb1   :  { %7214 = vsyncpa [#allocation9], 1 }
 0xfb2   :  { %7215 = vsyncpa [#allocation4], 1 }
 0xfb3   :  { %7217 = vsyncpa [#allocation4 + $0x1], 1 }

</bundles_post_ra>
